<compile_context>
chip_gen: v7x
topology: tpu7x:2x2x1
jax: 0.10.0
libtpu: 0.0.40
codegen_flags: <defaults>
</compile_context>

<pallas_src>
import math

import jax
import jax.numpy as jnp
from jax import lax
from jax.experimental import pallas as pl
from jax.experimental.pallas import tpu as pltpu


# ----------------------------------------------------------------------------
# Model constants
# ----------------------------------------------------------------------------
D_MODEL = 128
HEADS = 4            # args.hheads
NUM_STATE = 6        # last arg of BlockRecTransformer(128, 1, hheads, 6)
SEQ_LEN = 6          # data.view(B, 6, -1)
FFN_HIDDEN = 256
KERNEL_NUM = 512
FILTER_SIZES = (6, 6)
N_CLASSES = 745
N_PAD = 768          # classifier width padded to a lane-dense multiple of 128

_TB_MAX = 64         # samples per grid step (rows per step = 6*TB <= 384)


# ----------------------------------------------------------------------------
# In-kernel activation helpers (f32 math)
# ----------------------------------------------------------------------------
def _elu(x):
    # torch.nn.functional.elu, alpha = 1.0 (exp only evaluated on the safe branch)
    return jnp.where(x > 0, x, jnp.exp(jnp.minimum(x, 0.0)) - 1.0)


def _gelu(x):
    # TODO(synk): tanh approximation of GELU (PyTorch nn.GELU defaults to erf);
    # ~1e-3 deviation, and the FFN activation is part of our own realization.
    c = math.sqrt(2.0 / math.pi)
    return 0.5 * x * (1.0 + jnp.tanh(c * (x + 0.044715 * x * x * x)))


# ----------------------------------------------------------------------------
# Fused forward kernel (one grid step == one tile of TB samples, rows position-major)
# ----------------------------------------------------------------------------
def _forward_kernel(x_ref, mask_ref, we_ref, be_ref, ln1g_ref, ln1b_ref,
                    wq_ref, bq_ref, wk_ref, bk_ref, wv_ref, bv_ref,
                    kst_ref, vst_ref, wo_ref, bo_ref,
                    ln2g_ref, ln2b_ref, w1_ref, b1_ref, w2_ref, b2_ref,
                    wconv_ref, bconv_ref, wd2_ref, bd2_ref,
                    o_ref, h_scr):
    f32, bf16 = jnp.float32, jnp.bfloat16
    S, D, H = SEQ_LEN, D_MODEL, HEADS
    Dh = D // H
    R = h_scr.shape[0]                 # = S * TB   (rows are position-major)
    TB = R // S
    scale = 1.0 / math.sqrt(Dh)
    dn_t = (((1,), (1,)), ((), ()))    # a @ b.T without materializing a transpose

    def mm(a, w, b):
        # bf16 operands, f32 accumulation
        return jnp.dot(a.astype(bf16), w, preferred_element_type=f32) + b

    def layernorm(v, g, b):
        mu = jnp.mean(v, axis=-1, keepdims=True)
        vc = v - mu
        var = jnp.mean(vc * vc, axis=-1, keepdims=True)
        return vc * lax.rsqrt(var + 1e-5) * g + b

    # ---- embedding: (R, L) -> (R, D) ----------------------------------------
    x = x_ref[0]                                             # (R, L) f32
    h = mm(x, we_ref[...], be_ref[...])                      # (R, D) f32

    # ---- block-recurrent attention (pre-LN), batched over TB samples --------
    hn = layernorm(h, ln1g_ref[...], ln1b_ref[...])
    hn_b = hn.astype(bf16)
    mask = mask_ref[...]                                     # (R, R) additive block-diag

    attn = jnp.zeros((R, D), f32)
    for hd in range(H):
        q = jnp.dot(hn_b, wq_ref[hd], preferred_element_type=f32) + bq_ref[hd]   # (R, Dh)
        k = jnp.dot(hn_b, wk_ref[hd], preferred_element_type=f32) + bk_ref[hd]   # (R, Dh)
        v = jnp.dot(hn_b, wv_ref[hd], preferred_element_type=f32) + bv_ref[hd]   # (R, Dh)
        # keys/values over [state ; sequence]; the state K/V are precomputed
        # constants shared by every sample, so no mask is needed on that part.
        s_st = lax.dot_general(q, kst_ref[hd], dn_t, preferred_element_type=f32) * scale   # (R, NS)
        s_sq = lax.dot_general(q, k, dn_t, preferred_element_type=f32) * scale + mask      # (R, R)
        m = jnp.maximum(jnp.max(s_st, axis=-1, keepdims=True),
                        jnp.max(s_sq, axis=-1, keepdims=True))
        p_st = jnp.exp(s_st - m)
        p_sq = jnp.exp(s_sq - m)
        denom = (jnp.sum(p_st, axis=-1, keepdims=True)
                 + jnp.sum(p_sq, axis=-1, keepdims=True))
        num = (jnp.dot(p_st, vst_ref[hd], preferred_element_type=f32)
               + jnp.dot(p_sq, v, preferred_element_type=f32))                    # (R, Dh)
        o_h = num / denom                                    # exact divide (review note)
        # head-merge folded into the output projection (per-head rows of Wo)
        attn = attn + jnp.dot(o_h.astype(bf16), wo_ref[hd], preferred_element_type=f32)
    h = h + attn + bo_ref[...]

    # ---- pre-LN GELU FFN -----------------------------------------------------
    hn2 = layernorm(h, ln2g_ref[...], ln2b_ref[...])
    ff = _gelu(mm(hn2, w1_ref[...], b1_ref[...]))
    h = h + mm(ff, w2_ref[...], b2_ref[...])                 # (R, D)

    # ---- Conv1d (kernel covers the whole sequence), both 512-filter banks fused:
    #      sum over the 6 temporal taps of (TB, D) @ (D, 1024) matmuls.  The rows
    #      for tap s are h[s*TB:(s+1)*TB] (position-major), sliced from a scratch
    #      ref to avoid an unsupported sublane->lane value reshape.
    h_scr[...] = h
    conv = jnp.zeros((TB, 2 * KERNEL_NUM), f32)
    for s in range(S):
        rows = h_scr[s * TB:(s + 1) * TB, :].astype(bf16)    # (TB, D)
        conv = conv + jnp.dot(rows, wconv_ref[s], preferred_element_type=f32)
    enc = _elu(conv + bconv_ref[...])                        # conv -> ELU -> max_pool(len 1)
    enc = _elu(enc)                                          # dropout (eval) = id, then ELU

    # ---- classifier + log_softmax over the padded, lane-dense width ----------
    logits = jnp.dot(enc.astype(bf16), wd2_ref[...],
                     preferred_element_type=f32) + bd2_ref[...]                   # (TB, N_PAD)
    mx = jnp.max(logits, axis=-1, keepdims=True)
    z = logits - mx
    lse = jnp.log(jnp.sum(jnp.exp(z), axis=-1, keepdims=True))
    o_ref[0] = (z - lse).astype(o_ref.dtype)


# ----------------------------------------------------------------------------
# Wrapper
# ----------------------------------------------------------------------------
def _const_index_map(nd):
    if nd == 1:
        return lambda c: (0,)
    if nd == 2:
        return lambda c: (0, 0)
    return lambda c: (0, 0, 0)


def _resident_spec(a):
    # full-array block, same block every grid step -> DMA'd once, VMEM-resident
    return pl.BlockSpec(a.shape, _const_index_map(a.ndim))


_WEIGHT_ORDER = ("we", "be", "ln1g", "ln1b",
                 "wq", "bq", "wk", "bk", "wv", "bv", "kst", "vst", "wo", "bo",
                 "ln2g", "ln2b", "w1", "b1", "w2", "b2",
                 "wconv", "bconv", "wd2", "bd2")


def _grid_plan(B):
    """Number of batch chunks and samples-per-chunk (TB, multiple of 8)."""
    n = max(1, -(-B // _TB_MAX))
    if n == 1 and B >= 32:
        n = 2                         # v7x: give the second TensorCore a chunk
    tb = -(-B // n)
    tb = ((tb + 7) // 8) * 8          # 8-row-aligned position groups for the conv slices
    return n, tb


def forward(data, packed):
    """data: (B, 6*L) or (B, 6, L)  ->  (B, 745) log-probabilities."""
    B = data.shape[0]
    x = data.reshape(B, SEQ_LEN, -1).astype(jnp.float32)     # data.view(B, 6, -1)
    L = x.shape[-1]

    nchunks, TB = _grid_plan(B)
    B_pad = nchunks * TB
    if B_pad != B:
        x = jnp.concatenate(
            [x, jnp.zeros((B_pad - B, SEQ_LEN, L), x.dtype)], axis=0)
    R = SEQ_LEN * TB
    # (B_pad, S, L) -> position-major rows per chunk: (nchunks, S*TB, L)
    xr = x.reshape(nchunks, TB, SEQ_LEN, L).transpose(0, 2, 1, 3).reshape(nchunks, R, L)

    # additive block-diagonal mask: row/col sample id = index % TB (position-major)
    ids = jnp.arange(R, dtype=jnp.int32) % TB
    mask = jnp.where(ids[:, None] == ids[None, :], 0.0, -1e30).astype(jnp.float32)

    weights = [packed[k] for k in _WEIGHT_ORDER]

    out = pl.pallas_call(
        _forward_kernel,
        grid=(nchunks,),
        in_specs=[pl.BlockSpec((1, R, L), lambda c: (c, 0, 0)),
                  _resident_spec(mask)]
                 + [_resident_spec(w) for w in weights],
        out_specs=pl.BlockSpec((1, TB, N_PAD), lambda c: (c, 0, 0)),
        out_shape=jax.ShapeDtypeStruct((nchunks, TB, N_PAD), jnp.float32),
        scratch_shapes=[pltpu.VMEM((R, D_MODEL), jnp.float32)],
        compiler_params=pltpu.CompilerParams(
            dimension_semantics=("parallel",)),
    )(xr, mask, *weights)
    return out.reshape(B_pad, N_PAD)[:B, :N_CLASSES]


# ----------------------------------------------------------------------------
# Deterministic parameter init (torch-style layouts) + TPU repacking
# ----------------------------------------------------------------------------
def init_params(key, L):
    ks = iter(jax.random.split(key, 32))

    def nrm(shape, scale=0.05):
        return scale * jax.random.normal(next(ks), shape, dtype=jnp.float32)

    D = D_MODEL
    p = {
        "W_e": nrm((L, D)), "b_e": jnp.zeros((D,), jnp.float32),
        "state_init": nrm((NUM_STATE, D)),
        "ln1_g": jnp.ones((D,), jnp.float32), "ln1_b": jnp.zeros((D,), jnp.float32),
        "lns_g": jnp.ones((D,), jnp.float32), "lns_b": jnp.zeros((D,), jnp.float32),
        "ln2_g": jnp.ones((D,), jnp.float32), "ln2_b": jnp.zeros((D,), jnp.float32),
        "Wq": nrm((D, D)), "bq": jnp.zeros((D,), jnp.float32),
        "Wk": nrm((D, D)), "bk": jnp.zeros((D,), jnp.float32),
        "Wv": nrm((D, D)), "bv": jnp.zeros((D,), jnp.float32),
        "Wo": nrm((D, D)), "bo": jnp.zeros((D,), jnp.float32),
        "W1": nrm((D, FFN_HIDDEN)), "b1": jnp.zeros((FFN_HIDDEN,), jnp.float32),
        "W2": nrm((FFN_HIDDEN, D)), "b2": jnp.zeros((D,), jnp.float32),
        "dense2_w": nrm((KERNEL_NUM * len(FILTER_SIZES), N_CLASSES)),
        "dense2_b": jnp.zeros((N_CLASSES,), jnp.float32),
    }
    for i, fs in enumerate(FILTER_SIZES):
        p[f"conv{i}_w"] = nrm((KERNEL_NUM, D, fs))           # torch Conv1d layout
        p[f"conv{i}_b"] = nrm((KERNEL_NUM,), 0.01)
    return p


def pack_params(p):
    """Repack params into fused, TPU-friendly layouts (bf16 matmul weights)."""
    bf, f32 = jnp.bfloat16, jnp.float32
    D, H = D_MODEL, HEADS
    Dh = D // H

    def row(v):
        return v.reshape(1, -1).astype(f32)

    def heads_in(w):      # (D, D) -> (H, D, Dh): per-head input projections
        return jnp.transpose(w.reshape(D, H, Dh), (1, 0, 2)).astype(bf)

    def heads_bias(b):    # (D,) -> (H, 1, Dh)
        return b.reshape(H, 1, Dh).astype(f32)

    def heads_rows(a):    # (NS, D) -> (H, NS, Dh)
        return jnp.transpose(a.reshape(NUM_STATE, H, Dh), (1, 0, 2)).astype(f32)

    # State-token K/V hoisted out of the kernel: they depend only on the weights.
    st = p["state_init"].astype(f32)
    mu = jnp.mean(st, axis=-1, keepdims=True)
    var = jnp.mean((st - mu) ** 2, axis=-1, keepdims=True)
    sn = (st - mu) * lax.rsqrt(var + 1e-5) * p["lns_g"] + p["lns_b"]
    k_state = sn @ p["Wk"] + p["bk"]                                 # (NS, D)
    v_state = sn @ p["Wv"] + p["bv"]                                 # (NS, D)

    # Both Conv1d banks packed per sequence position:
    #   wconv[s, ci, co_global] = conv_i[co, ci, s],  co_global = i*512 + co
    wc = jnp.concatenate([p["conv0_w"], p["conv1_w"]], axis=0)       # (1024, 128, 6)
    wconv = jnp.transpose(wc, (2, 1, 0)).astype(bf)                  # (6, 128, 1024)
    bconv = jnp.concatenate([p["conv0_b"], p["conv1_b"]]).reshape(1, -1).astype(f32)

    # Classifier padded 745 -> 768; padded logits pinned to -1e30 via the bias
    # so log_softmax normalization is unchanged (wrapper slices them off).
    wd2 = jnp.zeros((2 * KERNEL_NUM, N_PAD), f32).at[:, :N_CLASSES].set(p["dense2_w"])
    bd2 = jnp.full((N_PAD,), -1e30, f32).at[:N_CLASSES].set(p["dense2_b"])

    return {
        "we": p["W_e"].astype(bf), "be": row(p["b_e"]),
        "ln1g": row(p["ln1_g"]), "ln1b": row(p["ln1_b"]),
        "wq": heads_in(p["Wq"]), "bq": heads_bias(p["bq"]),
        "wk": heads_in(p["Wk"]), "bk": heads_bias(p["bk"]),
        "wv": heads_in(p["Wv"]), "bv": heads_bias(p["bv"]),
        "kst": heads_rows(k_state), "vst": heads_rows(v_state),
        "wo": p["Wo"].reshape(H, Dh, D).astype(bf), "bo": row(p["bo"]),
        "ln2g": row(p["ln2_g"]), "ln2b": row(p["ln2_b"]),
        "w1": p["W1"].astype(bf), "b1": row(p["b1"]),
        "w2": p["W2"].astype(bf), "b2": row(p["b2"]),
        "wconv": wconv, "bconv": bconv,
        "wd2": wd2.astype(bf), "bd2": bd2.reshape(1, N_PAD),
    }


# ----------------------------------------------------------------------------
if __name__ == "__main__":
    key = jax.random.PRNGKey(0)
    kd, kp = jax.random.split(key)

    B, L = 2, 32                                   # data viewed as (B, 6, L)
    data = jax.random.normal(kd, (B, SEQ_LEN * L), dtype=jnp.float32)

    params = init_params(kp, L)
    packed = pack_params(params)

    fwd = jax.jit(forward)
    out = jax.block_until_ready(fwd(data, packed))

    assert out.shape == (B, N_CLASSES), out.shape
    # rows are log-probabilities
    assert bool(jnp.all(jnp.isfinite(out)))
    assert bool(jnp.allclose(jnp.sum(jnp.exp(out), axis=1), 1.0, atol=1e-3))
    print("KERNEL_OK")
</pallas_src>

<mosaic_0001>
module attributes {stable_mosaic.version = 11 : i64} {
  func.func @_forward_kernel(%arg0: i32, %arg1: memref<1x48x32xf32, #tpu.memory_space<vmem>>, %arg2: memref<48x48xf32, #tpu.memory_space<vmem>>, %arg3: memref<32x128xbf16, #tpu.memory_space<vmem>>, %arg4: memref<1x128xf32, #tpu.memory_space<vmem>>, %arg5: memref<1x128xf32, #tpu.memory_space<vmem>>, %arg6: memref<1x128xf32, #tpu.memory_space<vmem>>, %arg7: memref<4x128x32xbf16, #tpu.memory_space<vmem>>, %arg8: memref<4x1x32xf32, #tpu.memory_space<vmem>>, %arg9: memref<4x128x32xbf16, #tpu.memory_space<vmem>>, %arg10: memref<4x1x32xf32, #tpu.memory_space<vmem>>, %arg11: memref<4x128x32xbf16, #tpu.memory_space<vmem>>, %arg12: memref<4x1x32xf32, #tpu.memory_space<vmem>>, %arg13: memref<4x6x32xf32, #tpu.memory_space<vmem>>, %arg14: memref<4x6x32xf32, #tpu.memory_space<vmem>>, %arg15: memref<4x32x128xbf16, #tpu.memory_space<vmem>>, %arg16: memref<1x128xf32, #tpu.memory_space<vmem>>, %arg17: memref<1x128xf32, #tpu.memory_space<vmem>>, %arg18: memref<1x128xf32, #tpu.memory_space<vmem>>, %arg19: memref<128x256xbf16, #tpu.memory_space<vmem>>, %arg20: memref<1x256xf32, #tpu.memory_space<vmem>>, %arg21: memref<256x128xbf16, #tpu.memory_space<vmem>>, %arg22: memref<1x128xf32, #tpu.memory_space<vmem>>, %arg23: memref<6x128x1024xbf16, #tpu.memory_space<vmem>>, %arg24: memref<1x1024xf32, #tpu.memory_space<vmem>>, %arg25: memref<1024x768xbf16, #tpu.memory_space<vmem>>, %arg26: memref<1x768xf32, #tpu.memory_space<vmem>>, %arg27: memref<1x8x768xf32, #tpu.memory_space<vmem>>, %arg28: memref<48x128xf32, #tpu.memory_space<vmem>>) attributes {dimension_semantics = [#tpu.dimension_semantics<parallel>], iteration_bounds = array<i64: 1>, scalar_prefetch = 0 : i64, scratch_operands = 1 : i64, tpu.core_type = #tpu.core_type<tc>, window_params = [{transform_indices = @transform_0, window_bounds = array<i64: 1, 48, 32>}, {pipeline_mode = #tpu.pipeline_mode<synchronous>, transform_indices = @transform_1, window_bounds = array<i64: 48, 48>}, {pipeline_mode = #tpu.pipeline_mode<synchronous>, transform_indices = @transform_2, window_bounds = array<i64: 32, 128>}, {pipeline_mode = #tpu.pipeline_mode<synchronous>, transform_indices = @transform_3, window_bounds = array<i64: 1, 128>}, {pipeline_mode = #tpu.pipeline_mode<synchronous>, transform_indices = @transform_4, window_bounds = array<i64: 1, 128>}, {pipeline_mode = #tpu.pipeline_mode<synchronous>, transform_indices = @transform_5, window_bounds = array<i64: 1, 128>}, {pipeline_mode = #tpu.pipeline_mode<synchronous>, transform_indices = @transform_6, window_bounds = array<i64: 4, 128, 32>}, {pipeline_mode = #tpu.pipeline_mode<synchronous>, transform_indices = @transform_7, window_bounds = array<i64: 4, 1, 32>}, {pipeline_mode = #tpu.pipeline_mode<synchronous>, transform_indices = @transform_8, window_bounds = array<i64: 4, 128, 32>}, {pipeline_mode = #tpu.pipeline_mode<synchronous>, transform_indices = @transform_9, window_bounds = array<i64: 4, 1, 32>}, {pipeline_mode = #tpu.pipeline_mode<synchronous>, transform_indices = @transform_10, window_bounds = array<i64: 4, 128, 32>}, {pipeline_mode = #tpu.pipeline_mode<synchronous>, transform_indices = @transform_11, window_bounds = array<i64: 4, 1, 32>}, {pipeline_mode = #tpu.pipeline_mode<synchronous>, transform_indices = @transform_12, window_bounds = array<i64: 4, 6, 32>}, {pipeline_mode = #tpu.pipeline_mode<synchronous>, transform_indices = @transform_13, window_bounds = array<i64: 4, 6, 32>}, {pipeline_mode = #tpu.pipeline_mode<synchronous>, transform_indices = @transform_14, window_bounds = array<i64: 4, 32, 128>}, {pipeline_mode = #tpu.pipeline_mode<synchronous>, transform_indices = @transform_15, window_bounds = array<i64: 1, 128>}, {pipeline_mode = #tpu.pipeline_mode<synchronous>, transform_indices = @transform_16, window_bounds = array<i64: 1, 128>}, {pipeline_mode = #tpu.pipeline_mode<synchronous>, transform_indices = @transform_17, window_bounds = array<i64: 1, 128>}, {pipeline_mode = #tpu.pipeline_mode<synchronous>, transform_indices = @transform_18, window_bounds = array<i64: 128, 256>}, {pipeline_mode = #tpu.pipeline_mode<synchronous>, transform_indices = @transform_19, window_bounds = array<i64: 1, 256>}, {pipeline_mode = #tpu.pipeline_mode<synchronous>, transform_indices = @transform_20, window_bounds = array<i64: 256, 128>}, {pipeline_mode = #tpu.pipeline_mode<synchronous>, transform_indices = @transform_21, window_bounds = array<i64: 1, 128>}, {pipeline_mode = #tpu.pipeline_mode<synchronous>, transform_indices = @transform_22, window_bounds = array<i64: 6, 128, 1024>}, {pipeline_mode = #tpu.pipeline_mode<synchronous>, transform_indices = @transform_23, window_bounds = array<i64: 1, 1024>}, {pipeline_mode = #tpu.pipeline_mode<synchronous>, transform_indices = @transform_24, window_bounds = array<i64: 1024, 768>}, {pipeline_mode = #tpu.pipeline_mode<synchronous>, transform_indices = @transform_25, window_bounds = array<i64: 1, 768>}, {transform_indices = @transform_26, window_bounds = array<i64: 1, 8, 768>}]} {
    %c0 = arith.constant 0 : index
    %c0_0 = arith.constant 0 : index
    %c0_1 = arith.constant 0 : index
    %0 = vector.load %arg1[%c0, %c0_0, %c0_1] : memref<1x48x32xf32, #tpu.memory_space<vmem>>, vector<1x48x32xf32>
    %1 = vector.shape_cast %0 : vector<1x48x32xf32> to vector<48x32xf32>
    %c0_2 = arith.constant 0 : index
    %c0_3 = arith.constant 0 : index
    %2 = vector.load %arg3[%c0_2, %c0_3] : memref<32x128xbf16, #tpu.memory_space<vmem>>, vector<32x128xbf16>
    %c0_4 = arith.constant 0 : index
    %c0_5 = arith.constant 0 : index
    %3 = vector.load %arg4[%c0_4, %c0_5] : memref<1x128xf32, #tpu.memory_space<vmem>>, vector<1x128xf32>
    %4 = arith.truncf %1 : vector<48x32xf32> to vector<48x32xbf16>
    %cst = arith.constant dense<0.000000e+00> : vector<48x128xf32>
    %5 = tpu.matmul %4, %2, %cst {dimension_numbers = #tpu.dot_dimension_numbers<[1], [0], [0], [1], [0, 0, 1, 1], [], []>} : vector<48x32xbf16>, vector<32x128xbf16>, vector<48x128xf32> -> vector<48x128xf32>
    %6 = vector.broadcast %3 : vector<1x128xf32> to vector<48x128xf32>
    %7 = arith.addf %5, %6 : vector<48x128xf32>
    %c0_6 = arith.constant 0 : index
    %c0_7 = arith.constant 0 : index
    %8 = vector.load %arg5[%c0_6, %c0_7] : memref<1x128xf32, #tpu.memory_space<vmem>>, vector<1x128xf32>
    %c0_8 = arith.constant 0 : index
    %c0_9 = arith.constant 0 : index
    %9 = vector.load %arg6[%c0_8, %c0_9] : memref<1x128xf32, #tpu.memory_space<vmem>>, vector<1x128xf32>
    %cst_10 = arith.constant dense<0.000000e+00> : vector<48xf32>
    %10 = vector.multi_reduction <add>, %7, %cst_10 [1] : vector<48x128xf32> to vector<48xf32>
    %11 = vector.shape_cast %10 : vector<48xf32> to vector<48x1xf32>
    %cst_11 = arith.constant 1.280000e+02 : f32
    %12 = vector.broadcast %cst_11 : f32 to vector<48x1xf32>
    %13 = arith.divf %11, %12 : vector<48x1xf32>
    %14 = vector.broadcast %13 : vector<48x1xf32> to vector<48x128xf32>
    %15 = arith.subf %7, %14 : vector<48x128xf32>
    %16 = arith.mulf %15, %15 : vector<48x128xf32>
    %cst_12 = arith.constant dense<0.000000e+00> : vector<48xf32>
    %17 = vector.multi_reduction <add>, %16, %cst_12 [1] : vector<48x128xf32> to vector<48xf32>
    %18 = vector.shape_cast %17 : vector<48xf32> to vector<48x1xf32>
    %cst_13 = arith.constant 1.280000e+02 : f32
    %19 = vector.broadcast %cst_13 : f32 to vector<48x1xf32>
    %20 = arith.divf %18, %19 : vector<48x1xf32>
    %cst_14 = arith.constant 9.99999974E-6 : f32
    %21 = vector.broadcast %cst_14 : f32 to vector<48x1xf32>
    %22 = arith.addf %20, %21 : vector<48x1xf32>
    %23 = math.rsqrt %22 : vector<48x1xf32>
    %24 = vector.broadcast %23 : vector<48x1xf32> to vector<48x128xf32>
    %25 = arith.mulf %15, %24 : vector<48x128xf32>
    %26 = vector.broadcast %8 : vector<1x128xf32> to vector<48x128xf32>
    %27 = arith.mulf %25, %26 : vector<48x128xf32>
    %28 = vector.broadcast %9 : vector<1x128xf32> to vector<48x128xf32>
    %29 = arith.addf %27, %28 : vector<48x128xf32>
    %30 = arith.truncf %29 : vector<48x128xf32> to vector<48x128xbf16>
    %c0_15 = arith.constant 0 : index
    %c0_16 = arith.constant 0 : index
    %31 = vector.load %arg2[%c0_15, %c0_16] : memref<48x48xf32, #tpu.memory_space<vmem>>, vector<48x48xf32>
    %cst_17 = arith.constant 0.000000e+00 : f32
    %32 = vector.broadcast %cst_17 : f32 to vector<48x128xf32>
    %c0_18 = arith.constant 0 : index
    %c0_19 = arith.constant 0 : index
    %c0_20 = arith.constant 0 : index
    %33 = vector.load %arg7[%c0_18, %c0_19, %c0_20] : memref<4x128x32xbf16, #tpu.memory_space<vmem>>, vector<1x128x32xbf16>
    %34 = vector.shape_cast %33 : vector<1x128x32xbf16> to vector<128x32xbf16>
    %cst_21 = arith.constant dense<0.000000e+00> : vector<48x32xf32>
    %35 = tpu.matmul %30, %34, %cst_21 {dimension_numbers = #tpu.dot_dimension_numbers<[1], [0], [0], [1], [0, 0, 1, 1], [], []>} : vector<48x128xbf16>, vector<128x32xbf16>, vector<48x32xf32> -> vector<48x32xf32>
    %c0_22 = arith.constant 0 : index
    %c0_23 = arith.constant 0 : index
    %c0_24 = arith.constant 0 : index
    %36 = vector.load %arg8[%c0_22, %c0_23, %c0_24] : memref<4x1x32xf32, #tpu.memory_space<vmem>>, vector<1x1x32xf32>
    %37 = vector.shape_cast %36 : vector<1x1x32xf32> to vector<1x32xf32>
    %38 = vector.broadcast %37 : vector<1x32xf32> to vector<48x32xf32>
    %39 = arith.addf %35, %38 : vector<48x32xf32>
    %c0_25 = arith.constant 0 : index
    %c0_26 = arith.constant 0 : index
    %c0_27 = arith.constant 0 : index
    %40 = vector.load %arg9[%c0_25, %c0_26, %c0_27] : memref<4x128x32xbf16, #tpu.memory_space<vmem>>, vector<1x128x32xbf16>
    %41 = vector.shape_cast %40 : vector<1x128x32xbf16> to vector<128x32xbf16>
    %cst_28 = arith.constant dense<0.000000e+00> : vector<48x32xf32>
    %42 = tpu.matmul %30, %41, %cst_28 {dimension_numbers = #tpu.dot_dimension_numbers<[1], [0], [0], [1], [0, 0, 1, 1], [], []>} : vector<48x128xbf16>, vector<128x32xbf16>, vector<48x32xf32> -> vector<48x32xf32>
    %c0_29 = arith.constant 0 : index
    %c0_30 = arith.constant 0 : index
    %c0_31 = arith.constant 0 : index
    %43 = vector.load %arg10[%c0_29, %c0_30, %c0_31] : memref<4x1x32xf32, #tpu.memory_space<vmem>>, vector<1x1x32xf32>
    %44 = vector.shape_cast %43 : vector<1x1x32xf32> to vector<1x32xf32>
    %45 = vector.broadcast %44 : vector<1x32xf32> to vector<48x32xf32>
    %46 = arith.addf %42, %45 : vector<48x32xf32>
    %c0_32 = arith.constant 0 : index
    %c0_33 = arith.constant 0 : index
    %c0_34 = arith.constant 0 : index
    %47 = vector.load %arg11[%c0_32, %c0_33, %c0_34] : memref<4x128x32xbf16, #tpu.memory_space<vmem>>, vector<1x128x32xbf16>
    %48 = vector.shape_cast %47 : vector<1x128x32xbf16> to vector<128x32xbf16>
    %cst_35 = arith.constant dense<0.000000e+00> : vector<48x32xf32>
    %49 = tpu.matmul %30, %48, %cst_35 {dimension_numbers = #tpu.dot_dimension_numbers<[1], [0], [0], [1], [0, 0, 1, 1], [], []>} : vector<48x128xbf16>, vector<128x32xbf16>, vector<48x32xf32> -> vector<48x32xf32>
    %c0_36 = arith.constant 0 : index
    %c0_37 = arith.constant 0 : index
    %c0_38 = arith.constant 0 : index
    %50 = vector.load %arg12[%c0_36, %c0_37, %c0_38] : memref<4x1x32xf32, #tpu.memory_space<vmem>>, vector<1x1x32xf32>
    %51 = vector.shape_cast %50 : vector<1x1x32xf32> to vector<1x32xf32>
    %52 = vector.broadcast %51 : vector<1x32xf32> to vector<48x32xf32>
    %53 = arith.addf %49, %52 : vector<48x32xf32>
    %c0_39 = arith.constant 0 : index
    %c0_40 = arith.constant 0 : index
    %c0_41 = arith.constant 0 : index
    %54 = vector.load %arg13[%c0_39, %c0_40, %c0_41] : memref<4x6x32xf32, #tpu.memory_space<vmem>>, vector<1x6x32xf32>
    %55 = vector.shape_cast %54 : vector<1x6x32xf32> to vector<6x32xf32>
    %cst_42 = arith.constant dense<0.000000e+00> : vector<48x6xf32>
    %56 = tpu.matmul %39, %55, %cst_42 {dimension_numbers = #tpu.dot_dimension_numbers<[1], [1], [0], [0], [0, 0, 1, 0], [], []>} : vector<48x32xf32>, vector<6x32xf32>, vector<48x6xf32> -> vector<48x6xf32>
    %cst_43 = arith.constant 0.176776692 : f32
    %57 = vector.broadcast %cst_43 : f32 to vector<48x6xf32>
    %58 = arith.mulf %56, %57 : vector<48x6xf32>
    %cst_44 = arith.constant dense<0.000000e+00> : vector<48x48xf32>
    %59 = tpu.matmul %39, %46, %cst_44 {dimension_numbers = #tpu.dot_dimension_numbers<[1], [1], [0], [0], [0, 0, 1, 0], [], []>} : vector<48x32xf32>, vector<48x32xf32>, vector<48x48xf32> -> vector<48x48xf32>
    %cst_45 = arith.constant 0.176776692 : f32
    %60 = vector.broadcast %cst_45 : f32 to vector<48x48xf32>
    %61 = arith.mulf %59, %60 : vector<48x48xf32>
    %62 = arith.addf %61, %31 : vector<48x48xf32>
    %cst_46 = arith.constant dense<0xFF800000> : vector<48xf32>
    %63 = vector.multi_reduction <maximumf>, %58, %cst_46 [1] : vector<48x6xf32> to vector<48xf32>
    %64 = vector.shape_cast %63 : vector<48xf32> to vector<48x1xf32>
    %cst_47 = arith.constant dense<0xFF800000> : vector<48xf32>
    %65 = vector.multi_reduction <maximumf>, %62, %cst_47 [1] : vector<48x48xf32> to vector<48xf32>
    %66 = vector.shape_cast %65 : vector<48xf32> to vector<48x1xf32>
    %67 = arith.maximumf %64, %66 : vector<48x1xf32>
    %68 = vector.broadcast %67 : vector<48x1xf32> to vector<48x6xf32>
    %69 = arith.subf %58, %68 : vector<48x6xf32>
    %70 = math.exp %69 : vector<48x6xf32>
    %71 = vector.broadcast %67 : vector<48x1xf32> to vector<48x48xf32>
    %72 = arith.subf %62, %71 : vector<48x48xf32>
    %73 = math.exp %72 : vector<48x48xf32>
    %cst_48 = arith.constant dense<0.000000e+00> : vector<48xf32>
    %74 = vector.multi_reduction <add>, %70, %cst_48 [1] : vector<48x6xf32> to vector<48xf32>
    %75 = vector.shape_cast %74 : vector<48xf32> to vector<48x1xf32>
    %cst_49 = arith.constant dense<0.000000e+00> : vector<48xf32>
    %76 = vector.multi_reduction <add>, %73, %cst_49 [1] : vector<48x48xf32> to vector<48xf32>
    %77 = vector.shape_cast %76 : vector<48xf32> to vector<48x1xf32>
    %78 = arith.addf %75, %77 : vector<48x1xf32>
    %c0_50 = arith.constant 0 : index
    %c0_51 = arith.constant 0 : index
    %c0_52 = arith.constant 0 : index
    %79 = vector.load %arg14[%c0_50, %c0_51, %c0_52] : memref<4x6x32xf32, #tpu.memory_space<vmem>>, vector<1x6x32xf32>
    %80 = vector.shape_cast %79 : vector<1x6x32xf32> to vector<6x32xf32>
    %cst_53 = arith.constant dense<0.000000e+00> : vector<48x32xf32>
    %81 = tpu.matmul %70, %80, %cst_53 {dimension_numbers = #tpu.dot_dimension_numbers<[1], [0], [0], [1], [0, 0, 1, 1], [], []>} : vector<48x6xf32>, vector<6x32xf32>, vector<48x32xf32> -> vector<48x32xf32>
    %cst_54 = arith.constant dense<0.000000e+00> : vector<48x32xf32>
    %82 = tpu.matmul %73, %53, %cst_54 {dimension_numbers = #tpu.dot_dimension_numbers<[1], [0], [0], [1], [0, 0, 1, 1], [], []>} : vector<48x48xf32>, vector<48x32xf32>, vector<48x32xf32> -> vector<48x32xf32>
    %83 = arith.addf %81, %82 : vector<48x32xf32>
    %84 = vector.broadcast %78 : vector<48x1xf32> to vector<48x32xf32>
    %85 = arith.divf %83, %84 : vector<48x32xf32>
    %86 = arith.truncf %85 : vector<48x32xf32> to vector<48x32xbf16>
    %c0_55 = arith.constant 0 : index
    %c0_56 = arith.constant 0 : index
    %c0_57 = arith.constant 0 : index
    %87 = vector.load %arg15[%c0_55, %c0_56, %c0_57] : memref<4x32x128xbf16, #tpu.memory_space<vmem>>, vector<1x32x128xbf16>
    %88 = vector.shape_cast %87 : vector<1x32x128xbf16> to vector<32x128xbf16>
    %cst_58 = arith.constant dense<0.000000e+00> : vector<48x128xf32>
    %89 = tpu.matmul %86, %88, %cst_58 {dimension_numbers = #tpu.dot_dimension_numbers<[1], [0], [0], [1], [0, 0, 1, 1], [], []>} : vector<48x32xbf16>, vector<32x128xbf16>, vector<48x128xf32> -> vector<48x128xf32>
    %90 = arith.addf %32, %89 : vector<48x128xf32>
    %c1 = arith.constant 1 : index
    %c0_59 = arith.constant 0 : index
    %c0_60 = arith.constant 0 : index
    %91 = vector.load %arg7[%c1, %c0_59, %c0_60] : memref<4x128x32xbf16, #tpu.memory_space<vmem>>, vector<1x128x32xbf16>
    %92 = vector.shape_cast %91 : vector<1x128x32xbf16> to vector<128x32xbf16>
    %cst_61 = arith.constant dense<0.000000e+00> : vector<48x32xf32>
    %93 = tpu.matmul %30, %92, %cst_61 {dimension_numbers = #tpu.dot_dimension_numbers<[1], [0], [0], [1], [0, 0, 1, 1], [], []>} : vector<48x128xbf16>, vector<128x32xbf16>, vector<48x32xf32> -> vector<48x32xf32>
    %c1_62 = arith.constant 1 : index
    %c0_63 = arith.constant 0 : index
    %c0_64 = arith.constant 0 : index
    %94 = vector.load %arg8[%c1_62, %c0_63, %c0_64] : memref<4x1x32xf32, #tpu.memory_space<vmem>>, vector<1x1x32xf32>
    %95 = vector.shape_cast %94 : vector<1x1x32xf32> to vector<1x32xf32>
    %96 = vector.broadcast %95 : vector<1x32xf32> to vector<48x32xf32>
    %97 = arith.addf %93, %96 : vector<48x32xf32>
    %c1_65 = arith.constant 1 : index
    %c0_66 = arith.constant 0 : index
    %c0_67 = arith.constant 0 : index
    %98 = vector.load %arg9[%c1_65, %c0_66, %c0_67] : memref<4x128x32xbf16, #tpu.memory_space<vmem>>, vector<1x128x32xbf16>
    %99 = vector.shape_cast %98 : vector<1x128x32xbf16> to vector<128x32xbf16>
    %cst_68 = arith.constant dense<0.000000e+00> : vector<48x32xf32>
    %100 = tpu.matmul %30, %99, %cst_68 {dimension_numbers = #tpu.dot_dimension_numbers<[1], [0], [0], [1], [0, 0, 1, 1], [], []>} : vector<48x128xbf16>, vector<128x32xbf16>, vector<48x32xf32> -> vector<48x32xf32>
    %c1_69 = arith.constant 1 : index
    %c0_70 = arith.constant 0 : index
    %c0_71 = arith.constant 0 : index
    %101 = vector.load %arg10[%c1_69, %c0_70, %c0_71] : memref<4x1x32xf32, #tpu.memory_space<vmem>>, vector<1x1x32xf32>
    %102 = vector.shape_cast %101 : vector<1x1x32xf32> to vector<1x32xf32>
    %103 = vector.broadcast %102 : vector<1x32xf32> to vector<48x32xf32>
    %104 = arith.addf %100, %103 : vector<48x32xf32>
    %c1_72 = arith.constant 1 : index
    %c0_73 = arith.constant 0 : index
    %c0_74 = arith.constant 0 : index
    %105 = vector.load %arg11[%c1_72, %c0_73, %c0_74] : memref<4x128x32xbf16, #tpu.memory_space<vmem>>, vector<1x128x32xbf16>
    %106 = vector.shape_cast %105 : vector<1x128x32xbf16> to vector<128x32xbf16>
    %cst_75 = arith.constant dense<0.000000e+00> : vector<48x32xf32>
    %107 = tpu.matmul %30, %106, %cst_75 {dimension_numbers = #tpu.dot_dimension_numbers<[1], [0], [0], [1], [0, 0, 1, 1], [], []>} : vector<48x128xbf16>, vector<128x32xbf16>, vector<48x32xf32> -> vector<48x32xf32>
    %c1_76 = arith.constant 1 : index
    %c0_77 = arith.constant 0 : index
    %c0_78 = arith.constant 0 : index
    %108 = vector.load %arg12[%c1_76, %c0_77, %c0_78] : memref<4x1x32xf32, #tpu.memory_space<vmem>>, vector<1x1x32xf32>
    %109 = vector.shape_cast %108 : vector<1x1x32xf32> to vector<1x32xf32>
    %110 = vector.broadcast %109 : vector<1x32xf32> to vector<48x32xf32>
    %111 = arith.addf %107, %110 : vector<48x32xf32>
    %c1_79 = arith.constant 1 : index
    %c0_80 = arith.constant 0 : index
    %c0_81 = arith.constant 0 : index
    %112 = vector.load %arg13[%c1_79, %c0_80, %c0_81] : memref<4x6x32xf32, #tpu.memory_space<vmem>>, vector<1x6x32xf32>
    %113 = vector.shape_cast %112 : vector<1x6x32xf32> to vector<6x32xf32>
    %cst_82 = arith.constant dense<0.000000e+00> : vector<48x6xf32>
    %114 = tpu.matmul %97, %113, %cst_82 {dimension_numbers = #tpu.dot_dimension_numbers<[1], [1], [0], [0], [0, 0, 1, 0], [], []>} : vector<48x32xf32>, vector<6x32xf32>, vector<48x6xf32> -> vector<48x6xf32>
    %cst_83 = arith.constant 0.176776692 : f32
    %115 = vector.broadcast %cst_83 : f32 to vector<48x6xf32>
    %116 = arith.mulf %114, %115 : vector<48x6xf32>
    %cst_84 = arith.constant dense<0.000000e+00> : vector<48x48xf32>
    %117 = tpu.matmul %97, %104, %cst_84 {dimension_numbers = #tpu.dot_dimension_numbers<[1], [1], [0], [0], [0, 0, 1, 0], [], []>} : vector<48x32xf32>, vector<48x32xf32>, vector<48x48xf32> -> vector<48x48xf32>
    %cst_85 = arith.constant 0.176776692 : f32
    %118 = vector.broadcast %cst_85 : f32 to vector<48x48xf32>
    %119 = arith.mulf %117, %118 : vector<48x48xf32>
    %120 = arith.addf %119, %31 : vector<48x48xf32>
    %cst_86 = arith.constant dense<0xFF800000> : vector<48xf32>
    %121 = vector.multi_reduction <maximumf>, %116, %cst_86 [1] : vector<48x6xf32> to vector<48xf32>
    %122 = vector.shape_cast %121 : vector<48xf32> to vector<48x1xf32>
    %cst_87 = arith.constant dense<0xFF800000> : vector<48xf32>
    %123 = vector.multi_reduction <maximumf>, %120, %cst_87 [1] : vector<48x48xf32> to vector<48xf32>
    %124 = vector.shape_cast %123 : vector<48xf32> to vector<48x1xf32>
    %125 = arith.maximumf %122, %124 : vector<48x1xf32>
    %126 = vector.broadcast %125 : vector<48x1xf32> to vector<48x6xf32>
    %127 = arith.subf %116, %126 : vector<48x6xf32>
    %128 = math.exp %127 : vector<48x6xf32>
    %129 = vector.broadcast %125 : vector<48x1xf32> to vector<48x48xf32>
    %130 = arith.subf %120, %129 : vector<48x48xf32>
    %131 = math.exp %130 : vector<48x48xf32>
    %cst_88 = arith.constant dense<0.000000e+00> : vector<48xf32>
    %132 = vector.multi_reduction <add>, %128, %cst_88 [1] : vector<48x6xf32> to vector<48xf32>
    %133 = vector.shape_cast %132 : vector<48xf32> to vector<48x1xf32>
    %cst_89 = arith.constant dense<0.000000e+00> : vector<48xf32>
    %134 = vector.multi_reduction <add>, %131, %cst_89 [1] : vector<48x48xf32> to vector<48xf32>
    %135 = vector.shape_cast %134 : vector<48xf32> to vector<48x1xf32>
    %136 = arith.addf %133, %135 : vector<48x1xf32>
    %c1_90 = arith.constant 1 : index
    %c0_91 = arith.constant 0 : index
    %c0_92 = arith.constant 0 : index
    %137 = vector.load %arg14[%c1_90, %c0_91, %c0_92] : memref<4x6x32xf32, #tpu.memory_space<vmem>>, vector<1x6x32xf32>
    %138 = vector.shape_cast %137 : vector<1x6x32xf32> to vector<6x32xf32>
    %cst_93 = arith.constant dense<0.000000e+00> : vector<48x32xf32>
    %139 = tpu.matmul %128, %138, %cst_93 {dimension_numbers = #tpu.dot_dimension_numbers<[1], [0], [0], [1], [0, 0, 1, 1], [], []>} : vector<48x6xf32>, vector<6x32xf32>, vector<48x32xf32> -> vector<48x32xf32>
    %cst_94 = arith.constant dense<0.000000e+00> : vector<48x32xf32>
    %140 = tpu.matmul %131, %111, %cst_94 {dimension_numbers = #tpu.dot_dimension_numbers<[1], [0], [0], [1], [0, 0, 1, 1], [], []>} : vector<48x48xf32>, vector<48x32xf32>, vector<48x32xf32> -> vector<48x32xf32>
    %141 = arith.addf %139, %140 : vector<48x32xf32>
    %142 = vector.broadcast %136 : vector<48x1xf32> to vector<48x32xf32>
    %143 = arith.divf %141, %142 : vector<48x32xf32>
    %144 = arith.truncf %143 : vector<48x32xf32> to vector<48x32xbf16>
    %c1_95 = arith.constant 1 : index
    %c0_96 = arith.constant 0 : index
    %c0_97 = arith.constant 0 : index
    %145 = vector.load %arg15[%c1_95, %c0_96, %c0_97] : memref<4x32x128xbf16, #tpu.memory_space<vmem>>, vector<1x32x128xbf16>
    %146 = vector.shape_cast %145 : vector<1x32x128xbf16> to vector<32x128xbf16>
    %cst_98 = arith.constant dense<0.000000e+00> : vector<48x128xf32>
    %147 = tpu.matmul %144, %146, %cst_98 {dimension_numbers = #tpu.dot_dimension_numbers<[1], [0], [0], [1], [0, 0, 1, 1], [], []>} : vector<48x32xbf16>, vector<32x128xbf16>, vector<48x128xf32> -> vector<48x128xf32>
    %148 = arith.addf %90, %147 : vector<48x128xf32>
    %c2 = arith.constant 2 : index
    %c0_99 = arith.constant 0 : index
    %c0_100 = arith.constant 0 : index
    %149 = vector.load %arg7[%c2, %c0_99, %c0_100] : memref<4x128x32xbf16, #tpu.memory_space<vmem>>, vector<1x128x32xbf16>
    %150 = vector.shape_cast %149 : vector<1x128x32xbf16> to vector<128x32xbf16>
    %cst_101 = arith.constant dense<0.000000e+00> : vector<48x32xf32>
    %151 = tpu.matmul %30, %150, %cst_101 {dimension_numbers = #tpu.dot_dimension_numbers<[1], [0], [0], [1], [0, 0, 1, 1], [], []>} : vector<48x128xbf16>, vector<128x32xbf16>, vector<48x32xf32> -> vector<48x32xf32>
    %c2_102 = arith.constant 2 : index
    %c0_103 = arith.constant 0 : index
    %c0_104 = arith.constant 0 : index
    %152 = vector.load %arg8[%c2_102, %c0_103, %c0_104] : memref<4x1x32xf32, #tpu.memory_space<vmem>>, vector<1x1x32xf32>
    %153 = vector.shape_cast %152 : vector<1x1x32xf32> to vector<1x32xf32>
    %154 = vector.broadcast %153 : vector<1x32xf32> to vector<48x32xf32>
    %155 = arith.addf %151, %154 : vector<48x32xf32>
    %c2_105 = arith.constant 2 : index
    %c0_106 = arith.constant 0 : index
    %c0_107 = arith.constant 0 : index
    %156 = vector.load %arg9[%c2_105, %c0_106, %c0_107] : memref<4x128x32xbf16, #tpu.memory_space<vmem>>, vector<1x128x32xbf16>
    %157 = vector.shape_cast %156 : vector<1x128x32xbf16> to vector<128x32xbf16>
    %cst_108 = arith.constant dense<0.000000e+00> : vector<48x32xf32>
    %158 = tpu.matmul %30, %157, %cst_108 {dimension_numbers = #tpu.dot_dimension_numbers<[1], [0], [0], [1], [0, 0, 1, 1], [], []>} : vector<48x128xbf16>, vector<128x32xbf16>, vector<48x32xf32> -> vector<48x32xf32>
    %c2_109 = arith.constant 2 : index
    %c0_110 = arith.constant 0 : index
    %c0_111 = arith.constant 0 : index
    %159 = vector.load %arg10[%c2_109, %c0_110, %c0_111] : memref<4x1x32xf32, #tpu.memory_space<vmem>>, vector<1x1x32xf32>
    %160 = vector.shape_cast %159 : vector<1x1x32xf32> to vector<1x32xf32>
    %161 = vector.broadcast %160 : vector<1x32xf32> to vector<48x32xf32>
    %162 = arith.addf %158, %161 : vector<48x32xf32>
    %c2_112 = arith.constant 2 : index
    %c0_113 = arith.constant 0 : index
    %c0_114 = arith.constant 0 : index
    %163 = vector.load %arg11[%c2_112, %c0_113, %c0_114] : memref<4x128x32xbf16, #tpu.memory_space<vmem>>, vector<1x128x32xbf16>
    %164 = vector.shape_cast %163 : vector<1x128x32xbf16> to vector<128x32xbf16>
    %cst_115 = arith.constant dense<0.000000e+00> : vector<48x32xf32>
    %165 = tpu.matmul %30, %164, %cst_115 {dimension_numbers = #tpu.dot_dimension_numbers<[1], [0], [0], [1], [0, 0, 1, 1], [], []>} : vector<48x128xbf16>, vector<128x32xbf16>, vector<48x32xf32> -> vector<48x32xf32>
    %c2_116 = arith.constant 2 : index
    %c0_117 = arith.constant 0 : index
    %c0_118 = arith.constant 0 : index
    %166 = vector.load %arg12[%c2_116, %c0_117, %c0_118] : memref<4x1x32xf32, #tpu.memory_space<vmem>>, vector<1x1x32xf32>
    %167 = vector.shape_cast %166 : vector<1x1x32xf32> to vector<1x32xf32>
    %168 = vector.broadcast %167 : vector<1x32xf32> to vector<48x32xf32>
    %169 = arith.addf %165, %168 : vector<48x32xf32>
    %c2_119 = arith.constant 2 : index
    %c0_120 = arith.constant 0 : index
    %c0_121 = arith.constant 0 : index
    %170 = vector.load %arg13[%c2_119, %c0_120, %c0_121] : memref<4x6x32xf32, #tpu.memory_space<vmem>>, vector<1x6x32xf32>
    %171 = vector.shape_cast %170 : vector<1x6x32xf32> to vector<6x32xf32>
    %cst_122 = arith.constant dense<0.000000e+00> : vector<48x6xf32>
    %172 = tpu.matmul %155, %171, %cst_122 {dimension_numbers = #tpu.dot_dimension_numbers<[1], [1], [0], [0], [0, 0, 1, 0], [], []>} : vector<48x32xf32>, vector<6x32xf32>, vector<48x6xf32> -> vector<48x6xf32>
    %cst_123 = arith.constant 0.176776692 : f32
    %173 = vector.broadcast %cst_123 : f32 to vector<48x6xf32>
    %174 = arith.mulf %172, %173 : vector<48x6xf32>
    %cst_124 = arith.constant dense<0.000000e+00> : vector<48x48xf32>
    %175 = tpu.matmul %155, %162, %cst_124 {dimension_numbers = #tpu.dot_dimension_numbers<[1], [1], [0], [0], [0, 0, 1, 0], [], []>} : vector<48x32xf32>, vector<48x32xf32>, vector<48x48xf32> -> vector<48x48xf32>
    %cst_125 = arith.constant 0.176776692 : f32
    %176 = vector.broadcast %cst_125 : f32 to vector<48x48xf32>
    %177 = arith.mulf %175, %176 : vector<48x48xf32>
    %178 = arith.addf %177, %31 : vector<48x48xf32>
    %cst_126 = arith.constant dense<0xFF800000> : vector<48xf32>
    %179 = vector.multi_reduction <maximumf>, %174, %cst_126 [1] : vector<48x6xf32> to vector<48xf32>
    %180 = vector.shape_cast %179 : vector<48xf32> to vector<48x1xf32>
    %cst_127 = arith.constant dense<0xFF800000> : vector<48xf32>
    %181 = vector.multi_reduction <maximumf>, %178, %cst_127 [1] : vector<48x48xf32> to vector<48xf32>
    %182 = vector.shape_cast %181 : vector<48xf32> to vector<48x1xf32>
    %183 = arith.maximumf %180, %182 : vector<48x1xf32>
    %184 = vector.broadcast %183 : vector<48x1xf32> to vector<48x6xf32>
    %185 = arith.subf %174, %184 : vector<48x6xf32>
    %186 = math.exp %185 : vector<48x6xf32>
    %187 = vector.broadcast %183 : vector<48x1xf32> to vector<48x48xf32>
    %188 = arith.subf %178, %187 : vector<48x48xf32>
    %189 = math.exp %188 : vector<48x48xf32>
    %cst_128 = arith.constant dense<0.000000e+00> : vector<48xf32>
    %190 = vector.multi_reduction <add>, %186, %cst_128 [1] : vector<48x6xf32> to vector<48xf32>
    %191 = vector.shape_cast %190 : vector<48xf32> to vector<48x1xf32>
    %cst_129 = arith.constant dense<0.000000e+00> : vector<48xf32>
    %192 = vector.multi_reduction <add>, %189, %cst_129 [1] : vector<48x48xf32> to vector<48xf32>
    %193 = vector.shape_cast %192 : vector<48xf32> to vector<48x1xf32>
    %194 = arith.addf %191, %193 : vector<48x1xf32>
    %c2_130 = arith.constant 2 : index
    %c0_131 = arith.constant 0 : index
    %c0_132 = arith.constant 0 : index
    %195 = vector.load %arg14[%c2_130, %c0_131, %c0_132] : memref<4x6x32xf32, #tpu.memory_space<vmem>>, vector<1x6x32xf32>
    %196 = vector.shape_cast %195 : vector<1x6x32xf32> to vector<6x32xf32>
    %cst_133 = arith.constant dense<0.000000e+00> : vector<48x32xf32>
    %197 = tpu.matmul %186, %196, %cst_133 {dimension_numbers = #tpu.dot_dimension_numbers<[1], [0], [0], [1], [0, 0, 1, 1], [], []>} : vector<48x6xf32>, vector<6x32xf32>, vector<48x32xf32> -> vector<48x32xf32>
    %cst_134 = arith.constant dense<0.000000e+00> : vector<48x32xf32>
    %198 = tpu.matmul %189, %169, %cst_134 {dimension_numbers = #tpu.dot_dimension_numbers<[1], [0], [0], [1], [0, 0, 1, 1], [], []>} : vector<48x48xf32>, vector<48x32xf32>, vector<48x32xf32> -> vector<48x32xf32>
    %199 = arith.addf %197, %198 : vector<48x32xf32>
    %200 = vector.broadcast %194 : vector<48x1xf32> to vector<48x32xf32>
    %201 = arith.divf %199, %200 : vector<48x32xf32>
    %202 = arith.truncf %201 : vector<48x32xf32> to vector<48x32xbf16>
    %c2_135 = arith.constant 2 : index
    %c0_136 = arith.constant 0 : index
    %c0_137 = arith.constant 0 : index
    %203 = vector.load %arg15[%c2_135, %c0_136, %c0_137] : memref<4x32x128xbf16, #tpu.memory_space<vmem>>, vector<1x32x128xbf16>
    %204 = vector.shape_cast %203 : vector<1x32x128xbf16> to vector<32x128xbf16>
    %cst_138 = arith.constant dense<0.000000e+00> : vector<48x128xf32>
    %205 = tpu.matmul %202, %204, %cst_138 {dimension_numbers = #tpu.dot_dimension_numbers<[1], [0], [0], [1], [0, 0, 1, 1], [], []>} : vector<48x32xbf16>, vector<32x128xbf16>, vector<48x128xf32> -> vector<48x128xf32>
    %206 = arith.addf %148, %205 : vector<48x128xf32>
    %c3 = arith.constant 3 : index
    %c0_139 = arith.constant 0 : index
    %c0_140 = arith.constant 0 : index
    %207 = vector.load %arg7[%c3, %c0_139, %c0_140] : memref<4x128x32xbf16, #tpu.memory_space<vmem>>, vector<1x128x32xbf16>
    %208 = vector.shape_cast %207 : vector<1x128x32xbf16> to vector<128x32xbf16>
    %cst_141 = arith.constant dense<0.000000e+00> : vector<48x32xf32>
    %209 = tpu.matmul %30, %208, %cst_141 {dimension_numbers = #tpu.dot_dimension_numbers<[1], [0], [0], [1], [0, 0, 1, 1], [], []>} : vector<48x128xbf16>, vector<128x32xbf16>, vector<48x32xf32> -> vector<48x32xf32>
    %c3_142 = arith.constant 3 : index
    %c0_143 = arith.constant 0 : index
    %c0_144 = arith.constant 0 : index
    %210 = vector.load %arg8[%c3_142, %c0_143, %c0_144] : memref<4x1x32xf32, #tpu.memory_space<vmem>>, vector<1x1x32xf32>
    %211 = vector.shape_cast %210 : vector<1x1x32xf32> to vector<1x32xf32>
    %212 = vector.broadcast %211 : vector<1x32xf32> to vector<48x32xf32>
    %213 = arith.addf %209, %212 : vector<48x32xf32>
    %c3_145 = arith.constant 3 : index
    %c0_146 = arith.constant 0 : index
    %c0_147 = arith.constant 0 : index
    %214 = vector.load %arg9[%c3_145, %c0_146, %c0_147] : memref<4x128x32xbf16, #tpu.memory_space<vmem>>, vector<1x128x32xbf16>
    %215 = vector.shape_cast %214 : vector<1x128x32xbf16> to vector<128x32xbf16>
    %cst_148 = arith.constant dense<0.000000e+00> : vector<48x32xf32>
    %216 = tpu.matmul %30, %215, %cst_148 {dimension_numbers = #tpu.dot_dimension_numbers<[1], [0], [0], [1], [0, 0, 1, 1], [], []>} : vector<48x128xbf16>, vector<128x32xbf16>, vector<48x32xf32> -> vector<48x32xf32>
    %c3_149 = arith.constant 3 : index
    %c0_150 = arith.constant 0 : index
    %c0_151 = arith.constant 0 : index
    %217 = vector.load %arg10[%c3_149, %c0_150, %c0_151] : memref<4x1x32xf32, #tpu.memory_space<vmem>>, vector<1x1x32xf32>
    %218 = vector.shape_cast %217 : vector<1x1x32xf32> to vector<1x32xf32>
    %219 = vector.broadcast %218 : vector<1x32xf32> to vector<48x32xf32>
    %220 = arith.addf %216, %219 : vector<48x32xf32>
    %c3_152 = arith.constant 3 : index
    %c0_153 = arith.constant 0 : index
    %c0_154 = arith.constant 0 : index
    %221 = vector.load %arg11[%c3_152, %c0_153, %c0_154] : memref<4x128x32xbf16, #tpu.memory_space<vmem>>, vector<1x128x32xbf16>
    %222 = vector.shape_cast %221 : vector<1x128x32xbf16> to vector<128x32xbf16>
    %cst_155 = arith.constant dense<0.000000e+00> : vector<48x32xf32>
    %223 = tpu.matmul %30, %222, %cst_155 {dimension_numbers = #tpu.dot_dimension_numbers<[1], [0], [0], [1], [0, 0, 1, 1], [], []>} : vector<48x128xbf16>, vector<128x32xbf16>, vector<48x32xf32> -> vector<48x32xf32>
    %c3_156 = arith.constant 3 : index
    %c0_157 = arith.constant 0 : index
    %c0_158 = arith.constant 0 : index
    %224 = vector.load %arg12[%c3_156, %c0_157, %c0_158] : memref<4x1x32xf32, #tpu.memory_space<vmem>>, vector<1x1x32xf32>
    %225 = vector.shape_cast %224 : vector<1x1x32xf32> to vector<1x32xf32>
    %226 = vector.broadcast %225 : vector<1x32xf32> to vector<48x32xf32>
    %227 = arith.addf %223, %226 : vector<48x32xf32>
    %c3_159 = arith.constant 3 : index
    %c0_160 = arith.constant 0 : index
    %c0_161 = arith.constant 0 : index
    %228 = vector.load %arg13[%c3_159, %c0_160, %c0_161] : memref<4x6x32xf32, #tpu.memory_space<vmem>>, vector<1x6x32xf32>
    %229 = vector.shape_cast %228 : vector<1x6x32xf32> to vector<6x32xf32>
    %cst_162 = arith.constant dense<0.000000e+00> : vector<48x6xf32>
    %230 = tpu.matmul %213, %229, %cst_162 {dimension_numbers = #tpu.dot_dimension_numbers<[1], [1], [0], [0], [0, 0, 1, 0], [], []>} : vector<48x32xf32>, vector<6x32xf32>, vector<48x6xf32> -> vector<48x6xf32>
    %cst_163 = arith.constant 0.176776692 : f32
    %231 = vector.broadcast %cst_163 : f32 to vector<48x6xf32>
    %232 = arith.mulf %230, %231 : vector<48x6xf32>
    %cst_164 = arith.constant dense<0.000000e+00> : vector<48x48xf32>
    %233 = tpu.matmul %213, %220, %cst_164 {dimension_numbers = #tpu.dot_dimension_numbers<[1], [1], [0], [0], [0, 0, 1, 0], [], []>} : vector<48x32xf32>, vector<48x32xf32>, vector<48x48xf32> -> vector<48x48xf32>
    %cst_165 = arith.constant 0.176776692 : f32
    %234 = vector.broadcast %cst_165 : f32 to vector<48x48xf32>
    %235 = arith.mulf %233, %234 : vector<48x48xf32>
    %236 = arith.addf %235, %31 : vector<48x48xf32>
    %cst_166 = arith.constant dense<0xFF800000> : vector<48xf32>
    %237 = vector.multi_reduction <maximumf>, %232, %cst_166 [1] : vector<48x6xf32> to vector<48xf32>
    %238 = vector.shape_cast %237 : vector<48xf32> to vector<48x1xf32>
    %cst_167 = arith.constant dense<0xFF800000> : vector<48xf32>
    %239 = vector.multi_reduction <maximumf>, %236, %cst_167 [1] : vector<48x48xf32> to vector<48xf32>
    %240 = vector.shape_cast %239 : vector<48xf32> to vector<48x1xf32>
    %241 = arith.maximumf %238, %240 : vector<48x1xf32>
    %242 = vector.broadcast %241 : vector<48x1xf32> to vector<48x6xf32>
    %243 = arith.subf %232, %242 : vector<48x6xf32>
    %244 = math.exp %243 : vector<48x6xf32>
    %245 = vector.broadcast %241 : vector<48x1xf32> to vector<48x48xf32>
    %246 = arith.subf %236, %245 : vector<48x48xf32>
    %247 = math.exp %246 : vector<48x48xf32>
    %cst_168 = arith.constant dense<0.000000e+00> : vector<48xf32>
    %248 = vector.multi_reduction <add>, %244, %cst_168 [1] : vector<48x6xf32> to vector<48xf32>
    %249 = vector.shape_cast %248 : vector<48xf32> to vector<48x1xf32>
    %cst_169 = arith.constant dense<0.000000e+00> : vector<48xf32>
    %250 = vector.multi_reduction <add>, %247, %cst_169 [1] : vector<48x48xf32> to vector<48xf32>
    %251 = vector.shape_cast %250 : vector<48xf32> to vector<48x1xf32>
    %252 = arith.addf %249, %251 : vector<48x1xf32>
    %c3_170 = arith.constant 3 : index
    %c0_171 = arith.constant 0 : index
    %c0_172 = arith.constant 0 : index
    %253 = vector.load %arg14[%c3_170, %c0_171, %c0_172] : memref<4x6x32xf32, #tpu.memory_space<vmem>>, vector<1x6x32xf32>
    %254 = vector.shape_cast %253 : vector<1x6x32xf32> to vector<6x32xf32>
    %cst_173 = arith.constant dense<0.000000e+00> : vector<48x32xf32>
    %255 = tpu.matmul %244, %254, %cst_173 {dimension_numbers = #tpu.dot_dimension_numbers<[1], [0], [0], [1], [0, 0, 1, 1], [], []>} : vector<48x6xf32>, vector<6x32xf32>, vector<48x32xf32> -> vector<48x32xf32>
    %cst_174 = arith.constant dense<0.000000e+00> : vector<48x32xf32>
    %256 = tpu.matmul %247, %227, %cst_174 {dimension_numbers = #tpu.dot_dimension_numbers<[1], [0], [0], [1], [0, 0, 1, 1], [], []>} : vector<48x48xf32>, vector<48x32xf32>, vector<48x32xf32> -> vector<48x32xf32>
    %257 = arith.addf %255, %256 : vector<48x32xf32>
    %258 = vector.broadcast %252 : vector<48x1xf32> to vector<48x32xf32>
    %259 = arith.divf %257, %258 : vector<48x32xf32>
    %260 = arith.truncf %259 : vector<48x32xf32> to vector<48x32xbf16>
    %c3_175 = arith.constant 3 : index
    %c0_176 = arith.constant 0 : index
    %c0_177 = arith.constant 0 : index
    %261 = vector.load %arg15[%c3_175, %c0_176, %c0_177] : memref<4x32x128xbf16, #tpu.memory_space<vmem>>, vector<1x32x128xbf16>
    %262 = vector.shape_cast %261 : vector<1x32x128xbf16> to vector<32x128xbf16>
    %cst_178 = arith.constant dense<0.000000e+00> : vector<48x128xf32>
    %263 = tpu.matmul %260, %262, %cst_178 {dimension_numbers = #tpu.dot_dimension_numbers<[1], [0], [0], [1], [0, 0, 1, 1], [], []>} : vector<48x32xbf16>, vector<32x128xbf16>, vector<48x128xf32> -> vector<48x128xf32>
    %264 = arith.addf %206, %263 : vector<48x128xf32>
    %265 = arith.addf %7, %264 : vector<48x128xf32>
    %c0_179 = arith.constant 0 : index
    %c0_180 = arith.constant 0 : index
    %266 = vector.load %arg16[%c0_179, %c0_180] : memref<1x128xf32, #tpu.memory_space<vmem>>, vector<1x128xf32>
    %267 = vector.broadcast %266 : vector<1x128xf32> to vector<48x128xf32>
    %268 = arith.addf %265, %267 : vector<48x128xf32>
    %c0_181 = arith.constant 0 : index
    %c0_182 = arith.constant 0 : index
    %269 = vector.load %arg17[%c0_181, %c0_182] : memref<1x128xf32, #tpu.memory_space<vmem>>, vector<1x128xf32>
    %c0_183 = arith.constant 0 : index
    %c0_184 = arith.constant 0 : index
    %270 = vector.load %arg18[%c0_183, %c0_184] : memref<1x128xf32, #tpu.memory_space<vmem>>, vector<1x128xf32>
    %cst_185 = arith.constant dense<0.000000e+00> : vector<48xf32>
    %271 = vector.multi_reduction <add>, %268, %cst_185 [1] : vector<48x128xf32> to vector<48xf32>
    %272 = vector.shape_cast %271 : vector<48xf32> to vector<48x1xf32>
    %cst_186 = arith.constant 1.280000e+02 : f32
    %273 = vector.broadcast %cst_186 : f32 to vector<48x1xf32>
    %274 = arith.divf %272, %273 : vector<48x1xf32>
    %275 = vector.broadcast %274 : vector<48x1xf32> to vector<48x128xf32>
    %276 = arith.subf %268, %275 : vector<48x128xf32>
    %277 = arith.mulf %276, %276 : vector<48x128xf32>
    %cst_187 = arith.constant dense<0.000000e+00> : vector<48xf32>
    %278 = vector.multi_reduction <add>, %277, %cst_187 [1] : vector<48x128xf32> to vector<48xf32>
    %279 = vector.shape_cast %278 : vector<48xf32> to vector<48x1xf32>
    %cst_188 = arith.constant 1.280000e+02 : f32
    %280 = vector.broadcast %cst_188 : f32 to vector<48x1xf32>
    %281 = arith.divf %279, %280 : vector<48x1xf32>
    %cst_189 = arith.constant 9.99999974E-6 : f32
    %282 = vector.broadcast %cst_189 : f32 to vector<48x1xf32>
    %283 = arith.addf %281, %282 : vector<48x1xf32>
    %284 = math.rsqrt %283 : vector<48x1xf32>
    %285 = vector.broadcast %284 : vector<48x1xf32> to vector<48x128xf32>
    %286 = arith.mulf %276, %285 : vector<48x128xf32>
    %287 = vector.broadcast %269 : vector<1x128xf32> to vector<48x128xf32>
    %288 = arith.mulf %286, %287 : vector<48x128xf32>
    %289 = vector.broadcast %270 : vector<1x128xf32> to vector<48x128xf32>
    %290 = arith.addf %288, %289 : vector<48x128xf32>
    %c0_190 = arith.constant 0 : index
    %c0_191 = arith.constant 0 : index
    %291 = vector.load %arg19[%c0_190, %c0_191] : memref<128x256xbf16, #tpu.memory_space<vmem>>, vector<128x256xbf16>
    %c0_192 = arith.constant 0 : index
    %c0_193 = arith.constant 0 : index
    %292 = vector.load %arg20[%c0_192, %c0_193] : memref<1x256xf32, #tpu.memory_space<vmem>>, vector<1x256xf32>
    %293 = arith.truncf %290 : vector<48x128xf32> to vector<48x128xbf16>
    %cst_194 = arith.constant dense<0.000000e+00> : vector<48x256xf32>
    %294 = tpu.matmul %293, %291, %cst_194 {dimension_numbers = #tpu.dot_dimension_numbers<[1], [0], [0], [1], [0, 0, 1, 1], [], []>} : vector<48x128xbf16>, vector<128x256xbf16>, vector<48x256xf32> -> vector<48x256xf32>
    %295 = vector.broadcast %292 : vector<1x256xf32> to vector<48x256xf32>
    %296 = arith.addf %294, %295 : vector<48x256xf32>
    %cst_195 = arith.constant 5.000000e-01 : f32
    %297 = vector.broadcast %cst_195 : f32 to vector<48x256xf32>
    %298 = arith.mulf %297, %296 : vector<48x256xf32>
    %cst_196 = arith.constant 4.471500e-02 : f32
    %299 = vector.broadcast %cst_196 : f32 to vector<48x256xf32>
    %300 = arith.mulf %299, %296 : vector<48x256xf32>
    %301 = arith.mulf %300, %296 : vector<48x256xf32>
    %302 = arith.mulf %301, %296 : vector<48x256xf32>
    %303 = arith.addf %296, %302 : vector<48x256xf32>
    %cst_197 = arith.constant 0.797884583 : f32
    %304 = vector.broadcast %cst_197 : f32 to vector<48x256xf32>
    %305 = arith.mulf %304, %303 : vector<48x256xf32>
    %306 = math.tanh %305 : vector<48x256xf32>
    %cst_198 = arith.constant 1.000000e+00 : f32
    %307 = vector.broadcast %cst_198 : f32 to vector<48x256xf32>
    %308 = arith.addf %307, %306 : vector<48x256xf32>
    %309 = arith.mulf %298, %308 : vector<48x256xf32>
    %c0_199 = arith.constant 0 : index
    %c0_200 = arith.constant 0 : index
    %310 = vector.load %arg21[%c0_199, %c0_200] : memref<256x128xbf16, #tpu.memory_space<vmem>>, vector<256x128xbf16>
    %c0_201 = arith.constant 0 : index
    %c0_202 = arith.constant 0 : index
    %311 = vector.load %arg22[%c0_201, %c0_202] : memref<1x128xf32, #tpu.memory_space<vmem>>, vector<1x128xf32>
    %312 = arith.truncf %309 : vector<48x256xf32> to vector<48x256xbf16>
    %cst_203 = arith.constant dense<0.000000e+00> : vector<48x128xf32>
    %313 = tpu.matmul %312, %310, %cst_203 {dimension_numbers = #tpu.dot_dimension_numbers<[1], [0], [0], [1], [0, 0, 1, 1], [], []>} : vector<48x256xbf16>, vector<256x128xbf16>, vector<48x128xf32> -> vector<48x128xf32>
    %314 = vector.broadcast %311 : vector<1x128xf32> to vector<48x128xf32>
    %315 = arith.addf %313, %314 : vector<48x128xf32>
    %316 = arith.addf %268, %315 : vector<48x128xf32>
    %c0_204 = arith.constant 0 : index
    %c0_205 = arith.constant 0 : index
    %317 = vector.load %arg28[%c0_204, %c0_205] : memref<48x128xf32, #tpu.memory_space<vmem>>, vector<48x128xf32>
    tpu.vector_store %arg28[%c0_204, %c0_205], %316 {strides = array<i32>} : memref<48x128xf32, #tpu.memory_space<vmem>>, vector<48x128xf32>,
    %cst_206 = arith.constant 0.000000e+00 : f32
    %318 = vector.broadcast %cst_206 : f32 to vector<8x1024xf32>
    %c0_207 = arith.constant 0 : index
    %c0_208 = arith.constant 0 : index
    %319 = vector.load %arg28[%c0_207, %c0_208] : memref<48x128xf32, #tpu.memory_space<vmem>>, vector<8x128xf32>
    %320 = arith.truncf %319 : vector<8x128xf32> to vector<8x128xbf16>
    %c0_209 = arith.constant 0 : index
    %c0_210 = arith.constant 0 : index
    %c0_211 = arith.constant 0 : index
    %321 = vector.load %arg23[%c0_209, %c0_210, %c0_211] : memref<6x128x1024xbf16, #tpu.memory_space<vmem>>, vector<1x128x1024xbf16>
    %322 = vector.shape_cast %321 : vector<1x128x1024xbf16> to vector<128x1024xbf16>
    %cst_212 = arith.constant dense<0.000000e+00> : vector<8x1024xf32>
    %323 = tpu.matmul %320, %322, %cst_212 {dimension_numbers = #tpu.dot_dimension_numbers<[1], [0], [0], [1], [0, 0, 1, 1], [], []>} : vector<8x128xbf16>, vector<128x1024xbf16>, vector<8x1024xf32> -> vector<8x1024xf32>
    %324 = arith.addf %318, %323 : vector<8x1024xf32>
    %c8 = arith.constant 8 : index
    %c0_213 = arith.constant 0 : index
    %325 = vector.load %arg28[%c8, %c0_213] : memref<48x128xf32, #tpu.memory_space<vmem>>, vector<8x128xf32>
    %326 = arith.truncf %325 : vector<8x128xf32> to vector<8x128xbf16>
    %c1_214 = arith.constant 1 : index
    %c0_215 = arith.constant 0 : index
    %c0_216 = arith.constant 0 : index
    %327 = vector.load %arg23[%c1_214, %c0_215, %c0_216] : memref<6x128x1024xbf16, #tpu.memory_space<vmem>>, vector<1x128x1024xbf16>
    %328 = vector.shape_cast %327 : vector<1x128x1024xbf16> to vector<128x1024xbf16>
    %cst_217 = arith.constant dense<0.000000e+00> : vector<8x1024xf32>
    %329 = tpu.matmul %326, %328, %cst_217 {dimension_numbers = #tpu.dot_dimension_numbers<[1], [0], [0], [1], [0, 0, 1, 1], [], []>} : vector<8x128xbf16>, vector<128x1024xbf16>, vector<8x1024xf32> -> vector<8x1024xf32>
    %330 = arith.addf %324, %329 : vector<8x1024xf32>
    %c16 = arith.constant 16 : index
    %c0_218 = arith.constant 0 : index
    %331 = vector.load %arg28[%c16, %c0_218] : memref<48x128xf32, #tpu.memory_space<vmem>>, vector<8x128xf32>
    %332 = arith.truncf %331 : vector<8x128xf32> to vector<8x128xbf16>
    %c2_219 = arith.constant 2 : index
    %c0_220 = arith.constant 0 : index
    %c0_221 = arith.constant 0 : index
    %333 = vector.load %arg23[%c2_219, %c0_220, %c0_221] : memref<6x128x1024xbf16, #tpu.memory_space<vmem>>, vector<1x128x1024xbf16>
    %334 = vector.shape_cast %333 : vector<1x128x1024xbf16> to vector<128x1024xbf16>
    %cst_222 = arith.constant dense<0.000000e+00> : vector<8x1024xf32>
    %335 = tpu.matmul %332, %334, %cst_222 {dimension_numbers = #tpu.dot_dimension_numbers<[1], [0], [0], [1], [0, 0, 1, 1], [], []>} : vector<8x128xbf16>, vector<128x1024xbf16>, vector<8x1024xf32> -> vector<8x1024xf32>
    %336 = arith.addf %330, %335 : vector<8x1024xf32>
    %c24 = arith.constant 24 : index
    %c0_223 = arith.constant 0 : index
    %337 = vector.load %arg28[%c24, %c0_223] : memref<48x128xf32, #tpu.memory_space<vmem>>, vector<8x128xf32>
    %338 = arith.truncf %337 : vector<8x128xf32> to vector<8x128xbf16>
    %c3_224 = arith.constant 3 : index
    %c0_225 = arith.constant 0 : index
    %c0_226 = arith.constant 0 : index
    %339 = vector.load %arg23[%c3_224, %c0_225, %c0_226] : memref<6x128x1024xbf16, #tpu.memory_space<vmem>>, vector<1x128x1024xbf16>
    %340 = vector.shape_cast %339 : vector<1x128x1024xbf16> to vector<128x1024xbf16>
    %cst_227 = arith.constant dense<0.000000e+00> : vector<8x1024xf32>
    %341 = tpu.matmul %338, %340, %cst_227 {dimension_numbers = #tpu.dot_dimension_numbers<[1], [0], [0], [1], [0, 0, 1, 1], [], []>} : vector<8x128xbf16>, vector<128x1024xbf16>, vector<8x1024xf32> -> vector<8x1024xf32>
    %342 = arith.addf %336, %341 : vector<8x1024xf32>
    %c32 = arith.constant 32 : index
    %c0_228 = arith.constant 0 : index
    %343 = vector.load %arg28[%c32, %c0_228] : memref<48x128xf32, #tpu.memory_space<vmem>>, vector<8x128xf32>
    %344 = arith.truncf %343 : vector<8x128xf32> to vector<8x128xbf16>
    %c4 = arith.constant 4 : index
    %c0_229 = arith.constant 0 : index
    %c0_230 = arith.constant 0 : index
    %345 = vector.load %arg23[%c4, %c0_229, %c0_230] : memref<6x128x1024xbf16, #tpu.memory_space<vmem>>, vector<1x128x1024xbf16>
    %346 = vector.shape_cast %345 : vector<1x128x1024xbf16> to vector<128x1024xbf16>
    %cst_231 = arith.constant dense<0.000000e+00> : vector<8x1024xf32>
    %347 = tpu.matmul %344, %346, %cst_231 {dimension_numbers = #tpu.dot_dimension_numbers<[1], [0], [0], [1], [0, 0, 1, 1], [], []>} : vector<8x128xbf16>, vector<128x1024xbf16>, vector<8x1024xf32> -> vector<8x1024xf32>
    %348 = arith.addf %342, %347 : vector<8x1024xf32>
    %c40 = arith.constant 40 : index
    %c0_232 = arith.constant 0 : index
    %349 = vector.load %arg28[%c40, %c0_232] : memref<48x128xf32, #tpu.memory_space<vmem>>, vector<8x128xf32>
    %350 = arith.truncf %349 : vector<8x128xf32> to vector<8x128xbf16>
    %c5 = arith.constant 5 : index
    %c0_233 = arith.constant 0 : index
    %c0_234 = arith.constant 0 : index
    %351 = vector.load %arg23[%c5, %c0_233, %c0_234] : memref<6x128x1024xbf16, #tpu.memory_space<vmem>>, vector<1x128x1024xbf16>
    %352 = vector.shape_cast %351 : vector<1x128x1024xbf16> to vector<128x1024xbf16>
    %cst_235 = arith.constant dense<0.000000e+00> : vector<8x1024xf32>
    %353 = tpu.matmul %350, %352, %cst_235 {dimension_numbers = #tpu.dot_dimension_numbers<[1], [0], [0], [1], [0, 0, 1, 1], [], []>} : vector<8x128xbf16>, vector<128x1024xbf16>, vector<8x1024xf32> -> vector<8x1024xf32>
    %354 = arith.addf %348, %353 : vector<8x1024xf32>
    %c0_236 = arith.constant 0 : index
    %c0_237 = arith.constant 0 : index
    %355 = vector.load %arg24[%c0_236, %c0_237] : memref<1x1024xf32, #tpu.memory_space<vmem>>, vector<1x1024xf32>
    %356 = vector.broadcast %355 : vector<1x1024xf32> to vector<8x1024xf32>
    %357 = arith.addf %354, %356 : vector<8x1024xf32>
    %cst_238 = arith.constant 0.000000e+00 : f32
    %358 = vector.broadcast %cst_238 : f32 to vector<8x1024xf32>
    %359 = arith.cmpf ogt, %357, %358 : vector<8x1024xf32>
    %cst_239 = arith.constant 0.000000e+00 : f32
    %360 = vector.broadcast %cst_239 : f32 to vector<8x1024xf32>
    %361 = arith.minimumf %357, %360 : vector<8x1024xf32>
    %362 = math.exp %361 : vector<8x1024xf32>
    %cst_240 = arith.constant 1.000000e+00 : f32
    %363 = vector.broadcast %cst_240 : f32 to vector<8x1024xf32>
    %364 = arith.subf %362, %363 : vector<8x1024xf32>
    %365 = arith.select %359, %357, %364 : vector<8x1024xi1>, vector<8x1024xf32>
    %cst_241 = arith.constant 0.000000e+00 : f32
    %366 = vector.broadcast %cst_241 : f32 to vector<8x1024xf32>
    %367 = arith.cmpf ogt, %365, %366 : vector<8x1024xf32>
    %cst_242 = arith.constant 0.000000e+00 : f32
    %368 = vector.broadcast %cst_242 : f32 to vector<8x1024xf32>
    %369 = arith.minimumf %365, %368 : vector<8x1024xf32>
    %370 = math.exp %369 : vector<8x1024xf32>
    %cst_243 = arith.constant 1.000000e+00 : f32
    %371 = vector.broadcast %cst_243 : f32 to vector<8x1024xf32>
    %372 = arith.subf %370, %371 : vector<8x1024xf32>
    %373 = arith.select %367, %365, %372 : vector<8x1024xi1>, vector<8x1024xf32>
    %374 = arith.truncf %373 : vector<8x1024xf32> to vector<8x1024xbf16>
    %c0_244 = arith.constant 0 : index
    %c0_245 = arith.constant 0 : index
    %375 = vector.load %arg25[%c0_244, %c0_245] : memref<1024x768xbf16, #tpu.memory_space<vmem>>, vector<1024x768xbf16>
    %cst_246 = arith.constant dense<0.000000e+00> : vector<8x768xf32>
    %376 = tpu.matmul %374, %375, %cst_246 {dimension_numbers = #tpu.dot_dimension_numbers<[1], [0], [0], [1], [0, 0, 1, 1], [], []>} : vector<8x1024xbf16>, vector<1024x768xbf16>, vector<8x768xf32> -> vector<8x768xf32>
    %c0_247 = arith.constant 0 : index
    %c0_248 = arith.constant 0 : index
    %377 = vector.load %arg26[%c0_247, %c0_248] : memref<1x768xf32, #tpu.memory_space<vmem>>, vector<1x768xf32>
    %378 = vector.broadcast %377 : vector<1x768xf32> to vector<8x768xf32>
    %379 = arith.addf %376, %378 : vector<8x768xf32>
    %cst_249 = arith.constant dense<0xFF800000> : vector<8xf32>
    %380 = vector.multi_reduction <maximumf>, %379, %cst_249 [1] : vector<8x768xf32> to vector<8xf32>
    %381 = vector.shape_cast %380 : vector<8xf32> to vector<8x1xf32>
    %382 = vector.broadcast %381 : vector<8x1xf32> to vector<8x768xf32>
    %383 = arith.subf %379, %382 : vector<8x768xf32>
    %384 = math.exp %383 : vector<8x768xf32>
    %cst_250 = arith.constant dense<0.000000e+00> : vector<8xf32>
    %385 = vector.multi_reduction <add>, %384, %cst_250 [1] : vector<8x768xf32> to vector<8xf32>
    %386 = vector.shape_cast %385 : vector<8xf32> to vector<8x1xf32>
    %387 = math.log %386 : vector<8x1xf32>
    %388 = vector.broadcast %387 : vector<8x1xf32> to vector<8x768xf32>
    %389 = arith.subf %383, %388 : vector<8x768xf32>
    %c0_251 = arith.constant 0 : index
    %c0_252 = arith.constant 0 : index
    %c0_253 = arith.constant 0 : index
    %390 = vector.load %arg27[%c0_251, %c0_252, %c0_253] : memref<1x8x768xf32, #tpu.memory_space<vmem>>, vector<1x8x768xf32>
    %391 = vector.shape_cast %390 : vector<1x8x768xf32> to vector<8x768xf32>
    %392 = vector.shape_cast %389 : vector<8x768xf32> to vector<1x8x768xf32>
    tpu.vector_store %arg27[%c0_251, %c0_252, %c0_253], %392 {strides = array<i32>} : memref<1x8x768xf32, #tpu.memory_space<vmem>>, vector<1x8x768xf32>,
    return
  }
  func.func @transform_0(%arg0: i32) -> (i32, i32, i32) {
    %c0_i32 = arith.constant 0 : i32
    %c0_i32_0 = arith.constant 0 : i32
    %c0_i32_1 = arith.constant 0 : i32
    return %arg0, %c0_i32, %c0_i32_0 : i32, i32, i32
  }
  func.func @transform_1(%arg0: i32) -> (i32, i32) {
    %c0_i32 = arith.constant 0 : i32
    %c0_i32_0 = arith.constant 0 : i32
    %c0_i32_1 = arith.constant 0 : i32
    return %c0_i32, %c0_i32_0 : i32, i32
  }
  func.func @transform_2(%arg0: i32) -> (i32, i32) {
    %c0_i32 = arith.constant 0 : i32
    %c0_i32_0 = arith.constant 0 : i32
    %c0_i32_1 = arith.constant 0 : i32
    return %c0_i32, %c0_i32_0 : i32, i32
  }
  func.func @transform_3(%arg0: i32) -> (i32, i32) {
    %c0_i32 = arith.constant 0 : i32
    %c0_i32_0 = arith.constant 0 : i32
    %c0_i32_1 = arith.constant 0 : i32
    return %c0_i32, %c0_i32_0 : i32, i32
  }
  func.func @transform_4(%arg0: i32) -> (i32, i32) {
    %c0_i32 = arith.constant 0 : i32
    %c0_i32_0 = arith.constant 0 : i32
    %c0_i32_1 = arith.constant 0 : i32
    return %c0_i32, %c0_i32_0 : i32, i32
  }
  func.func @transform_5(%arg0: i32) -> (i32, i32) {
    %c0_i32 = arith.constant 0 : i32
    %c0_i32_0 = arith.constant 0 : i32
    %c0_i32_1 = arith.constant 0 : i32
    return %c0_i32, %c0_i32_0 : i32, i32
  }
  func.func @transform_6(%arg0: i32) -> (i32, i32, i32) {
    %c0_i32 = arith.constant 0 : i32
    %c0_i32_0 = arith.constant 0 : i32
    %c0_i32_1 = arith.constant 0 : i32
    %c0_i32_2 = arith.constant 0 : i32
    return %c0_i32, %c0_i32_0, %c0_i32_1 : i32, i32, i32
  }
  func.func @transform_7(%arg0: i32) -> (i32, i32, i32) {
    %c0_i32 = arith.constant 0 : i32
    %c0_i32_0 = arith.constant 0 : i32
    %c0_i32_1 = arith.constant 0 : i32
    %c0_i32_2 = arith.constant 0 : i32
    return %c0_i32, %c0_i32_0, %c0_i32_1 : i32, i32, i32
  }
  func.func @transform_8(%arg0: i32) -> (i32, i32, i32) {
    %c0_i32 = arith.constant 0 : i32
    %c0_i32_0 = arith.constant 0 : i32
    %c0_i32_1 = arith.constant 0 : i32
    %c0_i32_2 = arith.constant 0 : i32
    return %c0_i32, %c0_i32_0, %c0_i32_1 : i32, i32, i32
  }
  func.func @transform_9(%arg0: i32) -> (i32, i32, i32) {
    %c0_i32 = arith.constant 0 : i32
    %c0_i32_0 = arith.constant 0 : i32
    %c0_i32_1 = arith.constant 0 : i32
    %c0_i32_2 = arith.constant 0 : i32
    return %c0_i32, %c0_i32_0, %c0_i32_1 : i32, i32, i32
  }
  func.func @transform_10(%arg0: i32) -> (i32, i32, i32) {
    %c0_i32 = arith.constant 0 : i32
    %c0_i32_0 = arith.constant 0 : i32
    %c0_i32_1 = arith.constant 0 : i32
    %c0_i32_2 = arith.constant 0 : i32
    return %c0_i32, %c0_i32_0, %c0_i32_1 : i32, i32, i32
  }
  func.func @transform_11(%arg0: i32) -> (i32, i32, i32) {
    %c0_i32 = arith.constant 0 : i32
    %c0_i32_0 = arith.constant 0 : i32
    %c0_i32_1 = arith.constant 0 : i32
    %c0_i32_2 = arith.constant 0 : i32
    return %c0_i32, %c0_i32_0, %c0_i32_1 : i32, i32, i32
  }
  func.func @transform_12(%arg0: i32) -> (i32, i32, i32) {
    %c0_i32 = arith.constant 0 : i32
    %c0_i32_0 = arith.constant 0 : i32
    %c0_i32_1 = arith.constant 0 : i32
    %c0_i32_2 = arith.constant 0 : i32
    return %c0_i32, %c0_i32_0, %c0_i32_1 : i32, i32, i32
  }
  func.func @transform_13(%arg0: i32) -> (i32, i32, i32) {
    %c0_i32 = arith.constant 0 : i32
    %c0_i32_0 = arith.constant 0 : i32
    %c0_i32_1 = arith.constant 0 : i32
    %c0_i32_2 = arith.constant 0 : i32
    return %c0_i32, %c0_i32_0, %c0_i32_1 : i32, i32, i32
  }
  func.func @transform_14(%arg0: i32) -> (i32, i32, i32) {
    %c0_i32 = arith.constant 0 : i32
    %c0_i32_0 = arith.constant 0 : i32
    %c0_i32_1 = arith.constant 0 : i32
    %c0_i32_2 = arith.constant 0 : i32
    return %c0_i32, %c0_i32_0, %c0_i32_1 : i32, i32, i32
  }
  func.func @transform_15(%arg0: i32) -> (i32, i32) {
    %c0_i32 = arith.constant 0 : i32
    %c0_i32_0 = arith.constant 0 : i32
    %c0_i32_1 = arith.constant 0 : i32
    return %c0_i32, %c0_i32_0 : i32, i32
  }
  func.func @transform_16(%arg0: i32) -> (i32, i32) {
    %c0_i32 = arith.constant 0 : i32
    %c0_i32_0 = arith.constant 0 : i32
    %c0_i32_1 = arith.constant 0 : i32
    return %c0_i32, %c0_i32_0 : i32, i32
  }
  func.func @transform_17(%arg0: i32) -> (i32, i32) {
    %c0_i32 = arith.constant 0 : i32
    %c0_i32_0 = arith.constant 0 : i32
    %c0_i32_1 = arith.constant 0 : i32
    return %c0_i32, %c0_i32_0 : i32, i32
  }
  func.func @transform_18(%arg0: i32) -> (i32, i32) {
    %c0_i32 = arith.constant 0 : i32
    %c0_i32_0 = arith.constant 0 : i32
    %c0_i32_1 = arith.constant 0 : i32
    return %c0_i32, %c0_i32_0 : i32, i32
  }
  func.func @transform_19(%arg0: i32) -> (i32, i32) {
    %c0_i32 = arith.constant 0 : i32
    %c0_i32_0 = arith.constant 0 : i32
    %c0_i32_1 = arith.constant 0 : i32
    return %c0_i32, %c0_i32_0 : i32, i32
  }
  func.func @transform_20(%arg0: i32) -> (i32, i32) {
    %c0_i32 = arith.constant 0 : i32
    %c0_i32_0 = arith.constant 0 : i32
    %c0_i32_1 = arith.constant 0 : i32
    return %c0_i32, %c0_i32_0 : i32, i32
  }
  func.func @transform_21(%arg0: i32) -> (i32, i32) {
    %c0_i32 = arith.constant 0 : i32
    %c0_i32_0 = arith.constant 0 : i32
    %c0_i32_1 = arith.constant 0 : i32
    return %c0_i32, %c0_i32_0 : i32, i32
  }
  func.func @transform_22(%arg0: i32) -> (i32, i32, i32) {
    %c0_i32 = arith.constant 0 : i32
    %c0_i32_0 = arith.constant 0 : i32
    %c0_i32_1 = arith.constant 0 : i32
    %c0_i32_2 = arith.constant 0 : i32
    return %c0_i32, %c0_i32_0, %c0_i32_1 : i32, i32, i32
  }
  func.func @transform_23(%arg0: i32) -> (i32, i32) {
    %c0_i32 = arith.constant 0 : i32
    %c0_i32_0 = arith.constant 0 : i32
    %c0_i32_1 = arith.constant 0 : i32
    return %c0_i32, %c0_i32_0 : i32, i32
  }
  func.func @transform_24(%arg0: i32) -> (i32, i32) {
    %c0_i32 = arith.constant 0 : i32
    %c0_i32_0 = arith.constant 0 : i32
    %c0_i32_1 = arith.constant 0 : i32
    return %c0_i32, %c0_i32_0 : i32, i32
  }
  func.func @transform_25(%arg0: i32) -> (i32, i32) {
    %c0_i32 = arith.constant 0 : i32
    %c0_i32_0 = arith.constant 0 : i32
    %c0_i32_1 = arith.constant 0 : i32
    return %c0_i32, %c0_i32_0 : i32, i32
  }
  func.func @transform_26(%arg0: i32) -> (i32, i32, i32) {
    %c0_i32 = arith.constant 0 : i32
    %c0_i32_0 = arith.constant 0 : i32
    %c0_i32_1 = arith.constant 0 : i32
    return %arg0, %c0_i32, %c0_i32_0 : i32, i32, i32
  }
}

</mosaic_0001>

<bundles_post_ra>
// kernel: forward.1
= control target key start
LH: loop header
LB: loop body
LE: loop exit
PB: predicated region body
PF: predicated region fallthrough
CT: control target
= control target key end

     0   :  { %s17962_s0 = inlined_call_operand.vmem [shape: f32[1,48,32], index: 0, kind: input, shape index: {}]   ;;  %s17963_s1 = inlined_call_operand.vmem [shape: f32[48,48], index: 1, kind: input, shape index: {}]   ;;  %s17964_s2 = inlined_call_operand.hbm [shape: bf16[32,128], index: 2, kind: input, shape index: {}]   ;;  %s17965_s3 = inlined_call_operand.hbm [shape: f32[1,128], index: 3, kind: input, shape index: {}]   ;;  %s17966_s4 = inlined_call_operand.hbm [shape: f32[1,128], index: 4, kind: input, shape index: {}]   ;;  %s17967_s5 = inlined_call_operand.hbm [shape: f32[1,128], index: 5, kind: input, shape index: {}]   ;;  %s17968_s6 = inlined_call_operand.vmem [shape: bf16[4,128,32], index: 6, kind: input, shape index: {}]   ;;  %s17969_s7 = inlined_call_operand.hbm [shape: f32[4,1,32], index: 7, kind: input, shape index: {}]   ;;  %s17970_s8 = inlined_call_operand.vmem [shape: bf16[4,128,32], index: 8, kind: input, shape index: {}]   ;;  %s17971_s9 = inlined_call_operand.hbm [shape: f32[4,1,32], index: 9, kind: input, shape index: {}]   ;;  %s17972_s10 = inlined_call_operand.vmem [shape: bf16[4,128,32], index: 10, kind: input, shape index: {}]   ;;  %s17973_s11 = inlined_call_operand.hbm [shape: f32[4,1,32], index: 11, kind: input, shape index: {}]   ;;  %s17974_s12 = inlined_call_operand.vmem [shape: f32[4,6,32], index: 12, kind: input, shape index: {}]   ;;  %s17975_s13 = inlined_call_operand.vmem [shape: f32[4,6,32], index: 13, kind: input, shape index: {}]   ;;  %s17976_s14 = inlined_call_operand.hbm [shape: bf16[4,32,128], index: 14, kind: input, shape index: {}]   ;;  %s17977_s15 = inlined_call_operand.hbm [shape: f32[1,128], index: 15, kind: input, shape index: {}]   ;;  %s17978_s16 = inlined_call_operand.hbm [shape: f32[1,128], index: 16, kind: input, shape index: {}]   ;;  %s17979_s17 = inlined_call_operand.hbm [shape: f32[1,128], index: 17, kind: input, shape index: {}]   ;;  %s17980_s18 = inlined_call_operand.hbm [shape: bf16[128,256], index: 18, kind: input, shape index: {}]   ;;  %s17981_s19 = inlined_call_operand.hbm [shape: f32[1,256], index: 19, kind: input, shape index: {}]   ;;  %s17982_s20 = inlined_call_operand.hbm [shape: bf16[256,128], index: 20, kind: input, shape index: {}]   ;;  %s17983_s21 = inlined_call_operand.hbm [shape: f32[1,128], index: 21, kind: input, shape index: {}]   ;;  %s17984_s22 = inlined_call_operand.hbm [shape: bf16[6,128,1024], index: 22, kind: input, shape index: {}]   ;;  %s17985_s23 = inlined_call_operand.hbm [shape: f32[1,1024], index: 23, kind: input, shape index: {}]   ;;  %s17986_s24 = inlined_call_operand.hbm [shape: bf16[1024,768], index: 24, kind: input, shape index: {}]   ;;  %s17987_s25 = inlined_call_operand.hbm [shape: f32[1,768], index: 25, kind: input, shape index: {}]   ;;  %s17988_s26 = inlined_call_operand.vmem [shape: f32[1,8,768], index: 26, kind: output, shape index: {}]  }
   0x1   :  { %18004 = sst [smem:[#allocation42_spill]] %s17962_s0 }
   0x2   :  { %18005 = sst [smem:[#allocation43_spill]] %s17963_s1 }
   0x3   :  { %18006 = sst [smem:[#allocation44_spill]] %s17964_s2 }
   0x4   :  { %18007 = sst [smem:[#allocation45_spill]] %s17965_s3 }
   0x5   :  { %18008 = sst [smem:[#allocation46_spill]] %s17966_s4 }
   0x6   :  { %18009 = sst [smem:[#allocation47_spill]] %s17967_s5 }
   0x7   :  { %18010 = sst [smem:[#allocation48_spill]] %s17968_s6 }
   0x8   :  { %18011 = sst [smem:[#allocation49_spill]] %s17969_s7 }
   0x9   :  { %18012 = sst [smem:[#allocation50_spill]] %s17970_s8 }
   0xa   :  { %18013 = sst [smem:[#allocation51_spill]] %s17971_s9 }
   0xb   :  { %18014 = sst [smem:[#allocation52_spill]] %s17972_s10 }
   0xc   :  { %18015 = sst [smem:[#allocation53_spill]] %s17975_s13 }
   0xd   :  { %18016 = sst [smem:[#allocation54_spill]] %s17988_s26 }
   0xe   :  { %31 = vsyncpa [#allocation4], 0 }
   0xf   :  { %32 = vsyncpa [#allocation6], 0 }
  0x10   :  { %33 = vsyncpa [#allocation9], 0 }
  0x11   :  { %34 = vsyncpa [#allocation12], 0 }
  0x12   :  { %35 = vsyncpa [#allocation15], 0 }
  0x13   :  { %36 = vsyncpa [#allocation18], 0 }
  0x14   :  { %37 = vsyncpa [#allocation21], 0 }
  0x15   :  { %38 = vsyncpa [#allocation24], 0 }
  0x16   :  { %39 = vsyncpa [#allocation27], 0 }
  0x17   :  { %40 = vsyncpa [#allocation30], 0  ;;  %s15732_s27 = smov [#allocation5]   ;;  %s15733_s7 = smov [#allocation8]  }
  0x18   :  { %s63_s3 = sshll.u32 %s15732_s27, 4  ;;  %s83_s28 = sshll.u32 %s15733_s7, 4  ;;  %s64_s3 = int_to_ptr.vmem [resolvable:$true] %s63_s3  ;;  %s84_s28 = int_to_ptr.vmem [resolvable:$true] %s83_s28 }
  0x19   :  { %s18017_s29 = sld [smem:[#allocation45_spill]] }
  0x1f   :  { %s15294_s0 = scalar_lea.hbm %s18017_s29, 16 }
  0x20   :  { %p15295_p0 = scmp.ne.s32.totalorder %s18017_s29, %s15294_s0  ;;  %p15298_p1 = scmp.lt.u32.totalorder %s15294_s0, %s18017_s29 }
  0x22   :  { %p15300_p2 = pnand %p15298_p1, %p15295_p0 }
  0x24   :  { %15303 = shalt.err (!%p15300_p2)
}
  0x25   :  { %s15304_s10 = scalar_lea.vmem %s64_s3, 16  ;;  %s15308_s6 = scalar_lea.vmem %s64_s3, 32 }
  0x26   :  { %p15305_p3 = scmp.ne.s32.totalorder %s64_s3, %s15304_s10  ;;  %p15309_p4 = scmp.lt.s32.totalorder %s64_s3, %s64_s3 }
  0x27   :  { %p15310_p5 = scmp.lt.s32.totalorder %s15308_s6, %s15304_s10 }
  0x29   :  { %p15311_p6 = por %p15310_p5, %p15309_p4 }
  0x2b   :  { %p15312_p7 = pnand %p15311_p6, %p15305_p3 }
  0x2d   :  { %15315 = shalt.err (!%p15312_p7)
}
  0x2e   :  { %66 = dma.hbm_to_vmem [thread:$0]  %s18017_s29, 16, %s64_s3, [#allocation6]  }
  0x2f   :  { %s18018_s4 = sld [smem:[#allocation47_spill]] }
  0x35   :  { %s15316_s9 = scalar_lea.hbm %s18018_s4, 16 }
  0x36   :  { %p15317_p8 = scmp.ne.s32.totalorder %s18018_s4, %s15316_s9  ;;  %p15320_p9 = scmp.lt.u32.totalorder %s15316_s9, %s18018_s4 }
  0x38   :  { %p15322_p10 = pnand %p15320_p9, %p15317_p8 }
  0x3a   :  { %15325 = shalt.err (!%p15322_p10)
}
  0x3b   :  { %s15326_s10 = scalar_lea.vmem %s84_s28, 16  ;;  %s15330_s6 = scalar_lea.vmem %s84_s28, 32 }
  0x3c   :  { %p15327_p11 = scmp.ne.s32.totalorder %s84_s28, %s15326_s10  ;;  %p15331_p12 = scmp.lt.s32.totalorder %s84_s28, %s84_s28 }
  0x3d   :  { %p15332_p13 = scmp.lt.s32.totalorder %s15330_s6, %s15326_s10 }
  0x3f   :  { %p15333_p0 = por %p15332_p13, %p15331_p12 }
  0x41   :  { %p15334_p1 = pnand %p15333_p0, %p15327_p11 }
  0x43   :  { %15337 = shalt.err (!%p15334_p1)
}
  0x44   :  { %86 = dma.hbm_to_vmem [thread:$0]  %s18018_s4, 16, %s84_s28, [#allocation9]  }
  0x45   :  { %s15734_s1 = smov [#allocation11]   ;;  %s18019_s9 = sld [smem:[#allocation51_spill]] }
  0x46   :  { %s108_s27 = sshll.u32 %s15734_s1, 4  ;;  %s109_s27 = int_to_ptr.vmem [resolvable:$true] %s108_s27 }
  0x4b   :  { %s15338_s30 = scalar_lea.hbm %s18019_s9, 64 }
  0x4c   :  { %p15339_p2 = scmp.ne.s32.totalorder %s18019_s9, %s15338_s30  ;;  %p15342_p3 = scmp.lt.u32.totalorder %s15338_s30, %s18019_s9 }
  0x4e   :  { %p15344_p4 = pnand %p15342_p3, %p15339_p2 }
  0x50   :  { %15347 = shalt.err (!%p15344_p4)
}
  0x51   :  { %s15348_s6 = scalar_lea.vmem %s109_s27, 64  ;;  %p15353_p6 = scmp.lt.s32.totalorder %s109_s27, %s109_s27 }
  0x52   :  { %p15349_p5 = scmp.ne.s32.totalorder %s109_s27, %s15348_s6  ;;  %p15354_p7 = scmp.lt.s32.totalorder %s15348_s6, %s15348_s6 }
  0x54   :  { %p15355_p8 = por %p15354_p7, %p15353_p6 }
  0x56   :  { %p15356_p9 = pnand %p15355_p8, %p15349_p5 }
  0x58   :  { %15359 = shalt.err (!%p15356_p9)
}
  0x59   :  { %s18002_s28 = smov 16   ;;  %s15736_s4 = smov 1  }
  0x5a   :  { %114 = dma.hbm_to_vmem [thread:$0]  %s18019_s9, 64, %s109_s27, [#allocation12], %s18002_s28, %s18002_s28, %s15736_s4  }
  0x5b   :  { %s15737_s1 = smov [#allocation14]   ;;  %s15738_s8 = smov [#allocation17]  }
  0x5c   :  { %s138_s7 = sshll.u32 %s15737_s1, 4  ;;  %s161_s30 = sshll.u32 %s15738_s8, 4  ;;  %s139_s7 = int_to_ptr.vmem [resolvable:$true] %s138_s7  ;;  %s162_s30 = int_to_ptr.vmem [resolvable:$true] %s161_s30 }
  0x5d   :  { %s15360_s5 = scalar_lea.hbm %s17976_s14, 1024 }
  0x5e   :  { %p15361_p10 = scmp.ne.s32.totalorder %s17976_s14, %s15360_s5  ;;  %p15364_p11 = scmp.lt.u32.totalorder %s15360_s5, %s17976_s14 }
  0x60   :  { %p15366_p12 = pnand %p15364_p11, %p15361_p10 }
  0x62   :  { %15369 = shalt.err (!%p15366_p12)
}
  0x63   :  { %s15370_s27 = scalar_lea.vmem %s139_s7, 1024  ;;  %p15375_p0 = scmp.lt.s32.totalorder %s139_s7, %s139_s7 }
  0x64   :  { %p15371_p13 = scmp.ne.s32.totalorder %s139_s7, %s15370_s27  ;;  %p15376_p1 = scmp.lt.s32.totalorder %s15370_s27, %s15370_s27 }
  0x66   :  { %p15377_p2 = por %p15376_p1, %p15375_p0 }
  0x68   :  { %p15378_p3 = pnand %p15377_p2, %p15371_p13 }
  0x6a   :  { %15381 = shalt.err (!%p15378_p3)
}
  0x6b   :  { %s15739_s9 = smov 64   ;;  %s15740_s3 = smov 4  }
  0x6c   :  { %144 = dma.hbm_to_vmem [thread:$0]  %s17976_s14, 1024, %s139_s7, [#allocation15], %s15739_s9, %s15739_s9, %s15740_s3  }
  0x6d   :  { %s15382_s8 = scalar_lea.hbm %s17978_s16, 16 }
  0x6e   :  { %p15383_p4 = scmp.ne.s32.totalorder %s17978_s16, %s15382_s8  ;;  %p15386_p5 = scmp.lt.u32.totalorder %s15382_s8, %s17978_s16 }
  0x70   :  { %p15388_p6 = pnand %p15386_p5, %p15383_p4 }
  0x72   :  { %15391 = shalt.err (!%p15388_p6)
}
  0x73   :  { %s15392_s6 = scalar_lea.vmem %s162_s30, 16  ;;  %s15396_s27 = scalar_lea.vmem %s162_s30, 32 }
  0x74   :  { %p15393_p7 = scmp.ne.s32.totalorder %s162_s30, %s15392_s6  ;;  %p15397_p8 = scmp.lt.s32.totalorder %s162_s30, %s162_s30 }
  0x75   :  { %p15398_p9 = scmp.lt.s32.totalorder %s15396_s27, %s15392_s6 }
  0x77   :  { %p15399_p10 = por %p15398_p9, %p15397_p8 }
  0x79   :  { %p15400_p11 = pnand %p15399_p10, %p15393_p7 }
  0x7b   :  { %15403 = shalt.err (!%p15400_p11)
}
  0x7c   :  { %164 = dma.hbm_to_vmem [thread:$0]  %s17978_s16, 16, %s162_s30, [#allocation18]  }
  0x7d   :  { %s15741_s29 = smov [#allocation20]   ;;  %s15404_s8 = scalar_lea.hbm %s17980_s18, 2048 }
  0x7e   :  { %s180_s1 = sshll.u32 %s15741_s29, 4  ;;  %p15405_p12 = scmp.ne.s32.totalorder %s17980_s18, %s15404_s8  ;;  %s181_s1 = int_to_ptr.vmem [resolvable:$true] %s180_s1 }
  0x7f   :  { %p15408_p13 = scmp.lt.u32.totalorder %s15404_s8, %s17980_s18 }
  0x81   :  { %p15410_p0 = pnand %p15408_p13, %p15405_p12 }
  0x83   :  { %15413 = shalt.err (!%p15410_p0)
}
  0x84   :  { %s15414_s6 = scalar_lea.vmem %s181_s1, 2048  ;;  %p15419_p2 = scmp.lt.s32.totalorder %s181_s1, %s181_s1 }
  0x85   :  { %p15415_p1 = scmp.ne.s32.totalorder %s181_s1, %s15414_s6  ;;  %p15420_p3 = scmp.lt.s32.totalorder %s15414_s6, %s15414_s6 }
  0x87   :  { %p15421_p4 = por %p15420_p3, %p15419_p2 }
  0x89   :  { %p15422_p5 = pnand %p15421_p4, %p15415_p1 }
  0x8b   :  { %15425 = shalt.err (!%p15422_p5)
}
  0x8c   :  { %s15742_s16 = smov 128   ;;  %s15743_s30 = smov 8  }
  0x8d   :  { %186 = dma.hbm_to_vmem [thread:$0]  %s17980_s18, 2048, %s181_s1, [#allocation21], %s15742_s16, %s15742_s16, %s15743_s30  }
  0x8e   :  { %s15744_s7 = smov [#allocation23]   ;;  %s15745_s13 = smov [#allocation26]  }
  0x8f   :  { %s202_s29 = sshll.u32 %s15744_s7, 4  ;;  %s224_s26 = sshll.u32 %s15745_s13, 4  ;;  %s203_s29 = int_to_ptr.vmem [resolvable:$true] %s202_s29  ;;  %s15977_s26 = int_to_ptr.vmem [resolvable:$true] %s224_s26 }
  0x90   :  { %s15426_s2 = scalar_lea.hbm %s17982_s20, 2048 }
  0x91   :  { %p15427_p6 = scmp.ne.s32.totalorder %s17982_s20, %s15426_s2  ;;  %p15430_p7 = scmp.lt.u32.totalorder %s15426_s2, %s17982_s20 }
  0x93   :  { %p15432_p8 = pnand %p15430_p7, %p15427_p6 }
  0x95   :  { %15435 = shalt.err (!%p15432_p8)
}
  0x96   :  { %s15436_s18 = scalar_lea.vmem %s203_s29, 2048  ;;  %p15441_p10 = scmp.lt.s32.totalorder %s203_s29, %s203_s29 }
  0x97   :  { %p15437_p9 = scmp.ne.s32.totalorder %s203_s29, %s15436_s18  ;;  %p15442_p11 = scmp.lt.s32.totalorder %s15436_s18, %s15436_s18 }
  0x99   :  { %p15443_p12 = por %p15442_p11, %p15441_p10 }
  0x9b   :  { %p15444_p13 = pnand %p15443_p12, %p15437_p9 }
  0x9d   :  { %15447 = shalt.err (!%p15444_p13)
}
  0x9e   :  { %208 = dma.hbm_to_vmem [thread:$0]  %s17982_s20, 2048, %s203_s29, [#allocation24], %s15739_s9, %s15739_s9, %s15740_s3  }
  0x9f   :  { %s15448_s28 = scalar_lea.hbm %s17984_s22, 49152 }
  0xa0   :  { %p15449_p0 = scmp.ne.s32.totalorder %s17984_s22, %s15448_s28  ;;  %p15452_p1 = scmp.lt.u32.totalorder %s15448_s28, %s17984_s22 }
  0xa2   :  { %p15454_p2 = pnand %p15452_p1, %p15449_p0 }
  0xa4   :  { %15457 = shalt.err (!%p15454_p2)
}
  0xa5   :  { %s15458_s0 = scalar_lea.vmem %s15977_s26, 49152  ;;  %p15463_p4 = scmp.lt.s32.totalorder %s15977_s26, %s15977_s26 }
  0xa6   :  { %p15459_p3 = scmp.ne.s32.totalorder %s15977_s26, %s15458_s0  ;;  %p15464_p5 = scmp.lt.s32.totalorder %s15458_s0, %s15458_s0 }
  0xa8   :  { %p15465_p6 = por %p15464_p5, %p15463_p4 }
  0xaa   :  { %p15466_p7 = pnand %p15465_p6, %p15459_p3 }
  0xac   :  { %15469 = shalt.err (!%p15466_p7)
}
  0xad   :  { %s15746_s20 = smov 512   ;;  %s15747_s29 = smov 32  }
  0xae   :  { %230 = dma.hbm_to_vmem [thread:$0]  %s17984_s22, 49152, %s15977_s26, [#allocation27], %s15746_s20, %s15746_s20, %s15747_s29  }
  0xaf   :  { %s15748_s10 = smov [#allocation29]   ;;  %s15470_s16 = scalar_lea.hbm %s17986_s24, 49152 }
  0xb0   :  { %s246_s6 = sshll.u32 %s15748_s10, 4  ;;  %p15471_p8 = scmp.ne.s32.totalorder %s17986_s24, %s15470_s16  ;;  %s247_s6 = int_to_ptr.vmem [resolvable:$true] %s246_s6 }
  0xb1   :  { %p15474_p9 = scmp.lt.u32.totalorder %s15470_s16, %s17986_s24 }
  0xb3   :  { %p15476_p10 = pnand %p15474_p9, %p15471_p8 }
  0xb5   :  { %15479 = shalt.err (!%p15476_p10)
}
  0xb6   :  { %s15480_s7 = scalar_lea.vmem %s247_s6, 49152  ;;  %p15485_p12 = scmp.lt.s32.totalorder %s247_s6, %s247_s6 }
  0xb7   :  { %p15481_p11 = scmp.ne.s32.totalorder %s247_s6, %s15480_s7  ;;  %p15486_p13 = scmp.lt.s32.totalorder %s15480_s7, %s15480_s7 }
  0xb9   :  { %p15487_p0 = por %p15486_p13, %p15485_p12 }
  0xbb   :  { %p15488_p1 = pnand %p15487_p0, %p15481_p11 }
  0xbd   :  { %15491 = shalt.err (!%p15488_p1)
}
  0xbe   :  { %s15749_s22 = smov 384   ;;  %s15750_s26 = smov 24  }
  0xbf   :  { %252 = dma.hbm_to_vmem [thread:$0]  %s17986_s24, 49152, %s247_s6, [#allocation30], %s15749_s22, %s15749_s22, %s15750_s26  }
  0xc0   :  { %s15751_s0 = smov [#allocation3]   ;;  %s15752_s29 = smov [#allocation7]  }
  0xc1   :  { %s50_s20 = sshll.u32 %s15751_s0, 4  ;;  %s73_s2 = sshll.u32 %s15752_s29, 4  ;;  %s51_s20 = int_to_ptr.vmem [resolvable:$true] %s50_s20  ;;  %s74_s2 = int_to_ptr.vmem [resolvable:$true] %s73_s2 }
  0xc2   :  { %s18020_s18 = sld [smem:[#allocation44_spill]] }
  0xc8   :  { %s15492_s1 = scalar_lea.hbm %s18020_s18, 256 }
  0xc9   :  { %p15493_p2 = scmp.ne.s32.totalorder %s18020_s18, %s15492_s1  ;;  %p15496_p3 = scmp.lt.u32.totalorder %s15492_s1, %s18020_s18 }
  0xcb   :  { %p15498_p4 = pnand %p15496_p3, %p15493_p2 }
  0xcd   :  { %15501 = shalt.err (!%p15498_p4)
}
  0xce   :  { %s15502_s24 = scalar_lea.vmem %s51_s20, 256  ;;  %p15507_p6 = scmp.lt.s32.totalorder %s51_s20, %s51_s20 }
  0xcf   :  { %p15503_p5 = scmp.ne.s32.totalorder %s51_s20, %s15502_s24  ;;  %p15508_p7 = scmp.lt.s32.totalorder %s15502_s24, %s15502_s24 }
  0xd1   :  { %p15509_p8 = por %p15508_p7, %p15507_p6 }
  0xd3   :  { %p15510_p9 = pnand %p15509_p8, %p15503_p5 }
  0xd5   :  { %15513 = shalt.err (!%p15510_p9)
}
  0xd6   :  { %56 = dma.hbm_to_vmem [thread:$0]  %s18020_s18, 256, %s51_s20, [#allocation4], %s15739_s9, %s15739_s9, %s15740_s3  }
  0xd7   :  { %s18021_s26 = sld [smem:[#allocation46_spill]] }
  0xdd   :  { %s15514_s13 = scalar_lea.hbm %s18021_s26, 16 }
  0xde   :  { %p15515_p10 = scmp.ne.s32.totalorder %s18021_s26, %s15514_s13  ;;  %p15518_p11 = scmp.lt.u32.totalorder %s15514_s13, %s18021_s26 }
  0xe0   :  { %p15520_p12 = pnand %p15518_p11, %p15515_p10 }
  0xe2   :  { %15523 = shalt.err (!%p15520_p12)
}
  0xe3   :  { %s15524_s10 = scalar_lea.vmem %s74_s2, 16  ;;  %s15528_s1 = scalar_lea.vmem %s74_s2, 32 }
  0xe4   :  { %p15525_p13 = scmp.ne.s32.totalorder %s74_s2, %s15524_s10  ;;  %p15529_p0 = scmp.lt.s32.totalorder %s74_s2, %s74_s2 }
  0xe5   :  { %p15530_p1 = scmp.lt.s32.totalorder %s15528_s1, %s15524_s10 }
  0xe7   :  { %p15531_p2 = por %p15530_p1, %p15529_p0 }
  0xe9   :  { %p15532_p3 = pnand %p15531_p2, %p15525_p13 }
  0xeb   :  { %15535 = shalt.err (!%p15532_p3)
}
  0xec   :  { %76 = dma.hbm_to_vmem [thread:$0]  %s18021_s26, 16, %s74_s2, [#allocation6]  }
  0xed   :  { %s15753_s20 = smov [#allocation10]   ;;  %s15754_s16 = smov [#allocation13]  }
  0xee   :  { %s94_s18 = sshll.u32 %s15753_s20, 4  ;;  %s122_s30 = sshll.u32 %s15754_s16, 4  ;;  %s95_s18 = int_to_ptr.vmem [resolvable:$true] %s94_s18  ;;  %s123_s30 = int_to_ptr.vmem [resolvable:$true] %s122_s30 }
  0xef   :  { %s18022_s24 = sld [smem:[#allocation49_spill]] }
  0xf5   :  { %s15536_s6 = scalar_lea.hbm %s18022_s24, 64 }
  0xf6   :  { %p15537_p4 = scmp.ne.s32.totalorder %s18022_s24, %s15536_s6  ;;  %p15540_p5 = scmp.lt.u32.totalorder %s15536_s6, %s18022_s24 }
  0xf8   :  { %p15542_p6 = pnand %p15540_p5, %p15537_p4 }
  0xfa   :  { %15545 = shalt.err (!%p15542_p6)
}
  0xfb   :  { %s15546_s2 = scalar_lea.vmem %s95_s18, 64  ;;  %p15551_p8 = scmp.lt.s32.totalorder %s95_s18, %s95_s18 }
  0xfc   :  { %p15547_p7 = scmp.ne.s32.totalorder %s95_s18, %s15546_s2  ;;  %p15552_p9 = scmp.lt.s32.totalorder %s15546_s2, %s15546_s2 }
  0xfe   :  { %p15553_p10 = por %p15552_p9, %p15551_p8 }
 0x100   :  { %p15554_p11 = pnand %p15553_p10, %p15547_p7 }
 0x102   :  { %15557 = shalt.err (!%p15554_p11)
}
 0x103   :  { %s18023_s26 = smov 16   ;;  %s15558_s10 = scalar_lea.hbm %s17973_s11, 64 }
 0x104   :  { %100 = dma.hbm_to_vmem [thread:$0]  %s18022_s24, 64, %s95_s18, [#allocation9], %s18023_s26, %s18023_s26, %s15736_s4  }
 0x105   :  { %p15559_p12 = scmp.ne.s32.totalorder %s17973_s11, %s15558_s10  ;;  %p15562_p13 = scmp.lt.u32.totalorder %s15558_s10, %s17973_s11 }
 0x107   :  { %p15564_p0 = pnand %p15562_p13, %p15559_p12 }
 0x109   :  { %15567 = shalt.err (!%p15564_p0)
}
 0x10a   :  { %s15568_s16 = scalar_lea.vmem %s123_s30, 64  ;;  %p15573_p2 = scmp.lt.s32.totalorder %s123_s30, %s123_s30 }
 0x10b   :  { %p15569_p1 = scmp.ne.s32.totalorder %s123_s30, %s15568_s16  ;;  %p15574_p3 = scmp.lt.s32.totalorder %s15568_s16, %s15568_s16 }
 0x10d   :  { %p15575_p4 = por %p15574_p3, %p15573_p2 }
 0x10f   :  { %p15576_p5 = pnand %p15575_p4, %p15569_p1 }
 0x111   :  { %15579 = shalt.err (!%p15576_p5)
}
 0x112   :  { %128 = dma.hbm_to_vmem [thread:$0]  %s17973_s11, 64, %s123_s30, [#allocation12], %s18023_s26, %s18023_s26, %s15736_s4  }
 0x113   :  { %s15755_s28 = smov [#allocation16]   ;;  %s15756_s6 = smov [#allocation19]  }
 0x114   :  { %s151_s24 = sshll.u32 %s15755_s28, 4  ;;  %s171_s14 = sshll.u32 %s15756_s6, 4  ;;  %s152_s24 = int_to_ptr.vmem [resolvable:$true] %s151_s24  ;;  %s172_s14 = int_to_ptr.vmem [resolvable:$true] %s171_s14 }
 0x115   :  { %s15580_s13 = scalar_lea.hbm %s17977_s15, 16 }
 0x116   :  { %p15581_p6 = scmp.ne.s32.totalorder %s17977_s15, %s15580_s13  ;;  %p15584_p7 = scmp.lt.u32.totalorder %s15580_s13, %s17977_s15 }
 0x118   :  { %p15586_p8 = pnand %p15584_p7, %p15581_p6 }
 0x11a   :  { %15589 = shalt.err (!%p15586_p8)
}
 0x11b   :  { %s15590_s11 = scalar_lea.vmem %s152_s24, 16  ;;  %s15594_s4 = scalar_lea.vmem %s152_s24, 32 }
 0x11c   :  { %p15591_p9 = scmp.ne.s32.totalorder %s152_s24, %s15590_s11  ;;  %p15595_p10 = scmp.lt.s32.totalorder %s152_s24, %s152_s24 }
 0x11d   :  { %p15596_p11 = scmp.lt.s32.totalorder %s15594_s4, %s15590_s11 }
 0x11f   :  { %p15597_p12 = por %p15596_p11, %p15595_p10 }
 0x121   :  { %p15598_p13 = pnand %p15597_p12, %p15591_p9 }
 0x123   :  { %15601 = shalt.err (!%p15598_p13)
}
 0x124   :  { %154 = dma.hbm_to_vmem [thread:$0]  %s17977_s15, 16, %s152_s24, [#allocation15]  }
 0x125   :  { %s15602_s1 = scalar_lea.hbm %s17979_s17, 16 }
 0x126   :  { %p15603_p0 = scmp.ne.s32.totalorder %s17979_s17, %s15602_s1  ;;  %p15606_p1 = scmp.lt.u32.totalorder %s15602_s1, %s17979_s17 }
 0x128   :  { %p15608_p2 = pnand %p15606_p1, %p15603_p0 }
 0x12a   :  { %15611 = shalt.err (!%p15608_p2)
}
 0x12b   :  { %s15612_s18 = scalar_lea.vmem %s172_s14, 16  ;;  %s15616_s27 = scalar_lea.vmem %s172_s14, 32 }
 0x12c   :  { %p15613_p3 = scmp.ne.s32.totalorder %s172_s14, %s15612_s18  ;;  %p15617_p4 = scmp.lt.s32.totalorder %s172_s14, %s172_s14 }
 0x12d   :  { %p15618_p5 = scmp.lt.s32.totalorder %s15616_s27, %s15612_s18 }
 0x12f   :  { %p15619_p6 = por %p15618_p5, %p15617_p4 }
 0x131   :  { %p15620_p7 = pnand %p15619_p6, %p15613_p3 }
 0x133   :  { %15623 = shalt.err (!%p15620_p7)
}
 0x134   :  { %174 = dma.hbm_to_vmem [thread:$0]  %s17979_s17, 16, %s172_s14, [#allocation18]  }
 0x135   :  { %s15757_s24 = smov [#allocation22]   ;;  %s15758_s7 = smov [#allocation25]  }
 0x136   :  { %s193_s6 = sshll.u32 %s15757_s24, 4  ;;  %s215_s22 = sshll.u32 %s15758_s7, 4  ;;  %s194_s6 = int_to_ptr.vmem [resolvable:$true] %s193_s6  ;;  %s216_s22 = int_to_ptr.vmem [resolvable:$true] %s215_s22 }
 0x137   :  { %s15624_s8 = scalar_lea.hbm %s17981_s19, 32 }
 0x138   :  { %p15625_p8 = scmp.ne.s32.totalorder %s17981_s19, %s15624_s8  ;;  %p15628_p9 = scmp.lt.u32.totalorder %s15624_s8, %s17981_s19 }
 0x13a   :  { %p15630_p10 = pnand %p15628_p9, %p15625_p8 }
 0x13c   :  { %15633 = shalt.err (!%p15630_p10)
}
 0x13d   :  { %s15634_s17 = scalar_lea.vmem %s194_s6, 32  ;;  %p15639_p12 = scmp.lt.s32.totalorder %s194_s6, %s194_s6 }
 0x13e   :  { %p15635_p11 = scmp.ne.s32.totalorder %s194_s6, %s15634_s17  ;;  %p15640_p13 = scmp.lt.s32.totalorder %s15634_s17, %s15634_s17 }
 0x140   :  { %p15641_p0 = por %p15640_p13, %p15639_p12 }
 0x142   :  { %p15642_p1 = pnand %p15641_p0, %p15635_p11 }
 0x144   :  { %15645 = shalt.err (!%p15642_p1)
}
 0x145   :  { %196 = dma.hbm_to_vmem [thread:$0]  %s17981_s19, 32, %s194_s6, [#allocation21]  }
 0x146   :  { %s15646_s10 = scalar_lea.hbm %s17983_s21, 16 }
 0x147   :  { %p15647_p2 = scmp.ne.s32.totalorder %s17983_s21, %s15646_s10  ;;  %p15650_p3 = scmp.lt.u32.totalorder %s15646_s10, %s17983_s21 }
 0x149   :  { %p15652_p4 = pnand %p15650_p3, %p15647_p2 }
 0x14b   :  { %15655 = shalt.err (!%p15652_p4)
}
 0x14c   :  { %s15656_s16 = scalar_lea.vmem %s216_s22, 16  ;;  %s15660_s18 = scalar_lea.vmem %s216_s22, 32 }
 0x14d   :  { %p15657_p5 = scmp.ne.s32.totalorder %s216_s22, %s15656_s16  ;;  %p15661_p6 = scmp.lt.s32.totalorder %s216_s22, %s216_s22 }
 0x14e   :  { %p15662_p7 = scmp.lt.s32.totalorder %s15660_s18, %s15656_s16 }
 0x150   :  { %p15663_p8 = por %p15662_p7, %p15661_p6 }
 0x152   :  { %p15664_p9 = pnand %p15663_p8, %p15657_p5 }
 0x154   :  { %15667 = shalt.err (!%p15664_p9)
}
 0x155   :  { %218 = dma.hbm_to_vmem [thread:$0]  %s17983_s21, 16, %s216_s22, [#allocation24]  }
 0x156   :  { %s15759_s15 = smov [#allocation28]   ;;  %s15760_s24 = smov [#allocation31]  }
 0x157   :  { %s237_s28 = sshll.u32 %s15759_s15, 4  ;;  %s259_s6 = sshll.u32 %s15760_s24, 4  ;;  %s238_s28 = int_to_ptr.vmem [resolvable:$true] %s237_s28  ;;  %s260_s6 = int_to_ptr.vmem [resolvable:$true] %s259_s6 }
 0x158   :  { %s15668_s2 = scalar_lea.hbm %s17985_s23, 128 }
 0x159   :  { %p15669_p10 = scmp.ne.s32.totalorder %s17985_s23, %s15668_s2  ;;  %p15672_p11 = scmp.lt.u32.totalorder %s15668_s2, %s17985_s23 }
 0x15b   :  { %p15674_p12 = pnand %p15672_p11, %p15669_p10 }
 0x15d   :  { %15677 = shalt.err (!%p15674_p12)
}
 0x15e   :  { %s15678_s21 = scalar_lea.vmem %s238_s28, 128  ;;  %p15683_p0 = scmp.lt.s32.totalorder %s238_s28, %s238_s28 }
 0x15f   :  { %p15679_p13 = scmp.ne.s32.totalorder %s238_s28, %s15678_s21  ;;  %p15684_p1 = scmp.lt.s32.totalorder %s15678_s21, %s15678_s21 }
 0x161   :  { %p15685_p2 = por %p15684_p1, %p15683_p0 }
 0x163   :  { %p15686_p3 = pnand %p15685_p2, %p15679_p13 }
 0x165   :  { %15689 = shalt.err (!%p15686_p3)
}
 0x166   :  { %240 = dma.hbm_to_vmem [thread:$0]  %s17985_s23, 128, %s238_s28, [#allocation27]  }
 0x167   :  { %s15690_s30 = scalar_lea.hbm %s17987_s25, 96 }
 0x168   :  { %p15691_p4 = scmp.ne.s32.totalorder %s17987_s25, %s15690_s30  ;;  %p15694_p5 = scmp.lt.u32.totalorder %s15690_s30, %s17987_s25 }
 0x16a   :  { %p15696_p6 = pnand %p15694_p5, %p15691_p4 }
 0x16c   :  { %15699 = shalt.err (!%p15696_p6)
}
 0x16d   :  { %s15700_s9 = scalar_lea.vmem %s260_s6, 96  ;;  %p15705_p8 = scmp.lt.s32.totalorder %s260_s6, %s260_s6 }
 0x16e   :  { %p15701_p7 = scmp.ne.s32.totalorder %s260_s6, %s15700_s9  ;;  %p15706_p9 = scmp.lt.s32.totalorder %s15700_s9, %s15700_s9 }
 0x170   :  { %p15707_p10 = por %p15706_p9, %p15705_p8 }
 0x172   :  { %p15708_p11 = pnand %p15707_p10, %p15701_p7 }
 0x174   :  { %15711 = shalt.err (!%p15708_p11)
}
 0x175   :  { %262 = dma.hbm_to_vmem [thread:$0]  %s17987_s25, 96, %s260_s6, [#allocation30]  }
 0x176   :  { %15712 = dma.done.wait [#allocation4], 256  }
 0x177   :  { %15713 = vsyncadd [#allocation4], 4294967040 }
 0x178   :  { %15714 = dma.done.wait [#allocation6], 32  }
 0x179   :  { %15715 = vsyncadd [#allocation6], 4294967264 }
 0x17a   :  { %15716 = dma.done.wait [#allocation9], 80  }
 0x17b   :  { %15717 = vsyncadd [#allocation9], 4294967216 }
 0x17c   :  { %15718 = dma.done.wait [#allocation12], 128  }
 0x17d   :  { %15719 = vsyncadd [#allocation12], 4294967168 }
 0x17e   :  { %15720 = dma.done.wait [#allocation15], 1040  }
 0x17f   :  { %15721 = vsyncadd [#allocation15], 4294966256 }
 0x180   :  { %15722 = dma.done.wait [#allocation18], 32  }
 0x181   :  { %15723 = vsyncadd [#allocation18], 4294967264 }
 0x182   :  { %15724 = dma.done.wait [#allocation21], 2080  }
 0x183   :  { %15725 = vsyncadd [#allocation21], 4294965216 }
 0x184   :  { %15726 = dma.done.wait [#allocation24], 2064  }
 0x185   :  { %15727 = vsyncadd [#allocation24], 4294965232 }
 0x186   :  { %15728 = dma.done.wait [#allocation27], 49280  }
 0x187   :  { %15729 = vsyncadd [#allocation27], 4294918016 }
 0x188   :  { %15730 = dma.done.wait [#allocation30], 49248  }
 0x189   :  { %15731 = vsyncadd [#allocation30], 4294918048  ;;  %v15761_v0 = vmov 0.0   ;;  %vm15762_vm0 = vmmov 0   ;;  %v14327_v1 = vld [vmem:[#allocation3] sm:$0xff]   ;;  %v14328_v2 = vld [vmem:[#allocation3 + $0x8] sm:$0xff]  }
 0x18a   :  { %13439 = vmatprep.subr.bf16.mxu0 %v15761_v0  ;;  %13443 = vmatprep.mubr.msk.bf16.mxu0 %vm15762_vm0, %v15761_v0  ;;  %s18024_s16 = sld [smem:[#allocation42_spill]]  ;;  %vm353_vm1 = vcmask 261120   ;;  %v11862_v12 = vld [vmem:[#allocation5] ss:$0 sm:$0xff]  ;;  %s18025_s29 = sld [smem:[#allocation48_spill]]  ;;  %vm1154_vm3 = vcmask 48128  }
 0x18b   :  { %13455 = vmatprep.subr.bf16.mxu1 %v15761_v0  ;;  %13471 = vmatprep.mubr.msk.bf16.mxu1 %vm15762_vm0, %v15761_v0  ;;  %s18026_s22 = sld [smem:[#allocation50_spill]]  ;;  %s18027_s26 = sld [smem:[#allocation52_spill]]  ;;  %vm16372_vm2 = vmpackc.low %vm353_vm1, %vm353_vm1  ;;  %vm1173_vm4 = vcmask 392192   ;;  %vm1408_vm5 = vcmask 1045504  }
 0x18c   :  { %13440 = vmatpush3.bf16.msra.mxu0 %v14327_v1  ;;  %s18030_s11 = sld [smem:[#allocation43_spill]]  ;;  %s18031_s20 = sld [smem:[#allocation53_spill]] }
 0x18d   :  { %13441 = vmatprep.subr.bf16.mxu0 %v15761_v0  ;;  %s18032_s15 = sld [smem:[#allocation54_spill]] }
 0x190   :  { %v321_v3 = vld [vmem:[%s18024_s16] sm:$0xff]  ;;  %v322_v4 = vld [vmem:[%s18024_s16 + $0x8] sm:$0xff]  ;;  %13442 = vmatpush3.bf16.msra.mxu0 %v14328_v2  ;;  %v323_v6 = vld [vmem:[%s18024_s16 + $0x10] sm:$0xff] }
 0x191   :  { %v332_v5 = vpack.c.bf16 %v322_v4, %v321_v3  ;;  %13483 = vmatprep.subr.bf16.mxu0 %v15761_v0  ;;  %v324_v7 = vld [vmem:[%s18024_s16 + $0x18] sm:$0xff]  ;;  %v325_v9 = vld [vmem:[%s18024_s16 + $0x20] sm:$0xff]  ;;  %v326_v10 = vld [vmem:[%s18024_s16 + $0x28] sm:$0xff] }
 0x192   :  { %v333_v8 = vpack.c.bf16 %v324_v7, %v323_v6  ;;  %v334_v11 = vpack.c.bf16 %v326_v10, %v325_v9  ;;  %v14329_v31 = vld [vmem:[%s18025_s29] sm:$0xff]   ;;  %v14331_v33 = vld [vmem:[%s18025_s29 + $0x8] sm:$0xff]   ;;  %v14333_v58 = vld [vmem:[%s18025_s29 + $0x10] sm:$0xff]  }
 0x193   :  { %13444 = vmatmul.mubr.msk.bf16.vlgmr.msra.gmra.mrb[0].mxu0 %vm353_vm1, %v332_v5  ;;  %v14330_v32 = vld [vmem:[%s18026_s22] sm:$0xff]   ;;  %13456 = vmatpush3.bf16.msra.mxu1 %v14329_v31  ;;  %v14332_v55 = vld [vmem:[%s18026_s22 + $0x8] sm:$0xff]   ;;  %v14334_v60 = vld [vmem:[%s18026_s22 + $0x10] sm:$0xff]  }
 0x194   :  { %13447 = vmatprep.mubr.msk.bf16.mxu0 %vm15762_vm0, %v15761_v0  ;;  %13484 = vmatpush3.bf16.msra.mxu0 %v14330_v32  ;;  %v14335_v61 = vld [vmem:[%s18025_s29 + $0x18] sm:$0xff]   ;;  %v14337_v63 = vld [vmem:[%s18025_s29 + $0x20] sm:$0xff]   ;;  %v14339_v2 = vld [vmem:[%s18025_s29 + $0x28] sm:$0xff]  }
 0x195   :  { %13457 = vmatprep.subr.bf16.mxu1 %v15761_v0  ;;  %13485 = vmatprep.subr.bf16.mxu0 %v15761_v0  ;;  %v14336_v62 = vld [vmem:[%s18026_s22 + $0x18] sm:$0xff]   ;;  %v14338_v1 = vld [vmem:[%s18026_s22 + $0x20] sm:$0xff]   ;;  %v14340_v3 = vld [vmem:[%s18026_s22 + $0x28] sm:$0xff]  }
 0x196   :  { %v14341_v4 = vld [vmem:[%s18025_s29 + $0x30] sm:$0xff]   ;;  %v14343_v6 = vld [vmem:[%s18025_s29 + $0x38] sm:$0xff]  }
 0x197   :  { %13458 = vmatpush3.bf16.msra.mxu1 %v14331_v33  ;;  %v14342_v5 = vld [vmem:[%s18026_s22 + $0x30] sm:$0xff]   ;;  %v14344_v7 = vld [vmem:[%s18026_s22 + $0x38] sm:$0xff]  }
 0x198   :  { %13459 = vmatprep.subr.bf16.mxu1 %v15761_v0  ;;  %13486 = vmatpush3.bf16.msra.mxu0 %v14332_v55 }
 0x199   :  { %13487 = vmatprep.subr.bf16.mxu0 %v15761_v0 }
 0x19b   :  { %13448 = vmatmul.mubr.msk.bf16.gmra.mrb[4].mxu0 %vm353_vm1, %v333_v8  ;;  %13460 = vmatpush3.bf16.msra.mxu1 %v14333_v58  ;;  %v906_v8 = vld [vmem:[%s17974_s12] sm:$0x3f] }
 0x19c   :  { %13451 = vmatprep.mubr.msk.bf16.mxu0 %vm15762_vm0, %v15761_v0  ;;  %13488 = vmatpush3.bf16.msra.mxu0 %v14334_v60 }
 0x19d   :  { %13461 = vmatprep.subr.bf16.mxu1 %v15761_v0  ;;  %13489 = vmatprep.subr.bf16.mxu0 %v15761_v0 }
 0x19f   :  { %13462 = vmatpush3.bf16.msra.mxu1 %v14335_v61 }
 0x1a0   :  { %13490 = vmatpush3.bf16.msra.mxu0 %v14336_v62  ;;  %13463 = vmatprep.subr.bf16.mxu1 %v15761_v0 }
 0x1a1   :  { %13491 = vmatprep.subr.bf16.mxu0 %v15761_v0 }
 0x1a3   :  { %13452 = vmatmul.mubr.msk.bf16.gmra.mrb[8].mxu0 %vm353_vm1, %v334_v11  ;;  %13464 = vmatpush3.bf16.msra.mxu1 %v14337_v63 }
 0x1a4   :  { %13499 = vmatprep.mubr.msk.bf16.mxu0 %vm15762_vm0, %v15761_v0  ;;  %13492 = vmatpush3.bf16.msra.mxu0 %v14338_v1 }
 0x1a5   :  { %13465 = vmatprep.subr.bf16.mxu1 %v15761_v0  ;;  %13493 = vmatprep.subr.bf16.mxu0 %v15761_v0 }
 0x1a7   :  { %13466 = vmatpush3.bf16.msra.mxu1 %v14339_v2  ;;  %v14349_v2 = vld [vmem:[%s18027_s26 + $0x20] sm:$0xff]  }
 0x1a8   :  { %13494 = vmatpush3.bf16.msra.mxu0 %v14340_v3  ;;  %13467 = vmatprep.subr.bf16.mxu1 %v15761_v0 }
 0x1a9   :  { %13495 = vmatprep.subr.bf16.mxu0 %v15761_v0 }
 0x1ab   :  { %13468 = vmatpush3.bf16.msra.mxu1 %v14341_v4  ;;  %v14350_v4 = vld [vmem:[%s18027_s26 + $0x28] sm:$0xff]  }
 0x1ac   :  { %13496 = vmatpush3.bf16.msra.mxu0 %v14342_v5  ;;  %13469 = vmatprep.subr.bf16.mxu1 %v15761_v0  ;;  %v14351_v5 = vld [vmem:[%s18027_s26 + $0x30] sm:$0xff]  }
 0x1ad   :  { %13497 = vmatprep.subr.bf16.mxu0 %v15761_v0 }
 0x1af   :  { %13470 = vmatpush3.bf16.msra.mxu1 %v14343_v6  ;;  %v14352_v6 = vld [vmem:[%s18027_s26 + $0x38] sm:$0xff]  }
 0x1b0   :  { %13498 = vmatpush3.bf16.msra.mxu0 %v14344_v7  ;;  %13511 = vmatprep.subr.bf16.mxu1 %v15761_v0  ;;  %v11870_v7 = vld [vmem:[#allocation10] ss:$0 sm:$0xff] }
 0x1b1   :  { %13539 = vmatprep.subr.msk.mxu0 %vm353_vm1, %v906_v8 }
 0x266   :  { %v397_v13 = vpop.f32.mrb[0].mxu0 }
 0x267   :  { %v16187_v14 = vadd.f32 %v11862_v12, %v397_v13  ;;  %v13445_v15 = vpop.f32.mrb[1].mxu0 }
 0x268   :  { %v400_v16 = vpop.f32.mrb[2].mxu0 }
 0x269   :  { %422 = vadd.xlane.f32.xlu0 %v16187_v14  ;;  %v13446_v17 = vpop.f32.mrb[3].mxu0  ;;  %v16190_v18 = vadd.f32 %v11862_v12, %v400_v16 }
 0x26d   :  { %424 = vadd.xlane.f32.xlu0 %v16190_v18 }
 0x26e   :  { %v405_v19 = vpop.f32.mrb[4].mxu0 }
 0x26f   :  { %v16193_v20 = vadd.f32 %v11862_v12, %v405_v19  ;;  %v13449_v21 = vpop.f32.mrb[5].mxu0 }
 0x270   :  { %v408_v22 = vpop.f32.mrb[6].mxu0 }
 0x271   :  { %426 = vadd.xlane.f32.xlu1 %v16193_v20  ;;  %v13450_v23 = vpop.f32.mrb[7].mxu0  ;;  %v16196_v24 = vadd.f32 %v11862_v12, %v408_v22 }
 0x275   :  { %428 = vadd.xlane.f32.xlu1 %v16196_v24 }
 0x276   :  { %v413_v25 = vpop.f32.mrb[8].mxu0 }
 0x277   :  { %v16199_v26 = vadd.f32 %v11862_v12, %v413_v25  ;;  %v13453_v27 = vpop.f32.mrb[9].mxu0 }
 0x278   :  { %v416_v28 = vpop.f32.mrb[10].mxu0 }
 0x279   :  { %v16201_v29 = vadd.f32 %v11862_v12, %v416_v28  ;;  %430 = vadd.xlane.f32.xlu0 %v16199_v26  ;;  %v13454_v30 = vpop.f32.mrb[11].mxu0 }
 0x27a   :  { %v11868_v30 = vld [vmem:[#allocation7] ss:$0 sm:$0xff] }
 0x27b   :  { %432 = vadd.xlane.f32.xlu1 %v16201_v29 }
 0x2f6   :  { %v423_v34 = vpop.xlane.xlu0 %422 }
 0x2f7   :  { %v435_v35 = vmul.f32 0.0078125, %v423_v34 }
 0x2f9   :  { %v16218_v36 = vsub.f32 %v16187_v14, %v435_v35 }
 0x2fa   :  { %v425_v37 = vpop.xlane.xlu0 %424 }
 0x2fb   :  { %v436_v38 = vmul.f32 0.0078125, %v425_v37  ;;  %v447_v39 = vmul.f32 %v16218_v36, %v16218_v36 }
 0x2fd   :  { %453 = vadd.xlane.f32.xlu0 %v447_v39  ;;  %v16223_v40 = vsub.f32 %v16190_v18, %v436_v38  ;;  %v11869_v39 = vld [vmem:[#allocation8] ss:$0 sm:$0xff] }
 0x2fe   :  { %v427_v41 = vpop.xlane.xlu1 %426 }
 0x2ff   :  { %v437_v42 = vmul.f32 0.0078125, %v427_v41  ;;  %v448_v43 = vmul.f32 %v16223_v40, %v16223_v40 }
 0x301   :  { %455 = vadd.xlane.f32.xlu1 %v448_v43  ;;  %v16228_v44 = vsub.f32 %v16193_v20, %v437_v42 }
 0x302   :  { %v429_v45 = vpop.xlane.xlu1 %428 }
 0x303   :  { %v438_v46 = vmul.f32 0.0078125, %v429_v45  ;;  %v449_v47 = vmul.f32 %v16228_v44, %v16228_v44 }
 0x305   :  { %457 = vadd.xlane.f32.xlu0 %v449_v47  ;;  %v16233_v48 = vsub.f32 %v16196_v24, %v438_v46  ;;  %v14345_v47 = vld [vmem:[%s18027_s26] sm:$0xff]  }
 0x306   :  { %v431_v49 = vpop.xlane.xlu0 %430 }
 0x307   :  { %v439_v50 = vmul.f32 0.0078125, %v431_v49  ;;  %v450_v51 = vmul.f32 %v16233_v48, %v16233_v48 }
 0x308   :  { %v433_v52 = vpop.xlane.xlu1 %432 }
 0x309   :  { %v440_v53 = vmul.f32 0.0078125, %v433_v52  ;;  %459 = vadd.xlane.f32.xlu1 %v450_v51  ;;  %v16238_v54 = vsub.f32 %v16199_v26, %v439_v50  ;;  %v14346_v52 = vld [vmem:[%s18027_s26 + $0x8] sm:$0xff]  }
 0x30b   :  { %v451_v56 = vmul.f32 %v16238_v54, %v16238_v54  ;;  %v16246_v57 = vsub.f32 %v16201_v29, %v440_v53 }
 0x30d   :  { %461 = vadd.xlane.f32.xlu0 %v451_v56  ;;  %v452_v59 = vmul.f32 %v16246_v57, %v16246_v57 }
 0x30f   :  { %463 = vadd.xlane.f32.xlu1 %v452_v59  ;;  %v14347_v59 = vld [vmem:[%s18027_s26 + $0x10] sm:$0xff]  }
 0x38a   :  { %v454_v9 = vpop.xlane.xlu0 %453 }
 0x38b   :  { %v465_v10 = vmul.f32 0.0078125, %v454_v9  ;;  %v11879_v9 = vld [vmem:[#allocation11] ss:$0 sm:$0xff] }
 0x38d   :  { %v471_v11 = vadd.f32 1e-05, %v465_v10 }
 0x38e   :  { %v456_v12 = vpop.xlane.xlu1 %455 }
 0x38f   :  { %15049 = vrsqrt.f32 %v471_v11  ;;  %v466_v13 = vmul.f32 0.0078125, %v456_v12 }
 0x391   :  { %v472_v15 = vadd.f32 1e-05, %v466_v13 }
 0x392   :  { %v458_v16 = vpop.xlane.xlu0 %457 }
 0x393   :  { %15051 = vrsqrt.f32 %v472_v15  ;;  %v467_v17 = vmul.f32 0.0078125, %v458_v16 }
 0x395   :  { %v473_v19 = vadd.f32 1e-05, %v467_v17 }
 0x396   :  { %v460_v21 = vpop.xlane.xlu1 %459 }
 0x397   :  { %15053 = vrsqrt.f32 %v473_v19  ;;  %v468_v22 = vmul.f32 0.0078125, %v460_v21 }
 0x399   :  { %v15050_v23 = vpop.eup %15049  ;;  %v474_v25 = vadd.f32 1e-05, %v468_v22 }
 0x39a   :  { %v483_v27 = vmul.f32 %v15050_v23, %v16218_v36  ;;  %v462_v28 = vpop.xlane.xlu0 %461 }
 0x39b   :  { %15055 = vrsqrt.f32 %v474_v25  ;;  %v469_v31 = vmul.f32 0.0078125, %v462_v28 }
 0x39c   :  { %v464_v32 = vpop.xlane.xlu1 %463  ;;  %v495_v37 = vmul.f32 %v11868_v30, %v483_v27 }
 0x39d   :  { %v15052_v33 = vpop.eup %15051  ;;  %v475_v34 = vadd.f32 1e-05, %v469_v31  ;;  %v470_v35 = vmul.f32 0.0078125, %v464_v32 }
 0x39e   :  { %v484_v38 = vmul.f32 %v15052_v33, %v16223_v40  ;;  %v507_v45 = vadd.f32 %v11869_v39, %v495_v37 }
 0x39f   :  { %15057 = vrsqrt.f32 %v475_v34  ;;  %v476_v41 = vadd.f32 1e-05, %v470_v35 }
 0x3a0   :  { %v496_v42 = vmul.f32 %v11868_v30, %v484_v38 }
 0x3a1   :  { %v15054_v43 = vpop.eup %15053  ;;  %15059 = vrsqrt.f32 %v476_v41 }
 0x3a2   :  { %v508_v46 = vadd.f32 %v11869_v39, %v496_v42  ;;  %v485_v36 = vmul.f32 %v15054_v43, %v16228_v44 }
 0x3a4   :  { %v16308_v49 = vpack.c.bf16 %v508_v46, %v507_v45  ;;  %v497_v51 = vmul.f32 %v11868_v30, %v485_v36 }
 0x3a5   :  { %v15056_v50 = vpop.eup %15055 }
 0x3a6   :  { %v486_v40 = vmul.f32 %v15056_v50, %v16233_v48  ;;  %13472 = vmatmul.mubr.bf16.vlgmr.msra.gmra.mrb[0].mxu1 %v16308_v49  ;;  %13500 = vmatmul.mubr.bf16.vlgmr.msra.gmra.mrb[12].mxu0 %v16308_v49  ;;  %v509_v48 = vadd.f32 %v11869_v39, %v497_v51 }
 0x3a7   :  { %13512 = vmatpush3.bf16.msra.mxu1 %v14345_v47  ;;  %13475 = vmatprep.mubr.msk.bf16.mxu1 %vm15762_vm0, %v15761_v0 }
 0x3a8   :  { %v498_v44 = vmul.f32 %v11868_v30, %v486_v40  ;;  %13513 = vmatprep.subr.bf16.mxu1 %v15761_v0  ;;  %13503 = vmatprep.mubr.msk.bf16.mxu0 %vm15762_vm0, %v15761_v0 }
 0x3a9   :  { %v15058_v53 = vpop.eup %15057  ;;  %13540 = vmatpush3.xpose.msk.msra.mxu0 %vm353_vm1, %v906_v8 }
 0x3aa   :  { %v510_v55 = vadd.f32 %v11869_v39, %v498_v44  ;;  %v487_v56 = vmul.f32 %v15058_v53, %v16238_v54  ;;  %v14348_v54 = vld [vmem:[%s18027_s26 + $0x18] sm:$0xff]  }
 0x3ab   :  { %v15060_v58 = vpop.eup %15059  ;;  %13514 = vmatpush3.bf16.msra.mxu1 %v14346_v52 }
 0x3ac   :  { %v16326_v60 = vpack.c.bf16 %v510_v55, %v509_v48  ;;  %v488_v61 = vmul.f32 %v15060_v58, %v16246_v57  ;;  %13515 = vmatprep.subr.bf16.mxu1 %v15761_v0  ;;  %v499_v62 = vmul.f32 %v11868_v30, %v487_v56  ;;  %v14353_v58 = vld [vmem:[%s18025_s29 + $0x40] sm:$0xff]  }
 0x3ae   :  { %v500_v63 = vmul.f32 %v11868_v30, %v488_v61  ;;  %13476 = vmatmul.mubr.bf16.gmra.mrb[4].mxu1 %v16326_v60  ;;  %13504 = vmatmul.mubr.bf16.gmra.mrb[16].mxu0 %v16326_v60  ;;  %v511_v57 = vadd.f32 %v11869_v39, %v499_v62  ;;  %v14354_v62 = vld [vmem:[%s18025_s29 + $0x48] sm:$0xff]  }
 0x3af   :  { %13516 = vmatpush3.bf16.msra.mxu1 %v14347_v59  ;;  %13479 = vmatprep.mubr.msk.bf16.mxu1 %vm15762_vm0, %v15761_v0  ;;  %v11888_v59 = vld [vmem:[#allocation13] ss:$0 sm:$0xff] }
 0x3b0   :  { %v512_v1 = vadd.f32 %v11869_v39, %v500_v63  ;;  %13517 = vmatprep.subr.bf16.mxu1 %v15761_v0  ;;  %13507 = vmatprep.mubr.msk.bf16.mxu0 %vm15762_vm0, %v15761_v0 }
 0x3b2   :  { %v16343_v3 = vpack.c.bf16 %v512_v1, %v511_v57 }
 0x3b3   :  { %13518 = vmatpush3.bf16.msra.mxu1 %v14348_v54 }
 0x3b4   :  { %13519 = vmatprep.subr.bf16.mxu1 %v15761_v0 }
 0x3b6   :  { %13480 = vmatmul.mubr.bf16.gmra.mrb[8].mxu1 %v16343_v3  ;;  %13508 = vmatmul.mubr.bf16.gmra.mrb[20].mxu0 %v16343_v3 }
 0x3b7   :  { %13520 = vmatpush3.bf16.msra.mxu1 %v14349_v2  ;;  %13527 = vmatprep.mubr.msk.bf16.mxu1 %vm15762_vm0, %v15761_v0 }
 0x3b8   :  { %13521 = vmatprep.subr.bf16.mxu1 %v15761_v0 }
 0x3bb   :  { %13522 = vmatpush3.bf16.msra.mxu1 %v14350_v4  ;;  %v14355_v4 = vld [vmem:[%s18025_s29 + $0x50] sm:$0xff]  }
 0x3bc   :  { %13523 = vmatprep.subr.bf16.mxu1 %v15761_v0 }
 0x3bf   :  { %13524 = vmatpush3.bf16.msra.mxu1 %v14351_v5 }
 0x3c0   :  { %13525 = vmatprep.subr.bf16.mxu1 %v15761_v0 }
 0x3c3   :  { %13526 = vmatpush3.bf16.msra.mxu1 %v14352_v6 }
 0x3c6   :  { %13528 = vmatmul.mubr.bf16.vlgmr.msra.gmra.mrb[12].mxu1 %v16308_v49 }
 0x3c7   :  { %13531 = vmatprep.mubr.msk.bf16.mxu1 %vm15762_vm0, %v15761_v0 }
 0x3ce   :  { %13532 = vmatmul.mubr.bf16.gmra.mrb[16].mxu1 %v16326_v60 }
 0x3cf   :  { %13535 = vmatprep.mubr.msk.bf16.mxu1 %vm15762_vm0, %v15761_v0 }
 0x3d6   :  { %13536 = vmatmul.mubr.bf16.gmra.mrb[20].mxu1 %v16343_v3 }
 0x479   :  { %v627_v8 = vpop.f32.mrb[0].mxu1  ;;  %v755_v10 = vpop.f32.mrb[12].mxu0 }
 0x47a   :  { %v628_v11 = vadd.f32 %v11870_v7, %v627_v8  ;;  %v13473_v12 = vpop.f32.mrb[1].mxu1  ;;  %v13501_v13 = vpop.f32.mrb[13].mxu0  ;;  %v756_v17 = vadd.f32 %v11879_v9, %v755_v10 }
 0x47b   :  { %v630_v15 = vpop.f32.mrb[2].mxu1  ;;  %v758_v16 = vpop.f32.mrb[14].mxu0  ;;  %v14357_v13 = vld [vmem:[%s18025_s29 + $0x60] sm:$0xff]  }
 0x47c   :  { %v631_v19 = vadd.f32 %v11870_v7, %v630_v15  ;;  %v759_v21 = vadd.f32 %v11879_v9, %v758_v16  ;;  %v13474_v22 = vpop.f32.mrb[3].mxu1  ;;  %v13502_v23 = vpop.f32.mrb[15].mxu0  ;;  %13541 = vmatprep.mubr.msk.f32.mxu0 %vm353_vm1, %v628_v11 }
 0x47e   :  { %v14111_v27 = vpack.c.bf16 %v759_v21, %v756_v17  ;;  %13542 = vmatmul.mubr.msk.f32.vlgmr.msra.gmra.mrb[24].mxu0 %vm353_vm1, %v631_v19  ;;  %v14358_v17 = vld [vmem:[%s18025_s29 + $0x68] sm:$0xff]  }
 0x480   :  { %14113 = vmatprep.subr.msk.bf16.mxu0 %vm16372_vm2, %v14111_v27 }
 0x481   :  { %v635_v28 = vpop.f32.mrb[4].mxu1  ;;  %v763_v30 = vpop.f32.mrb[16].mxu0  ;;  %14116 = vmatpush3.bf16.xpose.msk.msra.mxu0 %vm16372_vm2, %v14111_v27 }
 0x482   :  { %v636_v31 = vadd.f32 %v11870_v7, %v635_v28  ;;  %v13477_v32 = vpop.f32.mrb[5].mxu1  ;;  %v13505_v33 = vpop.f32.mrb[17].mxu0  ;;  %v764_v37 = vadd.f32 %v11879_v9, %v763_v30  ;;  %v14359_v28 = vld [vmem:[%s18025_s29 + $0x70] sm:$0xff]  }
 0x483   :  { %v638_v34 = vpop.f32.mrb[6].mxu1  ;;  %v766_v35 = vpop.f32.mrb[18].mxu0  ;;  %v14361_v32 = vld [vmem:[%s18027_s26 + $0x40] sm:$0xff]   ;;  %v14362_v33 = vld [vmem:[%s18027_s26 + $0x48] sm:$0xff]  }
 0x484   :  { %v639_v38 = vadd.f32 %v11870_v7, %v638_v34  ;;  %v767_v39 = vadd.f32 %v11879_v9, %v766_v35  ;;  %v13478_v41 = vpop.f32.mrb[7].mxu1  ;;  %v13506_v42 = vpop.f32.mrb[19].mxu0  ;;  %13544 = vmatprep.mubr.msk.f32.mxu0 %vm353_vm1, %v636_v31  ;;  %v14363_v34 = vld [vmem:[%s18027_s26 + $0x50] sm:$0xff]   ;;  %v14364_v35 = vld [vmem:[%s18027_s26 + $0x58] sm:$0xff]  }
 0x485   :  { %v14368_v41 = vld [vmem:[%s18027_s26 + $0x78] sm:$0xff]  }
 0x486   :  { %v14117_v43 = vpack.c.bf16 %v767_v39, %v764_v37  ;;  %13545 = vmatmul.mubr.msk.f32.gmra.mrb[26].mxu0 %vm353_vm1, %v639_v38  ;;  %v14365_v37 = vld [vmem:[%s18027_s26 + $0x60] sm:$0xff]   ;;  %v14367_v39 = vld [vmem:[%s18027_s26 + $0x70] sm:$0xff]  }
 0x488   :  { %14119 = vmatprep.subr.msk.bf16.mxu0 %vm16372_vm2, %v14117_v43 }
 0x489   :  { %v643_v45 = vpop.f32.mrb[8].mxu1  ;;  %v771_v46 = vpop.f32.mrb[20].mxu0  ;;  %14122 = vmatpush3.bf16.xpose.msk.msra.mxu0 %vm16372_vm2, %v14117_v43 }
 0x48a   :  { %v644_v36 = vadd.f32 %v11870_v7, %v643_v45  ;;  %v13481_v47 = vpop.f32.mrb[9].mxu1  ;;  %v13509_v50 = vpop.f32.mrb[21].mxu0  ;;  %v772_v52 = vadd.f32 %v11879_v9, %v771_v46 }
 0x48b   :  { %v646_v51 = vpop.f32.mrb[10].mxu1  ;;  %v774_v40 = vpop.f32.mrb[22].mxu0 }
 0x48c   :  { %v647_v44 = vadd.f32 %v11870_v7, %v646_v51  ;;  %v775_v53 = vadd.f32 %v11879_v9, %v774_v40  ;;  %v13482_v48 = vpop.f32.mrb[11].mxu1  ;;  %v13510_v55 = vpop.f32.mrb[23].mxu0  ;;  %13547 = vmatprep.mubr.msk.f32.mxu0 %vm353_vm1, %v644_v36  ;;  %v14356_v7 = vld [vmem:[%s18025_s29 + $0x58] sm:$0xff]  }
 0x48e   :  { %v14123_v56 = vpack.c.bf16 %v775_v53, %v772_v52  ;;  %13548 = vmatmul.mubr.msk.f32.gmra.mrb[28].mxu0 %vm353_vm1, %v647_v44 }
 0x48f   :  { %13562 = vmatprep.mubr.msk.f32.mxu0 %vm353_vm1, %v628_v11 }
 0x490   :  { %14125 = vmatprep.subr.msk.bf16.mxu0 %vm16372_vm2, %v14123_v56 }
 0x491   :  { %14128 = vmatpush3.bf16.xpose.msk.msra.mxu0 %vm16372_vm2, %v14123_v56 }
 0x492   :  { %13603 = vmatprep.subr.bf16.mxu0 %v15761_v0 }
 0x498   :  { %13563 = vmatmul.mubr.msk.f32.vlgmr.msra.gmra.mrb[30].mxu0 %vm353_vm1, %v631_v19 }
 0x499   :  { %v883_v61 = vpop.f32.mrb[12].mxu1  ;;  %13565 = vmatprep.mubr.msk.f32.mxu0 %vm353_vm1, %v636_v31  ;;  %13604 = vmatpush3.bf16.msra.mxu0 %v14353_v58  ;;  %v14360_v31 = vld [vmem:[%s18025_s29 + $0x78] sm:$0xff]  }
 0x49a   :  { %v13529_v63 = vpop.f32.mrb[13].mxu1  ;;  %13605 = vmatprep.subr.bf16.mxu0 %v15761_v0  ;;  %v884_v1 = vadd.f32 %v11888_v59, %v883_v61 }
 0x49b   :  { %v886_v54 = vpop.f32.mrb[14].mxu1  ;;  %v16508_v63 = vld [vmem:[%s18030_s11 + $0x8] sm:$0xff] }
 0x49c   :  { %v887_v57 = vadd.f32 %v11888_v59, %v886_v54  ;;  %v13530_v2 = vpop.f32.mrb[15].mxu1  ;;  %13566 = vmatmul.mubr.msk.f32.gmra.mrb[32].mxu0 %vm353_vm1, %v639_v38  ;;  %v14366_v38 = vld [vmem:[%s18027_s26 + $0x68] sm:$0xff]  }
 0x49d   :  { %13568 = vmatprep.mubr.msk.f32.mxu0 %vm353_vm1, %v644_v36  ;;  %13606 = vmatpush3.bf16.msra.mxu0 %v14354_v62  ;;  %v16513_v2 = vld [vmem:[%s18030_s11] sm:$0xff] }
 0x49e   :  { %v14129_v5 = vpack.c.bf16 %v887_v57, %v884_v1  ;;  %13607 = vmatprep.subr.bf16.mxu0 %v15761_v0 }
 0x4a0   :  { %14130 = vmatprep.subr.bf16.mxu1 %v14129_v5  ;;  %13569 = vmatmul.mubr.msk.f32.gmra.mrb[34].mxu0 %vm353_vm1, %v647_v44 }
 0x4a1   :  { %v891_v6 = vpop.f32.mrb[16].mxu1  ;;  %14132 = vmatpush3.bf16.msra.mxu1 %v14129_v5  ;;  %13608 = vmatpush3.bf16.msra.mxu0 %v14355_v4 }
 0x4a2   :  { %v13533_v8 = vpop.f32.mrb[17].mxu1  ;;  %13609 = vmatprep.subr.bf16.mxu0 %v15761_v0  ;;  %13619 = vmatprep.mubr.msk.bf16.mxu0 %vm15762_vm0, %v15761_v0  ;;  %v892_v10 = vadd.f32 %v11888_v59, %v891_v6 }
 0x4a3   :  { %v894_v9 = vpop.f32.mrb[18].mxu1 }
 0x4a4   :  { %v895_v11 = vadd.f32 %v11888_v59, %v894_v9  ;;  %v13534_v12 = vpop.f32.mrb[19].mxu1 }
 0x4a5   :  { %13610 = vmatpush3.bf16.msra.mxu0 %v14356_v7 }
 0x4a6   :  { %v14133_v15 = vpack.c.bf16 %v895_v11, %v892_v10  ;;  %13611 = vmatprep.subr.bf16.mxu0 %v15761_v0  ;;  %v16526_v10 = vld [vmem:[%s18030_s11 + $0x18] sm:$0xff] }
 0x4a8   :  { %14134 = vmatprep.subr.bf16.mxu1 %v14133_v15 }
 0x4a9   :  { %v899_v16 = vpop.f32.mrb[20].mxu1  ;;  %14136 = vmatpush3.bf16.msra.mxu1 %v14133_v15  ;;  %13612 = vmatpush3.bf16.msra.mxu0 %v14357_v13 }
 0x4aa   :  { %v13537_v19 = vpop.f32.mrb[21].mxu1  ;;  %13613 = vmatprep.subr.bf16.mxu0 %v15761_v0  ;;  %v900_v22 = vadd.f32 %v11888_v59, %v899_v16 }
 0x4ab   :  { %v902_v21 = vpop.f32.mrb[22].mxu1 }
 0x4ac   :  { %v903_v23 = vadd.f32 %v11888_v59, %v902_v21  ;;  %v13538_v27 = vpop.f32.mrb[23].mxu1 }
 0x4ad   :  { %13614 = vmatpush3.bf16.msra.mxu0 %v14358_v17  ;;  %v16536_v17 = vld [vmem:[%s18030_s11 + $0x10] sm:$0xff] }
 0x4ae   :  { %v14137_v30 = vpack.c.bf16 %v903_v23, %v900_v22  ;;  %13615 = vmatprep.subr.bf16.mxu0 %v15761_v0  ;;  %v16546_v23 = vld [vmem:[%s18030_s11 + $0x20] sm:$0xff] }
 0x4b0   :  { %14138 = vmatprep.subr.bf16.mxu1 %v14137_v30 }
 0x4b1   :  { %14140 = vmatpush3.bf16.msra.mxu1 %v14137_v30  ;;  %13616 = vmatpush3.bf16.msra.mxu0 %v14359_v28 }
 0x4b2   :  { %13617 = vmatprep.subr.bf16.mxu0 %v15761_v0 }
 0x4b5   :  { %13618 = vmatpush3.bf16.msra.mxu0 %v14360_v31  ;;  %v16556_v31 = vld [vmem:[%s18030_s11 + $0x28] sm:$0xff] }
 0x4b6   :  { %13659 = vmatprep.subr.bf16.mxu0 %v15761_v0 }
 0x4b8   :  { %13620 = vmatmul.mubr.bf16.vlgmr.msra.gmra.mrb[36].mxu0 %v16308_v49 }
 0x4b9   :  { %13660 = vmatpush3.bf16.msra.mxu0 %v14361_v32  ;;  %13623 = vmatprep.mubr.msk.bf16.mxu0 %vm15762_vm0, %v15761_v0 }
 0x4ba   :  { %13661 = vmatprep.subr.bf16.mxu0 %v15761_v0 }
 0x4bd   :  { %13662 = vmatpush3.bf16.msra.mxu0 %v14362_v33 }
 0x4be   :  { %13663 = vmatprep.subr.bf16.mxu0 %v15761_v0 }
 0x4c0   :  { %13624 = vmatmul.mubr.bf16.gmra.mrb[40].mxu0 %v16326_v60 }
 0x4c1   :  { %13664 = vmatpush3.bf16.msra.mxu0 %v14363_v34  ;;  %13627 = vmatprep.mubr.msk.bf16.mxu0 %vm15762_vm0, %v15761_v0 }
 0x4c2   :  { %13665 = vmatprep.subr.bf16.mxu0 %v15761_v0 }
 0x4c5   :  { %13666 = vmatpush3.bf16.msra.mxu0 %v14364_v35  ;;  %v11945_v35 = vld [vmem:[#allocation10 + $0x1] ss:$0 sm:$0xff] }
 0x4c6   :  { %13667 = vmatprep.subr.bf16.mxu0 %v15761_v0 }
 0x4c8   :  { %13628 = vmatmul.mubr.bf16.gmra.mrb[44].mxu0 %v16343_v3 }
 0x4c9   :  { %13668 = vmatpush3.bf16.msra.mxu0 %v14365_v37  ;;  %13675 = vmatprep.mubr.msk.bf16.mxu0 %vm15762_vm0, %v15761_v0 }
 0x4ca   :  { %13669 = vmatprep.subr.bf16.mxu0 %v15761_v0 }
 0x4cd   :  { %13670 = vmatpush3.bf16.msra.mxu0 %v14366_v38 }
 0x4ce   :  { %13671 = vmatprep.subr.bf16.mxu0 %v15761_v0 }
 0x4d1   :  { %13672 = vmatpush3.bf16.msra.mxu0 %v14367_v39 }
 0x4d2   :  { %13673 = vmatprep.subr.bf16.mxu0 %v15761_v0 }
 0x4d5   :  { %13674 = vmatpush3.bf16.msra.mxu0 %v14368_v41 }
 0x4d8   :  { %13676 = vmatmul.mubr.bf16.vlgmr.msra.gmra.mrb[48].mxu0 %v16308_v49 }
 0x4d9   :  { %13679 = vmatprep.mubr.msk.bf16.mxu0 %vm15762_vm0, %v15761_v0 }
 0x4e0   :  { %13680 = vmatmul.mubr.bf16.gmra.mrb[52].mxu0 %v16326_v60 }
 0x4e1   :  { %13683 = vmatprep.mubr.msk.bf16.mxu0 %vm15762_vm0, %v15761_v0 }
 0x4e8   :  { %13684 = vmatmul.mubr.bf16.gmra.mrb[56].mxu0 %v16343_v3 }
 0x551   :  { %v13543_v42 = vpop.f32.mrb[24].mxu0 }
 0x552   :  { %v16481_v43 = vmul.f32 0.17677669, %v13543_v42  ;;  %v994_v45 = vpop.f32.mrb[25].mxu0 }
 0x553   :  { %v16483_v46 = vmul.f32 0.17677669, %v994_v45 }
 0x554   :  { %v1158_v36 = vsel %vm1154_vm3, %v16481_v43, -inf }
 0x555   :  { %1159 = vmax.xlane.f32.xlu0 %v1158_v36  ;;  %v1155_v47 = vsel %vm1154_vm3, %v16483_v46, -inf }
 0x559   :  { %1156 = vmax.xlane.f32.xlu0 %v1155_v47  ;;  %v13546_v50 = vpop.f32.mrb[26].mxu0 }
 0x55a   :  { %v16489_v51 = vmul.f32 0.17677669, %v13546_v50  ;;  %v1004_v40 = vpop.f32.mrb[27].mxu0 }
 0x55b   :  { %v16491_v52 = vmul.f32 0.17677669, %v1004_v40 }
 0x55c   :  { %v1164_v44 = vsel %vm1154_vm3, %v16489_v51, -inf }
 0x55d   :  { %1165 = vmax.xlane.f32.xlu0 %v1164_v44  ;;  %v1161_v53 = vsel %vm1154_vm3, %v16491_v52, -inf }
 0x561   :  { %1162 = vmax.xlane.f32.xlu0 %v1161_v53  ;;  %v13549_v48 = vpop.f32.mrb[28].mxu0 }
 0x562   :  { %v1014_v55 = vpop.f32.mrb[29].mxu0  ;;  %v16499_v58 = vmul.f32 0.17677669, %v13549_v48 }
 0x563   :  { %v16497_v56 = vmul.f32 0.17677669, %v1014_v55 }
 0x564   :  { %v1170_v61 = vsel %vm1154_vm3, %v16499_v58, -inf }
 0x565   :  { %v1167_v59 = vsel %vm1154_vm3, %v16497_v56, -inf }
 0x566   :  { %1168 = vmax.xlane.f32.xlu0 %v1167_v59 }
 0x56a   :  { %1171 = vmax.xlane.f32.xlu0 %v1170_v61 }
 0x56b   :  { %v13564_v62 = vpop.f32.mrb[30].mxu0 }
 0x56c   :  { %v1143_v54 = vmul.f32 0.17677669, %v13564_v62  ;;  %v1113_v1 = vpop.f32.mrb[31].mxu0  ;;  %v16580_v62 = vld [vmem:[%s18031_s20] sm:$0x3f] }
 0x56d   :  { %v1142_v57 = vmul.f32 0.17677669, %v1113_v1  ;;  %13592 = vmatprep.subr.msk.mxu1 %vm1408_vm5, %v16580_v62 }
 0x56e   :  { %v16516_v4 = vadd.f32 %v1143_v54, %v16508_v63 }
 0x56f   :  { %v13567_v5 = vpop.f32.mrb[32].mxu0  ;;  %v16521_v9 = vadd.f32 %v1142_v57, %v16513_v2  ;;  %v11995_v57 = vld [vmem:[#allocation13 + $0x1] ss:$0 sm:$0xff] }
 0x570   :  { %v1145_v6 = vmul.f32 0.17677669, %v13567_v5  ;;  %v1123_v7 = vpop.f32.mrb[33].mxu0  ;;  %v1177_v8 = vsel %vm1173_vm4, %v16516_v4, -inf }
 0x571   :  { %1178 = vmax.xlane.f32.xlu1 %v1177_v8  ;;  %v1144_v12 = vmul.f32 0.17677669, %v1123_v7  ;;  %v1174_v15 = vsel %vm1173_vm4, %v16521_v9, -inf }
 0x572   :  { %v16531_v16 = vadd.f32 %v1145_v6, %v16526_v10 }
 0x573   :  { %v13570_v11 = vpop.f32.mrb[34].mxu0  ;;  %v16541_v22 = vadd.f32 %v1144_v12, %v16536_v17 }
 0x574   :  { %v1133_v13 = vpop.f32.mrb[35].mxu0  ;;  %v1183_v21 = vsel %vm1173_vm4, %v16531_v16, -inf  ;;  %v1147_v27 = vmul.f32 0.17677669, %v13570_v11 }
 0x575   :  { %1175 = vmax.xlane.f32.xlu1 %v1174_v15  ;;  %v1146_v19 = vmul.f32 0.17677669, %v1133_v13  ;;  %v1180_v28 = vsel %vm1173_vm4, %v16541_v22, -inf }
 0x576   :  { %v16561_v33 = vadd.f32 %v1147_v27, %v16556_v31 }
 0x577   :  { %v16551_v30 = vadd.f32 %v1146_v19, %v16546_v23 }
 0x578   :  { %v1189_v34 = vsel %vm1173_vm4, %v16561_v33, -inf }
 0x579   :  { %1184 = vmax.xlane.f32.xlu1 %v1183_v21  ;;  %v1186_v32 = vsel %vm1173_vm4, %v16551_v30, -inf }
 0x57d   :  { %1181 = vmax.xlane.f32.xlu1 %v1180_v28 }
 0x581   :  { %1187 = vmax.xlane.f32.xlu1 %v1186_v32 }
 0x585   :  { %1190 = vmax.xlane.f32.xlu1 %v1189_v34 }
 0x58b   :  { %v1633_v37 = vpop.f32.mrb[36].mxu0 }
 0x58c   :  { %v16565_v38 = vadd.f32 %v11945_v35, %v1633_v37  ;;  %v13621_v39 = vpop.f32.mrb[37].mxu0 }
 0x58d   :  { %v1636_v41 = vpop.f32.mrb[38].mxu0 }
 0x58e   :  { %v16567_v42 = vadd.f32 %v11945_v35, %v1636_v41  ;;  %v13622_v45 = vpop.f32.mrb[39].mxu0  ;;  %13710 = vmatprep.mubr.msk.f32.mxu0 %vm353_vm1, %v16565_v38 }
 0x593   :  { %v1641_v36 = vpop.f32.mrb[40].mxu0 }
 0x594   :  { %v16571_v47 = vadd.f32 %v11945_v35, %v1641_v36  ;;  %v13625_v50 = vpop.f32.mrb[41].mxu0 }
 0x595   :  { %v1644_v40 = vpop.f32.mrb[42].mxu0 }
 0x596   :  { %v16573_v44 = vadd.f32 %v11945_v35, %v1644_v40  ;;  %v13626_v53 = vpop.f32.mrb[43].mxu0 }
 0x59b   :  { %v1649_v48 = vpop.f32.mrb[44].mxu0 }
 0x59c   :  { %v16575_v55 = vadd.f32 %v11945_v35, %v1649_v48  ;;  %v13629_v59 = vpop.f32.mrb[45].mxu0 }
 0x59d   :  { %v1652_v61 = vpop.f32.mrb[46].mxu0 }
 0x59e   :  { %v16582_v54 = vadd.f32 %v11945_v35, %v1652_v61  ;;  %v13630_v1 = vpop.f32.mrb[47].mxu0 }
 0x5ab   :  { %v1893_v5 = vpop.f32.mrb[48].mxu0 }
 0x5ac   :  { %v13677_v6 = vpop.f32.mrb[49].mxu0  ;;  %v1894_v8 = vadd.f32 %v11995_v57, %v1893_v5 }
 0x5ad   :  { %v1896_v7 = vpop.f32.mrb[50].mxu0 }
 0x5ae   :  { %v1897_v11 = vadd.f32 %v11995_v57, %v1896_v7  ;;  %v13678_v12 = vpop.f32.mrb[51].mxu0 }
 0x5b0   :  { %v16586_v13 = vpack.c.bf16 %v1897_v11, %v1894_v8 }
 0x5b3   :  { %v1901_v15 = vpop.f32.mrb[52].mxu0 }
 0x5b4   :  { %v13681_v19 = vpop.f32.mrb[53].mxu0  ;;  %v1902_v27 = vadd.f32 %v11995_v57, %v1901_v15 }
 0x5b5   :  { %v1904_v21 = vpop.f32.mrb[54].mxu0 }
 0x5b6   :  { %v1905_v28 = vadd.f32 %v11995_v57, %v1904_v21  ;;  %v13682_v32 = vpop.f32.mrb[55].mxu0 }
 0x5b8   :  { %v16588_v34 = vpack.c.bf16 %v1905_v28, %v1902_v27 }
 0x5bb   :  { %v1909_v35 = vpop.f32.mrb[56].mxu0 }
 0x5bc   :  { %v13685_v37 = vpop.f32.mrb[57].mxu0  ;;  %v1910_v41 = vadd.f32 %v11995_v57, %v1909_v35 }
 0x5bd   :  { %v1912_v39 = vpop.f32.mrb[58].mxu0 }
 0x5be   :  { %v1913_v45 = vadd.f32 %v11995_v57, %v1912_v39  ;;  %v13686_v36 = vpop.f32.mrb[59].mxu0 }
 0x5c0   :  { %v16590_v50 = vpack.c.bf16 %v1913_v45, %v1910_v41 }
 0x5e2   :  { %v1160_v40 = vpop.xlane.xlu0 %1159 }
 0x5e6   :  { %v1157_v53 = vpop.xlane.xlu0 %1156 }
 0x5ea   :  { %v1166_v61 = vpop.xlane.xlu0 %1165 }
 0x5ee   :  { %v1163_v8 = vpop.xlane.xlu0 %1162 }
 0x5f3   :  { %v1169_v28 = vpop.xlane.xlu0 %1168 }
 0x5f7   :  { %v1172_v41 = vpop.xlane.xlu0 %1171 }
 0x5fe   :  { %v1179_v48 = vpop.xlane.xlu1 %1178 }
 0x5ff   :  { %v1193_v59 = vmax.f32 %v1160_v40, %v1179_v48 }
 0x601   :  { %v1217_v5 = vsub.f32 %v16516_v4, %v1193_v59 }
 0x602   :  { %v1176_v1 = vpop.xlane.xlu1 %1175 }
 0x603   :  { %v1192_v6 = vmax.f32 %v1157_v53, %v1176_v1  ;;  %v1224_v12 = vmul.f32 1.442695, %v1217_v5 }
 0x605   :  { %v1216_v7 = vsub.f32 %v16521_v9, %v1192_v6  ;;  %v1198_v36 = vsub.f32 %v16483_v46, %v1192_v6 }
 0x606   :  { %v1185_v11 = vpop.xlane.xlu1 %1184 }
 0x607   :  { %v1222_v15 = vmul.f32 1.442695, %v1216_v7  ;;  %v1195_v19 = vmax.f32 %v1166_v61, %v1185_v11  ;;  %v1199_v61 = vsub.f32 %v16481_v43, %v1193_v59 }
 0x609   :  { %15061 = vpow2.f32 %v1222_v15  ;;  %v1219_v21 = vsub.f32 %v16531_v16, %v1195_v19  ;;  %v1206_v5 = vmul.f32 1.442695, %v1199_v61 }
 0x60a   :  { %v1182_v57 = vpop.xlane.xlu1 %1181  ;;  %15063 = vpow2.f32 %v1224_v12 }
 0x60b   :  { %v1194_v27 = vmax.f32 %v1163_v8, %v1182_v57  ;;  %v1228_v37 = vmul.f32 1.442695, %v1219_v21  ;;  %v14370_v57 = vld [vmem:[%s18026_s22 + $0x48] sm:$0xff]  }
 0x60d   :  { %v1218_v32 = vsub.f32 %v16541_v22, %v1194_v27  ;;  %v1200_v46 = vsub.f32 %v16491_v52, %v1194_v27 }
 0x60e   :  { %v1188_v35 = vpop.xlane.xlu1 %1187 }
 0x60f   :  { %v1226_v4 = vmul.f32 1.442695, %v1218_v32  ;;  %v1196_v39 = vmax.f32 %v1169_v28, %v1188_v35  ;;  %v1208_v6 = vmul.f32 1.442695, %v1200_v46  ;;  %v14371_v28 = vld [vmem:[%s18026_s22 + $0x50] sm:$0xff]   ;;  %v14372_v35 = vld [vmem:[%s18026_s22 + $0x58] sm:$0xff]  }
 0x611   :  { %v1220_v9 = vsub.f32 %v16551_v30, %v1196_v39  ;;  %15065 = vpow2.f32 %v1226_v4  ;;  %v1204_v30 = vmul.f32 1.442695, %v1198_v36  ;;  %v1202_v43 = vsub.f32 %v16497_v56, %v1196_v39  ;;  %v14374_v4 = vld [vmem:[%s18026_s22 + $0x68] sm:$0xff]   ;;  %v14375_v39 = vld [vmem:[%s18026_s22 + $0x70] sm:$0xff]  }
 0x612   :  { %v1191_v45 = vpop.xlane.xlu1 %1190  ;;  %15067 = vpow2.f32 %v1228_v37  ;;  %v14373_v37 = vld [vmem:[%s18026_s22 + $0x60] sm:$0xff]  }
 0x613   :  { %v1230_v40 = vmul.f32 1.442695, %v1220_v9  ;;  %v1197_v53 = vmax.f32 %v1172_v41, %v1191_v45  ;;  %v16598_v48 = vpop.eup %15061  ;;  %v14376_v9 = vld [vmem:[%s18026_s22 + $0x78] sm:$0xff]   ;;  %v12004_v41 = vld [vmem:[%s17974_s12 + $0x8] sm:$0x3f] }
 0x614   :  { %v16600_v16 = vpop.eup %15063  ;;  %13583 = vmatprep.mubr.msk.f32.mxu1 %vm1173_vm4, %v16598_v48 }
 0x615   :  { %v1221_v22 = vsub.f32 %v16561_v33, %v1197_v53  ;;  %15069 = vpow2.f32 %v1230_v40  ;;  %13584 = vmatmul.mubr.msk.f32.vlgmr.msra.gmra.mrb[24].mxu1 %vm1173_vm4, %v16600_v16  ;;  %v1201_v33 = vsub.f32 %v16489_v51, %v1195_v19  ;;  %v1212_v51 = vmul.f32 1.442695, %v1202_v43 }
 0x616   :  { %13593 = vmatpush3.msk.msra.mxu1 %vm1408_vm5, %v16580_v62  ;;  %v1203_v62 = vsub.f32 %v16499_v58, %v1197_v53  ;;  %v14369_v58 = vld [vmem:[%s18026_s22 + $0x40] sm:$0xff]   ;;  %v11970_v53 = vld [vmem:[#allocation11 + $0x1] ss:$0 sm:$0xff] }
 0x617   :  { %v1232_v1 = vmul.f32 1.442695, %v1221_v22  ;;  %13631 = vmatprep.subr.bf16.mxu1 %v15761_v0  ;;  %v1210_v52 = vmul.f32 1.442695, %v1201_v33 }
 0x618   :  { %v1214_v56 = vmul.f32 1.442695, %v1203_v62 }
 0x619   :  { %15071 = vpow2.f32 %v1232_v1 }
 0x61a   :  { %15073 = vpow2.f32 %v1204_v30 }
 0x61b   :  { %v16614_v59 = vpop.eup %15065  ;;  %15075 = vpow2.f32 %v1206_v5 }
 0x61c   :  { %v16616_v7 = vpop.eup %15067  ;;  %13586 = vmatprep.mubr.msk.f32.mxu1 %vm1173_vm4, %v16614_v59  ;;  %15077 = vpow2.f32 %v1208_v6 }
 0x61d   :  { %13587 = vmatmul.mubr.msk.f32.gmra.mrb[26].mxu1 %vm1173_vm4, %v16616_v7  ;;  %15079 = vpow2.f32 %v1210_v52 }
 0x61e   :  { %15081 = vpow2.f32 %v1212_v51 }
 0x61f   :  { %v16623_v8 = vpop.eup %15069  ;;  %15083 = vpow2.f32 %v1214_v56 }
 0x620   :  { %13589 = vmatprep.mubr.msk.f32.mxu1 %vm1173_vm4, %v16623_v8 }
 0x623   :  { %v16627_v11 = vpop.eup %15071 }
 0x624   :  { %v16629_v12 = vpop.eup %15073  ;;  %13590 = vmatmul.mubr.msk.f32.gmra.mrb[28].mxu1 %vm1173_vm4, %v16627_v11 }
 0x625   :  { %13594 = vmatprep.mubr.msk.f32.mxu1 %vm1154_vm3, %v16629_v12  ;;  %v16638_v15 = vpop.eup %15075 }
 0x626   :  { %v16640_v19 = vpop.eup %15077 }
 0x627   :  { %v16650_v21 = vpop.eup %15079 }
 0x628   :  { %13595 = vmatmul.mubr.msk.f32.vlgmr.msra.gmra.mrb[24].mxu1 %vm1154_vm3, %v16638_v15  ;;  %v16652_v27 = vpop.eup %15081 }
 0x629   :  { %13632 = vmatpush3.bf16.msra.mxu1 %v14369_v58  ;;  %13597 = vmatprep.mubr.msk.f32.mxu1 %vm1154_vm3, %v16640_v19  ;;  %v16662_v32 = vpop.eup %15083 }
 0x62a   :  { %13633 = vmatprep.subr.bf16.mxu1 %v15761_v0 }
 0x62c   :  { %13598 = vmatmul.mubr.msk.f32.gmra.mrb[26].mxu1 %vm1154_vm3, %v16650_v21 }
 0x62d   :  { %13634 = vmatpush3.bf16.msra.mxu1 %v14370_v57  ;;  %13600 = vmatprep.mubr.msk.f32.mxu1 %vm1154_vm3, %v16652_v27 }
 0x62e   :  { %13635 = vmatprep.subr.bf16.mxu1 %v15761_v0 }
 0x630   :  { %13601 = vmatmul.mubr.msk.f32.gmra.mrb[28].mxu1 %vm1154_vm3, %v16662_v32 }
 0x631   :  { %13636 = vmatpush3.bf16.msra.mxu1 %v14371_v28  ;;  %13647 = vmatprep.mubr.msk.bf16.mxu1 %vm15762_vm0, %v15761_v0 }
 0x632   :  { %13637 = vmatprep.subr.bf16.mxu1 %v15761_v0 }
 0x635   :  { %13638 = vmatpush3.bf16.msra.mxu1 %v14372_v35 }
 0x636   :  { %13639 = vmatprep.subr.bf16.mxu1 %v15761_v0 }
 0x639   :  { %13640 = vmatpush3.bf16.msra.mxu1 %v14373_v37 }
 0x63a   :  { %13641 = vmatprep.subr.bf16.mxu1 %v15761_v0 }
 0x63d   :  { %13642 = vmatpush3.bf16.msra.mxu1 %v14374_v4 }
 0x63e   :  { %13643 = vmatprep.subr.bf16.mxu1 %v15761_v0 }
 0x641   :  { %13644 = vmatpush3.bf16.msra.mxu1 %v14375_v39 }
 0x642   :  { %13645 = vmatprep.subr.bf16.mxu1 %v15761_v0 }
 0x645   :  { %13646 = vmatpush3.bf16.msra.mxu1 %v14376_v9 }
 0x646   :  { %13687 = vmatprep.subr.msk.mxu1 %vm353_vm1, %v12004_v41 }
 0x648   :  { %13648 = vmatmul.mubr.bf16.vlgmr.msra.gmra.mrb[32].mxu1 %v16308_v49 }
 0x649   :  { %13651 = vmatprep.mubr.msk.bf16.mxu1 %vm15762_vm0, %v15761_v0 }
 0x64e   :  { %13688 = vmatpush3.xpose.msk.msra.mxu1 %vm353_vm1, %v12004_v41 }
 0x64f   :  { %14160 = vmatprep.subr.bf16.mxu1 %v16586_v13 }
 0x650   :  { %13652 = vmatmul.mubr.bf16.gmra.mrb[36].mxu1 %v16326_v60 }
 0x651   :  { %13655 = vmatprep.mubr.msk.bf16.mxu1 %vm15762_vm0, %v15761_v0 }
 0x658   :  { %13656 = vmatmul.mubr.bf16.gmra.mrb[40].mxu1 %v16343_v3 }
 0x659   :  { %13689 = vmatprep.mubr.msk.f32.mxu1 %vm353_vm1, %v16565_v38 }
 0x660   :  { %13690 = vmatmul.mubr.msk.f32.vlgmr.msra.gmra.mrb[30].mxu1 %vm353_vm1, %v16567_v42 }
 0x661   :  { %14162 = vmatpush3.bf16.msra.mxu1 %v16586_v13  ;;  %13692 = vmatprep.mubr.msk.f32.mxu1 %vm353_vm1, %v16571_v47 }
 0x662   :  { %14164 = vmatprep.subr.bf16.mxu1 %v16588_v34 }
 0x664   :  { %13693 = vmatmul.mubr.msk.f32.gmra.mrb[44].mxu1 %vm353_vm1, %v16573_v44 }
 0x665   :  { %14166 = vmatpush3.bf16.msra.mxu1 %v16588_v34  ;;  %13695 = vmatprep.mubr.msk.f32.mxu1 %vm353_vm1, %v16575_v55 }
 0x666   :  { %14168 = vmatprep.subr.bf16.mxu1 %v16590_v50 }
 0x668   :  { %13696 = vmatmul.mubr.msk.f32.gmra.mrb[46].mxu1 %vm353_vm1, %v16582_v54 }
 0x669   :  { %14170 = vmatpush3.bf16.msra.mxu1 %v16590_v50 }
 0x6fb   :  { %v16718_v38 = vpop.f32.mrb[24].mxu1 }
 0x6fc   :  { %v16720_v13 = vpop.f32.mrb[25].mxu1 }
 0x6ff   :  { %v16722_v45 = vpop.f32.mrb[26].mxu1 }
 0x700   :  { %v16724_v36 = vpop.f32.mrb[27].mxu1 }
 0x703   :  { %v16726_v40 = vpop.f32.mrb[28].mxu1 }
 0x704   :  { %v16728_v34 = vpop.f32.mrb[29].mxu1 }
 0x71b   :  { %v1763_v22 = vpop.f32.mrb[32].mxu1 }
 0x71c   :  { %v13649_v61 = vpop.f32.mrb[33].mxu1  ;;  %v1764_v46 = vadd.f32 %v11970_v53, %v1763_v22 }
 0x71d   :  { %v1766_v30 = vpop.f32.mrb[34].mxu1 }
 0x71e   :  { %v1767_v1 = vadd.f32 %v11970_v53, %v1766_v30  ;;  %v13650_v5 = vpop.f32.mrb[35].mxu1 }
 0x720   :  { %v14141_v50 = vpack.c.bf16 %v1767_v1, %v1764_v46 }
 0x722   :  { %14143 = vmatprep.subr.msk.bf16.mxu0 %vm16372_vm2, %v14141_v50 }
 0x723   :  { %v1771_v33 = vpop.f32.mrb[36].mxu1  ;;  %14146 = vmatpush3.bf16.xpose.msk.msra.mxu0 %vm16372_vm2, %v14141_v50 }
 0x724   :  { %v13653_v6 = vpop.f32.mrb[37].mxu1  ;;  %v1772_v52 = vadd.f32 %v11970_v53, %v1771_v33 }
 0x725   :  { %v1774_v43 = vpop.f32.mrb[38].mxu1 }
 0x726   :  { %v1775_v62 = vadd.f32 %v11970_v53, %v1774_v43  ;;  %v13654_v51 = vpop.f32.mrb[39].mxu1 }
 0x727   :  { %v1240_v51 = vsel %vm1154_vm3, %v16640_v19, 0.0 }
 0x728   :  { %v14147_v56 = vpack.c.bf16 %v1775_v62, %v1772_v52  ;;  %v1252_v62 = vsel %vm1173_vm4, %v16598_v48, 0.0 }
 0x72a   :  { %14149 = vmatprep.subr.msk.bf16.mxu0 %vm16372_vm2, %v14147_v56 }
 0x72b   :  { %v1779_v58 = vpop.f32.mrb[40].mxu1  ;;  %14152 = vmatpush3.bf16.xpose.msk.msra.mxu0 %vm16372_vm2, %v14147_v56  ;;  %v1258_v56 = vsel %vm1173_vm4, %v16614_v59, 0.0 }
 0x72c   :  { %v13657_v57 = vpop.f32.mrb[41].mxu1  ;;  %v1780_v35 = vadd.f32 %v11970_v53, %v1779_v58 }
 0x72d   :  { %v1782_v28 = vpop.f32.mrb[42].mxu1 }
 0x72e   :  { %v1783_v37 = vadd.f32 %v11970_v53, %v1782_v28  ;;  %v13658_v4 = vpop.f32.mrb[43].mxu1 }
 0x730   :  { %v14153_v39 = vpack.c.bf16 %v1783_v37, %v1780_v35 }
 0x732   :  { %14155 = vmatprep.subr.msk.bf16.mxu0 %vm16372_vm2, %v14153_v39 }
 0x733   :  { %v13691_v9 = vpop.f32.mrb[30].mxu1  ;;  %14158 = vmatpush3.bf16.xpose.msk.msra.mxu0 %vm16372_vm2, %v14153_v39 }
 0x734   :  { %v16742_v41 = vmul.f32 0.17677669, %v13691_v9  ;;  %v2005_v22 = vpop.f32.mrb[31].mxu1  ;;  %13751 = vmatprep.subr.bf16.mxu0 %v15761_v0 }
 0x735   :  { %v16745_v61 = vmul.f32 0.17677669, %v2005_v22 }
 0x736   :  { %v2168_v30 = vsel %vm1154_vm3, %v16742_v41, -inf }
 0x737   :  { %2169 = vmax.xlane.f32.xlu0 %v2168_v30  ;;  %v13694_v53 = vpop.f32.mrb[44].mxu1  ;;  %v2165_v5 = vsel %vm1154_vm3, %v16745_v61, -inf }
 0x738   :  { %v2015_v46 = vpop.f32.mrb[45].mxu1  ;;  %v16749_v1 = vmul.f32 0.17677669, %v13694_v53 }
 0x739   :  { %v16757_v6 = vmul.f32 0.17677669, %v2015_v46 }
 0x73a   :  { %13711 = vmatmul.mubr.msk.f32.vlgmr.msra.gmra.mrb[60].mxu0 %vm353_vm1, %v16567_v42  ;;  %v2174_v43 = vsel %vm1154_vm3, %v16749_v1, -inf }
 0x73b   :  { %13713 = vmatprep.mubr.msk.f32.mxu0 %vm353_vm1, %v16571_v47  ;;  %2166 = vmax.xlane.f32.xlu0 %v2165_v5  ;;  %v13697_v50 = vpop.f32.mrb[46].mxu1  ;;  %v2171_v47 = vsel %vm1154_vm3, %v16757_v6, -inf }
 0x73c   :  { %v2025_v33 = vpop.f32.mrb[47].mxu1 }
 0x73d   :  { %v16765_v42 = vmul.f32 0.17677669, %v2025_v33 }
 0x73e   :  { %13714 = vmatmul.mubr.msk.f32.gmra.mrb[62].mxu0 %vm353_vm1, %v16573_v44  ;;  %v16773_v44 = vmul.f32 0.17677669, %v13697_v50 }
 0x73f   :  { %13716 = vmatprep.mubr.msk.f32.mxu0 %vm353_vm1, %v16575_v55  ;;  %2175 = vmax.xlane.f32.xlu0 %v2174_v43  ;;  %v2177_v52 = vsel %vm1154_vm3, %v16765_v42, -inf }
 0x740   :  { %v2180_v55 = vsel %vm1154_vm3, %v16773_v44, -inf }
 0x742   :  { %13717 = vmatmul.mubr.msk.f32.gmra.mrb[64].mxu0 %vm353_vm1, %v16582_v54  ;;  %v1234_v54 = vsel %vm1154_vm3, %v16629_v12, 0.0 }
 0x743   :  { %2172 = vmax.xlane.f32.xlu0 %v2171_v47  ;;  %13755 = vmatprep.mubr.msk.bf16.mxu0 %vm15762_vm0, %v15761_v0 }
 0x747   :  { %2178 = vmax.xlane.f32.xlu0 %v2177_v52  ;;  %v1243_v52 = vsel %vm1154_vm3, %v16650_v21, 0.0 }
 0x74b   :  { %2181 = vmax.xlane.f32.xlu0 %v2180_v55  ;;  %v16816_v55 = vld [vmem:[%s18031_s20 + $0x8] sm:$0x3f] }
 0x74c   :  { %13740 = vmatprep.subr.msk.mxu1 %vm1408_vm5, %v16816_v55 }
 0x74f   :  { %1235 = vadd.xlane.f32.xlu0 %v1234_v54 }
 0x753   :  { %1253 = vadd.xlane.f32.xlu0 %v1252_v62 }
 0x757   :  { %1241 = vadd.xlane.f32.xlu0 %v1240_v51 }
 0x75b   :  { %1259 = vadd.xlane.f32.xlu0 %v1258_v56 }
 0x80d   :  { %v13712_v58 = vpop.f32.mrb[60].mxu0 }
 0x80e   :  { %v2154_v57 = vmul.f32 0.17677669, %v13712_v58  ;;  %v2124_v28 = vpop.f32.mrb[61].mxu0 }
 0x80f   :  { %v2153_v35 = vmul.f32 0.17677669, %v2124_v28 }
 0x810   :  { %v2160_v37 = vadd.f32 %v2154_v57, %v16508_v63 }
 0x811   :  { %v13715_v12 = vpop.f32.mrb[62].mxu0  ;;  %v2159_v9 = vadd.f32 %v2153_v35, %v16513_v2 }
 0x812   :  { %v2156_v4 = vmul.f32 0.17677669, %v13715_v12  ;;  %v2134_v39 = vpop.f32.mrb[63].mxu0  ;;  %v2186_v48 = vsel %vm1173_vm4, %v2160_v37, -inf }
 0x813   :  { %2187 = vmax.xlane.f32.xlu1 %v2186_v48  ;;  %v2155_v22 = vmul.f32 0.17677669, %v2134_v39  ;;  %v2183_v59 = vsel %vm1173_vm4, %v2159_v9, -inf }
 0x814   :  { %v2162_v53 = vadd.f32 %v2156_v4, %v16526_v10 }
 0x815   :  { %v13718_v19 = vpop.f32.mrb[64].mxu0  ;;  %v2161_v63 = vadd.f32 %v2155_v22, %v16536_v17  ;;  %v1237_v17 = vsel %vm1154_vm3, %v16638_v15, 0.0  ;;  %v2170_v15 = vpop.xlane.xlu0 %2169 }
 0x816   :  { %v2144_v30 = vpop.f32.mrb[65].mxu0  ;;  %v2192_v5 = vsel %vm1173_vm4, %v2162_v53, -inf  ;;  %v2158_v50 = vmul.f32 0.17677669, %v13718_v19 }
 0x817   :  { %2184 = vmax.xlane.f32.xlu1 %v2183_v59  ;;  %v2157_v46 = vmul.f32 0.17677669, %v2144_v30  ;;  %v2189_v33 = vsel %vm1173_vm4, %v2161_v63, -inf }
 0x818   :  { %v16801_v47 = vadd.f32 %v2158_v50, %v16556_v31  ;;  %v1261_v31 = vsel %vm1173_vm4, %v16616_v7, 0.0 }
 0x819   :  { %v16796_v2 = vadd.f32 %v2157_v46, %v16546_v23  ;;  %v1255_v23 = vsel %vm1173_vm4, %v16600_v16, 0.0  ;;  %v2167_v54 = vpop.xlane.xlu0 %2166 }
 0x81a   :  { %v2198_v10 = vsel %vm1173_vm4, %v16801_v47, -inf }
 0x81b   :  { %2193 = vmax.xlane.f32.xlu1 %v2192_v5  ;;  %v2195_v43 = vsel %vm1173_vm4, %v16796_v2, -inf }
 0x81d   :  { %v2176_v16 = vpop.xlane.xlu0 %2175 }
 0x81f   :  { %2190 = vmax.xlane.f32.xlu1 %v2189_v33 }
 0x821   :  { %v2173_v62 = vpop.xlane.xlu0 %2172 }
 0x823   :  { %2196 = vmax.xlane.f32.xlu1 %v2195_v43 }
 0x825   :  { %v2179_v51 = vpop.xlane.xlu0 %2178 }
 0x827   :  { %2199 = vmax.xlane.f32.xlu1 %v2198_v10 }
 0x829   :  { %v2182_v4 = vpop.xlane.xlu0 %2181 }
 0x82b   :  { %1238 = vadd.xlane.f32.xlu1 %v1237_v17 }
 0x82d   :  { %v1236_v5 = vpop.xlane.xlu0 %1235 }
 0x82f   :  { %1256 = vadd.xlane.f32.xlu1 %v1255_v23 }
 0x833   :  { %1244 = vadd.xlane.f32.xlu1 %v1243_v52  ;;  %v1254_v52 = vpop.xlane.xlu0 %1253 }
 0x837   :  { %1262 = vadd.xlane.f32.xlu1 %v1261_v31 }
 0x8a0   :  { %v2188_v56 = vpop.xlane.xlu1 %2187 }
 0x8a1   :  { %v2202_v21 = vmax.f32 %v2170_v15, %v2188_v56 }
 0x8a3   :  { %v2208_v58 = vsub.f32 %v16742_v41, %v2202_v21  ;;  %v2226_v57 = vsub.f32 %v2160_v37, %v2202_v21 }
 0x8a4   :  { %v2185_v7 = vpop.xlane.xlu1 %2184 }
 0x8a5   :  { %v2215_v28 = vmul.f32 1.442695, %v2208_v58  ;;  %v2233_v35 = vmul.f32 1.442695, %v2226_v57  ;;  %v2201_v12 = vmax.f32 %v2167_v54, %v2185_v7  ;;  %v1270_v58 = vadd.f32 %v1254_v52, %v1236_v5  ;;  %v1242_v7 = vpop.xlane.xlu0 %1241  ;;  %v14377_v52 = vld [vmem:[#allocation14] sm:$0xff]  }
 0x8a7   :  { %15085 = vpow2.f32 %v2215_v28  ;;  %v2207_v39 = vsub.f32 %v16745_v61, %v2201_v12  ;;  %v2225_v48 = vsub.f32 %v2159_v9, %v2201_v12 }
 0x8a8   :  { %v2194_v19 = vpop.xlane.xlu1 %2193  ;;  %15087 = vpow2.f32 %v2233_v35 }
 0x8a9   :  { %v2213_v22 = vmul.f32 1.442695, %v2207_v39  ;;  %v2231_v30 = vmul.f32 1.442695, %v2225_v48  ;;  %v2204_v59 = vmax.f32 %v2176_v16, %v2194_v19 }
 0x8ab   :  { %15089 = vpow2.f32 %v2213_v22  ;;  %v2210_v46 = vsub.f32 %v16749_v1, %v2204_v59  ;;  %v2228_v37 = vsub.f32 %v2162_v53, %v2204_v59 }
 0x8ac   :  { %15091 = vpow2.f32 %v2231_v30  ;;  %v2191_v41 = vpop.xlane.xlu1 %2190 }
 0x8ad   :  { %v2203_v50 = vmax.f32 %v2173_v62, %v2191_v41  ;;  %v2219_v33 = vmul.f32 1.442695, %v2210_v46  ;;  %v2237_v61 = vmul.f32 1.442695, %v2228_v37 }
 0x8af   :  { %v2227_v43 = vsub.f32 %v2161_v63, %v2203_v50  ;;  %v2209_v31 = vsub.f32 %v16757_v6, %v2203_v50  ;;  %15093 = vpow2.f32 %v2219_v33 }
 0x8b0   :  { %v2197_v10 = vpop.xlane.xlu1 %2196 }
 0x8b1   :  { %v16823_v17 = vpop.eup %15085  ;;  %v2235_v9 = vmul.f32 1.442695, %v2227_v43  ;;  %v2205_v23 = vmax.f32 %v2179_v51, %v2197_v10  ;;  %v2217_v51 = vmul.f32 1.442695, %v2209_v31 }
 0x8b2   :  { %v2246_v15 = vsel %vm1154_vm3, %v16823_v17, 0.0  ;;  %v15088_v1 = vpop.eup %15087 }
 0x8b3   :  { %v2229_v54 = vsub.f32 %v16796_v2, %v2205_v23  ;;  %2247 = vadd.xlane.f32.xlu1 %v2246_v15  ;;  %15095 = vpow2.f32 %v2235_v9  ;;  %v2264_v21 = vsel %vm1173_vm4, %v15088_v1, 0.0 }
 0x8b4   :  { %v2200_v53 = vpop.xlane.xlu1 %2199  ;;  %15097 = vpow2.f32 %v2237_v61 }
 0x8b5   :  { %v16829_v63 = vpop.eup %15089  ;;  %v2239_v16 = vmul.f32 1.442695, %v2229_v54  ;;  %v2206_v62 = vmax.f32 %v2182_v4, %v2200_v53  ;;  %v2211_v4 = vsub.f32 %v16765_v42, %v2205_v23  ;;  %v1267_v42 = vsel %vm1173_vm4, %v16627_v11, 0.0 }
 0x8b6   :  { %v15092_v56 = vpop.eup %15091  ;;  %v2243_v6 = vsel %vm1154_vm3, %v16829_v63, 0.0  ;;  %v1264_v11 = vsel %vm1173_vm4, %v16623_v8, 0.0 }
 0x8b7   :  { %v2212_v57 = vsub.f32 %v16773_v44, %v2206_v62  ;;  %v2230_v2 = vsub.f32 %v16801_v47, %v2206_v62  ;;  %13731 = vmatprep.mubr.msk.f32.mxu1 %vm1173_vm4, %v15092_v56  ;;  %2265 = vadd.xlane.f32.xlu1 %v2264_v21  ;;  %15099 = vpow2.f32 %v2239_v16  ;;  %v1249_v44 = vsel %vm1154_vm3, %v16662_v32, 0.0 }
 0x8b8   :  { %13732 = vmatmul.mubr.msk.f32.vlgmr.msra.gmra.mrb[48].mxu1 %vm1173_vm4, %v15088_v1  ;;  %2244 = vadd.xlane.f32.xlu0 %v2243_v6  ;;  %v1239_v28 = vpop.xlane.xlu1 %1238  ;;  %15101 = vpow2.f32 %v2217_v51  ;;  %v2261_v47 = vsel %vm1173_vm4, %v15092_v56, 0.0  ;;  %v2221_v30 = vmul.f32 1.442695, %v2211_v4  ;;  %v1246_v32 = vsel %vm1154_vm3, %v16652_v27, 0.0  ;;  %v14388_v4 = vld [vmem:[#allocation14 + $0x18] sm:$0xff]  }
 0x8b9   :  { %v2223_v35 = vmul.f32 1.442695, %v2212_v57  ;;  %v2241_v12 = vmul.f32 1.442695, %v2230_v2  ;;  %13741 = vmatpush3.msk.msra.mxu1 %vm1408_vm5, %v16816_v55  ;;  %15103 = vrcp.f32 %v1270_v58  ;;  %v15094_v48 = vpop.eup %15093  ;;  %v1260_v55 = vpop.xlane.xlu0 %1259  ;;  %v14379_v58 = vld [vmem:[%s18026_s22 + $0x80] sm:$0xff]   ;;  %v14382_v57 = vld [vmem:[%s18026_s22 + $0x98] sm:$0xff]  }
 0x8ba   :  { %13767 = vmatprep.subr.bf16.mxu1 %v15761_v0  ;;  %v1272_v5 = vadd.f32 %v1260_v55, %v1242_v7  ;;  %v2252_v37 = vsel %vm1154_vm3, %v15094_v48, 0.0  ;;  %v14383_v2 = vld [vmem:[%s18026_s22 + $0xa0] sm:$0xff]   ;;  %v14384_v7 = vld [vmem:[%s18026_s22 + $0xa8] sm:$0xff]  }
 0x8bb   :  { %1250 = vadd.xlane.f32.xlu1 %v1249_v44  ;;  %15105 = vpow2.f32 %v2241_v12  ;;  %v14387_v12 = vld [vmem:[#allocation14 + $0x10] sm:$0xff]  }
 0x8bc   :  { %2262 = vadd.xlane.f32.xlu0 %v2261_v47  ;;  %v1257_v39 = vpop.xlane.xlu1 %1256  ;;  %15107 = vpow2.f32 %v2223_v35  ;;  %v14386_v35 = vld [vmem:[%s18026_s22 + $0xb8] sm:$0xff]   ;;  %13752 = vmatpush3.bf16.msra.mxu0 %v14387_v12  ;;  %v14391_v12 = vld [vmem:[%s18025_s29 + $0x90] sm:$0xff]  }
 0x8bd   :  { %v1271_v19 = vadd.f32 %v1257_v39, %v1239_v28  ;;  %v15096_v22 = vpop.eup %15095  ;;  %v14385_v28 = vld [vmem:[%s18026_s22 + $0xb0] sm:$0xff]   ;;  %13753 = vmatprep.subr.bf16.mxu0 %v15761_v0 }
 0x8be   :  { %v15098_v59 = vpop.eup %15097  ;;  %13734 = vmatprep.mubr.msk.f32.mxu1 %vm1173_vm4, %v15096_v22  ;;  %v2267_v54 = vsel %vm1173_vm4, %v15096_v22, 0.0 }
 0x8bf   :  { %15109 = vrcp.f32 %v1271_v19  ;;  %1268 = vadd.xlane.f32.xlu1 %v1267_v42  ;;  %13735 = vmatmul.mubr.msk.f32.gmra.mrb[50].mxu1 %vm1173_vm4, %v15098_v59  ;;  %v2270_v61 = vsel %vm1173_vm4, %v15098_v59, 0.0 }
 0x8c0   :  { %1247 = vadd.xlane.f32.xlu0 %v1246_v32  ;;  %v1245_v46 = vpop.xlane.xlu1 %1244  ;;  %15111 = vpow2.f32 %v2221_v30  ;;  %13754 = vmatpush3.bf16.msra.mxu0 %v14388_v4 }
 0x8c1   :  { %v15100_v41 = vpop.eup %15099  ;;  %15113 = vrcp.f32 %v1272_v5  ;;  %13783 = vmatprep.subr.bf16.mxu0 %v15761_v0 }
 0x8c2   :  { %13737 = vmatprep.mubr.msk.f32.mxu1 %vm1173_vm4, %v15100_v41  ;;  %v15102_v50 = vpop.eup %15101  ;;  %v2273_v21 = vsel %vm1173_vm4, %v15100_v41, 0.0 }
 0x8c3   :  { %2253 = vadd.xlane.f32.xlu1 %v2252_v37  ;;  %v15104_v27 = vpop.eup %15103  ;;  %v2249_v23 = vsel %vm1154_vm3, %v15102_v50, 0.0 }
 0x8c4   :  { %1265 = vadd.xlane.f32.xlu0 %v1264_v11  ;;  %v1263_v33 = vpop.xlane.xlu1 %1262  ;;  %v1508_v31 = vmul.f32 %v15104_v27, %v16720_v13 }
 0x8c5   :  { %v1273_v43 = vadd.f32 %v1263_v33, %v1245_v46  ;;  %v15106_v10 = vpop.eup %15105 }
 0x8c6   :  { %v15108_v9 = vpop.eup %15107  ;;  %13738 = vmatmul.mubr.msk.f32.gmra.mrb[52].mxu1 %vm1173_vm4, %v15106_v10  ;;  %v2276_v62 = vsel %vm1173_vm4, %v15106_v10, 0.0 }
 0x8c7   :  { %15115 = vrcp.f32 %v1273_v43  ;;  %2271 = vadd.xlane.f32.xlu1 %v2270_v61  ;;  %13742 = vmatprep.mubr.msk.f32.mxu1 %vm1154_vm3, %v16829_v63  ;;  %v2258_v1 = vsel %vm1154_vm3, %v15108_v9, 0.0  ;;  %v14378_v63 = vld [vmem:[#allocation14 + $0x8] sm:$0xff]  }
 0x8c8   :  { %2250 = vadd.xlane.f32.xlu0 %v2249_v23 }
 0x8c9   :  { %v15110_v8 = vpop.eup %15109 }
 0x8ca   :  { %v1510_v15 = vmul.f32 %v15110_v8, %v16718_v38  ;;  %13743 = vmatmul.mubr.msk.f32.vlgmr.msra.gmra.mrb[48].mxu1 %vm1154_vm3, %v16823_v17  ;;  %v15112_v53 = vpop.eup %15111 }
 0x8cb   :  { %2259 = vadd.xlane.f32.xlu1 %v2258_v1  ;;  %13745 = vmatprep.mubr.msk.f32.mxu1 %vm1154_vm3, %v15102_v50  ;;  %v15114_v38 = vpop.eup %15113  ;;  %v2255_v13 = vsel %vm1154_vm3, %v15112_v53, 0.0 }
 0x8cc   :  { %v1519_v16 = vpack.c.bf16 %v1510_v15, %v1508_v31  ;;  %2268 = vadd.xlane.f32.xlu0 %v2267_v54  ;;  %13768 = vmatpush3.bf16.msra.mxu1 %v14377_v52  ;;  %v1512_v56 = vmul.f32 %v15114_v38, %v16724_v36  ;;  %v14381_v36 = vld [vmem:[%s18026_s22 + $0x90] sm:$0xff]  }
 0x8cd   :  { %13769 = vmatprep.subr.bf16.mxu1 %v15761_v0 }
 0x8ce   :  { %13746 = vmatmul.mubr.msk.f32.gmra.mrb[50].mxu1 %vm1154_vm3, %v15094_v48 }
 0x8cf   :  { %2277 = vadd.xlane.f32.xlu1 %v2276_v62  ;;  %13748 = vmatprep.mubr.msk.f32.mxu1 %vm1154_vm3, %v15112_v53  ;;  %v14389_v62 = vld [vmem:[%s18025_s29 + $0x80] sm:$0xff]  }
 0x8d0   :  { %2256 = vadd.xlane.f32.xlu0 %v2255_v13  ;;  %13770 = vmatpush3.bf16.msra.mxu1 %v14378_v63 }
 0x8d1   :  { %v15116_v17 = vpop.eup %15115  ;;  %13811 = vmatprep.subr.bf16.mxu1 %v15761_v0 }
 0x8d2   :  { %v1514_v51 = vmul.f32 %v15116_v17, %v16722_v45  ;;  %13749 = vmatmul.mubr.msk.f32.gmra.mrb[52].mxu1 %vm1154_vm3, %v15108_v9  ;;  %v14380_v45 = vld [vmem:[%s18026_s22 + $0x88] sm:$0xff]  }
 0x8d3   :  { %13771 = vmatprep.mubr.msk.bf16.mxu1 %vm15762_vm0, %v15761_v0 }
 0x8d4   :  { %2274 = vadd.xlane.f32.xlu0 %v2273_v21  ;;  %v1520_v6 = vpack.c.bf16 %v1514_v51, %v1512_v56 }
 0x8d6   :  { %13772 = vmatmul.mubr.msk.bf16.vlgmr.msra.gmra.mrb[56].mxu1 %vm353_vm1, %v1519_v16 }
 0x8d7   :  { %13775 = vmatprep.mubr.msk.bf16.mxu1 %vm15762_vm0, %v15761_v0  ;;  %13812 = vmatpush3.bf16.msra.mxu1 %v14379_v58  ;;  %v14390_v58 = vld [vmem:[%s18025_s29 + $0x88] sm:$0xff]  }
 0x8d8   :  { %13813 = vmatprep.subr.bf16.mxu1 %v15761_v0 }
 0x8db   :  { %13814 = vmatpush3.bf16.msra.mxu1 %v14380_v45 }
 0x8dc   :  { %13815 = vmatprep.subr.bf16.mxu1 %v15761_v0 }
 0x8de   :  { %13776 = vmatmul.mubr.msk.bf16.gmra.mrb[60].mxu1 %vm353_vm1, %v1520_v6 }
 0x8df   :  { %13816 = vmatpush3.bf16.msra.mxu1 %v14381_v36  ;;  %13779 = vmatprep.mubr.msk.bf16.mxu1 %vm15762_vm0, %v15761_v0 }
 0x8e0   :  { %13817 = vmatprep.subr.bf16.mxu1 %v15761_v0 }
 0x8e3   :  { %13818 = vmatpush3.bf16.msra.mxu1 %v14382_v57 }
 0x8e4   :  { %13819 = vmatprep.subr.bf16.mxu1 %v15761_v0 }
 0x8e7   :  { %13820 = vmatpush3.bf16.msra.mxu1 %v14383_v2 }
 0x8e8   :  { %13821 = vmatprep.subr.bf16.mxu1 %v15761_v0 }
 0x8eb   :  { %13822 = vmatpush3.bf16.msra.mxu1 %v14384_v7 }
 0x8ec   :  { %13823 = vmatprep.subr.bf16.mxu1 %v15761_v0 }
 0x8ef   :  { %13824 = vmatpush3.bf16.msra.mxu1 %v14385_v28 }
 0x8f0   :  { %13825 = vmatprep.subr.bf16.mxu1 %v15761_v0 }
 0x8f3   :  { %13826 = vmatpush3.bf16.msra.mxu1 %v14386_v35 }
 0x940   :  { %v2248_v44 = vpop.xlane.xlu1 %2247 }
 0x944   :  { %v2266_v47 = vpop.xlane.xlu1 %2265 }
 0x945   :  { %v2280_v39 = vadd.f32 %v2266_v47, %v2248_v44  ;;  %v2245_v48 = vpop.xlane.xlu0 %2244 }
 0x948   :  { %v1251_v19 = vpop.xlane.xlu1 %1250 }
 0x949   :  { %v2263_v22 = vpop.xlane.xlu0 %2262 }
 0x94a   :  { %v2279_v55 = vadd.f32 %v2263_v22, %v2245_v48  ;;  %v14393_v22 = vld [vmem:[%s18025_s29 + $0xa0] sm:$0xff]  }
 0x94c   :  { %v1269_v30 = vpop.xlane.xlu1 %1268 }
 0x94d   :  { %v1248_v42 = vpop.xlane.xlu0 %1247  ;;  %v1275_v59 = vadd.f32 %v1269_v30, %v1251_v19  ;;  %v14392_v19 = vld [vmem:[%s18025_s29 + $0x98] sm:$0xff]  }
 0x94f   :  { %15117 = vrcp.f32 %v1275_v59 }
 0x951   :  { %v1266_v32 = vpop.xlane.xlu0 %1265 }
 0x952   :  { %v1274_v46 = vadd.f32 %v1266_v32, %v1248_v42  ;;  %v14394_v32 = vld [vmem:[%s18025_s29 + $0xa8] sm:$0xff]  }
 0x954   :  { %15119 = vrcp.f32 %v1274_v46  ;;  %v14395_v46 = vld [vmem:[%s18025_s29 + $0xb0] sm:$0xff]  }
 0x955   :  { %15121 = vrcp.f32 %v2280_v39 }
 0x956   :  { %15123 = vrcp.f32 %v2279_v55 }
 0x959   :  { %v15118_v5 = vpop.eup %15117 }
 0x95a   :  { %v1518_v11 = vmul.f32 %v15118_v5, %v16726_v40  ;;  %v2251_v40 = vpop.xlane.xlu0 %2250  ;;  %v14396_v5 = vld [vmem:[%s18025_s29 + $0xb8] sm:$0xff]  }
 0x95e   :  { %v15120_v41 = vpop.eup %15119  ;;  %v2269_v27 = vpop.xlane.xlu0 %2268 }
 0x95f   :  { %v1516_v37 = vmul.f32 %v15120_v41, %v16728_v34  ;;  %v2254_v34 = vpop.xlane.xlu1 %2253  ;;  %v2281_v9 = vadd.f32 %v2269_v27, %v2251_v40  ;;  %v15122_v15 = vpop.eup %15121  ;;  %v14397_v41 = vld [vmem:[%s18027_s26 + $0x80] sm:$0xff]   ;;  %v14403_v27 = vld [vmem:[%s18027_s26 + $0xb0] sm:$0xff]  }
 0x960   :  { %v15124_v54 = vpop.eup %15123  ;;  %v14401_v40 = vld [vmem:[%s18027_s26 + $0xa0] sm:$0xff]  }
 0x961   :  { %v1521_v50 = vpack.c.bf16 %v1518_v11, %v1516_v37  ;;  %v12123_v37 = vld [vmem:[%s17974_s12 + $0x10] sm:$0x3f]  ;;  %v14398_v11 = vld [vmem:[%s18027_s26 + $0x88] sm:$0xff]  }
 0x962   :  { %v2257_v10 = vpop.xlane.xlu0 %2256  ;;  %13867 = vmatprep.subr.msk.mxu1 %vm353_vm1, %v12123_v37 }
 0x963   :  { %13780 = vmatmul.mubr.msk.bf16.gmra.mrb[64].mxu1 %vm353_vm1, %v1521_v50  ;;  %v2272_v33 = vpop.xlane.xlu1 %2271  ;;  %v14399_v50 = vld [vmem:[%s18027_s26 + $0x90] sm:$0xff]  }
 0x964   :  { %13827 = vmatprep.mubr.msk.bf16.mxu1 %vm15762_vm0, %v15761_v0  ;;  %v2282_v61 = vadd.f32 %v2272_v33, %v2254_v34  ;;  %v14400_v34 = vld [vmem:[%s18027_s26 + $0x98] sm:$0xff]   ;;  %v14402_v33 = vld [vmem:[%s18027_s26 + $0xa8] sm:$0xff]  }
 0x966   :  { %v2275_v8 = vpop.xlane.xlu0 %2274  ;;  %15125 = vrcp.f32 %v2282_v61 }
 0x967   :  { %v2260_v43 = vpop.xlane.xlu1 %2259  ;;  %15127 = vrcp.f32 %v2281_v9  ;;  %v2283_v31 = vadd.f32 %v2275_v8, %v2257_v10  ;;  %v12089_v8 = vld [vmem:[#allocation11 + $0x2] ss:$0 sm:$0xff] }
 0x96b   :  { %13828 = vmatmul.mubr.bf16.vlgmr.msra.gmra.mrb[68].mxu1 %v16308_v49  ;;  %v2278_v23 = vpop.xlane.xlu1 %2277 }
 0x96c   :  { %13831 = vmatprep.mubr.msk.bf16.mxu1 %vm15762_vm0, %v15761_v0  ;;  %v2284_v52 = vadd.f32 %v2278_v23, %v2260_v43  ;;  %13868 = vmatpush3.xpose.msk.msra.mxu1 %vm353_vm1, %v12123_v37  ;;  %v14404_v43 = vld [vmem:[%s18027_s26 + $0xb8] sm:$0xff]  }
 0x96e   :  { %15129 = vrcp.f32 %v2284_v52 }
 0x96f   :  { %15131 = vrcp.f32 %v2283_v31 }
 0x970   :  { %v15126_v38 = vpop.eup %15125 }
 0x971   :  { %v15128_v56 = vpop.eup %15127 }
 0x973   :  { %13832 = vmatmul.mubr.bf16.gmra.mrb[72].mxu1 %v16326_v60 }
 0x974   :  { %13835 = vmatprep.mubr.msk.bf16.mxu1 %vm15762_vm0, %v15761_v0 }
 0x978   :  { %v15130_v45 = vpop.eup %15129 }
 0x979   :  { %v15132_v2 = vpop.eup %15131 }
 0x97b   :  { %13836 = vmatmul.mubr.bf16.gmra.mrb[76].mxu1 %v16343_v3 }
 0x99d   :  { %v13744_v1 = vpop.f32.mrb[48].mxu1 }
 0x99e   :  { %v2519_v53 = vmul.f32 %v15122_v15, %v13744_v1  ;;  %v2487_v16 = vpop.f32.mrb[49].mxu1 }
 0x99f   :  { %v2517_v63 = vmul.f32 %v15124_v54, %v2487_v16 }
 0x9a1   :  { %v2528_v13 = vpack.c.bf16 %v2519_v53, %v2517_v63  ;;  %v13747_v17 = vpop.f32.mrb[50].mxu1 }
 0x9a2   :  { %v2523_v51 = vmul.f32 %v15126_v38, %v13747_v17  ;;  %v2497_v21 = vpop.f32.mrb[51].mxu1 }
 0x9a3   :  { %v2521_v6 = vmul.f32 %v15128_v56, %v2497_v21  ;;  %13756 = vmatmul.mubr.msk.bf16.vlgmr.msra.gmra.mrb[68].mxu0 %vm353_vm1, %v2528_v13 }
 0x9a4   :  { %13784 = vmatpush3.bf16.msra.mxu0 %v14389_v62  ;;  %13759 = vmatprep.mubr.msk.bf16.mxu0 %vm15762_vm0, %v15761_v0 }
 0x9a5   :  { %v2529_v36 = vpack.c.bf16 %v2523_v51, %v2521_v6  ;;  %v13750_v57 = vpop.f32.mrb[52].mxu1  ;;  %13785 = vmatprep.subr.bf16.mxu0 %v15761_v0 }
 0x9a6   :  { %v2527_v7 = vmul.f32 %v15130_v45, %v13750_v57  ;;  %v2507_v28 = vpop.f32.mrb[53].mxu1 }
 0x9a7   :  { %v2525_v35 = vmul.f32 %v15132_v2, %v2507_v28 }
 0x9a8   :  { %13786 = vmatpush3.bf16.msra.mxu0 %v14390_v58 }
 0x9a9   :  { %v2530_v4 = vpack.c.bf16 %v2527_v7, %v2525_v35  ;;  %v16943_v44 = vpop.f32.mrb[56].mxu1  ;;  %13787 = vmatprep.subr.bf16.mxu0 %v15761_v0 }
 0x9aa   :  { %v13773_v47 = vpop.f32.mrb[57].mxu1 }
 0x9ab   :  { %13760 = vmatmul.mubr.msk.bf16.gmra.mrb[72].mxu0 %vm353_vm1, %v2529_v36  ;;  %v16947_v39 = vpop.f32.mrb[58].mxu1 }
 0x9ac   :  { %13788 = vmatpush3.bf16.msra.mxu0 %v14391_v12  ;;  %v13774_v48 = vpop.f32.mrb[59].mxu1  ;;  %13763 = vmatprep.mubr.msk.bf16.mxu0 %vm15762_vm0, %v15761_v0 }
 0x9ad   :  { %13789 = vmatprep.subr.bf16.mxu0 %v15761_v0 }
 0x9b0   :  { %13790 = vmatpush3.bf16.msra.mxu0 %v14392_v19 }
 0x9b1   :  { %v16958_v55 = vpop.f32.mrb[60].mxu1  ;;  %13791 = vmatprep.subr.bf16.mxu0 %v15761_v0 }
 0x9b2   :  { %v13777_v30 = vpop.f32.mrb[61].mxu1 }
 0x9b3   :  { %13764 = vmatmul.mubr.msk.bf16.gmra.mrb[76].mxu0 %vm353_vm1, %v2530_v4  ;;  %v16962_v42 = vpop.f32.mrb[62].mxu1 }
 0x9b4   :  { %13792 = vmatpush3.bf16.msra.mxu0 %v14393_v22  ;;  %v13778_v59 = vpop.f32.mrb[63].mxu1  ;;  %13799 = vmatprep.mubr.msk.bf16.mxu0 %vm15762_vm0, %v15761_v0 }
 0x9b5   :  { %13793 = vmatprep.subr.bf16.mxu0 %v15761_v0 }
 0x9b8   :  { %13794 = vmatpush3.bf16.msra.mxu0 %v14394_v32 }
 0x9b9   :  { %13795 = vmatprep.subr.bf16.mxu0 %v15761_v0 }
 0x9bc   :  { %13796 = vmatpush3.bf16.msra.mxu0 %v14395_v46 }
 0x9bd   :  { %13797 = vmatprep.subr.bf16.mxu0 %v15761_v0 }
 0x9c0   :  { %13798 = vmatpush3.bf16.msra.mxu0 %v14396_v5 }
 0x9c1   :  { %13839 = vmatprep.subr.bf16.mxu0 %v15761_v0 }
 0x9c3   :  { %13800 = vmatmul.mubr.bf16.vlgmr.msra.gmra.mrb[80].mxu0 %v16308_v49 }
 0x9c4   :  { %13840 = vmatpush3.bf16.msra.mxu0 %v14397_v41  ;;  %13803 = vmatprep.mubr.msk.bf16.mxu0 %vm15762_vm0, %v15761_v0 }
 0x9c5   :  { %13841 = vmatprep.subr.bf16.mxu0 %v15761_v0 }
 0x9c8   :  { %13842 = vmatpush3.bf16.msra.mxu0 %v14398_v11  ;;  %v12064_v11 = vld [vmem:[#allocation10 + $0x2] ss:$0 sm:$0xff] }
 0x9c9   :  { %13843 = vmatprep.subr.bf16.mxu0 %v15761_v0 }
 0x9cb   :  { %13804 = vmatmul.mubr.bf16.gmra.mrb[84].mxu0 %v16326_v60 }
 0x9cc   :  { %13844 = vmatpush3.bf16.msra.mxu0 %v14399_v50  ;;  %13807 = vmatprep.mubr.msk.bf16.mxu0 %vm15762_vm0, %v15761_v0 }
 0x9cd   :  { %13845 = vmatprep.subr.bf16.mxu0 %v15761_v0 }
 0x9d0   :  { %13846 = vmatpush3.bf16.msra.mxu0 %v14400_v34 }
 0x9d1   :  { %13847 = vmatprep.subr.bf16.mxu0 %v15761_v0 }
 0x9d3   :  { %13808 = vmatmul.mubr.bf16.gmra.mrb[88].mxu0 %v16343_v3 }
 0x9d4   :  { %13848 = vmatpush3.bf16.msra.mxu0 %v14401_v40  ;;  %13855 = vmatprep.mubr.msk.bf16.mxu0 %vm15762_vm0, %v15761_v0 }
 0x9d5   :  { %13849 = vmatprep.subr.bf16.mxu0 %v15761_v0 }
 0x9d8   :  { %13850 = vmatpush3.bf16.msra.mxu0 %v14402_v33 }
 0x9d9   :  { %13851 = vmatprep.subr.bf16.mxu0 %v15761_v0 }
 0x9dc   :  { %13852 = vmatpush3.bf16.msra.mxu0 %v14403_v27 }
 0x9dd   :  { %13853 = vmatprep.subr.bf16.mxu0 %v15761_v0 }
 0x9e0   :  { %13854 = vmatpush3.bf16.msra.mxu0 %v14404_v43 }
 0x9e3   :  { %13856 = vmatmul.mubr.bf16.vlgmr.msra.gmra.mrb[92].mxu0 %v16308_v49 }
 0x9e4   :  { %13859 = vmatprep.mubr.msk.bf16.mxu0 %vm15762_vm0, %v15761_v0 }
 0x9eb   :  { %13860 = vmatmul.mubr.bf16.gmra.mrb[96].mxu0 %v16326_v60 }
 0x9ec   :  { %13863 = vmatprep.mubr.msk.bf16.mxu0 %vm15762_vm0, %v15761_v0 }
 0x9f3   :  { %13864 = vmatmul.mubr.bf16.gmra.mrb[100].mxu0 %v16343_v3 }
 0xa36   :  { %v2685_v10 = vpop.f32.mrb[64].mxu1 }
 0xa37   :  { %v13781_v61 = vpop.f32.mrb[65].mxu1 }
 0xa38   :  { %v2688_v9 = vpop.f32.mrb[66].mxu1 }
 0xa39   :  { %v13782_v23 = vpop.f32.mrb[67].mxu1 }
 0xa3e   :  { %v2929_v52 = vpop.f32.mrb[68].mxu1 }
 0xa3f   :  { %v13829_v31 = vpop.f32.mrb[69].mxu1  ;;  %v2930_v1 = vadd.f32 %v12089_v8, %v2929_v52 }
 0xa40   :  { %v2932_v15 = vpop.f32.mrb[70].mxu1 }
 0xa41   :  { %v2933_v54 = vadd.f32 %v12089_v8, %v2932_v15  ;;  %v13830_v53 = vpop.f32.mrb[71].mxu1 }
 0xa42   :  { %v12114_v53 = vld [vmem:[#allocation13 + $0x2] ss:$0 sm:$0xff] }
 0xa43   :  { %v14171_v16 = vpack.c.bf16 %v2933_v54, %v2930_v1 }
 0xa45   :  { %14173 = vmatprep.subr.msk.bf16.mxu1 %vm16372_vm2, %v14171_v16 }
 0xa46   :  { %v2937_v63 = vpop.f32.mrb[72].mxu1 }
 0xa47   :  { %v2938_v62 = vadd.f32 %v12089_v8, %v2937_v63  ;;  %v13833_v38 = vpop.f32.mrb[73].mxu1 }
 0xa48   :  { %v2940_v13 = vpop.f32.mrb[74].mxu1 }
 0xa49   :  { %v2941_v17 = vadd.f32 %v12089_v8, %v2940_v13  ;;  %v13834_v56 = vpop.f32.mrb[75].mxu1 }
 0xa4b   :  { %v14177_v51 = vpack.c.bf16 %v2941_v17, %v2938_v62 }
 0xa4e   :  { %v2945_v21 = vpop.f32.mrb[76].mxu1 }
 0xa4f   :  { %v2946_v6 = vadd.f32 %v12089_v8, %v2945_v21  ;;  %v13837_v58 = vpop.f32.mrb[77].mxu1 }
 0xa50   :  { %v2948_v45 = vpop.f32.mrb[78].mxu1 }
 0xa51   :  { %v2949_v36 = vadd.f32 %v12089_v8, %v2948_v45  ;;  %v13838_v57 = vpop.f32.mrb[79].mxu1 }
 0xa53   :  { %v14183_v2 = vpack.c.bf16 %v2949_v36, %v2946_v6 }
 0xa76   :  { %v2591_v7 = vpop.f32.mrb[68].mxu0 }
 0xa77   :  { %v17034_v28 = vadd.f32 %v16943_v44, %v2591_v7  ;;  %v13757_v35 = vpop.f32.mrb[69].mxu0 }
 0xa78   :  { %v2594_v12 = vpop.f32.mrb[70].mxu0 }
 0xa79   :  { %v17037_v4 = vadd.f32 %v16947_v39, %v2594_v12  ;;  %v13758_v47 = vpop.f32.mrb[71].mxu0 }
 0xa7e   :  { %v2599_v48 = vpop.f32.mrb[72].mxu0 }
 0xa7f   :  { %v17040_v19 = vadd.f32 %v16958_v55, %v2599_v48  ;;  %v13761_v22 = vpop.f32.mrb[73].mxu0 }
 0xa80   :  { %v2602_v30 = vpop.f32.mrb[74].mxu0 }
 0xa81   :  { %v17043_v59 = vadd.f32 %v16962_v42, %v2602_v30  ;;  %v13762_v32 = vpop.f32.mrb[75].mxu0 }
 0xa86   :  { %v2607_v46 = vpop.f32.mrb[76].mxu0 }
 0xa87   :  { %v17045_v5 = vadd.f32 %v2685_v10, %v2607_v46  ;;  %v13765_v44 = vpop.f32.mrb[77].mxu0 }
 0xa88   :  { %v2610_v41 = vpop.f32.mrb[78].mxu0 }
 0xa89   :  { %v17047_v37 = vadd.f32 %v2688_v9, %v2610_v41  ;;  %v13766_v39 = vpop.f32.mrb[79].mxu0 }
 0xa96   :  { %v2799_v50 = vpop.f32.mrb[80].mxu0 }
 0xa97   :  { %v2800_v34 = vadd.f32 %v12064_v11, %v2799_v50  ;;  %v13801_v40 = vpop.f32.mrb[81].mxu0 }
 0xa98   :  { %v2802_v55 = vpop.f32.mrb[82].mxu0 }
 0xa99   :  { %v2803_v33 = vadd.f32 %v12064_v11, %v2802_v55  ;;  %v13802_v27 = vpop.f32.mrb[83].mxu0  ;;  %13869 = vmatprep.mubr.msk.f32.mxu1 %vm353_vm1, %v2800_v34 }
 0xa9b   :  { %13870 = vmatmul.mubr.msk.f32.vlgmr.msra.gmra.mrb[54].mxu1 %vm353_vm1, %v2803_v33 }
 0xa9c   :  { %14176 = vmatpush3.bf16.xpose.msk.msra.mxu1 %vm16372_vm2, %v14171_v16 }
 0xa9d   :  { %14179 = vmatprep.subr.msk.bf16.mxu1 %vm16372_vm2, %v14177_v51 }
 0xa9e   :  { %v2807_v42 = vpop.f32.mrb[84].mxu0 }
 0xa9f   :  { %v2808_v43 = vadd.f32 %v12064_v11, %v2807_v42  ;;  %v13805_v10 = vpop.f32.mrb[85].mxu0 }
 0xaa0   :  { %v2810_v61 = vpop.f32.mrb[86].mxu0 }
 0xaa1   :  { %v2811_v9 = vadd.f32 %v12064_v11, %v2810_v61  ;;  %v13806_v23 = vpop.f32.mrb[87].mxu0  ;;  %13872 = vmatprep.mubr.msk.f32.mxu1 %vm353_vm1, %v2808_v43 }
 0xaa3   :  { %13873 = vmatmul.mubr.msk.f32.gmra.mrb[80].mxu1 %vm353_vm1, %v2811_v9 }
 0xaa4   :  { %14182 = vmatpush3.bf16.xpose.msk.msra.mxu1 %vm16372_vm2, %v14177_v51 }
 0xaa5   :  { %14185 = vmatprep.subr.msk.bf16.mxu1 %vm16372_vm2, %v14183_v2 }
 0xaa6   :  { %v2815_v8 = vpop.f32.mrb[88].mxu0 }
 0xaa7   :  { %v2816_v52 = vadd.f32 %v12064_v11, %v2815_v8  ;;  %v13809_v31 = vpop.f32.mrb[89].mxu0 }
 0xaa8   :  { %v2818_v15 = vpop.f32.mrb[90].mxu0 }
 0xaa9   :  { %v2819_v1 = vadd.f32 %v12064_v11, %v2818_v15  ;;  %v13810_v54 = vpop.f32.mrb[91].mxu0  ;;  %13875 = vmatprep.mubr.msk.f32.mxu1 %vm353_vm1, %v2816_v52  ;;  %v17101_v15 = vld [vmem:[%s18030_s11 + $0x8] sm:$0xff] }
 0xaab   :  { %13876 = vmatmul.mubr.msk.f32.gmra.mrb[82].mxu1 %vm353_vm1, %v2819_v1 }
 0xaac   :  { %14188 = vmatpush3.bf16.xpose.msk.msra.mxu1 %vm16372_vm2, %v14183_v2  ;;  %13890 = vmatprep.mubr.msk.f32.mxu1 %vm353_vm1, %v2800_v34 }
 0xaad   :  { %13931 = vmatprep.subr.bf16.mxu1 %v15761_v0 }
 0xab3   :  { %13891 = vmatmul.mubr.msk.f32.vlgmr.msra.gmra.mrb[84].mxu1 %vm353_vm1, %v2803_v33 }
 0xab4   :  { %13893 = vmatprep.mubr.msk.f32.mxu1 %vm353_vm1, %v2808_v43 }
 0xab6   :  { %v3059_v16 = vpop.f32.mrb[92].mxu0 }
 0xab7   :  { %13894 = vmatmul.mubr.msk.f32.gmra.mrb[86].mxu1 %vm353_vm1, %v2811_v9  ;;  %v13857_v63 = vpop.f32.mrb[93].mxu0  ;;  %v3060_v38 = vadd.f32 %v12114_v53, %v3059_v16 }
 0xab8   :  { %13896 = vmatprep.mubr.msk.f32.mxu1 %vm353_vm1, %v2816_v52  ;;  %v3062_v62 = vpop.f32.mrb[94].mxu0 }
 0xab9   :  { %v3063_v13 = vadd.f32 %v12114_v53, %v3062_v62  ;;  %v13858_v17 = vpop.f32.mrb[95].mxu0  ;;  %v17108_v62 = vld [vmem:[%s18030_s11] sm:$0xff] }
 0xabb   :  { %v14189_v56 = vpack.c.bf16 %v3063_v13, %v3060_v38  ;;  %13897 = vmatmul.mubr.msk.f32.gmra.mrb[88].mxu1 %vm353_vm1, %v2819_v1 }
 0xabc   :  { %13935 = vmatprep.mubr.msk.bf16.mxu1 %vm15762_vm0, %v15761_v0 }
 0xabd   :  { %14190 = vmatprep.subr.bf16.mxu0 %v14189_v56 }
 0xabe   :  { %v3067_v51 = vpop.f32.mrb[96].mxu0  ;;  %14192 = vmatpush3.bf16.msra.mxu0 %v14189_v56 }
 0xabf   :  { %v13861_v21 = vpop.f32.mrb[97].mxu0  ;;  %v3068_v58 = vadd.f32 %v12114_v53, %v3067_v51 }
 0xac0   :  { %v3070_v6 = vpop.f32.mrb[98].mxu0  ;;  %v17115_v21 = vld [vmem:[%s18030_s11 + $0x18] sm:$0xff] }
 0xac1   :  { %v3071_v45 = vadd.f32 %v12114_v53, %v3070_v6  ;;  %v13862_v36 = vpop.f32.mrb[99].mxu0 }
 0xac2   :  { %v17122_v36 = vld [vmem:[%s18030_s11 + $0x10] sm:$0xff] }
 0xac3   :  { %v14193_v57 = vpack.c.bf16 %v3071_v45, %v3068_v58 }
 0xac5   :  { %14194 = vmatprep.subr.bf16.mxu0 %v14193_v57 }
 0xac6   :  { %v3075_v2 = vpop.f32.mrb[100].mxu0  ;;  %14196 = vmatpush3.bf16.msra.mxu0 %v14193_v57 }
 0xac7   :  { %v13865_v7 = vpop.f32.mrb[101].mxu0  ;;  %v3076_v12 = vadd.f32 %v12114_v53, %v3075_v2 }
 0xac8   :  { %v3078_v35 = vpop.f32.mrb[102].mxu0 }
 0xac9   :  { %v3079_v47 = vadd.f32 %v12114_v53, %v3078_v35  ;;  %v13866_v48 = vpop.f32.mrb[103].mxu0  ;;  %v17129_v35 = vld [vmem:[%s18030_s11 + $0x20] sm:$0xff] }
 0xaca   :  { %v17136_v48 = vld [vmem:[%s18030_s11 + $0x28] sm:$0xff] }
 0xacb   :  { %v14197_v22 = vpack.c.bf16 %v3079_v47, %v3076_v12 }
 0xacd   :  { %14198 = vmatprep.subr.bf16.mxu0 %v14197_v22 }
 0xace   :  { %14200 = vmatpush3.bf16.msra.mxu0 %v14197_v22 }
 0xb6e   :  { %v13871_v30 = vpop.f32.mrb[54].mxu1 }
 0xb6f   :  { %v17074_v32 = vmul.f32 0.17677669, %v13871_v30  ;;  %v3171_v46 = vpop.f32.mrb[55].mxu1 }
 0xb70   :  { %v17076_v44 = vmul.f32 0.17677669, %v3171_v46  ;;  %v17146_v46 = vld [vmem:[%s18031_s20 + $0x10] sm:$0x3f] }
 0xb71   :  { %v3334_v41 = vsel %vm1154_vm3, %v17074_v32, -inf  ;;  %13920 = vmatprep.subr.msk.mxu0 %vm1408_vm5, %v17146_v46 }
 0xb72   :  { %3335 = vmax.xlane.f32.xlu0 %v3334_v41  ;;  %v3331_v39 = vsel %vm1154_vm3, %v17076_v44, -inf }
 0xb76   :  { %3332 = vmax.xlane.f32.xlu0 %v3331_v39  ;;  %v13874_v11 = vpop.f32.mrb[80].mxu1 }
 0xb77   :  { %v17082_v50 = vmul.f32 0.17677669, %v13874_v11  ;;  %v3181_v34 = vpop.f32.mrb[81].mxu1 }
 0xb78   :  { %v17084_v40 = vmul.f32 0.17677669, %v3181_v34 }
 0xb79   :  { %v3340_v55 = vsel %vm1154_vm3, %v17082_v50, -inf }
 0xb7a   :  { %3341 = vmax.xlane.f32.xlu0 %v3340_v55  ;;  %v3337_v33 = vsel %vm1154_vm3, %v17084_v40, -inf }
 0xb7e   :  { %3338 = vmax.xlane.f32.xlu0 %v3337_v33  ;;  %v13877_v27 = vpop.f32.mrb[82].mxu1 }
 0xb7f   :  { %v3191_v42 = vpop.f32.mrb[83].mxu1  ;;  %v17092_v10 = vmul.f32 0.17677669, %v13877_v27 }
 0xb80   :  { %v17090_v43 = vmul.f32 0.17677669, %v3191_v42 }
 0xb81   :  { %v3346_v23 = vsel %vm1154_vm3, %v17092_v10, -inf }
 0xb82   :  { %v3343_v61 = vsel %vm1154_vm3, %v17090_v43, -inf }
 0xb83   :  { %3344 = vmax.xlane.f32.xlu0 %v3343_v61 }
 0xb86   :  { %v13892_v9 = vpop.f32.mrb[84].mxu1 }
 0xb87   :  { %v3320_v8 = vmul.f32 0.17677669, %v13892_v9  ;;  %v3290_v52 = vpop.f32.mrb[85].mxu1  ;;  %3347 = vmax.xlane.f32.xlu0 %v3346_v23 }
 0xb88   :  { %v3319_v31 = vmul.f32 0.17677669, %v3290_v52 }
 0xb89   :  { %v3326_v1 = vadd.f32 %v17101_v15, %v3320_v8 }
 0xb8a   :  { %v13895_v54 = vpop.f32.mrb[86].mxu1  ;;  %v3325_v38 = vadd.f32 %v17108_v62, %v3319_v31 }
 0xb8b   :  { %v3322_v53 = vmul.f32 0.17677669, %v13895_v54  ;;  %v3300_v16 = vpop.f32.mrb[87].mxu1  ;;  %v3352_v63 = vsel %vm1173_vm4, %v3326_v1, -inf }
 0xb8c   :  { %3353 = vmax.xlane.f32.xlu1 %v3352_v63  ;;  %v3321_v17 = vmul.f32 0.17677669, %v3300_v16  ;;  %v3349_v51 = vsel %vm1173_vm4, %v3325_v38, -inf }
 0xb8d   :  { %v3328_v6 = vadd.f32 %v17115_v21, %v3322_v53 }
 0xb8e   :  { %v13898_v13 = vpop.f32.mrb[88].mxu1  ;;  %v3327_v57 = vadd.f32 %v17122_v36, %v3321_v17 }
 0xb8f   :  { %v3310_v56 = vpop.f32.mrb[89].mxu1  ;;  %v3358_v45 = vsel %vm1173_vm4, %v3328_v6, -inf  ;;  %v3324_v2 = vmul.f32 0.17677669, %v13898_v13 }
 0xb90   :  { %3350 = vmax.xlane.f32.xlu1 %v3349_v51  ;;  %v3323_v58 = vmul.f32 0.17677669, %v3310_v56  ;;  %v3355_v7 = vsel %vm1173_vm4, %v3327_v57, -inf }
 0xb91   :  { %v17139_v22 = vadd.f32 %v17136_v48, %v3324_v2 }
 0xb92   :  { %v3329_v12 = vadd.f32 %v17129_v35, %v3323_v58 }
 0xb93   :  { %v3364_v30 = vsel %vm1173_vm4, %v17139_v22, -inf }
 0xb94   :  { %3359 = vmax.xlane.f32.xlu1 %v3358_v45  ;;  %v3361_v47 = vsel %vm1173_vm4, %v3329_v12, -inf }
 0xb98   :  { %3356 = vmax.xlane.f32.xlu1 %v3355_v7 }
 0xb9c   :  { %3362 = vmax.xlane.f32.xlu1 %v3361_v47 }
 0xba0   :  { %3365 = vmax.xlane.f32.xlu1 %v3364_v30 }
 0xbff   :  { %v3336_v41 = vpop.xlane.xlu0 %3335 }
 0xc03   :  { %v3333_v39 = vpop.xlane.xlu0 %3332 }
 0xc07   :  { %v3342_v55 = vpop.xlane.xlu0 %3341 }
 0xc0b   :  { %v3339_v31 = vpop.xlane.xlu0 %3338 }
 0xc10   :  { %v3345_v58 = vpop.xlane.xlu0 %3344 }
 0xc19   :  { %v3354_v11 = vpop.xlane.xlu1 %3353 }
 0xc1a   :  { %v3368_v34 = vmax.f32 %v3336_v41, %v3354_v11  ;;  %v3348_v11 = vpop.xlane.xlu0 %3347 }
 0xc1c   :  { %v3374_v33 = vsub.f32 %v17074_v32, %v3368_v34  ;;  %v3392_v27 = vsub.f32 %v3326_v1, %v3368_v34 }
 0xc1d   :  { %v3351_v42 = vpop.xlane.xlu1 %3350 }
 0xc1e   :  { %v3381_v61 = vmul.f32 1.442695, %v3374_v33  ;;  %v3399_v9 = vmul.f32 1.442695, %v3392_v27  ;;  %v3367_v23 = vmax.f32 %v3333_v39, %v3351_v42 }
 0xc20   :  { %15133 = vpow2.f32 %v3381_v61  ;;  %v3373_v8 = vsub.f32 %v17076_v44, %v3367_v23  ;;  %v3391_v52 = vsub.f32 %v3325_v38, %v3367_v23 }
 0xc21   :  { %v3360_v54 = vpop.xlane.xlu1 %3359  ;;  %15135 = vpow2.f32 %v3399_v9 }
 0xc22   :  { %v3379_v53 = vmul.f32 1.442695, %v3373_v8  ;;  %v3397_v16 = vmul.f32 1.442695, %v3391_v52  ;;  %v3370_v63 = vmax.f32 %v3342_v55, %v3360_v54 }
 0xc24   :  { %15137 = vpow2.f32 %v3379_v53  ;;  %v3376_v13 = vsub.f32 %v17082_v50, %v3370_v63  ;;  %v3394_v17 = vsub.f32 %v3328_v6, %v3370_v63 }
 0xc25   :  { %15139 = vpow2.f32 %v3397_v16  ;;  %v3357_v32 = vpop.xlane.xlu1 %3356 }
 0xc26   :  { %v3385_v1 = vmul.f32 1.442695, %v3376_v13  ;;  %v3403_v56 = vmul.f32 1.442695, %v3394_v17  ;;  %v3369_v51 = vmax.f32 %v3339_v31, %v3357_v32 }
 0xc28   :  { %15141 = vpow2.f32 %v3385_v1  ;;  %v3375_v44 = vsub.f32 %v17084_v40, %v3369_v51  ;;  %v3393_v38 = vsub.f32 %v3327_v57, %v3369_v51  ;;  %v14405_v51 = vld [vmem:[%s18026_s22 + $0xc0] sm:$0xff]  }
 0xc29   :  { %v3363_v45 = vpop.xlane.xlu1 %3362  ;;  %15143 = vpow2.f32 %v3403_v56 }
 0xc2a   :  { %v17154_v2 = vpop.eup %15133  ;;  %v3383_v7 = vmul.f32 1.442695, %v3375_v44  ;;  %v3401_v47 = vmul.f32 1.442695, %v3393_v38  ;;  %v3371_v30 = vmax.f32 %v3345_v58, %v3363_v45  ;;  %v14406_v38 = vld [vmem:[%s18026_s22 + $0xc8] sm:$0xff]   ;;  %v14407_v45 = vld [vmem:[%s18026_s22 + $0xd0] sm:$0xff]  }
 0xc2b   :  { %v3412_v50 = vsel %vm1154_vm3, %v17154_v2, 0.0  ;;  %v15136_v6 = vpop.eup %15135 }
 0xc2c   :  { %15145 = vpow2.f32 %v3383_v7  ;;  %v3377_v41 = vsub.f32 %v17090_v43, %v3371_v30  ;;  %v3395_v39 = vsub.f32 %v3329_v12, %v3371_v30  ;;  %3413 = vadd.xlane.f32.xlu1 %v3412_v50  ;;  %v3430_v42 = vsel %vm1173_vm4, %v15136_v6, 0.0  ;;  %v14409_v7 = vld [vmem:[%s18026_s22 + $0xe0] sm:$0xff]   ;;  %v14411_v50 = vld [vmem:[%s18026_s22 + $0xf0] sm:$0xff]  }
 0xc2d   :  { %15147 = vpow2.f32 %v3401_v47  ;;  %v3366_v40 = vpop.xlane.xlu1 %3365  ;;  %v14410_v47 = vld [vmem:[%s18026_s22 + $0xe8] sm:$0xff]  }
 0xc2e   :  { %v15138_v57 = vpop.eup %15137  ;;  %v3405_v34 = vmul.f32 1.442695, %v3395_v39  ;;  %v3372_v55 = vmax.f32 %v3348_v11, %v3366_v40  ;;  %v3387_v27 = vmul.f32 1.442695, %v3377_v41  ;;  %v14413_v30 = vld [vmem:[#allocation14 + $0x20] sm:$0xff]   ;;  %v14414_v41 = vld [vmem:[#allocation14 + $0x28] sm:$0xff]  }
 0xc2f   :  { %v15140_v33 = vpop.eup %15139  ;;  %v3409_v61 = vsel %vm1154_vm3, %v15138_v57, 0.0  ;;  %13932 = vmatpush3.bf16.msra.mxu1 %v14413_v30  ;;  %v12237_v39 = vld [vmem:[%s17974_s12 + $0x18] sm:$0x3f] }
 0xc30   :  { %v3378_v9 = vsub.f32 %v17092_v10, %v3372_v55  ;;  %v3396_v23 = vsub.f32 %v17139_v22, %v3372_v55  ;;  %13911 = vmatprep.mubr.msk.f32.mxu0 %vm1173_vm4, %v15140_v33  ;;  %3431 = vadd.xlane.f32.xlu1 %v3430_v42  ;;  %15149 = vpow2.f32 %v3405_v34  ;;  %v3427_v22 = vsel %vm1173_vm4, %v15140_v33, 0.0 }
 0xc31   :  { %3410 = vadd.xlane.f32.xlu0 %v3409_v61  ;;  %13912 = vmatmul.mubr.msk.f32.vlgmr.msra.gmra.mrb[66].mxu0 %vm1173_vm4, %v15136_v6  ;;  %15151 = vpow2.f32 %v3387_v27  ;;  %v14412_v6 = vld [vmem:[%s18026_s22 + $0xf8] sm:$0xff]  }
 0xc32   :  { %v15142_v43 = vpop.eup %15141  ;;  %v3389_v12 = vmul.f32 1.442695, %v3378_v9  ;;  %v3407_v8 = vmul.f32 1.442695, %v3396_v23  ;;  %13921 = vmatpush3.msk.msra.mxu0 %vm1408_vm5, %v17146_v46  ;;  %13933 = vmatprep.subr.bf16.mxu1 %v15761_v0 }
 0xc33   :  { %v3418_v52 = vsel %vm1154_vm3, %v15142_v43, 0.0  ;;  %13975 = vmatprep.subr.bf16.mxu0 %v15761_v0  ;;  %v15144_v10 = vpop.eup %15143  ;;  %13934 = vmatpush3.bf16.msra.mxu1 %v14414_v41 }
 0xc34   :  { %15153 = vpow2.f32 %v3389_v12  ;;  %3419 = vadd.xlane.f32.xlu1 %v3418_v52  ;;  %v3436_v53 = vsel %vm1173_vm4, %v15144_v10, 0.0  ;;  %13947 = vmatprep.subr.bf16.mxu1 %v15761_v0 }
 0xc35   :  { %15155 = vpow2.f32 %v3407_v8  ;;  %3428 = vadd.xlane.f32.xlu0 %v3427_v22 }
 0xc36   :  { %v15146_v31 = vpop.eup %15145 }
 0xc37   :  { %v15148_v54 = vpop.eup %15147  ;;  %v3415_v16 = vsel %vm1154_vm3, %v15146_v31, 0.0 }
 0xc38   :  { %13914 = vmatprep.mubr.msk.f32.mxu0 %vm1173_vm4, %v15148_v54  ;;  %3437 = vadd.xlane.f32.xlu1 %v3436_v53  ;;  %v3433_v63 = vsel %vm1173_vm4, %v15148_v54, 0.0 }
 0xc39   :  { %3416 = vadd.xlane.f32.xlu0 %v3415_v16  ;;  %13915 = vmatmul.mubr.msk.f32.gmra.mrb[104].mxu0 %vm1173_vm4, %v15144_v10 }
 0xc3a   :  { %v15150_v46 = vpop.eup %15149 }
 0xc3b   :  { %13917 = vmatprep.mubr.msk.f32.mxu0 %vm1173_vm4, %v15150_v46  ;;  %v15152_v13 = vpop.eup %15151  ;;  %v3439_v44 = vsel %vm1173_vm4, %v15150_v46, 0.0 }
 0xc3c   :  { %v3421_v56 = vsel %vm1154_vm3, %v15152_v13, 0.0 }
 0xc3d   :  { %3434 = vadd.xlane.f32.xlu0 %v3433_v63 }
 0xc3e   :  { %v15154_v17 = vpop.eup %15153 }
 0xc3f   :  { %v15156_v32 = vpop.eup %15155  ;;  %v3424_v1 = vsel %vm1154_vm3, %v15154_v17, 0.0 }
 0xc40   :  { %13918 = vmatmul.mubr.msk.f32.gmra.mrb[106].mxu0 %vm1173_vm4, %v15156_v32  ;;  %3425 = vadd.xlane.f32.xlu1 %v3424_v1  ;;  %v3442_v58 = vsel %vm1173_vm4, %v15156_v32, 0.0 }
 0xc41   :  { %3422 = vadd.xlane.f32.xlu0 %v3421_v56  ;;  %13922 = vmatprep.mubr.msk.f32.mxu0 %vm1154_vm3, %v15138_v57 }
 0xc44   :  { %13923 = vmatmul.mubr.msk.f32.vlgmr.msra.gmra.mrb[66].mxu0 %vm1154_vm3, %v17154_v2  ;;  %3443 = vadd.xlane.f32.xlu1 %v3442_v58  ;;  %v14408_v2 = vld [vmem:[%s18026_s22 + $0xd8] sm:$0xff]  }
 0xc45   :  { %13976 = vmatpush3.bf16.msra.mxu0 %v14405_v51  ;;  %3440 = vadd.xlane.f32.xlu0 %v3439_v44 }
 0xc46   :  { %13925 = vmatprep.mubr.msk.f32.mxu0 %vm1154_vm3, %v15146_v31  ;;  %13977 = vmatprep.subr.bf16.mxu0 %v15761_v0 }
 0xc48   :  { %13926 = vmatmul.mubr.msk.f32.gmra.mrb[104].mxu0 %vm1154_vm3, %v15142_v43 }
 0xc49   :  { %13978 = vmatpush3.bf16.msra.mxu0 %v14406_v38  ;;  %13928 = vmatprep.mubr.msk.f32.mxu0 %vm1154_vm3, %v15152_v13 }
 0xc4a   :  { %13979 = vmatprep.subr.bf16.mxu0 %v15761_v0 }
 0xc4c   :  { %13929 = vmatmul.mubr.msk.f32.gmra.mrb[106].mxu0 %vm1154_vm3, %v15154_v17  ;;  %v14415_v17 = vld [vmem:[%s18025_s29 + $0xc0] sm:$0xff]  }
 0xc4d   :  { %13980 = vmatpush3.bf16.msra.mxu0 %v14407_v45  ;;  %13991 = vmatprep.mubr.msk.bf16.mxu0 %vm15762_vm0, %v15761_v0  ;;  %v14416_v45 = vld [vmem:[%s18025_s29 + $0xc8] sm:$0xff]  }
 0xc4e   :  { %13981 = vmatprep.subr.bf16.mxu0 %v15761_v0 }
 0xc51   :  { %13982 = vmatpush3.bf16.msra.mxu0 %v14408_v2 }
 0xc52   :  { %13983 = vmatprep.subr.bf16.mxu0 %v15761_v0 }
 0xc55   :  { %13984 = vmatpush3.bf16.msra.mxu0 %v14409_v7 }
 0xc56   :  { %13985 = vmatprep.subr.bf16.mxu0 %v15761_v0 }
 0xc59   :  { %13986 = vmatpush3.bf16.msra.mxu0 %v14410_v47 }
 0xc5a   :  { %13987 = vmatprep.subr.bf16.mxu0 %v15761_v0 }
 0xc5d   :  { %13988 = vmatpush3.bf16.msra.mxu0 %v14411_v50 }
 0xc5e   :  { %13989 = vmatprep.subr.bf16.mxu0 %v15761_v0 }
 0xc61   :  { %13990 = vmatpush3.bf16.msra.mxu0 %v14412_v6 }
 0xc62   :  { %14031 = vmatprep.subr.msk.mxu0 %vm353_vm1, %v12237_v39 }
 0xc64   :  { %13992 = vmatmul.mubr.bf16.vlgmr.msra.gmra.mrb[108].mxu0 %v16308_v49 }
 0xc65   :  { %13995 = vmatprep.mubr.msk.bf16.mxu0 %vm15762_vm0, %v15761_v0 }
 0xc6a   :  { %14032 = vmatpush3.xpose.msk.msra.mxu0 %vm353_vm1, %v12237_v39  ;;  %v14417_v39 = vld [vmem:[%s18025_s29 + $0xd0] sm:$0xff]  }
 0xc6c   :  { %13996 = vmatmul.mubr.bf16.gmra.mrb[112].mxu0 %v16326_v60 }
 0xc6d   :  { %13999 = vmatprep.mubr.msk.bf16.mxu0 %vm15762_vm0, %v15761_v0 }
 0xc74   :  { %14000 = vmatmul.mubr.bf16.gmra.mrb[116].mxu0 %v16343_v3 }
 0xcb9   :  { %v3414_v40 = vpop.xlane.xlu1 %3413 }
 0xcbd   :  { %v3432_v34 = vpop.xlane.xlu1 %3431 }
 0xcbe   :  { %v3411_v11 = vpop.xlane.xlu0 %3410  ;;  %v3446_v9 = vadd.f32 %v3432_v34, %v3414_v40  ;;  %v14418_v40 = vld [vmem:[%s18025_s29 + $0xd8] sm:$0xff]   ;;  %v14420_v34 = vld [vmem:[%s18025_s29 + $0xe8] sm:$0xff]  }
 0xcc0   :  { %15157 = vrcp.f32 %v3446_v9 }
 0xcc1   :  { %v3420_v33 = vpop.xlane.xlu1 %3419 }
 0xcc2   :  { %v3429_v57 = vpop.xlane.xlu0 %3428 }
 0xcc3   :  { %v3445_v43 = vadd.f32 %v3429_v57, %v3411_v11  ;;  %v14419_v57 = vld [vmem:[%s18025_s29 + $0xe0] sm:$0xff]  }
 0xcc5   :  { %v3438_v42 = vpop.xlane.xlu1 %3437  ;;  %15159 = vrcp.f32 %v3445_v43 }
 0xcc6   :  { %v3417_v55 = vpop.xlane.xlu0 %3416  ;;  %v3448_v12 = vadd.f32 %v3438_v42, %v3420_v33  ;;  %v14422_v33 = vld [vmem:[%s18025_s29 + $0xf8] sm:$0xff]  }
 0xcc8   :  { %15161 = vrcp.f32 %v3448_v12 }
 0xcca   :  { %v3435_v27 = vpop.xlane.xlu0 %3434  ;;  %v15158_v54 = vpop.eup %15157 }
 0xccb   :  { %v3447_v8 = vadd.f32 %v3435_v27, %v3417_v55  ;;  %v14421_v55 = vld [vmem:[%s18025_s29 + $0xf0] sm:$0xff]   ;;  %v12203_v27 = vld [vmem:[#allocation11 + $0x3] ss:$0 sm:$0xff] }
 0xccd   :  { %v3426_v61 = vpop.xlane.xlu1 %3425  ;;  %15163 = vrcp.f32 %v3447_v8  ;;  %v14423_v8 = vld [vmem:[%s18027_s26 + $0xc0] sm:$0xff]  }
 0xcce   :  { %v3423_v23 = vpop.xlane.xlu0 %3422 }
 0xccf   :  { %v15160_v16 = vpop.eup %15159 }
 0xcd1   :  { %v3444_v52 = vpop.xlane.xlu1 %3443 }
 0xcd2   :  { %v3441_v10 = vpop.xlane.xlu0 %3440  ;;  %v3450_v22 = vadd.f32 %v3444_v52, %v3426_v61  ;;  %v15162_v32 = vpop.eup %15161 }
 0xcd3   :  { %v3449_v31 = vadd.f32 %v3441_v10, %v3423_v23  ;;  %v14424_v10 = vld [vmem:[%s18027_s26 + $0xc8] sm:$0xff]  }
 0xcd4   :  { %15165 = vrcp.f32 %v3450_v22 }
 0xcd5   :  { %15167 = vrcp.f32 %v3449_v31 }
 0xcd7   :  { %v15164_v51 = vpop.eup %15163 }
 0xcde   :  { %v15166_v2 = vpop.eup %15165 }
 0xcdf   :  { %v15168_v30 = vpop.eup %15167 }
 0xd17   :  { %v13924_v53 = vpop.f32.mrb[66].mxu0 }
 0xd18   :  { %v3685_v46 = vmul.f32 %v15158_v54, %v13924_v53  ;;  %v3653_v63 = vpop.f32.mrb[67].mxu0 }
 0xd19   :  { %v3683_v13 = vmul.f32 %v15160_v16, %v3653_v63  ;;  %v14425_v63 = vld [vmem:[%s18027_s26 + $0xd0] sm:$0xff]  }
 0xd1b   :  { %v3694_v1 = vpack.c.bf16 %v3685_v46, %v3683_v13  ;;  %v13927_v56 = vpop.f32.mrb[104].mxu0 }
 0xd1c   :  { %v3689_v58 = vmul.f32 %v15162_v32, %v13927_v56  ;;  %v3663_v44 = vpop.f32.mrb[105].mxu0 }
 0xd1d   :  { %v3687_v38 = vmul.f32 %v15164_v51, %v3663_v44  ;;  %13936 = vmatmul.mubr.msk.bf16.vlgmr.msra.gmra.mrb[92].mxu1 %vm353_vm1, %v3694_v1 }
 0xd1e   :  { %13948 = vmatpush3.bf16.msra.mxu1 %v14415_v17  ;;  %13939 = vmatprep.mubr.msk.bf16.mxu1 %vm15762_vm0, %v15761_v0  ;;  %v14426_v17 = vld [vmem:[%s18027_s26 + $0xd8] sm:$0xff]  }
 0xd1f   :  { %v3695_v7 = vpack.c.bf16 %v3689_v58, %v3687_v38  ;;  %v13930_v47 = vpop.f32.mrb[106].mxu0  ;;  %13949 = vmatprep.subr.bf16.mxu1 %v15761_v0  ;;  %v14427_v38 = vld [vmem:[%s18027_s26 + $0xe0] sm:$0xff]  }
 0xd20   :  { %v3693_v50 = vmul.f32 %v15166_v2, %v13930_v47  ;;  %v3673_v6 = vpop.f32.mrb[107].mxu0  ;;  %v14428_v2 = vld [vmem:[%s18027_s26 + $0xe8] sm:$0xff]   ;;  %v14430_v47 = vld [vmem:[%s18027_s26 + $0xf8] sm:$0xff]  }
 0xd21   :  { %v3691_v41 = vmul.f32 %v15168_v30, %v3673_v6 }
 0xd22   :  { %13950 = vmatpush3.bf16.msra.mxu1 %v14416_v45 }
 0xd23   :  { %v3696_v11 = vpack.c.bf16 %v3693_v50, %v3691_v41  ;;  %13951 = vmatprep.subr.bf16.mxu1 %v15761_v0 }
 0xd25   :  { %13940 = vmatmul.mubr.msk.bf16.gmra.mrb[96].mxu1 %vm353_vm1, %v3695_v7  ;;  %v14429_v7 = vld [vmem:[%s18027_s26 + $0xf0] sm:$0xff]  }
 0xd26   :  { %13952 = vmatpush3.bf16.msra.mxu1 %v14417_v39  ;;  %13943 = vmatprep.mubr.msk.bf16.mxu1 %vm15762_vm0, %v15761_v0 }
 0xd27   :  { %13953 = vmatprep.subr.bf16.mxu1 %v15761_v0 }
 0xd2a   :  { %13954 = vmatpush3.bf16.msra.mxu1 %v14418_v40 }
 0xd2b   :  { %13955 = vmatprep.subr.bf16.mxu1 %v15761_v0 }
 0xd2d   :  { %13944 = vmatmul.mubr.msk.bf16.gmra.mrb[100].mxu1 %vm353_vm1, %v3696_v11 }
 0xd2e   :  { %13956 = vmatpush3.bf16.msra.mxu1 %v14419_v57  ;;  %13963 = vmatprep.mubr.msk.bf16.mxu1 %vm15762_vm0, %v15761_v0 }
 0xd2f   :  { %13957 = vmatprep.subr.bf16.mxu1 %v15761_v0 }
 0xd32   :  { %13958 = vmatpush3.bf16.msra.mxu1 %v14420_v34 }
 0xd33   :  { %13959 = vmatprep.subr.bf16.mxu1 %v15761_v0 }
 0xd36   :  { %13960 = vmatpush3.bf16.msra.mxu1 %v14421_v55 }
 0xd37   :  { %v4023_v42 = vpop.f32.mrb[108].mxu0  ;;  %13961 = vmatprep.subr.bf16.mxu1 %v15761_v0 }
 0xd38   :  { %v13993_v61 = vpop.f32.mrb[109].mxu0  ;;  %v4024_v23 = vadd.f32 %v12203_v27, %v4023_v42 }
 0xd39   :  { %v4026_v9 = vpop.f32.mrb[110].mxu0  ;;  %v12178_v61 = vld [vmem:[#allocation10 + $0x3] ss:$0 sm:$0xff] }
 0xd3a   :  { %v4027_v43 = vadd.f32 %v12203_v27, %v4026_v9  ;;  %13962 = vmatpush3.bf16.msra.mxu1 %v14422_v33  ;;  %v13994_v12 = vpop.f32.mrb[111].mxu0 }
 0xd3b   :  { %14003 = vmatprep.subr.bf16.mxu1 %v15761_v0 }
 0xd3c   :  { %v17279_v52 = vpack.c.bf16 %v4027_v43, %v4024_v23 }
 0xd3d   :  { %13964 = vmatmul.mubr.bf16.vlgmr.msra.gmra.mrb[104].mxu1 %v16308_v49 }
 0xd3e   :  { %14004 = vmatpush3.bf16.msra.mxu1 %v14423_v8  ;;  %14203 = vmatprep.subr.msk.bf16.mxu0 %vm16372_vm2, %v17279_v52 }
 0xd3f   :  { %v4031_v22 = vpop.f32.mrb[112].mxu0  ;;  %14005 = vmatprep.subr.bf16.mxu1 %v15761_v0  ;;  %13967 = vmatprep.mubr.msk.bf16.mxu1 %vm15762_vm0, %v15761_v0 }
 0xd40   :  { %v4032_v31 = vadd.f32 %v12203_v27, %v4031_v22  ;;  %v13997_v54 = vpop.f32.mrb[113].mxu0 }
 0xd41   :  { %v4034_v53 = vpop.f32.mrb[114].mxu0 }
 0xd42   :  { %v4035_v16 = vadd.f32 %v12203_v27, %v4034_v53  ;;  %v13998_v46 = vpop.f32.mrb[115].mxu0  ;;  %14006 = vmatpush3.bf16.msra.mxu1 %v14424_v10 }
 0xd43   :  { %14007 = vmatprep.subr.bf16.mxu1 %v15761_v0 }
 0xd44   :  { %v17295_v13 = vpack.c.bf16 %v4035_v16, %v4032_v31 }
 0xd45   :  { %13968 = vmatmul.mubr.bf16.gmra.mrb[108].mxu1 %v16326_v60 }
 0xd46   :  { %14008 = vmatpush3.bf16.msra.mxu1 %v14425_v63  ;;  %13971 = vmatprep.mubr.msk.bf16.mxu1 %vm15762_vm0, %v15761_v0 }
 0xd47   :  { %v4039_v32 = vpop.f32.mrb[116].mxu0  ;;  %14009 = vmatprep.subr.bf16.mxu1 %v15761_v0 }
 0xd48   :  { %v4040_v1 = vadd.f32 %v12203_v27, %v4039_v32  ;;  %v14001_v56 = vpop.f32.mrb[117].mxu0 }
 0xd49   :  { %v4042_v51 = vpop.f32.mrb[118].mxu0 }
 0xd4a   :  { %v4043_v58 = vadd.f32 %v12203_v27, %v4042_v51  ;;  %v14002_v44 = vpop.f32.mrb[119].mxu0  ;;  %14010 = vmatpush3.bf16.msra.mxu1 %v14426_v17 }
 0xd4b   :  { %14011 = vmatprep.subr.bf16.mxu1 %v15761_v0 }
 0xd4c   :  { %v17308_v45 = vpack.c.bf16 %v4043_v58, %v4040_v1 }
 0xd4d   :  { %13972 = vmatmul.mubr.bf16.gmra.mrb[112].mxu1 %v16343_v3 }
 0xd4e   :  { %14012 = vmatpush3.bf16.msra.mxu1 %v14427_v38  ;;  %14019 = vmatprep.mubr.msk.bf16.mxu1 %vm15762_vm0, %v15761_v0 }
 0xd4f   :  { %14013 = vmatprep.subr.bf16.mxu1 %v15761_v0 }
 0xd52   :  { %14014 = vmatpush3.bf16.msra.mxu1 %v14428_v2 }
 0xd53   :  { %14015 = vmatprep.subr.bf16.mxu1 %v15761_v0 }
 0xd56   :  { %14016 = vmatpush3.bf16.msra.mxu1 %v14429_v7 }
 0xd57   :  { %14017 = vmatprep.subr.bf16.mxu1 %v15761_v0 }
 0xd5a   :  { %14018 = vmatpush3.bf16.msra.mxu1 %v14430_v47 }
 0xd5d   :  { %14020 = vmatmul.mubr.bf16.vlgmr.msra.gmra.mrb[116].mxu1 %v16308_v49 }
 0xd5e   :  { %14023 = vmatprep.mubr.msk.bf16.mxu1 %vm15762_vm0, %v15761_v0 }
 0xd65   :  { %14024 = vmatmul.mubr.bf16.gmra.mrb[120].mxu1 %v16326_v60 }
 0xd66   :  { %14027 = vmatprep.mubr.msk.bf16.mxu1 %vm15762_vm0, %v15761_v0 }
 0xd6d   :  { %14028 = vmatmul.mubr.bf16.gmra.mrb[124].mxu1 %v16343_v3 }
 0xdf0   :  { %v3757_v30 = vpop.f32.mrb[92].mxu1 }
 0xdf1   :  { %v17333_v50 = vadd.f32 %v3757_v30, %v17034_v28  ;;  %v13937_v6 = vpop.f32.mrb[93].mxu1 }
 0xdf2   :  { %v3760_v41 = vpop.f32.mrb[94].mxu1 }
 0xdf3   :  { %v17336_v39 = vadd.f32 %v3760_v41, %v17037_v4  ;;  %v13938_v49 = vpop.f32.mrb[95].mxu1 }
 0xdf8   :  { %v3765_v11 = vpop.f32.mrb[96].mxu1 }
 0xdf9   :  { %v17339_v40 = vadd.f32 %v3765_v11, %v17040_v19  ;;  %v13941_v60 = vpop.f32.mrb[97].mxu1 }
 0xdfa   :  { %v3768_v57 = vpop.f32.mrb[98].mxu1 }
 0xdfb   :  { %v17342_v34 = vadd.f32 %v3768_v57, %v17043_v59  ;;  %v13942_v3 = vpop.f32.mrb[99].mxu1 }
 0xe00   :  { %v3773_v55 = vpop.f32.mrb[100].mxu1 }
 0xe01   :  { %v17345_v28 = vadd.f32 %v3773_v55, %v17045_v5  ;;  %v13945_v33 = vpop.f32.mrb[101].mxu1 }
 0xe02   :  { %v3776_v27 = vpop.f32.mrb[102].mxu1 }
 0xe03   :  { %v17348_v4 = vadd.f32 %v3776_v27, %v17047_v37  ;;  %v13946_v42 = vpop.f32.mrb[103].mxu1 }
 0xe10   :  { %v3893_v9 = vpop.f32.mrb[104].mxu1 }
 0xe11   :  { %v3894_v19 = vadd.f32 %v12178_v61, %v3893_v9  ;;  %v13965_v23 = vpop.f32.mrb[105].mxu1 }
 0xe12   :  { %v3896_v43 = vpop.f32.mrb[106].mxu1 }
 0xe13   :  { %v3897_v12 = vadd.f32 %v12178_v61, %v3896_v43  ;;  %v13966_v8 = vpop.f32.mrb[107].mxu1  ;;  %14033 = vmatprep.mubr.msk.f32.mxu0 %vm353_vm1, %v3894_v19 }
 0xe15   :  { %14034 = vmatmul.mubr.msk.f32.vlgmr.msra.gmra.mrb[120].mxu0 %vm353_vm1, %v3897_v12 }
 0xe16   :  { %14206 = vmatpush3.bf16.xpose.msk.msra.mxu0 %vm16372_vm2, %v17279_v52 }
 0xe17   :  { %14209 = vmatprep.subr.msk.bf16.mxu0 %vm16372_vm2, %v17295_v13 }
 0xe18   :  { %v3901_v59 = vpop.f32.mrb[108].mxu1 }
 0xe19   :  { %v3902_v5 = vadd.f32 %v12178_v61, %v3901_v59  ;;  %v13969_v37 = vpop.f32.mrb[109].mxu1 }
 0xe1a   :  { %v3904_v10 = vpop.f32.mrb[110].mxu1 }
 0xe1b   :  { %v3905_v22 = vadd.f32 %v12178_v61, %v3904_v10  ;;  %v13970_v31 = vpop.f32.mrb[111].mxu1  ;;  %14036 = vmatprep.mubr.msk.f32.mxu0 %vm353_vm1, %v3902_v5 }
 0xe1d   :  { %14037 = vmatmul.mubr.msk.f32.gmra.mrb[122].mxu0 %vm353_vm1, %v3905_v22 }
 0xe1e   :  { %14212 = vmatpush3.bf16.xpose.msk.msra.mxu0 %vm16372_vm2, %v17295_v13  ;;  %v12228_v13 = vld [vmem:[#allocation13 + $0x3] ss:$0 sm:$0xff] }
 0xe1f   :  { %14215 = vmatprep.subr.msk.bf16.mxu0 %vm16372_vm2, %v17308_v45 }
 0xe20   :  { %v3909_v52 = vpop.f32.mrb[112].mxu1 }
 0xe21   :  { %v3910_v54 = vadd.f32 %v12178_v61, %v3909_v52  ;;  %v13973_v53 = vpop.f32.mrb[113].mxu1 }
 0xe22   :  { %v3912_v16 = vpop.f32.mrb[114].mxu1 }
 0xe23   :  { %v3913_v46 = vadd.f32 %v12178_v61, %v3912_v16  ;;  %v13974_v63 = vpop.f32.mrb[115].mxu1  ;;  %14039 = vmatprep.mubr.msk.f32.mxu0 %vm353_vm1, %v3910_v54 }
 0xe25   :  { %14040 = vmatmul.mubr.msk.f32.gmra.mrb[124].mxu0 %vm353_vm1, %v3913_v46 }
 0xe26   :  { %14218 = vmatpush3.bf16.xpose.msk.msra.mxu0 %vm16372_vm2, %v17308_v45  ;;  %14054 = vmatprep.mubr.msk.f32.mxu0 %vm353_vm1, %v3894_v19 }
 0xe27   :  { %14095 = vmatprep.subr.bf16.mxu0 %v15761_v0 }
 0xe2d   :  { %14055 = vmatmul.mubr.msk.f32.vlgmr.msra.gmra.mrb[126].mxu0 %vm353_vm1, %v3897_v12 }
 0xe2e   :  { %14057 = vmatprep.mubr.msk.f32.mxu0 %vm353_vm1, %v3902_v5 }
 0xe30   :  { %v4153_v17 = vpop.f32.mrb[116].mxu1 }
 0xe31   :  { %14058 = vmatmul.mubr.msk.f32.gmra.mrb[128].mxu0 %vm353_vm1, %v3905_v22  ;;  %v14021_v32 = vpop.f32.mrb[117].mxu1  ;;  %v4154_v56 = vadd.f32 %v12228_v13, %v4153_v17 }
 0xe32   :  { %14060 = vmatprep.mubr.msk.f32.mxu0 %vm353_vm1, %v3910_v54  ;;  %v4156_v1 = vpop.f32.mrb[118].mxu1 }
 0xe33   :  { %v4157_v51 = vadd.f32 %v12228_v13, %v4156_v1  ;;  %v14022_v25 = vpop.f32.mrb[119].mxu1 }
 0xe35   :  { %v14219_v58 = vpack.c.bf16 %v4157_v51, %v4154_v56  ;;  %14061 = vmatmul.mubr.msk.f32.gmra.mrb[130].mxu0 %vm353_vm1, %v3913_v46 }
 0xe36   :  { %14099 = vmatprep.mubr.msk.bf16.mxu0 %vm15762_vm0, %v15761_v0 }
 0xe37   :  { %14220 = vmatprep.subr.bf16.mxu1 %v14219_v58 }
 0xe38   :  { %v4161_v44 = vpop.f32.mrb[120].mxu1  ;;  %14222 = vmatpush3.bf16.msra.mxu1 %v14219_v58 }
 0xe39   :  { %v14025_v38 = vpop.f32.mrb[121].mxu1  ;;  %v4162_v2 = vadd.f32 %v12228_v13, %v4161_v44 }
 0xe3a   :  { %v4164_v45 = vpop.f32.mrb[122].mxu1 }
 0xe3b   :  { %v4165_v7 = vadd.f32 %v12228_v13, %v4164_v45  ;;  %v14026_v47 = vpop.f32.mrb[123].mxu1 }
 0xe3d   :  { %v14223_v30 = vpack.c.bf16 %v4165_v7, %v4162_v2 }
 0xe3f   :  { %14224 = vmatprep.subr.bf16.mxu1 %v14223_v30 }
 0xe40   :  { %v4169_v6 = vpop.f32.mrb[124].mxu1  ;;  %14226 = vmatpush3.bf16.msra.mxu1 %v14223_v30 }
 0xe41   :  { %v14029_v41 = vpop.f32.mrb[125].mxu1  ;;  %v4170_v11 = vadd.f32 %v12228_v13, %v4169_v6 }
 0xe42   :  { %v4172_v49 = vpop.f32.mrb[126].mxu1 }
 0xe43   :  { %v4173_v60 = vadd.f32 %v12228_v13, %v4172_v49  ;;  %v14030_v57 = vpop.f32.mrb[127].mxu1 }
 0xe45   :  { %v14227_v3 = vpack.c.bf16 %v4173_v60, %v4170_v11 }
 0xe47   :  { %14228 = vmatprep.subr.bf16.mxu1 %v14227_v3 }
 0xe48   :  { %14230 = vmatpush3.bf16.msra.mxu1 %v14227_v3 }
 0xee8   :  { %v14035_v55 = vpop.f32.mrb[120].mxu0 }
 0xee9   :  { %v17380_v33 = vmul.f32 0.17677669, %v14035_v55  ;;  %v4265_v27 = vpop.f32.mrb[121].mxu0 }
 0xeea   :  { %v17382_v42 = vmul.f32 0.17677669, %v4265_v27 }
 0xeeb   :  { %v4428_v61 = vsel %vm1154_vm3, %v17380_v33, -inf }
 0xeec   :  { %4429 = vmax.xlane.f32.xlu0 %v4428_v61  ;;  %v4425_v9 = vsel %vm1154_vm3, %v17382_v42, -inf }
 0xef0   :  { %4426 = vmax.xlane.f32.xlu0 %v4425_v9  ;;  %v14038_v19 = vpop.f32.mrb[122].mxu0 }
 0xef1   :  { %v17388_v23 = vmul.f32 0.17677669, %v14038_v19  ;;  %v4275_v43 = vpop.f32.mrb[123].mxu0 }
 0xef2   :  { %v17390_v12 = vmul.f32 0.17677669, %v4275_v43 }
 0xef3   :  { %v4434_v8 = vsel %vm1154_vm3, %v17388_v23, -inf }
 0xef4   :  { %4435 = vmax.xlane.f32.xlu0 %v4434_v8  ;;  %v4431_v59 = vsel %vm1154_vm3, %v17390_v12, -inf }
 0xef8   :  { %4432 = vmax.xlane.f32.xlu0 %v4431_v59  ;;  %v14041_v5 = vpop.f32.mrb[124].mxu0 }
 0xef9   :  { %v4285_v37 = vpop.f32.mrb[125].mxu0  ;;  %v17398_v22 = vmul.f32 0.17677669, %v14041_v5 }
 0xefa   :  { %v17396_v10 = vmul.f32 0.17677669, %v4285_v37 }
 0xefb   :  { %v4440_v54 = vsel %vm1154_vm3, %v17398_v22, -inf }
 0xefc   :  { %v4437_v31 = vsel %vm1154_vm3, %v17396_v10, -inf }
 0xefd   :  { %4438 = vmax.xlane.f32.xlu0 %v4437_v31 }
 0xf00   :  { %v14056_v52 = vpop.f32.mrb[126].mxu0 }
 0xf01   :  { %v4414_v53 = vmul.f32 0.17677669, %v14056_v52  ;;  %v4384_v16 = vpop.f32.mrb[127].mxu0  ;;  %4441 = vmax.xlane.f32.xlu0 %v4440_v54 }
 0xf02   :  { %v4413_v46 = vmul.f32 0.17677669, %v4384_v16 }
 0xf03   :  { %v4420_v63 = vadd.f32 %v17101_v15, %v4414_v53 }
 0xf04   :  { %v14059_v13 = vpop.f32.mrb[128].mxu0  ;;  %v4419_v56 = vadd.f32 %v17108_v62, %v4413_v46 }
 0xf05   :  { %v4416_v17 = vmul.f32 0.17677669, %v14059_v13  ;;  %v4394_v32 = vpop.f32.mrb[129].mxu0  ;;  %v4446_v1 = vsel %vm1173_vm4, %v4420_v63, -inf }
 0xf06   :  { %4447 = vmax.xlane.f32.xlu1 %v4446_v1  ;;  %v4415_v25 = vmul.f32 0.17677669, %v4394_v32  ;;  %v4443_v44 = vsel %vm1173_vm4, %v4419_v56, -inf }
 0xf07   :  { %v4422_v38 = vadd.f32 %v17115_v21, %v4416_v17 }
 0xf08   :  { %v14062_v51 = vpop.f32.mrb[130].mxu0  ;;  %v4421_v15 = vadd.f32 %v17122_v36, %v4415_v25  ;;  %v17422_v36 = vld [vmem:[%s18031_s20 + $0x18] sm:$0x3f] }
 0xf09   :  { %v4404_v58 = vpop.f32.mrb[131].mxu0  ;;  %v4452_v2 = vsel %vm1173_vm4, %v4422_v38, -inf  ;;  %v4418_v7 = vmul.f32 0.17677669, %v14062_v51  ;;  %14084 = vmatprep.subr.msk.mxu1 %vm1408_vm5, %v17422_v36 }
 0xf0a   :  { %4444 = vmax.xlane.f32.xlu1 %v4443_v44  ;;  %v4417_v45 = vmul.f32 0.17677669, %v4404_v58  ;;  %v4449_v47 = vsel %vm1173_vm4, %v4421_v15, -inf }
 0xf0b   :  { %v17415_v6 = vadd.f32 %v17136_v48, %v4418_v7 }
 0xf0c   :  { %v4423_v62 = vadd.f32 %v17129_v35, %v4417_v45 }
 0xf0d   :  { %v4458_v21 = vsel %vm1173_vm4, %v17415_v6, -inf }
 0xf0e   :  { %4453 = vmax.xlane.f32.xlu1 %v4452_v2  ;;  %v4455_v30 = vsel %vm1173_vm4, %v4423_v62, -inf }
 0xf12   :  { %4450 = vmax.xlane.f32.xlu1 %v4449_v47 }
 0xf16   :  { %4456 = vmax.xlane.f32.xlu1 %v4455_v30 }
 0xf1a   :  { %4459 = vmax.xlane.f32.xlu1 %v4458_v21 }
 0xf79   :  { %v4430_v35 = vpop.xlane.xlu0 %4429 }
 0xf7d   :  { %v4427_v41 = vpop.xlane.xlu0 %4426 }
 0xf81   :  { %v4436_v60 = vpop.xlane.xlu0 %4435 }
 0xf85   :  { %v4433_v43 = vpop.xlane.xlu0 %4432 }
 0xf8a   :  { %v4439_v46 = vpop.xlane.xlu0 %4438 }
 0xf8e   :  { %v4442_v44 = vpop.xlane.xlu0 %4441 }
 0xf93   :  { %v4448_v49 = vpop.xlane.xlu1 %4447 }
 0xf94   :  { %v4462_v11 = vmax.f32 %v4430_v35, %v4448_v49 }
 0xf96   :  { %v4468_v48 = vsub.f32 %v17380_v33, %v4462_v11  ;;  %v4486_v57 = vsub.f32 %v4420_v63, %v4462_v11 }
 0xf97   :  { %v4445_v3 = vpop.xlane.xlu1 %4444 }
 0xf98   :  { %v4475_v55 = vmul.f32 1.442695, %v4468_v48  ;;  %v4493_v27 = vmul.f32 1.442695, %v4486_v57  ;;  %v4461_v61 = vmax.f32 %v4427_v41, %v4445_v3 }
 0xf9a   :  { %15169 = vpow2.f32 %v4475_v55  ;;  %v4467_v9 = vsub.f32 %v17382_v42, %v4461_v61  ;;  %v4485_v19 = vsub.f32 %v4419_v56, %v4461_v61 }
 0xf9b   :  { %v4454_v8 = vpop.xlane.xlu1 %4453  ;;  %15171 = vpow2.f32 %v4493_v27 }
 0xf9c   :  { %v4473_v59 = vmul.f32 1.442695, %v4467_v9  ;;  %v4491_v5 = vmul.f32 1.442695, %v4485_v19  ;;  %v4464_v37 = vmax.f32 %v4436_v60, %v4454_v8 }
 0xf9e   :  { %15173 = vpow2.f32 %v4473_v59  ;;  %v4470_v31 = vsub.f32 %v17388_v23, %v4464_v37  ;;  %v4488_v52 = vsub.f32 %v4422_v38, %v4464_v37  ;;  %v14431_v59 = vld [vmem:[#allocation14 + $0x30] sm:$0xff]  }
 0xf9f   :  { %15175 = vpow2.f32 %v4491_v5  ;;  %v4451_v33 = vpop.xlane.xlu1 %4450  ;;  %14096 = vmatpush3.bf16.msra.mxu0 %v14431_v59  ;;  %v14432_v5 = vld [vmem:[#allocation14 + $0x38] sm:$0xff]  }
 0xfa0   :  { %v4479_v54 = vmul.f32 1.442695, %v4470_v31  ;;  %v4497_v53 = vmul.f32 1.442695, %v4488_v52  ;;  %v4463_v16 = vmax.f32 %v4433_v43, %v4451_v33  ;;  %14097 = vmatprep.subr.bf16.mxu0 %v15761_v0 }
 0xfa2   :  { %15177 = vpow2.f32 %v4479_v54  ;;  %v4469_v42 = vsub.f32 %v17390_v12, %v4463_v16  ;;  %v4487_v63 = vsub.f32 %v4421_v15, %v4463_v16 }
 0xfa3   :  { %v4457_v13 = vpop.xlane.xlu1 %4456  ;;  %15179 = vpow2.f32 %v4497_v53  ;;  %14098 = vmatpush3.bf16.msra.mxu0 %v14432_v5 }
 0xfa4   :  { %v15170_v17 = vpop.eup %15169  ;;  %v4477_v32 = vmul.f32 1.442695, %v4469_v42  ;;  %v4495_v1 = vmul.f32 1.442695, %v4487_v63  ;;  %v4465_v56 = vmax.f32 %v4439_v46, %v4457_v13 }
 0xfa5   :  { %v4506_v51 = vsel %vm1154_vm3, %v15170_v17, 0.0  ;;  %v15172_v23 = vpop.eup %15171 }
 0xfa6   :  { %15181 = vpow2.f32 %v4477_v32  ;;  %v4471_v25 = vsub.f32 %v17396_v10, %v4465_v56  ;;  %v4489_v58 = vsub.f32 %v4423_v62, %v4465_v56  ;;  %4507 = vadd.xlane.f32.xlu1 %v4506_v51  ;;  %v4524_v47 = vsel %vm1173_vm4, %v15172_v23, 0.0 }
 0xfa7   :  { %15183 = vpow2.f32 %v4495_v1  ;;  %v4460_v38 = vpop.xlane.xlu1 %4459 }
 0xfa8   :  { %v15174_v45 = vpop.eup %15173  ;;  %v4499_v12 = vmul.f32 1.442695, %v4489_v58  ;;  %v4466_v2 = vmax.f32 %v4442_v44, %v4460_v38  ;;  %v4481_v7 = vmul.f32 1.442695, %v4471_v25 }
 0xfa9   :  { %v15176_v15 = vpop.eup %15175  ;;  %v4503_v30 = vsel %vm1154_vm3, %v15174_v45, 0.0 }
 0xfaa   :  { %v4472_v21 = vsub.f32 %v17398_v22, %v4466_v2  ;;  %v4490_v35 = vsub.f32 %v17415_v6, %v4466_v2  ;;  %14075 = vmatprep.mubr.msk.f32.mxu1 %vm1173_vm4, %v15176_v15  ;;  %4525 = vadd.xlane.f32.xlu1 %v4524_v47  ;;  %15185 = vpow2.f32 %v4499_v12  ;;  %v4521_v22 = vsel %vm1173_vm4, %v15176_v15, 0.0 }
 0xfab   :  { %4504 = vadd.xlane.f32.xlu0 %v4503_v30  ;;  %14076 = vmatmul.mubr.msk.f32.vlgmr.msra.gmra.mrb[90].mxu1 %vm1173_vm4, %v15172_v23  ;;  %15187 = vpow2.f32 %v4481_v7 }
 0xfac   :  { %v15178_v10 = vpop.eup %15177  ;;  %v4483_v62 = vmul.f32 1.442695, %v4472_v21  ;;  %v4501_v41 = vmul.f32 1.442695, %v4490_v35  ;;  %14085 = vmatpush3.msk.msra.mxu1 %vm1408_vm5, %v17422_v36 }
 0xfad   :  { %v4512_v49 = vsel %vm1154_vm3, %v15178_v10, 0.0  ;;  %v15180_v11 = vpop.eup %15179 }
 0xfae   :  { %15189 = vpow2.f32 %v4483_v62  ;;  %4513 = vadd.xlane.f32.xlu1 %v4512_v49  ;;  %v4530_v48 = vsel %vm1173_vm4, %v15180_v11, 0.0 }
 0xfaf   :  { %15191 = vpow2.f32 %v4501_v41  ;;  %4522 = vadd.xlane.f32.xlu0 %v4521_v22 }
 0xfb0   :  { %v15182_v6 = vpop.eup %15181 }
 0xfb1   :  { %v15184_v60 = vpop.eup %15183  ;;  %v4509_v57 = vsel %vm1154_vm3, %v15182_v6, 0.0 }
 0xfb2   :  { %14078 = vmatprep.mubr.msk.f32.mxu1 %vm1173_vm4, %v15184_v60  ;;  %4531 = vadd.xlane.f32.xlu1 %v4530_v48  ;;  %v4527_v3 = vsel %vm1173_vm4, %v15184_v60, 0.0 }
 0xfb3   :  { %4510 = vadd.xlane.f32.xlu0 %v4509_v57  ;;  %14079 = vmatmul.mubr.msk.f32.gmra.mrb[128].mxu1 %vm1173_vm4, %v15180_v11 }
 0xfb4   :  { %v15186_v36 = vpop.eup %15185 }
 0xfb5   :  { %14081 = vmatprep.mubr.msk.f32.mxu1 %vm1173_vm4, %v15186_v36  ;;  %v15188_v55 = vpop.eup %15187  ;;  %v4533_v8 = vsel %vm1173_vm4, %v15186_v36, 0.0 }
 0xfb6   :  { %v4515_v19 = vsel %vm1154_vm3, %v15188_v55, 0.0 }
 0xfb7   :  { %4528 = vadd.xlane.f32.xlu0 %v4527_v3 }
 0xfb8   :  { %v15190_v27 = vpop.eup %15189 }
 0xfb9   :  { %v15192_v61 = vpop.eup %15191  ;;  %v4518_v9 = vsel %vm1154_vm3, %v15190_v27, 0.0 }
 0xfba   :  { %14082 = vmatmul.mubr.msk.f32.gmra.mrb[130].mxu1 %vm1173_vm4, %v15192_v61  ;;  %4519 = vadd.xlane.f32.xlu1 %v4518_v9  ;;  %v4536_v43 = vsel %vm1173_vm4, %v15192_v61, 0.0 }
 0xfbb   :  { %4516 = vadd.xlane.f32.xlu0 %v4515_v19  ;;  %14086 = vmatprep.mubr.msk.f32.mxu1 %vm1154_vm3, %v15174_v45 }
 0xfbe   :  { %14087 = vmatmul.mubr.msk.f32.vlgmr.msra.gmra.mrb[90].mxu1 %vm1154_vm3, %v15170_v17  ;;  %4537 = vadd.xlane.f32.xlu1 %v4536_v43 }
 0xfbf   :  { %4534 = vadd.xlane.f32.xlu0 %v4533_v8  ;;  %14089 = vmatprep.mubr.msk.f32.mxu1 %vm1154_vm3, %v15182_v6 }
 0xfc2   :  { %14090 = vmatmul.mubr.msk.f32.gmra.mrb[128].mxu1 %vm1154_vm3, %v15178_v10 }
 0xfc3   :  { %14092 = vmatprep.mubr.msk.f32.mxu1 %vm1154_vm3, %v15188_v55 }
 0xfc6   :  { %14093 = vmatmul.mubr.msk.f32.gmra.mrb[130].mxu1 %vm1154_vm3, %v15190_v27  ;;  %v12276_v27 = vld [vmem:[#allocation16] ss:$0 sm:$0xff] }
0x1033   :  { %v4508_v31 = vpop.xlane.xlu1 %4507 }
0x1037   :  { %v4526_v33 = vpop.xlane.xlu1 %4525 }
0x1038   :  { %v4505_v37 = vpop.xlane.xlu0 %4504  ;;  %v4540_v63 = vadd.f32 %v4526_v33, %v4508_v31 }
0x103a   :  { %15193 = vrcp.f32 %v4540_v63 }
0x103b   :  { %v4514_v53 = vpop.xlane.xlu1 %4513 }
0x103c   :  { %v4523_v52 = vpop.xlane.xlu0 %4522 }
0x103d   :  { %v4539_v17 = vadd.f32 %v4523_v52, %v4505_v37 }
0x103f   :  { %v4532_v46 = vpop.xlane.xlu1 %4531  ;;  %15195 = vrcp.f32 %v4539_v17  ;;  %v14435_v17 = vld [vmem:[#allocation20 + $0x4] ss:$8 sps:$4 sm:$0xff]  }
0x1040   :  { %v4511_v54 = vpop.xlane.xlu0 %4510  ;;  %v4542_v32 = vadd.f32 %v4532_v46, %v4514_v53  ;;  %5102 = vmatprep.subr.bf16.mxu0 %v14435_v17  ;;  %v14466_v17 = vld [vmem:[#allocation23 + $0x20] sm:$0xff]  }
0x1042   :  { %15197 = vrcp.f32 %v4542_v32  ;;  %v14438_v32 = vld [vmem:[#allocation20 + $0x14] ss:$8 sps:$4 sm:$0xff]  }
0x1044   :  { %v4529_v16 = vpop.xlane.xlu0 %4528  ;;  %v15194_v58 = vpop.eup %15193 }
0x1045   :  { %v4541_v1 = vadd.f32 %v4529_v16, %v4511_v54 }
0x1047   :  { %v4520_v42 = vpop.xlane.xlu1 %4519  ;;  %15199 = vrcp.f32 %v4541_v1  ;;  %v14436_v1 = vld [vmem:[#allocation20 + $0x10] ss:$8 sps:$4 sm:$0xff]  }
0x1048   :  { %v4517_v13 = vpop.xlane.xlu0 %4516 }
0x1049   :  { %v15196_v38 = vpop.eup %15195 }
0x104b   :  { %v4538_v56 = vpop.xlane.xlu1 %4537 }
0x104c   :  { %v4535_v51 = vpop.xlane.xlu0 %4534  ;;  %v4544_v23 = vadd.f32 %v4538_v56, %v4520_v42  ;;  %v15198_v15 = vpop.eup %15197 }
0x104d   :  { %v4543_v25 = vadd.f32 %v4535_v51, %v4517_v13 }
0x104e   :  { %15201 = vrcp.f32 %v4544_v23 }
0x104f   :  { %15203 = vrcp.f32 %v4543_v25 }
0x1051   :  { %v15200_v30 = vpop.eup %15199 }
0x1058   :  { %v15202_v62 = vpop.eup %15201 }
0x1059   :  { %v15204_v11 = vpop.eup %15203 }
0x1091   :  { %v14088_v44 = vpop.f32.mrb[90].mxu1 }
0x1092   :  { %v4779_v45 = vmul.f32 %v15194_v58, %v14088_v44  ;;  %v4747_v12 = vpop.f32.mrb[91].mxu1  ;;  %v14441_v58 = vld [vmem:[#allocation20 + $0x24] ss:$8 sps:$4 sm:$0xff]   ;;  %v14439_v44 = vld [vmem:[#allocation20 + $0x20] ss:$8 sps:$4 sm:$0xff]  }
0x1093   :  { %v4777_v2 = vmul.f32 %v15196_v38, %v4747_v12  ;;  %v14444_v38 = vld [vmem:[#allocation20 + $0x34] ss:$8 sps:$4 sm:$0xff]   ;;  %v14447_v12 = vld [vmem:[#allocation20 + $0x44] ss:$8 sps:$4 sm:$0xff]  }
0x1095   :  { %v4788_v7 = vpack.c.bf16 %v4779_v45, %v4777_v2  ;;  %v14091_v47 = vpop.f32.mrb[128].mxu1  ;;  %v14442_v45 = vld [vmem:[#allocation20 + $0x30] ss:$8 sps:$4 sm:$0xff]   ;;  %v14445_v2 = vld [vmem:[#allocation20 + $0x40] ss:$8 sps:$4 sm:$0xff]  }
0x1096   :  { %v4783_v21 = vmul.f32 %v15198_v15, %v14091_v47  ;;  %v4757_v35 = vpop.f32.mrb[129].mxu1  ;;  %v14450_v15 = vld [vmem:[#allocation20 + $0x54] ss:$8 sps:$4 sm:$0xff]   ;;  %v14453_v47 = vld [vmem:[#allocation20 + $0x64] ss:$8 sps:$4 sm:$0xff]  }
0x1097   :  { %v4781_v10 = vmul.f32 %v15200_v30, %v4757_v35  ;;  %14100 = vmatmul.mubr.msk.bf16.vlgmr.msra.gmra.mrb[132].mxu0 %vm353_vm1, %v4788_v7  ;;  %v14448_v7 = vld [vmem:[#allocation20 + $0x50] ss:$8 sps:$4 sm:$0xff]   ;;  %v14451_v30 = vld [vmem:[#allocation20 + $0x60] ss:$8 sps:$4 sm:$0xff]   ;;  %v14456_v35 = vld [vmem:[#allocation20 + $0x74] ss:$8 sps:$4 sm:$0xff]  }
0x1098   :  { %14103 = vmatprep.mubr.msk.bf16.mxu0 %vm15762_vm0, %v15761_v0 }
0x1099   :  { %v4789_v41 = vpack.c.bf16 %v4783_v21, %v4781_v10  ;;  %v14094_v49 = vpop.f32.mrb[130].mxu1  ;;  %v14454_v21 = vld [vmem:[#allocation20 + $0x70] ss:$8 sps:$4 sm:$0xff]   ;;  %v15763_v10 = vmov 0  }
0x109a   :  { %v4787_v22 = vmul.f32 %v15202_v62, %v14094_v49  ;;  %v4767_v6 = vpop.f32.mrb[131].mxu1 }
0x109b   :  { %v4785_v60 = vmul.f32 %v15204_v11, %v4767_v6 }
0x109d   :  { %v4790_v48 = vpack.c.bf16 %v4787_v22, %v4785_v60 }
0x109f   :  { %14104 = vmatmul.mubr.msk.bf16.gmra.mrb[136].mxu0 %vm353_vm1, %v4789_v41 }
0x10a0   :  { %14107 = vmatprep.mubr.msk.bf16.mxu0 %vm15762_vm0, %v15761_v0 }
0x10a7   :  { %14108 = vmatmul.mubr.msk.bf16.gmra.mrb[140].mxu0 %vm353_vm1, %v4790_v48 }
0x10a8   :  { %5134 = vmatprep.mubr.bf16.mxu0 %v15763_v10 }
0x116a   :  { %v4851_v57 = vpop.f32.mrb[132].mxu0 }
0x116b   :  { %v4874_v36 = vadd.f32 %v4851_v57, %v17333_v50  ;;  %v14101_v3 = vpop.f32.mrb[133].mxu0 }
0x116c   :  { %v4854_v55 = vpop.f32.mrb[134].mxu0 }
0x116d   :  { %v4880_v61 = vadd.f32 %v4874_v36, %v16187_v14  ;;  %v4875_v9 = vadd.f32 %v4854_v55, %v17336_v39  ;;  %v14102_v19 = vpop.f32.mrb[135].mxu0 }
0x116e   :  { %v17508_v19 = vld [vmem:[#allocation17] ss:$0 sm:$0xff] }
0x116f   :  { %v4881_v43 = vadd.f32 %v4875_v9, %v16190_v18  ;;  %v17471_v8 = vadd.f32 %v12276_v27, %v4880_v61 }
0x1171   :  { %4901 = vadd.xlane.f32.xlu0 %v17471_v8  ;;  %v17474_v0 = vadd.f32 %v12276_v27, %v4881_v43 }
0x1172   :  { %v4859_v59 = vpop.f32.mrb[136].mxu0 }
0x1173   :  { %v4876_v5 = vadd.f32 %v4859_v59, %v17339_v40  ;;  %4903 = vadd.xlane.f32.xlu1 %v17474_v0  ;;  %v14105_v50 = vpop.f32.mrb[137].mxu0 }
0x1174   :  { %v4862_v37 = vpop.f32.mrb[138].mxu0 }
0x1175   :  { %v4882_v14 = vadd.f32 %v4876_v5, %v16193_v20  ;;  %v4877_v39 = vadd.f32 %v4862_v37, %v17342_v34  ;;  %v14106_v31 = vpop.f32.mrb[139].mxu0  ;;  %v17513_v37 = vld [vmem:[#allocation19] ss:$0 sm:$0xff] }
0x1177   :  { %v4883_v18 = vadd.f32 %v4877_v39, %v16196_v24  ;;  %v17481_v52 = vadd.f32 %v12276_v27, %v4882_v14  ;;  %v14433_v24 = vld [vmem:[#allocation20] ss:$8 sps:$4 sm:$0xff]  }
0x1178   :  { %5103 = vmatpush1.bf16.msra.mxu0 %v14433_v24  ;;  %v14465_v24 = vld [vmem:[#allocation23 + $0x60] sm:$0xff]  }
0x1179   :  { %v17483_v33 = vadd.f32 %v12276_v27, %v4883_v18  ;;  %5104 = vmatprep.subr.bf16.mxu0 %v14438_v32  ;;  %v14467_v32 = vld [vmem:[#allocation23 + $0x68] sm:$0xff]  }
0x117a   :  { %v4867_v54 = vpop.f32.mrb[140].mxu0 }
0x117b   :  { %v4878_v53 = vadd.f32 %v4867_v54, %v17345_v28  ;;  %v14109_v16 = vpop.f32.mrb[141].mxu0  ;;  %v14457_v54 = vld [vmem:[#allocation23 + $0x40] sm:$0xff]  }
0x117c   :  { %v4870_v40 = vpop.f32.mrb[142].mxu0  ;;  %5105 = vmatpush1.bf16.msra.mxu0 %v14436_v1  ;;  %13405 = vmatprep.subr.bf16.mxu1 %v14457_v54  ;;  %v14459_v16 = vld [vmem:[#allocation23 + $0x48] sm:$0xff]  }
0x117d   :  { %v4884_v46 = vadd.f32 %v4878_v53, %v16199_v26  ;;  %v4879_v42 = vadd.f32 %v4870_v40, %v17348_v4  ;;  %v14110_v63 = vpop.f32.mrb[143].mxu0  ;;  %5106 = vmatprep.subr.bf16.mxu0 %v14441_v58  ;;  %v14458_v53 = vld [vmem:[#allocation23] sm:$0xff]   ;;  %v14460_v40 = vld [vmem:[#allocation23 + $0x8] sm:$0xff]  }
0x117e   :  { %13406 = vmatpush3.bf16.msra.mxu1 %v14458_v53  ;;  %v14463_v63 = vld [vmem:[#allocation23 + $0x58] sm:$0xff]   ;;  %v14468_v1 = vld [vmem:[#allocation23 + $0x28] sm:$0xff]  }
0x117f   :  { %v4885_v20 = vadd.f32 %v4879_v42, %v16201_v29  ;;  %v17489_v34 = vadd.f32 %v12276_v27, %v4884_v46  ;;  %13407 = vmatprep.subr.bf16.mxu1 %v14459_v16  ;;  %v14461_v46 = vld [vmem:[#allocation23 + $0x50] sm:$0xff]  }
0x1180   :  { %5107 = vmatpush1.bf16.msra.mxu0 %v14439_v44  ;;  %v14462_v42 = vld [vmem:[#allocation23 + $0x10] sm:$0xff]  }
0x1181   :  { %v17491_v13 = vadd.f32 %v12276_v27, %v4885_v20  ;;  %5108 = vmatprep.subr.bf16.mxu0 %v14444_v38  ;;  %v14464_v20 = vld [vmem:[#allocation23 + $0x18] sm:$0xff]  }
0x1182   :  { %13408 = vmatpush3.bf16.msra.mxu1 %v14460_v40 }
0x1183   :  { %13409 = vmatprep.subr.bf16.mxu1 %v14461_v46 }
0x1184   :  { %5109 = vmatpush1.bf16.msra.mxu0 %v14442_v45 }
0x1185   :  { %5110 = vmatprep.subr.bf16.mxu0 %v14447_v12 }
0x1186   :  { %13410 = vmatpush3.bf16.msra.mxu1 %v14462_v42 }
0x1187   :  { %13411 = vmatprep.subr.bf16.mxu1 %v14463_v63 }
0x1188   :  { %5111 = vmatpush1.bf16.msra.mxu0 %v14445_v2 }
0x1189   :  { %5112 = vmatprep.subr.bf16.mxu0 %v14450_v15 }
0x118a   :  { %13412 = vmatpush3.bf16.msra.mxu1 %v14464_v20 }
0x118b   :  { %13413 = vmatprep.subr.bf16.mxu1 %v14465_v24 }
0x118c   :  { %5113 = vmatpush1.bf16.msra.mxu0 %v14448_v7 }
0x118d   :  { %5114 = vmatprep.subr.bf16.mxu0 %v14453_v47 }
0x118e   :  { %13414 = vmatpush3.bf16.msra.mxu1 %v14466_v17 }
0x118f   :  { %13415 = vmatprep.subr.bf16.mxu1 %v14467_v32 }
0x1190   :  { %5115 = vmatpush1.bf16.msra.mxu0 %v14451_v30 }
0x1191   :  { %5116 = vmatprep.subr.bf16.mxu0 %v14456_v35 }
0x1192   :  { %13416 = vmatpush3.bf16.msra.mxu1 %v14468_v1 }
0x1194   :  { %5117 = vmatpush1.bf16.msra.mxu0 %v14454_v21 }
0x11fe   :  { %v4902_v28 = vpop.xlane.xlu0 %4901 }
0x11ff   :  { %v4913_v56 = vmul.f32 0.0078125, %v4902_v28  ;;  %v14469_v28 = vld [vmem:[#allocation23 + $0x70] sm:$0xff]  }
0x1200   :  { %v4904_v26 = vpop.xlane.xlu1 %4903  ;;  %13417 = vmatprep.subr.bf16.mxu1 %v14469_v28 }
0x1201   :  { %v4919_v4 = vsub.f32 %v17471_v8, %v4913_v56  ;;  %v4914_v51 = vmul.f32 0.0078125, %v4904_v26  ;;  %v14470_v56 = vld [vmem:[#allocation23 + $0x30] sm:$0xff]   ;;  %v14471_v26 = vld [vmem:[#allocation23 + $0x78] sm:$0xff]  }
0x1202   :  { %13418 = vmatpush3.bf16.msra.mxu1 %v14470_v56 }
0x1203   :  { %v4920_v29 = vsub.f32 %v17474_v0, %v4914_v51  ;;  %v4925_v23 = vmul.f32 %v4919_v4, %v4919_v4  ;;  %13419 = vmatprep.subr.bf16.mxu1 %v14471_v26 }
0x1205   :  { %4931 = vadd.xlane.f32.xlu0 %v4925_v23  ;;  %v4926_v25 = vmul.f32 %v4920_v29, %v4920_v29 }
0x1207   :  { %4933 = vadd.xlane.f32.xlu1 %v4926_v25 }
0x1209   :  { %4905 = vadd.xlane.f32.xlu0 %v17481_v52 }
0x120b   :  { %4907 = vadd.xlane.f32.xlu1 %v17483_v33 }
0x1292   :  { %v4932_v62 = vpop.xlane.xlu0 %4931 }
0x1293   :  { %v4943_v41 = vmul.f32 0.0078125, %v4932_v62 }
0x1294   :  { %v4934_v49 = vpop.xlane.xlu1 %4933 }
0x1295   :  { %v4949_v11 = vadd.f32 1e-05, %v4943_v41  ;;  %v4944_v22 = vmul.f32 0.0078125, %v4934_v49 }
0x1296   :  { %v4906_v6 = vpop.xlane.xlu0 %4905 }
0x1297   :  { %15205 = vrsqrt.f32 %v4949_v11  ;;  %v4950_v60 = vadd.f32 1e-05, %v4944_v22  ;;  %v4915_v48 = vmul.f32 0.0078125, %v4906_v6 }
0x1298   :  { %v4908_v57 = vpop.xlane.xlu1 %4907 }
0x1299   :  { %15207 = vrsqrt.f32 %v4950_v60  ;;  %v17499_v36 = vsub.f32 %v17481_v52, %v4915_v48  ;;  %v4916_v3 = vmul.f32 0.0078125, %v4908_v57  ;;  %v5012_v48 = vlaneseq }
0x129b   :  { %v17502_v55 = vsub.f32 %v17483_v33, %v4916_v3  ;;  %v4927_v27 = vmul.f32 %v17499_v36, %v17499_v36  ;;  %v17536_v57 = vshrl.u32 %v5012_v48, 7  ;;  %v5007_v3 = vld [vmem:[#allocation22] sm:$0x3]  ;;  %v5552_v48 = vld [vmem:[#allocation26 + $0x200] sm:$0xff] }
0x129d   :  { %4935 = vadd.xlane.f32.xlu0 %v4927_v27  ;;  %v4928_v61 = vmul.f32 %v17502_v55, %v17502_v55 }
0x129f   :  { %4937 = vadd.xlane.f32.xlu1 %v4928_v61 }
0x12a1   :  { %v15206_v9 = vpop.eup %15205  ;;  %4909 = vadd.xlane.f32.xlu0 %v17489_v34 }
0x12a2   :  { %v4961_v43 = vmul.f32 %v15206_v9, %v4919_v4  ;;  %v14472_v4 = vld [vmem:[#allocation23 + $0x38] sm:$0xff]  }
0x12a3   :  { %v15208_v59 = vpop.eup %15207  ;;  %4911 = vadd.xlane.f32.xlu1 %v17491_v13  ;;  %13420 = vmatpush3.bf16.msra.mxu1 %v14472_v4 }
0x12a4   :  { %v4973_v5 = vmul.f32 %v17508_v19, %v4961_v43  ;;  %v4962_v50 = vmul.f32 %v15208_v59, %v4920_v29 }
0x12a6   :  { %v4974_v14 = vmul.f32 %v17508_v19, %v4962_v50  ;;  %v4985_v39 = vadd.f32 %v17513_v37, %v4973_v5 }
0x12a8   :  { %v4986_v31 = vadd.f32 %v17513_v37, %v4974_v14 }
0x12aa   :  { %v5008_v18 = vpack.c.bf16 %v4986_v31, %v4985_v39 }
0x12ac   :  { %5135 = vmatmul.mubr.bf16.vlgmr.msra.gmra.mrb[144].mxu0 %v5008_v18 }
0x12ad   :  { %5144 = vmatprep.mubr.bf16.mxu0 %v15763_v10 }
0x132a   :  { %v4936_v51 = vpop.xlane.xlu0 %4935 }
0x132b   :  { %v4945_v29 = vmul.f32 0.0078125, %v4936_v51 }
0x132c   :  { %v4938_v23 = vpop.xlane.xlu1 %4937 }
0x132d   :  { %v4951_v25 = vadd.f32 1e-05, %v4945_v29  ;;  %v4946_v58 = vmul.f32 0.0078125, %v4938_v23 }
0x132e   :  { %v4910_v44 = vpop.xlane.xlu0 %4909 }
0x132f   :  { %15209 = vrsqrt.f32 %v4951_v25  ;;  %v4952_v38 = vadd.f32 1e-05, %v4946_v58  ;;  %v4917_v45 = vmul.f32 0.0078125, %v4910_v44 }
0x1330   :  { %v4912_v12 = vpop.xlane.xlu1 %4911 }
0x1331   :  { %15211 = vrsqrt.f32 %v4952_v38  ;;  %v17520_v2 = vsub.f32 %v17489_v34, %v4917_v45  ;;  %v4918_v15 = vmul.f32 0.0078125, %v4912_v12 }
0x1333   :  { %v17523_v7 = vsub.f32 %v17491_v13, %v4918_v15  ;;  %v4929_v47 = vmul.f32 %v17520_v2, %v17520_v2 }
0x1335   :  { %4939 = vadd.xlane.f32.xlu0 %v4929_v47  ;;  %v4930_v30 = vmul.f32 %v17523_v7, %v17523_v7 }
0x1337   :  { %4941 = vadd.xlane.f32.xlu1 %v4930_v30 }
0x1339   :  { %v15210_v21 = vpop.eup %15209 }
0x133a   :  { %v4963_v35 = vmul.f32 %v15210_v21, %v17499_v36  ;;  %v17539_v36 = vsub.s32 0, %v17536_v57 }
0x133b   :  { %v15212_v62 = vpop.eup %15211 }
0x133c   :  { %v4964_v41 = vmul.f32 %v15212_v62, %v17502_v55  ;;  %v4975_v49 = vmul.f32 %v17508_v19, %v4963_v35  ;;  %v17542_v55 = vsub.s32 1, %v17536_v57  ;;  %v17545_v27 = vrot.slane %v5007_v3, %v17539_v36 }
0x133e   :  { %v4976_v11 = vmul.f32 %v17508_v19, %v4964_v41  ;;  %v4987_v22 = vadd.f32 %v17513_v37, %v4975_v49  ;;  %v17548_v61 = vrot.slane %v5007_v3, %v17542_v55  ;;  %v5556_v3 = vld [vmem:[#allocation26 + $0x220] sm:$0xff] }
0x1340   :  { %v4988_v6 = vadd.f32 %v17513_v37, %v4976_v11 }
0x1342   :  { %v5009_v60 = vpack.c.bf16 %v4988_v6, %v4987_v22 }
0x1344   :  { %5145 = vmatmul.mubr.bf16.gmra.mrb[148].mxu0 %v5009_v60 }
0x1345   :  { %5154 = vmatprep.mubr.bf16.mxu0 %v15763_v10 }
0x137f   :  { %v5136_v9 = vpop.f32.mrb[144].mxu0 }
0x1380   :  { %v5137_v43 = vadd.f32 %v5136_v9, %v17545_v27  ;;  %v5138_v59 = vpop.f32.mrb[145].mxu0  ;;  %v5560_v9 = vld [vmem:[#allocation26 + $0x240] sm:$0xff] }
0x1381   :  { %v5139_v5 = vadd.f32 %v5138_v59, %v17548_v61  ;;  %v5140_v50 = vpop.f32.mrb[146].mxu0  ;;  %v12312_v59 = vcombine.low %v5552_v48, %v5556_v3 }
0x1382   :  { %v5177_v14 = vmul.f32 0.044715, %v5137_v43  ;;  %v5141_v39 = vadd.f32 %v5140_v50, %v17545_v27  ;;  %v5142_v31 = vpop.f32.mrb[147].mxu0  ;;  %v5165_v15 = vmul.f32 0.5, %v5137_v43  ;;  %v12313_v50 = vcombine.high %v5552_v48, %v5556_v3 }
0x1383   :  { %v5178_v18 = vmul.f32 0.044715, %v5139_v5  ;;  %v5143_v54 = vadd.f32 %v5142_v31, %v17548_v61  ;;  %v5166_v21 = vmul.f32 0.5, %v5139_v5  ;;  %v5572_v31 = vld [vmem:[#allocation26 + $0x2a0] sm:$0xff] }
0x1384   :  { %v5189_v53 = vmul.f32 %v5177_v14, %v5137_v43  ;;  %v5179_v16 = vmul.f32 0.044715, %v5141_v39  ;;  %v5167_v47 = vmul.f32 0.5, %v5141_v39  ;;  %v5564_v14 = vld [vmem:[#allocation26 + $0x260] sm:$0xff]  ;;  %5936 = vmatprep.subr.bf16.mxu0 %v12313_v50 }
0x1385   :  { %v5190_v40 = vmul.f32 %v5178_v18, %v5139_v5  ;;  %v5180_v46 = vmul.f32 0.044715, %v5143_v54  ;;  %v5168_v35 = vmul.f32 0.5, %v5143_v54  ;;  %5937 = vmatpush1.bf16.msra.mxu0 %v12312_v59 }
0x1386   :  { %v5201_v42 = vmul.f32 %v5189_v53, %v5137_v43  ;;  %v5191_v63 = vmul.f32 %v5179_v16, %v5141_v39  ;;  %v5580_v53 = vld [vmem:[#allocation26 + $0x2e0] sm:$0xff] }
0x1387   :  { %v5202_v20 = vmul.f32 %v5190_v40, %v5139_v5  ;;  %v5192_v24 = vmul.f32 %v5180_v46, %v5143_v54 }
0x1388   :  { %v5213_v17 = vadd.f32 %v5201_v42, %v5137_v43  ;;  %v5203_v32 = vmul.f32 %v5191_v63, %v5141_v39  ;;  %v12321_v43 = vcombine.high %v5560_v9, %v5564_v14  ;;  %v5584_v63 = vld [vmem:[#allocation26 + $0x300] sm:$0xff] }
0x1389   :  { %v5204_v1 = vmul.f32 %v5192_v24, %v5143_v54  ;;  %v5214_v28 = vadd.f32 %v5202_v20, %v5139_v5  ;;  %v12320_v5 = vcombine.low %v5560_v9, %v5564_v14  ;;  %v5588_v20 = vld [vmem:[#allocation26 + $0x320] sm:$0xff] }
0x138a   :  { %v5225_v56 = vmul.f32 0.7978846, %v5213_v17  ;;  %v5215_v26 = vadd.f32 %v5203_v32, %v5141_v39  ;;  %v5568_v39 = vld [vmem:[#allocation26 + $0x280] sm:$0xff]  ;;  %5938 = vmatprep.subr.bf16.mxu0 %v12321_v43 }
0x138b   :  { %v5216_v4 = vadd.f32 %v5204_v1, %v5143_v54  ;;  %v5226_v51 = vmul.f32 0.7978846, %v5214_v28  ;;  %v12329_v18 = vcombine.high %v5568_v39, %v5572_v31  ;;  %v5576_v54 = vld [vmem:[#allocation26 + $0x2c0] sm:$0xff]  ;;  %5939 = vmatpush1.bf16.msra.mxu0 %v12320_v5  ;;  %v12328_v16 = vcombine.low %v5568_v39, %v5572_v31 }
0x138c   :  { %15213 = vtanh.f32 %v5225_v56  ;;  %v5227_v29 = vmul.f32 0.7978846, %v5215_v26  ;;  %v12337_v46 = vcombine.high %v5576_v54, %v5580_v53  ;;  %v12336_v1 = vcombine.low %v5576_v54, %v5580_v53  ;;  %v5592_v26 = vld [vmem:[#allocation26 + $0x340] sm:$0xff] }
0x138d   :  { %v5228_v23 = vmul.f32 0.7978846, %v5216_v4  ;;  %15215 = vtanh.f32 %v5226_v51  ;;  %5940 = vmatprep.subr.bf16.mxu0 %v12329_v18  ;;  %v12345_v28 = vcombine.high %v5584_v63, %v5588_v20  ;;  %v5596_v4 = vld [vmem:[#allocation26 + $0x360] sm:$0xff]  ;;  %v12344_v51 = vcombine.low %v5584_v63, %v5588_v20 }
0x138e   :  { %15217 = vtanh.f32 %v5227_v29  ;;  %v12353_v29 = vcombine.high %v5592_v26, %v5596_v4 }
0x138f   :  { %15219 = vtanh.f32 %v5228_v23  ;;  %5941 = vmatpush1.bf16.msra.mxu0 %v12328_v16  ;;  %v12352_v23 = vcombine.low %v5592_v26, %v5596_v4 }
0x1390   :  { %5942 = vmatprep.subr.bf16.mxu0 %v12337_v46 }
0x1393   :  { %5943 = vmatpush1.bf16.msra.mxu0 %v12336_v1 }
0x1394   :  { %5944 = vmatprep.subr.bf16.mxu0 %v12345_v28 }
0x1396   :  { %v15214_v25 = vpop.eup %15213 }
0x1397   :  { %v15216_v58 = vpop.eup %15215  ;;  %v5249_v44 = vadd.f32 1.0, %v15214_v25  ;;  %5945 = vmatpush1.bf16.msra.mxu0 %v12344_v51 }
0x1398   :  { %v15218_v38 = vpop.eup %15217  ;;  %v5250_v45 = vadd.f32 1.0, %v15216_v58  ;;  %5946 = vmatprep.subr.bf16.mxu0 %v12353_v29 }
0x1399   :  { %v15220_v12 = vpop.eup %15219  ;;  %v5251_v30 = vadd.f32 1.0, %v15218_v38  ;;  %v5261_v41 = vmul.f32 %v5249_v44, %v5165_v15 }
0x139a   :  { %v5252_v62 = vadd.f32 1.0, %v15220_v12  ;;  %v5262_v11 = vmul.f32 %v5250_v45, %v5166_v21  ;;  %v5600_v21 = vld [vmem:[#allocation26 + $0x380] sm:$0xff] }
0x139b   :  { %v5263_v49 = vmul.f32 %v5251_v30, %v5167_v47  ;;  %5947 = vmatpush1.bf16.msra.mxu0 %v12352_v23 }
0x139c   :  { %v5264_v22 = vmul.f32 %v5252_v62, %v5168_v35  ;;  %v5604_v35 = vld [vmem:[#allocation26 + $0x3a0] sm:$0xff] }
0x139d   :  { %v5306_v6 = vpack.c.bf16 %v5263_v49, %v5261_v41  ;;  %v12361_v62 = vcombine.high %v5600_v21, %v5604_v35  ;;  %v12360_v41 = vcombine.low %v5600_v21, %v5604_v35 }
0x139e   :  { %v5307_v60 = vpack.c.bf16 %v5264_v22, %v5262_v11  ;;  %v17563_v22 = vld [vmem:[#allocation26 + $0x230] sm:$0xff] }
0x139f   :  { %5948 = vmatprep.subr.bf16.mxu0 %v12361_v62 }
0x13a0   :  { %5446 = vmatprep.mubr.bf16.mxu1 %v5307_v60  ;;  %5949 = vmatpush1.bf16.msra.mxu0 %v12360_v41 }
0x13a1   :  { %5447 = vmatmul.mubr.bf16.vlgmr.msra.gmra.mrb[132].mxu1 %v5306_v6 }
0x13c2   :  { %v4940_v40 = vpop.xlane.xlu0 %4939 }
0x13c3   :  { %v4947_v42 = vmul.f32 0.0078125, %v4940_v40 }
0x13c4   :  { %v4942_v24 = vpop.xlane.xlu1 %4941 }
0x13c5   :  { %v4953_v17 = vadd.f32 1e-05, %v4947_v42  ;;  %v4948_v32 = vmul.f32 0.0078125, %v4942_v24 }
0x13c7   :  { %15221 = vrsqrt.f32 %v4953_v17  ;;  %v4954_v56 = vadd.f32 1e-05, %v4948_v32 }
0x13c9   :  { %15223 = vrsqrt.f32 %v4954_v56 }
0x13d1   :  { %v15222_v25 = vpop.eup %15221 }
0x13d2   :  { %v4965_v58 = vmul.f32 %v15222_v25, %v17520_v2  ;;  %v5608_v2 = vld [vmem:[#allocation26 + $0x3c0] sm:$0xff] }
0x13d3   :  { %v15224_v44 = vpop.eup %15223 }
0x13d4   :  { %v4966_v38 = vmul.f32 %v15224_v44, %v17523_v7  ;;  %v4977_v45 = vmul.f32 %v17508_v19, %v4965_v58  ;;  %v5612_v7 = vld [vmem:[#allocation26 + $0x3e0] sm:$0xff] }
0x13d5   :  { %v12369_v49 = vcombine.high %v5608_v2, %v5612_v7  ;;  %v12368_v11 = vcombine.low %v5608_v2, %v5612_v7 }
0x13d6   :  { %v4978_v12 = vmul.f32 %v17508_v19, %v4966_v38  ;;  %v4989_v15 = vadd.f32 %v17513_v37, %v4977_v45  ;;  %v17561_v19 = vld [vmem:[#allocation26 + $0x210] sm:$0xff] }
0x13d7   :  { %5950 = vmatprep.subr.bf16.mxu0 %v12369_v49  ;;  %v12316_v6 = vcombine.low %v17561_v19, %v17563_v22  ;;  %v5553_v49 = vld [vmem:[#allocation26 + $0x208] sm:$0xff] }
0x13d8   :  { %v4990_v47 = vadd.f32 %v17513_v37, %v4978_v12  ;;  %5951 = vmatpush1.bf16.msra.mxu0 %v12368_v11  ;;  %v12317_v37 = vcombine.high %v17561_v19, %v17563_v22  ;;  %v5557_v11 = vld [vmem:[#allocation26 + $0x228] sm:$0xff]  ;;  %v5598_v19 = vld [vmem:[#allocation26 + $0x370] sm:$0xff] }
0x13da   :  { %v5010_v30 = vpack.c.bf16 %v4990_v47, %v4989_v15  ;;  %6018 = vmatprep.subr.bf16.mxu0 %v12317_v37  ;;  %v12315_v37 = vcombine.high %v5553_v49, %v5557_v11 }
0x13dc   :  { %5155 = vmatmul.mubr.bf16.gmra.mrb[152].mxu0 %v5010_v30  ;;  %5977 = vmatprep.subr.bf16.mxu1 %v12315_v37 }
0x13dd   :  { %5968 = vmatprep.mubr.bf16.mxu0 %v15763_v10 }
0x1417   :  { %v5146_v60 = vpop.f32.mrb[148].mxu0 }
0x1418   :  { %v5147_v48 = vadd.f32 %v5146_v60, %v17545_v27  ;;  %v5148_v3 = vpop.f32.mrb[149].mxu0  ;;  %v12314_v60 = vcombine.low %v5553_v49, %v5557_v11  ;;  %v5570_v49 = vld [vmem:[#allocation26 + $0x290] sm:$0xff] }
0x1419   :  { %v5149_v9 = vadd.f32 %v5148_v3, %v17548_v61  ;;  %v5150_v59 = vpop.f32.mrb[150].mxu0  ;;  %v5565_v3 = vld [vmem:[#allocation26 + $0x268] sm:$0xff]  ;;  %v5574_v11 = vld [vmem:[#allocation26 + $0x2b0] sm:$0xff] }
0x141a   :  { %v5181_v50 = vmul.f32 0.044715, %v5147_v48  ;;  %v5151_v14 = vadd.f32 %v5150_v59, %v17545_v27  ;;  %v5152_v43 = vpop.f32.mrb[151].mxu0  ;;  %v5169_v38 = vmul.f32 0.5, %v5147_v48  ;;  %5978 = vmatpush1.bf16.msra.mxu1 %v12314_v60  ;;  %v12333_v60 = vcombine.high %v5570_v49, %v5574_v11 }
0x141b   :  { %v5182_v39 = vmul.f32 0.044715, %v5149_v9  ;;  %v5153_v31 = vadd.f32 %v5152_v43, %v17548_v61  ;;  %v5170_v15 = vmul.f32 0.5, %v5149_v9 }
0x141c   :  { %v5193_v5 = vmul.f32 %v5181_v50, %v5147_v48  ;;  %v5183_v18 = vmul.f32 0.044715, %v5151_v14  ;;  %v5171_v45 = vmul.f32 0.5, %v5151_v14  ;;  %v5569_v50 = vld [vmem:[#allocation26 + $0x288] sm:$0xff] }
0x141d   :  { %v5194_v54 = vmul.f32 %v5182_v39, %v5149_v9  ;;  %v5184_v53 = vmul.f32 0.044715, %v5153_v31  ;;  %v5172_v47 = vmul.f32 0.5, %v5153_v31 }
0x141e   :  { %v5205_v16 = vmul.f32 %v5193_v5, %v5147_v48  ;;  %v5195_v40 = vmul.f32 %v5183_v18, %v5151_v14  ;;  %v5581_v5 = vld [vmem:[#allocation26 + $0x2e8] sm:$0xff] }
0x141f   :  { %v5206_v46 = vmul.f32 %v5194_v54, %v5149_v9  ;;  %v5196_v42 = vmul.f32 %v5184_v53, %v5153_v31  ;;  %v5585_v53 = vld [vmem:[#allocation26 + $0x308] sm:$0xff] }
0x1420   :  { %v5207_v63 = vmul.f32 %v5195_v40, %v5151_v14  ;;  %v5217_v20 = vadd.f32 %v5205_v16, %v5147_v48  ;;  %v5561_v48 = vld [vmem:[#allocation26 + $0x248] sm:$0xff] }
0x1421   :  { %v5208_v24 = vmul.f32 %v5196_v42, %v5153_v31  ;;  %v5218_v17 = vadd.f32 %v5206_v46, %v5149_v9  ;;  %v12322_v59 = vcombine.low %v5561_v48, %v5565_v3  ;;  %v12323_v9 = vcombine.high %v5561_v48, %v5565_v3  ;;  %v5589_v16 = vld [vmem:[#allocation26 + $0x328] sm:$0xff]  ;;  %v5578_v48 = vld [vmem:[#allocation26 + $0x2d0] sm:$0xff] }
0x1422   :  { %v5219_v32 = vadd.f32 %v5207_v63, %v5151_v14  ;;  %v5229_v1 = vmul.f32 0.7978846, %v5217_v20  ;;  %v5573_v14 = vld [vmem:[#allocation26 + $0x2a8] sm:$0xff]  ;;  %v12346_v40 = vcombine.low %v5585_v53, %v5589_v16  ;;  %v12347_v46 = vcombine.high %v5585_v53, %v5589_v16  ;;  %v5582_v3 = vld [vmem:[#allocation26 + $0x2f0] sm:$0xff] }
0x1423   :  { %v5220_v28 = vadd.f32 %v5208_v24, %v5153_v31  ;;  %v5230_v56 = vmul.f32 0.7978846, %v5218_v17  ;;  %5979 = vmatprep.subr.bf16.mxu1 %v12323_v9  ;;  %v12331_v43 = vcombine.high %v5569_v50, %v5573_v14  ;;  %v12330_v39 = vcombine.low %v5569_v50, %v5573_v14  ;;  %v5577_v31 = vld [vmem:[#allocation26 + $0x2c8] sm:$0xff]  ;;  %v5586_v9 = vld [vmem:[#allocation26 + $0x310] sm:$0xff] }
0x1424   :  { %v5231_v26 = vmul.f32 0.7978846, %v5219_v32  ;;  %15225 = vtanh.f32 %v5229_v1  ;;  %5980 = vmatpush1.bf16.msra.mxu1 %v12322_v59  ;;  %v12338_v18 = vcombine.low %v5577_v31, %v5581_v5  ;;  %v12339_v54 = vcombine.high %v5577_v31, %v5581_v5  ;;  %v5593_v42 = vld [vmem:[#allocation26 + $0x348] sm:$0xff]  ;;  %v5590_v50 = vld [vmem:[#allocation26 + $0x330] sm:$0xff] }
0x1425   :  { %v5232_v4 = vmul.f32 0.7978846, %v5220_v28  ;;  %15227 = vtanh.f32 %v5230_v56  ;;  %5981 = vmatprep.subr.bf16.mxu1 %v12331_v43  ;;  %v5597_v63 = vld [vmem:[#allocation26 + $0x368] sm:$0xff]  ;;  %v12341_v59 = vcombine.high %v5578_v48, %v5582_v3  ;;  %v12340_v14 = vcombine.low %v5578_v48, %v5582_v3  ;;  %v5602_v31 = vld [vmem:[#allocation26 + $0x390] sm:$0xff] }
0x1426   :  { %15229 = vtanh.f32 %v5231_v26  ;;  %v12354_v20 = vcombine.low %v5593_v42, %v5597_v63  ;;  %v12355_v24 = vcombine.high %v5593_v42, %v5597_v63  ;;  %v5601_v17 = vld [vmem:[#allocation26 + $0x388] sm:$0xff]  ;;  %v12349_v43 = vcombine.high %v5586_v9, %v5590_v50  ;;  %v5606_v5 = vld [vmem:[#allocation26 + $0x3b0] sm:$0xff]  ;;  %v5485_v42 = vld [vmem:[#allocation26] sm:$0xff] }
0x1427   :  { %15231 = vtanh.f32 %v5232_v4  ;;  %v5605_v32 = vld [vmem:[#allocation26 + $0x3a8] sm:$0xff]  ;;  %v12348_v22 = vcombine.low %v5586_v9, %v5590_v50  ;;  %v5610_v53 = vld [vmem:[#allocation26 + $0x3d0] sm:$0xff]  ;;  %v5489_v63 = vld [vmem:[#allocation26 + $0x20] sm:$0xff] }
0x1428   :  { %5982 = vmatpush1.bf16.msra.mxu1 %v12330_v39  ;;  %v12363_v1 = vcombine.high %v5601_v17, %v5605_v32  ;;  %v12362_v28 = vcombine.low %v5601_v17, %v5605_v32  ;;  %v5609_v56 = vld [vmem:[#allocation26 + $0x3c8] sm:$0xff]  ;;  %v5594_v39 = vld [vmem:[#allocation26 + $0x350] sm:$0xff]  ;;  %v5493_v17 = vld [vmem:[#allocation26 + $0x40] sm:$0xff] }
0x1429   :  { %5983 = vmatprep.subr.bf16.mxu1 %v12339_v54  ;;  %v5613_v26 = vld [vmem:[#allocation26 + $0x3e8] sm:$0xff]  ;;  %v12365_v54 = vcombine.high %v5602_v31, %v5606_v5  ;;  %v5614_v16 = vld [vmem:[#allocation26 + $0x3f0] sm:$0xff]  ;;  %v5497_v32 = vld [vmem:[#allocation26 + $0x60] sm:$0xff] }
0x142a   :  { %v12370_v4 = vcombine.low %v5609_v56, %v5613_v26 }
0x142c   :  { %5984 = vmatpush1.bf16.msra.mxu1 %v12338_v18  ;;  %v12356_v18 = vcombine.low %v5594_v39, %v5598_v19 }
0x142d   :  { %5985 = vmatprep.subr.bf16.mxu1 %v12347_v46  ;;  %v12373_v46 = vcombine.high %v5610_v53, %v5614_v16 }
0x142e   :  { %v15226_v51 = vpop.eup %15225 }
0x142f   :  { %v15228_v29 = vpop.eup %15227  ;;  %v5253_v23 = vadd.f32 1.0, %v15226_v51  ;;  %v12371_v51 = vcombine.high %v5609_v56, %v5613_v26  ;;  %v5501_v56 = vld [vmem:[#allocation26 + $0x80] sm:$0xff] }
0x1430   :  { %v15230_v25 = vpop.eup %15229  ;;  %v5254_v58 = vadd.f32 1.0, %v15228_v29  ;;  %5986 = vmatpush1.bf16.msra.mxu1 %v12346_v40  ;;  %v17573_v29 = vld [vmem:[#allocation26 + $0x218] sm:$0xff]  ;;  %v12364_v40 = vcombine.low %v5602_v31, %v5606_v5  ;;  %v5505_v26 = vld [vmem:[#allocation26 + $0xa0] sm:$0xff] }
0x1431   :  { %v15232_v44 = vpop.eup %15231  ;;  %v5255_v12 = vadd.f32 1.0, %v15230_v25  ;;  %v5265_v21 = vmul.f32 %v5253_v23, %v5169_v38  ;;  %5987 = vmatprep.subr.bf16.mxu1 %v12355_v24  ;;  %v17575_v23 = vld [vmem:[#allocation26 + $0x238] sm:$0xff]  ;;  %v12377_v24 = vcombine.high %v5485_v42, %v5489_v63  ;;  %v5545_v31 = vld [vmem:[#allocation26 + $0x1e0] sm:$0xff] }
0x1432   :  { %v5256_v30 = vadd.f32 1.0, %v15232_v44  ;;  %v5266_v62 = vmul.f32 %v5254_v58, %v5170_v15  ;;  %v12318_v25 = vcombine.low %v17573_v29, %v17575_v23  ;;  %v12319_v58 = vcombine.high %v17573_v29, %v17575_v23  ;;  %v6603_v23 = vld [vmem:[#allocation26 + $0x480] sm:$0xff] }
0x1433   :  { %v5267_v35 = vmul.f32 %v5255_v12, %v5171_v45 }
0x1434   :  { %v5268_v41 = vmul.f32 %v5256_v30, %v5172_v47  ;;  %5988 = vmatpush1.bf16.msra.mxu1 %v12354_v20  ;;  %v17583_v30 = vld [vmem:[#allocation25] ss:$0 sm:$0xff]  ;;  %v12372_v20 = vcombine.low %v5610_v53, %v5614_v16 }
0x1435   :  { %v5308_v2 = vpack.c.bf16 %v5267_v35, %v5265_v21  ;;  %5989 = vmatprep.subr.bf16.mxu1 %v12363_v1  ;;  %v5562_v35 = vld [vmem:[#allocation26 + $0x250] sm:$0xff]  ;;  %v12376_v1 = vcombine.low %v5485_v42, %v5489_v63 }
0x1436   :  { %v5309_v7 = vpack.c.bf16 %v5268_v41, %v5266_v62  ;;  %v5566_v62 = vld [vmem:[#allocation26 + $0x270] sm:$0xff] }
0x1437   :  { %v12324_v37 = vcombine.low %v5562_v35, %v5566_v62 }
0x1438   :  { %5454 = vmatprep.mubr.bf16.mxu1 %v5309_v7  ;;  %5990 = vmatpush1.bf16.msra.mxu1 %v12362_v28  ;;  %v12325_v7 = vcombine.high %v5562_v35, %v5566_v62  ;;  %v12385_v28 = vcombine.high %v5493_v17, %v5497_v32  ;;  %v5525_v62 = vld [vmem:[#allocation26 + $0x140] sm:$0xff] }
0x1439   :  { %5455 = vmatmul.mubr.bf16.gmra.mrb[136].mxu1 %v5308_v2  ;;  %5991 = vmatprep.subr.bf16.mxu1 %v12371_v51  ;;  %v12393_v51 = vcombine.high %v5501_v56, %v5505_v26 }
0x143c   :  { %5992 = vmatpush1.bf16.msra.mxu1 %v12370_v4  ;;  %v12384_v4 = vcombine.low %v5493_v17, %v5497_v32 }
0x143d   :  { %6059 = vmatprep.subr.bf16.mxu1 %v12319_v58  ;;  %v5509_v58 = vld [vmem:[#allocation26 + $0xc0] sm:$0xff] }
0x1474   :  { %v13421_v44 = vpop.f32.mrb[132].mxu1 }
0x1475   :  { %v13422_v38 = vpop.f32.mrb[133].mxu1 }
0x1476   :  { %v17581_v45 = vadd.f32 %v13422_v38, %v13421_v44  ;;  %v13424_v12 = vpop.f32.mrb[134].mxu1  ;;  %v5513_v44 = vld [vmem:[#allocation26 + $0xe0] sm:$0xff]  ;;  %v12392_v38 = vcombine.low %v5501_v56, %v5505_v26 }
0x1477   :  { %v13425_v15 = vpop.f32.mrb[135].mxu1 }
0x1478   :  { %v13426_v47 = vadd.f32 %v13425_v15, %v13424_v12  ;;  %v12401_v12 = vcombine.high %v5509_v58, %v5513_v44  ;;  %v5517_v15 = vld [vmem:[#allocation26 + $0x100] sm:$0xff]  ;;  %v5449_v16 = vadd.f32 %v17581_v45, %v17583_v30 }
0x147a   :  { %v5452_v21 = vadd.f32 %v13426_v47, %v17583_v30  ;;  %v5521_v47 = vld [vmem:[#allocation26 + $0x120] sm:$0xff]  ;;  %v5471_v56 = vadd.f32 %v5449_v16, %v17471_v8 }
0x147b   :  { %v12409_v35 = vcombine.high %v5517_v15, %v5521_v47 }
0x147c   :  { %v5472_v41 = vadd.f32 %v5452_v21, %v17474_v0  ;;  %v12332_v0 = vcombine.low %v5570_v49, %v5574_v11  ;;  %v12400_v21 = vcombine.low %v5509_v58, %v5513_v44  ;;  %v5495_v58 = vld [vmem:[#allocation26 + $0x50] sm:$0xff] }
0x147d   :  { %v5499_v44 = vld [vmem:[#allocation26 + $0x70] sm:$0xff] }
0x147e   :  { %v17587_v2 = vpack.c.bf16 %v5472_v41, %v5472_v41  ;;  %v5529_v41 = vld [vmem:[#allocation26 + $0x160] sm:$0xff]  ;;  %v12389_v8 = vcombine.high %v5495_v58, %v5499_v44 }
0x147f   :  { %v12417_v49 = vcombine.high %v5525_v62, %v5529_v41  ;;  %v12416_v9 = vcombine.low %v5525_v62, %v5529_v41  ;;  %v5503_v62 = vld [vmem:[#allocation26 + $0x90] sm:$0xff] }
0x1480   :  { %5969 = vmatmul.mubr.bf16.vlgmr.msra.gmra.mrb[156].mxu0 %v17587_v2  ;;  %v5507_v41 = vld [vmem:[#allocation26 + $0xb0] sm:$0xff] }
0x1481   :  { %6019 = vmatpush1.bf16.msra.mxu0 %v12316_v6  ;;  %6050 = vmatprep.mubr.bf16.mxu0 %v15763_v10  ;;  %v12357_v6 = vcombine.high %v5594_v39, %v5598_v19 }
0x1482   :  { %6020 = vmatprep.subr.bf16.mxu0 %v12325_v7  ;;  %v12408_v7 = vcombine.low %v5517_v15, %v5521_v47 }
0x1485   :  { %6021 = vmatpush1.bf16.msra.mxu0 %v12324_v37  ;;  %v5533_v37 = vld [vmem:[#allocation26 + $0x180] sm:$0xff] }
0x1486   :  { %6022 = vmatprep.subr.bf16.mxu0 %v12333_v60  ;;  %v5537_v60 = vld [vmem:[#allocation26 + $0x1a0] sm:$0xff] }
0x1487   :  { %v12425_v39 = vcombine.high %v5533_v37, %v5537_v60 }
0x1489   :  { %6023 = vmatpush1.bf16.msra.mxu0 %v12332_v0 }
0x148a   :  { %6024 = vmatprep.subr.bf16.mxu0 %v12341_v59 }
0x148d   :  { %6025 = vmatpush1.bf16.msra.mxu0 %v12340_v14 }
0x148e   :  { %6026 = vmatprep.subr.bf16.mxu0 %v12349_v43 }
0x1491   :  { %6027 = vmatpush1.bf16.msra.mxu0 %v12348_v22 }
0x1492   :  { %6028 = vmatprep.subr.bf16.mxu0 %v12357_v6  ;;  %v5541_v6 = vld [vmem:[#allocation26 + $0x1c0] sm:$0xff] }
0x1493   :  { %v12432_v45 = vcombine.low %v5541_v6, %v5545_v31 }
0x1495   :  { %6029 = vmatpush1.bf16.msra.mxu0 %v12356_v18 }
0x1496   :  { %6030 = vmatprep.subr.bf16.mxu0 %v12365_v54 }
0x1499   :  { %6031 = vmatpush1.bf16.msra.mxu0 %v12364_v40 }
0x149a   :  { %6032 = vmatprep.subr.bf16.mxu0 %v12373_v46  ;;  %v12433_v46 = vcombine.high %v5541_v6, %v5545_v31 }
0x149d   :  { %6033 = vmatpush1.bf16.msra.mxu0 %v12372_v20  ;;  %v5487_v20 = vld [vmem:[#allocation26 + $0x10] sm:$0xff] }
0x149e   :  { %6420 = vmatprep.subr.bf16.mxu0 %v12377_v24  ;;  %v5491_v24 = vld [vmem:[#allocation26 + $0x30] sm:$0xff] }
0x149f   :  { %v12381_v26 = vcombine.high %v5487_v20, %v5491_v24  ;;  %v12380_v47 = vcombine.low %v5487_v20, %v5491_v24  ;;  %v5531_v20 = vld [vmem:[#allocation26 + $0x170] sm:$0xff] }
0x14a0   :  { %6051 = vmatmul.mubr.bf16.vlgmr.msra.gmra.mrb[160].mxu0 %v17587_v2 }
0x14a1   :  { %6421 = vmatpush1.bf16.msra.mxu0 %v12376_v1  ;;  %6452 = vmatprep.mubr.bf16.mxu0 %v15763_v10 }
0x14a2   :  { %6422 = vmatprep.subr.bf16.mxu0 %v12385_v28 }
0x14a5   :  { %6423 = vmatpush1.bf16.msra.mxu0 %v12384_v4 }
0x14a6   :  { %6424 = vmatprep.subr.bf16.mxu0 %v12393_v51 }
0x14a9   :  { %6425 = vmatpush1.bf16.msra.mxu0 %v12392_v38 }
0x14aa   :  { %6426 = vmatprep.subr.bf16.mxu0 %v12401_v12 }
0x14ad   :  { %6427 = vmatpush1.bf16.msra.mxu0 %v12400_v21 }
0x14ae   :  { %6428 = vmatprep.subr.bf16.mxu0 %v12409_v35  ;;  %v17627_v35 = vpack.c.bf16 %v5471_v56, %v5471_v56  ;;  %v5543_v56 = vld [vmem:[#allocation26 + $0x1d0] sm:$0xff] }
0x14af   :  { %v5156_v11 = vpop.f32.mrb[152].mxu0 }
0x14b0   :  { %v17597_v48 = vadd.f32 %v5156_v11, %v17545_v27  ;;  %v5158_v3 = vpop.f32.mrb[153].mxu0  ;;  %v5511_v11 = vld [vmem:[#allocation26 + $0xd0] sm:$0xff] }
0x14b1   :  { %v17600_v0 = vadd.f32 %v5158_v3, %v17548_v61  ;;  %6429 = vmatpush1.bf16.msra.mxu0 %v12408_v7  ;;  %v5160_v59 = vpop.f32.mrb[154].mxu0  ;;  %v12388_v7 = vcombine.low %v5495_v58, %v5499_v44 }
0x14b2   :  { %v5185_v50 = vmul.f32 0.044715, %v17597_v48  ;;  %v17604_v14 = vadd.f32 %v5160_v59, %v17545_v27  ;;  %v5162_v43 = vpop.f32.mrb[155].mxu0  ;;  %6430 = vmatprep.subr.bf16.mxu0 %v12417_v49  ;;  %v12424_v27 = vcombine.low %v5533_v37, %v5537_v60  ;;  %v12397_v49 = vcombine.high %v5503_v62, %v5507_v41  ;;  %v5515_v37 = vld [vmem:[#allocation26 + $0xf0] sm:$0xff] }
0x14b3   :  { %v5186_v19 = vmul.f32 0.044715, %v17600_v0  ;;  %v17608_v22 = vadd.f32 %v5162_v43, %v17548_v61  ;;  %v12396_v60 = vcombine.low %v5503_v62, %v5507_v41  ;;  %v12405_v59 = vcombine.high %v5511_v11, %v5515_v37  ;;  %v5523_v43 = vld [vmem:[#allocation26 + $0x130] sm:$0xff] }
0x14b4   :  { %v5197_v5 = vmul.f32 %v5185_v50, %v17597_v48  ;;  %v5187_v18 = vmul.f32 0.044715, %v17604_v14  ;;  %v5519_v50 = vld [vmem:[#allocation26 + $0x110] sm:$0xff]  ;;  %v5174_v16 = vmul.f32 0.5, %v17600_v0 }
0x14b5   :  { %v5198_v54 = vmul.f32 %v5186_v19, %v17600_v0  ;;  %v5188_v53 = vmul.f32 0.044715, %v17608_v22  ;;  %6431 = vmatpush1.bf16.msra.mxu0 %v12416_v9 }
0x14b6   :  { %v5209_v40 = vmul.f32 %v5197_v5, %v17597_v48  ;;  %v5199_v61 = vmul.f32 %v5187_v18, %v17604_v14  ;;  %6432 = vmatprep.subr.bf16.mxu0 %v12425_v39  ;;  %v12404_v5 = vcombine.low %v5511_v11, %v5515_v37  ;;  %v5173_v18 = vmul.f32 0.5, %v17597_v48  ;;  %v6599_v11 = vld [vmem:[#allocation26 + $0x460] sm:$0xff]  ;;  %v5579_v37 = vld [vmem:[#allocation26 + $0x2d8] sm:$0xff] }
0x14b7   :  { %v5210_v42 = vmul.f32 %v5198_v54, %v17600_v0  ;;  %v5200_v63 = vmul.f32 %v5188_v53, %v17608_v22  ;;  %v5175_v54 = vmul.f32 0.5, %v17604_v14 }
0x14b8   :  { %v5211_v17 = vmul.f32 %v5199_v61, %v17604_v14  ;;  %v5221_v32 = vadd.f32 %v5209_v40, %v17597_v48  ;;  %v5176_v40 = vmul.f32 0.5, %v17608_v22 }
0x14b9   :  { %v5212_v1 = vmul.f32 %v5200_v63, %v17608_v22  ;;  %6433 = vmatpush1.bf16.msra.mxu0 %v12424_v27  ;;  %v5222_v28 = vadd.f32 %v5210_v42, %v17600_v0  ;;  %v12413_v27 = vcombine.high %v5519_v50, %v5523_v43  ;;  %v5527_v63 = vld [vmem:[#allocation26 + $0x150] sm:$0xff] }
0x14ba   :  { %6434 = vmatprep.subr.bf16.mxu0 %v12433_v46  ;;  %v5223_v4 = vadd.f32 %v5211_v17, %v17604_v14  ;;  %v5233_v51 = vmul.f32 0.7978846, %v5221_v32  ;;  %v12412_v32 = vcombine.low %v5519_v50, %v5523_v43  ;;  %v12421_v14 = vcombine.high %v5527_v63, %v5531_v20  ;;  %v5587_v50 = vld [vmem:[#allocation26 + $0x318] sm:$0xff] }
0x14bb   :  { %v5224_v38 = vadd.f32 %v5212_v1, %v17608_v22  ;;  %v5234_v12 = vmul.f32 0.7978846, %v5222_v28  ;;  %v5539_v28 = vld [vmem:[#allocation26 + $0x1b0] sm:$0xff]  ;;  %v12420_v0 = vcombine.low %v5527_v63, %v5531_v20  ;;  %v5591_v43 = vld [vmem:[#allocation26 + $0x338] sm:$0xff] }
0x14bc   :  { %v5235_v15 = vmul.f32 0.7978846, %v5223_v4  ;;  %15233 = vtanh.f32 %v5233_v51  ;;  %v5563_v4 = vld [vmem:[#allocation26 + $0x258] sm:$0xff] }
0x14bd   :  { %6435 = vmatpush1.bf16.msra.mxu0 %v12432_v45  ;;  %v5236_v21 = vmul.f32 0.7978846, %v5224_v38  ;;  %15235 = vtanh.f32 %v5234_v12  ;;  %v5535_v45 = vld [vmem:[#allocation26 + $0x190] sm:$0xff]  ;;  %v5567_v51 = vld [vmem:[#allocation26 + $0x278] sm:$0xff]  ;;  %v6587_v12 = vld [vmem:[#allocation26 + $0x400] sm:$0xff] }
0x14be   :  { %6502 = vmatprep.subr.bf16.mxu0 %v12381_v26  ;;  %15237 = vtanh.f32 %v5235_v15  ;;  %v12429_v22 = vcombine.high %v5535_v45, %v5539_v28  ;;  %v5547_v26 = vld [vmem:[#allocation26 + $0x1f0] sm:$0xff]  ;;  %v12428_v58 = vcombine.low %v5535_v45, %v5539_v28  ;;  %v12327_v38 = vcombine.high %v5563_v4, %v5567_v51  ;;  %v6591_v15 = vld [vmem:[#allocation26 + $0x420] sm:$0xff]  ;;  %v5603_v63 = vld [vmem:[#allocation26 + $0x398] sm:$0xff] }
0x14bf   :  { %15239 = vtanh.f32 %v5236_v21  ;;  %v12437_v44 = vcombine.high %v5543_v56, %v5547_v26  ;;  %v5575_v21 = vld [vmem:[#allocation26 + $0x2b8] sm:$0xff]  ;;  %v12326_v62 = vcombine.low %v5563_v4, %v5567_v51  ;;  %v12441_v41 = vcombine.high %v6587_v12, %v6591_v15  ;;  %v6635_v4 = vld [vmem:[#allocation26 + $0x580] sm:$0xff] }
0x14c0   :  { %6453 = vmatmul.mubr.bf16.vlgmr.msra.gmra.mrb[164].mxu0 %v17627_v35  ;;  %v5607_v20 = vld [vmem:[#allocation26 + $0x3b8] sm:$0xff]  ;;  %v6639_v51 = vld [vmem:[#allocation26 + $0x5a0] sm:$0xff] }
0x14c1   :  { %6503 = vmatpush1.bf16.msra.mxu0 %v12380_v47  ;;  %6534 = vmatprep.mubr.bf16.mxu0 %v15763_v10  ;;  %v5571_v47 = vld [vmem:[#allocation26 + $0x298] sm:$0xff] }
0x14c2   :  { %6504 = vmatprep.subr.bf16.mxu0 %v12389_v8  ;;  %v12436_v8 = vcombine.low %v5543_v56, %v5547_v26  ;;  %v5611_v45 = vld [vmem:[#allocation26 + $0x3d8] sm:$0xff] }
0x14c3   :  { %v5615_v28 = vld [vmem:[#allocation26 + $0x3f8] sm:$0xff] }
0x14c4   :  { %v12375_v26 = vcombine.high %v5611_v45, %v5615_v28 }
0x14c5   :  { %6505 = vmatpush1.bf16.msra.mxu0 %v12388_v7  ;;  %v12335_v7 = vcombine.high %v5571_v47, %v5575_v21 }
0x14c6   :  { %v15234_v3 = vpop.eup %15233  ;;  %6506 = vmatprep.subr.bf16.mxu0 %v12397_v49  ;;  %v6595_v49 = vld [vmem:[#allocation26 + $0x440] sm:$0xff] }
0x14c7   :  { %v15236_v9 = vpop.eup %15235  ;;  %v5257_v39 = vadd.f32 1.0, %v15234_v3  ;;  %v12440_v3 = vcombine.low %v6587_v12, %v6591_v15  ;;  %v12374_v12 = vcombine.low %v5611_v45, %v5615_v28  ;;  %v12489_v15 = vcombine.high %v6635_v4, %v6639_v51 }
0x14c8   :  { %v15238_v19 = vpop.eup %15237  ;;  %v5258_v6 = vadd.f32 1.0, %v15236_v9  ;;  %v12449_v9 = vcombine.high %v6595_v49, %v6599_v11 }
0x14c9   :  { %v15240_v31 = vpop.eup %15239  ;;  %6507 = vmatpush1.bf16.msra.mxu0 %v12396_v60  ;;  %v5259_v53 = vadd.f32 1.0, %v15238_v19  ;;  %v5269_v46 = vmul.f32 %v5257_v39, %v5173_v18  ;;  %v5583_v60 = vld [vmem:[#allocation26 + $0x2f8] sm:$0xff]  ;;  %v12448_v39 = vcombine.low %v6595_v49, %v6599_v11  ;;  %v6615_v18 = vld [vmem:[#allocation26 + $0x4e0] sm:$0xff] }
0x14ca   :  { %6508 = vmatprep.subr.bf16.mxu0 %v12405_v59  ;;  %v5260_v61 = vadd.f32 1.0, %v15240_v31  ;;  %v5270_v24 = vmul.f32 %v5258_v6, %v5174_v16  ;;  %v12334_v59 = vcombine.low %v5571_v47, %v5575_v21  ;;  %v12343_v29 = vcombine.high %v5579_v37, %v5583_v60  ;;  %v6643_v21 = vld [vmem:[#allocation26 + $0x5c0] sm:$0xff] }
0x14cb   :  { %v5271_v42 = vmul.f32 %v5259_v53, %v5175_v54  ;;  %v12342_v19 = vcombine.low %v5579_v37, %v5583_v60  ;;  %v12351_v31 = vcombine.high %v5587_v50, %v5591_v43  ;;  %v5595_v54 = vld [vmem:[#allocation26 + $0x358] sm:$0xff]  ;;  %v12350_v16 = vcombine.low %v5587_v50, %v5591_v43  ;;  %v17643_v60 = vld [vmem:[#allocation26 + $0x410] sm:$0xff]  ;;  %v5510_v43 = vld [vmem:[#allocation26 + $0xc8] sm:$0xff] }
0x14cc   :  { %v5272_v17 = vmul.f32 %v5260_v61, %v5176_v40  ;;  %v5599_v53 = vld [vmem:[#allocation26 + $0x378] sm:$0xff] }
0x14cd   :  { %6509 = vmatpush1.bf16.msra.mxu0 %v12404_v5  ;;  %v5310_v1 = vpack.c.bf16 %v5271_v42, %v5269_v46  ;;  %v6611_v5 = vld [vmem:[#allocation26 + $0x4c0] sm:$0xff]  ;;  %v12359_v61 = vcombine.high %v5595_v54, %v5599_v53 }
0x14ce   :  { %6510 = vmatprep.subr.bf16.mxu0 %v12413_v27  ;;  %v5311_v48 = vpack.c.bf16 %v5272_v17, %v5270_v24  ;;  %v12465_v40 = vcombine.high %v6611_v5, %v6615_v18  ;;  %v6619_v46 = vld [vmem:[#allocation26 + $0x500] sm:$0xff]  ;;  %v12464_v24 = vcombine.low %v6611_v5, %v6615_v18  ;;  %v12358_v17 = vcombine.low %v5595_v54, %v5599_v53  ;;  %v5526_v54 = vld [vmem:[#allocation26 + $0x148] sm:$0xff] }
0x14cf   :  { %v6623_v42 = vld [vmem:[#allocation26 + $0x520] sm:$0xff]  ;;  %v5530_v53 = vld [vmem:[#allocation26 + $0x168] sm:$0xff] }
0x14d0   :  { %5462 = vmatprep.mubr.bf16.mxu1 %v5311_v48  ;;  %v6627_v48 = vld [vmem:[#allocation26 + $0x540] sm:$0xff] }
0x14d1   :  { %6511 = vmatpush1.bf16.msra.mxu0 %v12412_v32  ;;  %5463 = vmatmul.mubr.bf16.gmra.mrb[140].mxu1 %v5310_v1  ;;  %v12473_v32 = vcombine.high %v6619_v46, %v6623_v42  ;;  %v12367_v1 = vcombine.high %v5603_v63, %v5607_v20 }
0x14d2   :  { %6512 = vmatprep.subr.bf16.mxu0 %v12421_v14  ;;  %6009 = vmatprep.mubr.bf16.mxu1 %v15763_v10  ;;  %v6631_v14 = vld [vmem:[#allocation26 + $0x560] sm:$0xff] }
0x14d3   :  { %v12481_v56 = vcombine.high %v6627_v48, %v6631_v14 }
0x14d5   :  { %6513 = vmatpush1.bf16.msra.mxu0 %v12420_v0  ;;  %v12472_v0 = vcombine.low %v6619_v46, %v6623_v42  ;;  %v12418_v46 = vcombine.low %v5526_v54, %v5530_v53 }
0x14d6   :  { %6514 = vmatprep.subr.bf16.mxu0 %v12429_v22  ;;  %v12366_v22 = vcombine.low %v5603_v63, %v5607_v20  ;;  %v5542_v20 = vld [vmem:[#allocation26 + $0x1c8] sm:$0xff] }
0x14d9   :  { %6515 = vmatpush1.bf16.msra.mxu0 %v12428_v58  ;;  %6010 = vmatmul.mubr.bf16.vlgmr.msra.gmra.mrb[144].mxu1 %v17587_v2  ;;  %v5486_v58 = vld [vmem:[#allocation26 + $0x8] sm:$0xff] }
0x14da   :  { %6060 = vmatpush1.bf16.msra.mxu1 %v12318_v25  ;;  %6516 = vmatprep.subr.bf16.mxu0 %v12437_v44  ;;  %v6607_v25 = vld [vmem:[#allocation26 + $0x4a0] sm:$0xff]  ;;  %v5490_v44 = vld [vmem:[#allocation26 + $0x28] sm:$0xff] }
0x14db   :  { %6061 = vmatprep.subr.bf16.mxu1 %v12327_v38  ;;  %6091 = vmatprep.mubr.bf16.mxu1 %v15763_v10  ;;  %v12457_v6 = vcombine.high %v6603_v23, %v6607_v25  ;;  %v12456_v27 = vcombine.low %v6603_v23, %v6607_v25  ;;  %v12480_v38 = vcombine.low %v6627_v48, %v6631_v14 }
0x14dc   :  { %v12379_v47 = vcombine.high %v5486_v58, %v5490_v44  ;;  %v12378_v49 = vcombine.low %v5486_v58, %v5490_v44 }
0x14dd   :  { %6517 = vmatpush1.bf16.msra.mxu0 %v12436_v8  ;;  %v6647_v8 = vld [vmem:[#allocation26 + $0x5e0] sm:$0xff] }
0x14de   :  { %6062 = vmatpush1.bf16.msra.mxu1 %v12326_v62  ;;  %6971 = vmatprep.subr.bf16.mxu0 %v12441_v41  ;;  %v5494_v62 = vld [vmem:[#allocation26 + $0x48] sm:$0xff]  ;;  %v12497_v11 = vcombine.high %v6643_v21, %v6647_v8 }
0x14df   :  { %6063 = vmatprep.subr.bf16.mxu1 %v12335_v7  ;;  %v5498_v41 = vld [vmem:[#allocation26 + $0x68] sm:$0xff]  ;;  %v12488_v7 = vcombine.low %v6635_v4, %v6639_v51  ;;  %v6601_v4 = vld [vmem:[#allocation26 + $0x470] sm:$0xff] }
0x14e0   :  { %6535 = vmatmul.mubr.bf16.vlgmr.msra.gmra.mrb[168].mxu0 %v17627_v35  ;;  %v12387_v37 = vcombine.high %v5494_v62, %v5498_v41  ;;  %v12386_v23 = vcombine.low %v5494_v62, %v5498_v41 }
0x14e1   :  { %6972 = vmatpush1.bf16.msra.mxu0 %v12440_v3  ;;  %7003 = vmatprep.mubr.bf16.mxu0 %v15763_v10  ;;  %v17645_v3 = vld [vmem:[#allocation26 + $0x430] sm:$0xff] }
0x14e2   :  { %6064 = vmatpush1.bf16.msra.mxu1 %v12334_v59  ;;  %6973 = vmatprep.subr.bf16.mxu0 %v12449_v9  ;;  %v5502_v59 = vld [vmem:[#allocation26 + $0x88] sm:$0xff]  ;;  %v12445_v25 = vcombine.high %v17643_v60, %v17645_v3  ;;  %v12444_v44 = vcombine.low %v17643_v60, %v17645_v3  ;;  %v6617_v60 = vld [vmem:[#allocation26 + $0x4f0] sm:$0xff] }
0x14e3   :  { %6065 = vmatprep.subr.bf16.mxu1 %v12343_v29  ;;  %v5506_v9 = vld [vmem:[#allocation26 + $0xa8] sm:$0xff]  ;;  %v12496_v29 = vcombine.low %v6643_v21, %v6647_v8  ;;  %v6605_v21 = vld [vmem:[#allocation26 + $0x490] sm:$0xff] }
0x14e4   :  { %v12395_v50 = vcombine.high %v5502_v59, %v5506_v9  ;;  %v6609_v8 = vld [vmem:[#allocation26 + $0x4b0] sm:$0xff] }
0x14e5   :  { %6974 = vmatpush1.bf16.msra.mxu0 %v12448_v39  ;;  %v5514_v39 = vld [vmem:[#allocation26 + $0xe8] sm:$0xff] }
0x14e6   :  { %6066 = vmatpush1.bf16.msra.mxu1 %v12342_v19  ;;  %6975 = vmatprep.subr.bf16.mxu0 %v12457_v6  ;;  %v12394_v19 = vcombine.low %v5502_v59, %v5506_v9  ;;  %v5518_v6 = vld [vmem:[#allocation26 + $0x108] sm:$0xff]  ;;  %v12402_v5 = vcombine.low %v5510_v43, %v5514_v39  ;;  %v12460_v59 = vcombine.low %v6605_v21, %v6609_v8 }
0x14e7   :  { %6067 = vmatprep.subr.bf16.mxu1 %v12351_v31  ;;  %v5522_v31 = vld [vmem:[#allocation26 + $0x128] sm:$0xff] }
0x14e8   :  { %v12411_v18 = vcombine.high %v5518_v6, %v5522_v31 }
0x14e9   :  { %6976 = vmatpush1.bf16.msra.mxu0 %v12456_v27  ;;  %v12410_v27 = vcombine.low %v5518_v6, %v5522_v31  ;;  %v5520_v31 = vld [vmem:[#allocation26 + $0x118] sm:$0xff] }
0x14ea   :  { %6068 = vmatpush1.bf16.msra.mxu1 %v12350_v16  ;;  %6977 = vmatprep.subr.bf16.mxu0 %v12465_v40  ;;  %v12419_v16 = vcombine.high %v5526_v54, %v5530_v53  ;;  %v5534_v40 = vld [vmem:[#allocation26 + $0x188] sm:$0xff]  ;;  %v6633_v54 = vld [vmem:[#allocation26 + $0x570] sm:$0xff] }
0x14eb   :  { %6069 = vmatprep.subr.bf16.mxu1 %v12359_v61  ;;  %v5538_v61 = vld [vmem:[#allocation26 + $0x1a8] sm:$0xff] }
0x14ec   :  { %v12427_v42 = vcombine.high %v5534_v40, %v5538_v61  ;;  %v12426_v48 = vcombine.low %v5534_v40, %v5538_v61  ;;  %v5528_v61 = vld [vmem:[#allocation26 + $0x158] sm:$0xff] }
0x14ed   :  { %6978 = vmatpush1.bf16.msra.mxu0 %v12464_v24  ;;  %v5546_v24 = vld [vmem:[#allocation26 + $0x1e8] sm:$0xff] }
0x14ee   :  { %6070 = vmatpush1.bf16.msra.mxu1 %v12358_v17  ;;  %6979 = vmatprep.subr.bf16.mxu0 %v12473_v32  ;;  %v12435_v45 = vcombine.high %v5542_v20, %v5546_v24  ;;  %v12434_v58 = vcombine.low %v5542_v20, %v5546_v24 }
0x14ef   :  { %6071 = vmatprep.subr.bf16.mxu1 %v12367_v1 }
0x14f1   :  { %6980 = vmatpush1.bf16.msra.mxu0 %v12472_v0 }
0x14f2   :  { %6072 = vmatpush1.bf16.msra.mxu1 %v12366_v22  ;;  %6981 = vmatprep.subr.bf16.mxu0 %v12481_v56  ;;  %v5488_v22 = vld [vmem:[#allocation26 + $0x18] sm:$0xff] }
0x14f3   :  { %6073 = vmatprep.subr.bf16.mxu1 %v12375_v26  ;;  %v5492_v56 = vld [vmem:[#allocation26 + $0x38] sm:$0xff]  ;;  %v6597_v26 = vld [vmem:[#allocation26 + $0x450] sm:$0xff] }
0x14f4   :  { %v12382_v62 = vcombine.low %v5488_v22, %v5492_v56 }
0x14f5   :  { %6982 = vmatpush1.bf16.msra.mxu0 %v12480_v38  ;;  %v12383_v38 = vcombine.high %v5488_v22, %v5492_v56 }
0x14f6   :  { %6074 = vmatpush1.bf16.msra.mxu1 %v12374_v12  ;;  %6983 = vmatprep.subr.bf16.mxu0 %v12489_v15  ;;  %v12453_v15 = vcombine.high %v6597_v26, %v6601_v4 }
0x14f7   :  { %6461 = vmatprep.subr.bf16.mxu1 %v12379_v47  ;;  %v5496_v47 = vld [vmem:[#allocation26 + $0x58] sm:$0xff] }
0x14f9   :  { %6092 = vmatmul.mubr.bf16.vlgmr.msra.gmra.mrb[148].mxu1 %v17587_v2  ;;  %6984 = vmatpush1.bf16.msra.mxu0 %v12488_v7  ;;  %v12403_v2 = vcombine.high %v5510_v43, %v5514_v39  ;;  %v12461_v7 = vcombine.high %v6605_v21, %v6609_v8  ;;  %v6625_v43 = vld [vmem:[#allocation26 + $0x530] sm:$0xff]  ;;  %v6588_v21 = vld [vmem:[#allocation26 + $0x408] sm:$0xff] }
0x14fa   :  { %6462 = vmatpush1.bf16.msra.mxu1 %v12378_v49  ;;  %6985 = vmatprep.subr.bf16.mxu0 %v12497_v11  ;;  %v5504_v49 = vld [vmem:[#allocation26 + $0x98] sm:$0xff]  ;;  %v6592_v8 = vld [vmem:[#allocation26 + $0x428] sm:$0xff] }
0x14fb   :  { %6463 = vmatprep.subr.bf16.mxu1 %v12387_v37  ;;  %6493 = vmatprep.mubr.bf16.mxu1 %v15763_v10  ;;  %v5508_v11 = vld [vmem:[#allocation26 + $0xb8] sm:$0xff]  ;;  %v6613_v37 = vld [vmem:[#allocation26 + $0x4d0] sm:$0xff] }
0x14fc   :  { %v12399_v9 = vcombine.high %v5504_v49, %v5508_v11  ;;  %v12398_v39 = vcombine.low %v5504_v49, %v5508_v11  ;;  %v12443_v49 = vcombine.high %v6588_v21, %v6592_v8 }
0x14fd   :  { %6986 = vmatpush1.bf16.msra.mxu0 %v12496_v29  ;;  %v12469_v29 = vcombine.high %v6613_v37, %v6617_v60 }
0x14fe   :  { %6464 = vmatpush1.bf16.msra.mxu1 %v12386_v23  ;;  %7053 = vmatprep.subr.bf16.mxu0 %v12445_v25  ;;  %v5512_v23 = vld [vmem:[#allocation26 + $0xd8] sm:$0xff] }
0x14ff   :  { %6465 = vmatprep.subr.bf16.mxu1 %v12395_v50  ;;  %v5516_v25 = vld [vmem:[#allocation26 + $0xf8] sm:$0xff]  ;;  %v6621_v50 = vld [vmem:[#allocation26 + $0x510] sm:$0xff] }
0x1500   :  { %v12477_v6 = vcombine.high %v6621_v50, %v6625_v43  ;;  %v12406_v53 = vcombine.low %v5512_v23, %v5516_v25 }
0x1502   :  { %6466 = vmatpush1.bf16.msra.mxu1 %v12394_v19  ;;  %v12468_v19 = vcombine.low %v6613_v37, %v6617_v60  ;;  %v6596_v37 = vld [vmem:[#allocation26 + $0x448] sm:$0xff] }
0x1503   :  { %6467 = vmatprep.subr.bf16.mxu1 %v12403_v2  ;;  %v12407_v2 = vcombine.high %v5512_v23, %v5516_v25  ;;  %v6600_v60 = vld [vmem:[#allocation26 + $0x468] sm:$0xff] }
0x1504   :  { %v12451_v23 = vcombine.high %v6596_v37, %v6600_v60 }
0x1506   :  { %6468 = vmatpush1.bf16.msra.mxu1 %v12402_v5  ;;  %v5524_v5 = vld [vmem:[#allocation26 + $0x138] sm:$0xff] }
0x1507   :  { %6469 = vmatprep.subr.bf16.mxu1 %v12411_v18  ;;  %v6629_v18 = vld [vmem:[#allocation26 + $0x550] sm:$0xff]  ;;  %v12414_v20 = vcombine.low %v5520_v31, %v5524_v5 }
0x1508   :  { %v12485_v40 = vcombine.high %v6629_v18, %v6633_v54  ;;  %v12484_v24 = vcombine.low %v6629_v18, %v6633_v54  ;;  %v6612_v18 = vld [vmem:[#allocation26 + $0x4c8] sm:$0xff] }
0x1509   :  { %v6616_v54 = vld [vmem:[#allocation26 + $0x4e8] sm:$0xff] }
0x150a   :  { %6470 = vmatpush1.bf16.msra.mxu1 %v12410_v27  ;;  %v12476_v27 = vcombine.low %v6621_v50, %v6625_v43  ;;  %v6604_v50 = vld [vmem:[#allocation26 + $0x488] sm:$0xff] }
0x150b   :  { %6471 = vmatprep.subr.bf16.mxu1 %v12419_v16  ;;  %v12415_v16 = vcombine.high %v5520_v31, %v5524_v5  ;;  %v6608_v43 = vld [vmem:[#allocation26 + $0x4a8] sm:$0xff] }
0x150c   :  { %v13427_v63 = vpop.f32.mrb[136].mxu1  ;;  %v12459_v31 = vcombine.high %v6604_v50, %v6608_v43 }
0x150d   :  { %v13428_v17 = vpop.f32.mrb[137].mxu1 }
0x150e   :  { %v13429_v32 = vadd.f32 %v13428_v17, %v13427_v63  ;;  %6472 = vmatpush1.bf16.msra.mxu1 %v12418_v46  ;;  %v13430_v1 = vpop.f32.mrb[138].mxu1  ;;  %v5532_v46 = vld [vmem:[#allocation26 + $0x178] sm:$0xff]  ;;  %v6641_v63 = vld [vmem:[#allocation26 + $0x5b0] sm:$0xff] }
0x150f   :  { %v13431_v14 = vpop.f32.mrb[139].mxu1  ;;  %6473 = vmatprep.subr.bf16.mxu1 %v12427_v42  ;;  %v6637_v42 = vld [vmem:[#allocation26 + $0x590] sm:$0xff]  ;;  %v12423_v17 = vcombine.high %v5528_v61, %v5532_v46 }
0x1510   :  { %v5457_v28 = vadd.f32 %v13429_v32, %v17583_v30  ;;  %v17652_v0 = vadd.f32 %v13431_v14, %v13430_v1  ;;  %v5500_v30 = vld [vmem:[#allocation26 + $0x78] sm:$0xff]  ;;  %v12493_v32 = vcombine.high %v6637_v42, %v6641_v63  ;;  %v6645_v14 = vld [vmem:[#allocation26 + $0x5d0] sm:$0xff]  ;;  %v12492_v22 = vcombine.low %v6637_v42, %v6641_v63  ;;  %v6624_v42 = vld [vmem:[#allocation26 + $0x528] sm:$0xff] }
0x1511   :  { %v12391_v41 = vcombine.high %v5496_v47, %v5500_v30  ;;  %v12390_v3 = vcombine.low %v5496_v47, %v5500_v30  ;;  %v5536_v1 = vld [vmem:[#allocation26 + $0x198] sm:$0xff]  ;;  %v7186_v63 = vld [vmem:[#allocation26 + $0x740] sm:$0xff] }
0x1512   :  { %v5473_v51 = vadd.f32 %v5457_v28, %v17481_v52  ;;  %6474 = vmatpush1.bf16.msra.mxu1 %v12426_v48  ;;  %v12452_v52 = vcombine.low %v6597_v26, %v6601_v4  ;;  %v5540_v48 = vld [vmem:[#allocation26 + $0x1b8] sm:$0xff]  ;;  %v12422_v28 = vcombine.low %v5528_v61, %v5532_v46  ;;  %v6620_v46 = vld [vmem:[#allocation26 + $0x508] sm:$0xff] }
0x1513   :  { %6475 = vmatprep.subr.bf16.mxu1 %v12435_v45  ;;  %v6649_v45 = vld [vmem:[#allocation26 + $0x5f0] sm:$0xff]  ;;  %v12431_v56 = vcombine.high %v5536_v1, %v5540_v48  ;;  %v5544_v4 = vld [vmem:[#allocation26 + $0x1d8] sm:$0xff] }
0x1514   :  { %v17657_v12 = vpack.c.bf16 %v5473_v51, %v5473_v51  ;;  %v12501_v26 = vcombine.high %v6645_v14, %v6649_v45  ;;  %v5548_v51 = vld [vmem:[#allocation26 + $0x1f8] sm:$0xff] }
0x1515   :  { %v12439_v47 = vcombine.high %v5544_v4, %v5548_v51 }
0x1516   :  { %6476 = vmatpush1.bf16.msra.mxu1 %v12434_v58  ;;  %7004 = vmatmul.mubr.bf16.vlgmr.msra.gmra.mrb[172].mxu0 %v17657_v12  ;;  %v7146_v58 = vld [vmem:[#allocation26 + $0x600] sm:$0xff] }
0x1517   :  { %7054 = vmatpush1.bf16.msra.mxu0 %v12444_v44  ;;  %6543 = vmatprep.subr.bf16.mxu1 %v12383_v38  ;;  %v7150_v44 = vld [vmem:[#allocation26 + $0x620] sm:$0xff]  ;;  %v12430_v38 = vcombine.low %v5536_v1, %v5540_v48  ;;  %v6628_v48 = vld [vmem:[#allocation26 + $0x548] sm:$0xff] }
0x1518   :  { %7055 = vmatprep.subr.bf16.mxu0 %v12453_v15  ;;  %7085 = vmatprep.mubr.bf16.mxu0 %v15763_v10  ;;  %v12500_v15 = vcombine.low %v6645_v14, %v6649_v45  ;;  %v12505_v30 = vcombine.high %v7146_v58, %v7150_v44  ;;  %v6632_v14 = vld [vmem:[#allocation26 + $0x568] sm:$0xff]  ;;  %v7194_v45 = vld [vmem:[#allocation26 + $0x780] sm:$0xff] }
0x1519   :  { %6494 = vmatmul.mubr.bf16.vlgmr.msra.gmra.mrb[152].mxu1 %v17627_v35 }
0x151a   :  { %6544 = vmatpush1.bf16.msra.mxu1 %v12382_v62  ;;  %6575 = vmatprep.mubr.bf16.mxu1 %v15763_v10  ;;  %v7154_v62 = vld [vmem:[#allocation26 + $0x640] sm:$0xff] }
0x151b   :  { %7056 = vmatpush1.bf16.msra.mxu0 %v12452_v52  ;;  %6545 = vmatprep.subr.bf16.mxu1 %v12391_v41  ;;  %v7158_v52 = vld [vmem:[#allocation26 + $0x660] sm:$0xff]  ;;  %v12438_v41 = vcombine.low %v5544_v4, %v5548_v51  ;;  %v6636_v51 = vld [vmem:[#allocation26 + $0x588] sm:$0xff] }
0x151c   :  { %7057 = vmatprep.subr.bf16.mxu0 %v12461_v7  ;;  %v12504_v7 = vcombine.low %v7146_v58, %v7150_v44  ;;  %v12513_v11 = vcombine.high %v7154_v62, %v7158_v52  ;;  %v6640_v58 = vld [vmem:[#allocation26 + $0x5a8] sm:$0xff]  ;;  %v7202_v44 = vld [vmem:[#allocation26 + $0x7c0] sm:$0xff] }
0x151e   :  { %6546 = vmatpush1.bf16.msra.mxu1 %v12390_v3  ;;  %v7162_v3 = vld [vmem:[#allocation26 + $0x680] sm:$0xff] }
0x151f   :  { %7058 = vmatpush1.bf16.msra.mxu0 %v12460_v59  ;;  %6547 = vmatprep.subr.bf16.mxu1 %v12399_v9  ;;  %v7166_v59 = vld [vmem:[#allocation26 + $0x6a0] sm:$0xff]  ;;  %v12442_v9 = vcombine.low %v6588_v21, %v6592_v8  ;;  %v17667_v21 = vld [vmem:[#allocation25] ss:$0 sm:$0xff] }
0x1520   :  { %7059 = vmatprep.subr.bf16.mxu0 %v12469_v29  ;;  %v12512_v29 = vcombine.low %v7154_v62, %v7158_v52  ;;  %v12521_v25 = vcombine.high %v7162_v3, %v7166_v59  ;;  %v5460_v8 = vadd.f32 %v17667_v21, %v17652_v0  ;;  %v6644_v52 = vld [vmem:[#allocation26 + $0x5c8] sm:$0xff]  ;;  %v7160_v0 = vld [vmem:[#allocation26 + $0x670] sm:$0xff] }
0x1522   :  { %6548 = vmatpush1.bf16.msra.mxu1 %v12398_v39  ;;  %v7170_v39 = vld [vmem:[#allocation26 + $0x6c0] sm:$0xff] }
0x1523   :  { %7060 = vmatpush1.bf16.msra.mxu0 %v12468_v19  ;;  %6549 = vmatprep.subr.bf16.mxu1 %v12407_v2  ;;  %v7174_v19 = vld [vmem:[#allocation26 + $0x6e0] sm:$0xff]  ;;  %v12450_v2 = vcombine.low %v6596_v37, %v6600_v60 }
0x1524   :  { %7061 = vmatprep.subr.bf16.mxu0 %v12477_v6  ;;  %v12520_v6 = vcombine.low %v7162_v3, %v7166_v59  ;;  %v12529_v5 = vcombine.high %v7170_v39, %v7174_v19  ;;  %v5474_v3 = vadd.f32 %v5460_v8, %v17483_v33  ;;  %v6630_v8 = vld [vmem:[#allocation26 + $0x558] sm:$0xff] }
0x1526   :  { %6550 = vmatpush1.bf16.msra.mxu1 %v12406_v53  ;;  %v7178_v53 = vld [vmem:[#allocation26 + $0x700] sm:$0xff] }
0x1527   :  { %7062 = vmatpush1.bf16.msra.mxu0 %v12476_v27  ;;  %6551 = vmatprep.subr.bf16.mxu1 %v12415_v16  ;;  %v7182_v27 = vld [vmem:[#allocation26 + $0x720] sm:$0xff]  ;;  %v12458_v16 = vcombine.low %v6604_v50, %v6608_v43 }
0x1528   :  { %7063 = vmatprep.subr.bf16.mxu0 %v12485_v40  ;;  %v12467_v40 = vcombine.high %v6612_v18, %v6616_v54  ;;  %v12537_v61 = vcombine.high %v7178_v53, %v7182_v27 }
0x152a   :  { %6552 = vmatpush1.bf16.msra.mxu1 %v12414_v20  ;;  %v7190_v20 = vld [vmem:[#allocation26 + $0x760] sm:$0xff] }
0x152b   :  { %7064 = vmatpush1.bf16.msra.mxu0 %v12484_v24  ;;  %6553 = vmatprep.subr.bf16.mxu1 %v12423_v17  ;;  %v12466_v24 = vcombine.low %v6612_v18, %v6616_v54  ;;  %v12536_v17 = vcombine.low %v7178_v53, %v7182_v27  ;;  %v12545_v1 = vcombine.high %v7186_v63, %v7190_v20  ;;  %v7164_v18 = vld [vmem:[#allocation26 + $0x690] sm:$0xff] }
0x152c   :  { %7065 = vmatprep.subr.bf16.mxu0 %v12493_v32  ;;  %v12475_v32 = vcombine.high %v6620_v46, %v6624_v42  ;;  %v7168_v54 = vld [vmem:[#allocation26 + $0x6b0] sm:$0xff] }
0x152e   :  { %6554 = vmatpush1.bf16.msra.mxu1 %v12422_v28  ;;  %v7198_v28 = vld [vmem:[#allocation26 + $0x7a0] sm:$0xff] }
0x152f   :  { %7066 = vmatpush1.bf16.msra.mxu0 %v12492_v22  ;;  %6555 = vmatprep.subr.bf16.mxu1 %v12431_v56  ;;  %v12474_v22 = vcombine.low %v6620_v46, %v6624_v42  ;;  %v12544_v56 = vcombine.low %v7186_v63, %v7190_v20  ;;  %v12553_v4 = vcombine.high %v7194_v45, %v7198_v28  ;;  %v6610_v46 = vld [vmem:[#allocation26 + $0x4b8] sm:$0xff]  ;;  %v7172_v42 = vld [vmem:[#allocation26 + $0x6d0] sm:$0xff] }
0x1530   :  { %7067 = vmatprep.subr.bf16.mxu0 %v12501_v26  ;;  %v12483_v26 = vcombine.high %v6628_v48, %v6632_v14  ;;  %v7176_v63 = vld [vmem:[#allocation26 + $0x6f0] sm:$0xff] }
0x1532   :  { %6556 = vmatpush1.bf16.msra.mxu1 %v12430_v38  ;;  %v7206_v38 = vld [vmem:[#allocation26 + $0x7e0] sm:$0xff] }
0x1533   :  { %7068 = vmatpush1.bf16.msra.mxu0 %v12500_v15  ;;  %6557 = vmatprep.subr.bf16.mxu1 %v12439_v47  ;;  %v12482_v15 = vcombine.low %v6628_v48, %v6632_v14  ;;  %v12552_v47 = vcombine.low %v7194_v45, %v7198_v28  ;;  %v12561_v62 = vcombine.high %v7202_v44, %v7206_v38  ;;  %v6618_v48 = vld [vmem:[#allocation26 + $0x4f8] sm:$0xff]  ;;  %v7180_v14 = vld [vmem:[#allocation26 + $0x710] sm:$0xff] }
0x1534   :  { %7530 = vmatprep.subr.bf16.mxu0 %v12505_v30  ;;  %v12491_v30 = vcombine.high %v6636_v51, %v6640_v58  ;;  %v12560_v37 = vcombine.low %v7202_v44, %v7206_v38  ;;  %v7184_v45 = vld [vmem:[#allocation26 + $0x730] sm:$0xff] }
0x1535   :  { %v7192_v44 = vld [vmem:[#allocation26 + $0x770] sm:$0xff] }
0x1536   :  { %6558 = vmatpush1.bf16.msra.mxu1 %v12438_v41  ;;  %7086 = vmatmul.mubr.bf16.vlgmr.msra.gmra.mrb[176].mxu0 %v17657_v12  ;;  %v6648_v41 = vld [vmem:[#allocation26 + $0x5e8] sm:$0xff] }
0x1537   :  { %7531 = vmatpush1.bf16.msra.mxu0 %v12504_v7  ;;  %7012 = vmatprep.subr.bf16.mxu1 %v12443_v49  ;;  %v7148_v7 = vld [vmem:[#allocation26 + $0x610] sm:$0xff]  ;;  %v12499_v60 = vcombine.high %v6644_v52, %v6648_v41 }
0x1538   :  { %7532 = vmatprep.subr.bf16.mxu0 %v12513_v11  ;;  %7562 = vmatprep.mubr.bf16.mxu0 %v15763_v10  ;;  %v7152_v49 = vld [vmem:[#allocation26 + $0x630] sm:$0xff]  ;;  %v12490_v11 = vcombine.low %v6636_v51, %v6640_v58  ;;  %v6626_v51 = vld [vmem:[#allocation26 + $0x538] sm:$0xff] }
0x1539   :  { %6576 = vmatmul.mubr.bf16.vlgmr.msra.gmra.mrb[156].mxu1 %v17627_v35  ;;  %v12528_v35 = vcombine.low %v7170_v39, %v7174_v19  ;;  %v12509_v59 = vcombine.high %v7148_v7, %v7152_v49  ;;  %v12508_v43 = vcombine.low %v7148_v7, %v7152_v49  ;;  %v17674_v19 = vpack.c.bf16 %v5474_v3, %v5474_v3  ;;  %v7188_v58 = vld [vmem:[#allocation26 + $0x750] sm:$0xff]  ;;  %v6642_v3 = vld [vmem:[#allocation26 + $0x5b8] sm:$0xff] }
0x153a   :  { %7013 = vmatpush1.bf16.msra.mxu1 %v12442_v9  ;;  %7044 = vmatprep.mubr.bf16.mxu1 %v15763_v10  ;;  %v6590_v9 = vld [vmem:[#allocation26 + $0x418] sm:$0xff]  ;;  %v12548_v49 = vcombine.low %v7188_v58, %v7192_v44 }
0x153b   :  { %7533 = vmatpush1.bf16.msra.mxu0 %v12512_v29  ;;  %7014 = vmatprep.subr.bf16.mxu1 %v12451_v23  ;;  %v6594_v29 = vld [vmem:[#allocation26 + $0x438] sm:$0xff]  ;;  %v7156_v23 = vld [vmem:[#allocation26 + $0x650] sm:$0xff] }
0x153c   :  { %7534 = vmatprep.subr.bf16.mxu0 %v12521_v25  ;;  %v12498_v25 = vcombine.low %v6644_v52, %v6648_v41  ;;  %v12447_v39 = vcombine.high %v6590_v9, %v6594_v29  ;;  %v12517_v33 = vcombine.high %v7156_v23, %v7160_v0  ;;  %v12446_v27 = vcombine.low %v6590_v9, %v6594_v29  ;;  %v7196_v52 = vld [vmem:[#allocation26 + $0x790] sm:$0xff] }
0x153d   :  { %v7200_v41 = vld [vmem:[#allocation26 + $0x7b0] sm:$0xff] }
0x153e   :  { %7015 = vmatpush1.bf16.msra.mxu1 %v12450_v2  ;;  %v7208_v9 = vld [vmem:[#allocation26 + $0x7f0] sm:$0xff] }
0x153f   :  { %7535 = vmatpush1.bf16.msra.mxu0 %v12520_v6  ;;  %7016 = vmatprep.subr.bf16.mxu1 %v12459_v31  ;;  %v6598_v6 = vld [vmem:[#allocation26 + $0x458] sm:$0xff] }
0x1540   :  { %7536 = vmatprep.subr.bf16.mxu0 %v12529_v5  ;;  %v6602_v31 = vld [vmem:[#allocation26 + $0x478] sm:$0xff] }
0x1541   :  { %v12454_v20 = vcombine.low %v6598_v6, %v6602_v31 }
0x1542   :  { %7017 = vmatpush1.bf16.msra.mxu1 %v12458_v16  ;;  %v12516_v16 = vcombine.low %v7156_v23, %v7160_v0  ;;  %v12556_v23 = vcombine.low %v7196_v52, %v7200_v41 }
0x1543   :  { %7537 = vmatpush1.bf16.msra.mxu0 %v12528_v35  ;;  %7018 = vmatprep.subr.bf16.mxu1 %v12467_v40  ;;  %v12455_v35 = vcombine.high %v6598_v6, %v6602_v31  ;;  %v12525_v40 = vcombine.high %v7164_v18, %v7168_v54  ;;  %v7709_v6 = vld [vmem:[#allocation26 + $0x820] sm:$0xff] }
0x1544   :  { %7538 = vmatprep.subr.bf16.mxu0 %v12537_v61  ;;  %v6606_v61 = vld [vmem:[#allocation26 + $0x498] sm:$0xff] }
0x1545   :  { %v12462_v28 = vcombine.low %v6606_v61, %v6610_v46 }
0x1546   :  { %7019 = vmatpush1.bf16.msra.mxu1 %v12466_v24  ;;  %v12524_v24 = vcombine.low %v7164_v18, %v7168_v54  ;;  %v7147_v54 = vld [vmem:[#allocation26 + $0x608] sm:$0xff] }
0x1547   :  { %7539 = vmatpush1.bf16.msra.mxu0 %v12536_v17  ;;  %7020 = vmatprep.subr.bf16.mxu1 %v12475_v32  ;;  %v12463_v17 = vcombine.high %v6606_v61, %v6610_v46  ;;  %v12533_v32 = vcombine.high %v7172_v42, %v7176_v63 }
0x1548   :  { %7540 = vmatprep.subr.bf16.mxu0 %v12545_v1  ;;  %v6614_v1 = vld [vmem:[#allocation26 + $0x4d8] sm:$0xff] }
0x1549   :  { %v12470_v38 = vcombine.low %v6614_v1, %v6618_v48 }
0x154a   :  { %7021 = vmatpush1.bf16.msra.mxu1 %v12474_v22  ;;  %v12532_v22 = vcombine.low %v7172_v42, %v7176_v63 }
0x154b   :  { %7541 = vmatpush1.bf16.msra.mxu0 %v12544_v56  ;;  %7022 = vmatprep.subr.bf16.mxu1 %v12483_v26  ;;  %v12471_v56 = vcombine.high %v6614_v1, %v6618_v48  ;;  %v12541_v26 = vcombine.high %v7180_v14, %v7184_v45  ;;  %v7721_v1 = vld [vmem:[#allocation26 + $0x880] sm:$0xff] }
0x154c   :  { %7542 = vmatprep.subr.bf16.mxu0 %v12553_v4  ;;  %v6622_v4 = vld [vmem:[#allocation26 + $0x518] sm:$0xff]  ;;  %v7725_v48 = vld [vmem:[#allocation26 + $0x8a0] sm:$0xff] }
0x154d   :  { %v12478_v7 = vcombine.low %v6622_v4, %v6626_v51 }
0x154e   :  { %7023 = vmatpush1.bf16.msra.mxu1 %v12482_v15  ;;  %v12540_v15 = vcombine.low %v7180_v14, %v7184_v45 }
0x154f   :  { %7543 = vmatpush1.bf16.msra.mxu0 %v12552_v47  ;;  %7024 = vmatprep.subr.bf16.mxu1 %v12491_v30  ;;  %v12479_v47 = vcombine.high %v6622_v4, %v6626_v51  ;;  %v12549_v30 = vcombine.high %v7188_v58, %v7192_v44  ;;  %v12585_v4 = vcombine.high %v7721_v1, %v7725_v48  ;;  %v7729_v51 = vld [vmem:[#allocation26 + $0x8c0] sm:$0xff] }
0x1550   :  { %7544 = vmatprep.subr.bf16.mxu0 %v12561_v62  ;;  %v6634_v62 = vld [vmem:[#allocation26 + $0x578] sm:$0xff]  ;;  %v7733_v58 = vld [vmem:[#allocation26 + $0x8e0] sm:$0xff] }
0x1551   :  { %v12486_v29 = vcombine.low %v6630_v8, %v6634_v62 }
0x1552   :  { %7025 = vmatpush1.bf16.msra.mxu1 %v12490_v11  ;;  %v12487_v11 = vcombine.high %v6630_v8, %v6634_v62  ;;  %v12593_v8 = vcombine.high %v7729_v51, %v7733_v58  ;;  %v7737_v62 = vld [vmem:[#allocation26 + $0x900] sm:$0xff] }
0x1553   :  { %7545 = vmatpush1.bf16.msra.mxu0 %v12560_v37  ;;  %v17672_v50 = vpop.f32.mrb[156].mxu0  ;;  %7026 = vmatprep.subr.bf16.mxu1 %v12499_v60  ;;  %v12557_v37 = vcombine.high %v7196_v52, %v7200_v41  ;;  %v6638_v60 = vld [vmem:[#allocation26 + $0x598] sm:$0xff]  ;;  %v7741_v52 = vld [vmem:[#allocation26 + $0x920] sm:$0xff] }
0x1554   :  { %v17676_v2 = vpop.f32.mrb[157].mxu0  ;;  %7612 = vmatprep.subr.bf16.mxu0 %v12509_v59  ;;  %v7204_v59 = vld [vmem:[#allocation26 + $0x7d0] sm:$0xff]  ;;  %v12495_v0 = vcombine.high %v6638_v60, %v6642_v3  ;;  %v12494_v31 = vcombine.low %v6638_v60, %v6642_v3  ;;  %v7745_v60 = vld [vmem:[#allocation26 + $0x940] sm:$0xff] }
0x1555   :  { %v5974_v5 = vpop.f32.mrb[158].mxu0  ;;  %v7749_v3 = vld [vmem:[#allocation26 + $0x960] sm:$0xff] }
0x1556   :  { %7027 = vmatpush1.bf16.msra.mxu1 %v12498_v25  ;;  %7563 = vmatmul.mubr.bf16.vlgmr.msra.gmra.mrb[180].mxu0 %v17674_v19  ;;  %v5975_v53 = vpop.f32.mrb[159].mxu0  ;;  %v12565_v25 = vcombine.high %v7204_v59, %v7208_v9  ;;  %v12564_v5 = vcombine.low %v7204_v59, %v7208_v9 }
0x1557   :  { %7613 = vmatpush1.bf16.msra.mxu0 %v12508_v43  ;;  %7094 = vmatprep.subr.bf16.mxu1 %v12447_v39  ;;  %v6646_v43 = vld [vmem:[#allocation26 + $0x5d8] sm:$0xff]  ;;  %v7151_v53 = vld [vmem:[#allocation26 + $0x628] sm:$0xff] }
0x1558   :  { %7614 = vmatprep.subr.bf16.mxu0 %v12517_v33  ;;  %7644 = vmatprep.mubr.bf16.mxu0 %v15763_v10  ;;  %v6650_v39 = vld [vmem:[#allocation26 + $0x5f8] sm:$0xff]  ;;  %v7705_v33 = vld [vmem:[#allocation26 + $0x800] sm:$0xff]  ;;  %v12507_v46 = vcombine.high %v7147_v54, %v7151_v53  ;;  %v12506_v45 = vcombine.low %v7147_v54, %v7151_v53 }
0x1559   :  { %7045 = vmatmul.mubr.bf16.vlgmr.msra.gmra.mrb[160].mxu1 %v17657_v12  ;;  %v12503_v18 = vcombine.high %v6646_v43, %v6650_v39  ;;  %v12568_v42 = vcombine.low %v7705_v33, %v7709_v6  ;;  %v7761_v53 = vld [vmem:[#allocation26 + $0x9c0] sm:$0xff] }
0x155a   :  { %7095 = vmatpush1.bf16.msra.mxu1 %v12446_v27  ;;  %7126 = vmatprep.mubr.bf16.mxu1 %v15763_v10  ;;  %v12569_v27 = vcombine.high %v7705_v33, %v7709_v6 }
0x155b   :  { %7615 = vmatpush1.bf16.msra.mxu0 %v12516_v16  ;;  %7096 = vmatprep.subr.bf16.mxu1 %v12455_v35  ;;  %v7713_v16 = vld [vmem:[#allocation26 + $0x840] sm:$0xff] }
0x155c   :  { %7616 = vmatprep.subr.bf16.mxu0 %v12525_v40  ;;  %v7717_v35 = vld [vmem:[#allocation26 + $0x860] sm:$0xff]  ;;  %v12502_v40 = vcombine.low %v6646_v43, %v6650_v39 }
0x155d   :  { %v7753_v43 = vld [vmem:[#allocation26 + $0x980] sm:$0xff] }
0x155e   :  { %7097 = vmatpush1.bf16.msra.mxu1 %v12454_v20  ;;  %v7155_v20 = vld [vmem:[#allocation26 + $0x648] sm:$0xff]  ;;  %v7757_v39 = vld [vmem:[#allocation26 + $0x9a0] sm:$0xff] }
0x155f   :  { %7617 = vmatpush1.bf16.msra.mxu0 %v12524_v24  ;;  %7098 = vmatprep.subr.bf16.mxu1 %v12463_v17  ;;  %v7159_v24 = vld [vmem:[#allocation26 + $0x668] sm:$0xff]  ;;  %v12577_v17 = vcombine.high %v7713_v16, %v7717_v35  ;;  %v12617_v54 = vcombine.high %v7753_v43, %v7757_v39 }
0x1560   :  { %7618 = vmatprep.subr.bf16.mxu0 %v12533_v32  ;;  %v12514_v44 = vcombine.low %v7155_v20, %v7159_v24 }
0x1562   :  { %7099 = vmatpush1.bf16.msra.mxu1 %v12462_v28  ;;  %v12515_v28 = vcombine.high %v7155_v20, %v7159_v24  ;;  %v17690_v24 = vld [vmem:[#allocation26 + $0x810] sm:$0xff] }
0x1563   :  { %7619 = vmatpush1.bf16.msra.mxu0 %v12532_v22  ;;  %7100 = vmatprep.subr.bf16.mxu1 %v12471_v56  ;;  %v12576_v22 = vcombine.low %v7713_v16, %v7717_v35  ;;  %v7163_v56 = vld [vmem:[#allocation26 + $0x688] sm:$0xff] }
0x1564   :  { %7620 = vmatprep.subr.bf16.mxu0 %v12541_v26  ;;  %v7167_v26 = vld [vmem:[#allocation26 + $0x6a8] sm:$0xff] }
0x1565   :  { %v12522_v41 = vcombine.low %v7163_v56, %v7167_v26 }
0x1566   :  { %7101 = vmatpush1.bf16.msra.mxu1 %v12470_v38  ;;  %v12523_v38 = vcombine.high %v7163_v56, %v7167_v26 }
0x1567   :  { %7621 = vmatpush1.bf16.msra.mxu0 %v12540_v15  ;;  %7102 = vmatprep.subr.bf16.mxu1 %v12479_v47  ;;  %v12584_v15 = vcombine.low %v7721_v1, %v7725_v48  ;;  %v7171_v47 = vld [vmem:[#allocation26 + $0x6c8] sm:$0xff] }
0x1568   :  { %7622 = vmatprep.subr.bf16.mxu0 %v12549_v30  ;;  %v7175_v30 = vld [vmem:[#allocation26 + $0x6e8] sm:$0xff] }
0x1569   :  { %v12530_v59 = vcombine.low %v7171_v47, %v7175_v30 }
0x156a   :  { %7103 = vmatpush1.bf16.msra.mxu1 %v12478_v7  ;;  %v12592_v7 = vcombine.low %v7729_v51, %v7733_v58  ;;  %v7157_v58 = vld [vmem:[#allocation26 + $0x658] sm:$0xff] }
0x156b   :  { %7623 = vmatpush1.bf16.msra.mxu0 %v12548_v49  ;;  %7104 = vmatprep.subr.bf16.mxu1 %v12487_v11  ;;  %v7179_v49 = vld [vmem:[#allocation26 + $0x708] sm:$0xff] }
0x156c   :  { %7624 = vmatprep.subr.bf16.mxu0 %v12557_v37  ;;  %v7183_v11 = vld [vmem:[#allocation26 + $0x728] sm:$0xff]  ;;  %v12601_v37 = vcombine.high %v7737_v62, %v7741_v52 }
0x156d   :  { %v12539_v9 = vcombine.high %v7179_v49, %v7183_v11  ;;  %v12538_v33 = vcombine.low %v7179_v49, %v7183_v11  ;;  %v7181_v11 = vld [vmem:[#allocation26 + $0x718] sm:$0xff] }
0x156e   :  { %7105 = vmatpush1.bf16.msra.mxu1 %v12486_v29  ;;  %v12600_v29 = vcombine.low %v7737_v62, %v7741_v52  ;;  %v7165_v62 = vld [vmem:[#allocation26 + $0x698] sm:$0xff] }
0x156f   :  { %7625 = vmatpush1.bf16.msra.mxu0 %v12556_v23  ;;  %7106 = vmatprep.subr.bf16.mxu1 %v12495_v0  ;;  %v7187_v23 = vld [vmem:[#allocation26 + $0x748] sm:$0xff]  ;;  %v7169_v52 = vld [vmem:[#allocation26 + $0x6b8] sm:$0xff] }
0x1570   :  { %7626 = vmatprep.subr.bf16.mxu0 %v12565_v25  ;;  %v7191_v0 = vld [vmem:[#allocation26 + $0x768] sm:$0xff]  ;;  %v12609_v25 = vcombine.high %v7745_v60, %v7749_v3 }
0x1571   :  { %v12547_v6 = vcombine.high %v7187_v23, %v7191_v0  ;;  %v12546_v16 = vcombine.low %v7187_v23, %v7191_v0 }
0x1572   :  { %7107 = vmatpush1.bf16.msra.mxu1 %v12494_v31  ;;  %v12608_v31 = vcombine.low %v7745_v60, %v7749_v3 }
0x1573   :  { %v17682_v61 = vpop.f32.mrb[160].mxu0  ;;  %7627 = vmatpush1.bf16.msra.mxu0 %v12564_v5  ;;  %7108 = vmatprep.subr.bf16.mxu1 %v12503_v18  ;;  %v7195_v5 = vld [vmem:[#allocation26 + $0x788] sm:$0xff] }
0x1574   :  { %v17684_v63 = vpop.f32.mrb[161].mxu0  ;;  %8089 = vmatprep.subr.bf16.mxu0 %v12569_v27  ;;  %v7199_v18 = vld [vmem:[#allocation26 + $0x7a8] sm:$0xff]  ;;  %v7765_v27 = vld [vmem:[#allocation26 + $0x9e0] sm:$0xff] }
0x1575   :  { %v6056_v32 = vpop.f32.mrb[162].mxu0  ;;  %v12555_v35 = vcombine.high %v7195_v5, %v7199_v18  ;;  %v12625_v20 = vcombine.high %v7761_v53, %v7765_v27  ;;  %v12624_v48 = vcombine.low %v7761_v53, %v7765_v27  ;;  %v7719_v53 = vld [vmem:[#allocation26 + $0x870] sm:$0xff] }
0x1576   :  { %v6057_v14 = vpop.f32.mrb[163].mxu0  ;;  %7109 = vmatpush1.bf16.msra.mxu1 %v12502_v40  ;;  %7645 = vmatmul.mubr.bf16.vlgmr.msra.gmra.mrb[184].mxu0 %v17674_v19  ;;  %v12616_v40 = vcombine.low %v7753_v43, %v7757_v39  ;;  %v12554_v32 = vcombine.low %v7195_v5, %v7199_v18  ;;  %v7197_v5 = vld [vmem:[#allocation26 + $0x798] sm:$0xff] }
0x1577   :  { %7571 = vmatprep.subr.bf16.mxu1 %v12507_v46  ;;  %8090 = vmatpush1.bf16.msra.mxu0 %v12568_v42  ;;  %v7203_v46 = vld [vmem:[#allocation26 + $0x7c8] sm:$0xff]  ;;  %v7149_v14 = vld [vmem:[#allocation26 + $0x618] sm:$0xff] }
0x1578   :  { %8091 = vmatprep.subr.bf16.mxu0 %v12577_v17  ;;  %8121 = vmatprep.mubr.bf16.mxu0 %v15763_v10  ;;  %v7207_v42 = vld [vmem:[#allocation26 + $0x7e8] sm:$0xff]  ;;  %v17692_v17 = vld [vmem:[#allocation26 + $0x830] sm:$0xff]  ;;  %v7201_v18 = vld [vmem:[#allocation26 + $0x7b8] sm:$0xff] }
0x1579   :  { %7127 = vmatmul.mubr.bf16.vlgmr.msra.gmra.mrb[164].mxu1 %v17657_v12  ;;  %v12531_v12 = vcombine.high %v7171_v47, %v7175_v30  ;;  %v12563_v1 = vcombine.high %v7203_v46, %v7207_v42 }
0x157a   :  { %7572 = vmatpush1.bf16.msra.mxu1 %v12506_v45  ;;  %7603 = vmatprep.mubr.bf16.mxu1 %v15763_v10  ;;  %v7153_v45 = vld [vmem:[#allocation26 + $0x638] sm:$0xff] }
0x157b   :  { %7573 = vmatprep.subr.bf16.mxu1 %v12515_v28  ;;  %8092 = vmatpush1.bf16.msra.mxu0 %v12576_v22  ;;  %v12573_v28 = vcombine.high %v17690_v24, %v17692_v17  ;;  %v12562_v22 = vcombine.low %v7203_v46, %v7207_v42  ;;  %v12511_v26 = vcombine.high %v7149_v14, %v7153_v45 }
0x157c   :  { %8093 = vmatprep.subr.bf16.mxu0 %v12585_v4  ;;  %v12510_v30 = vcombine.low %v7149_v14, %v7153_v45  ;;  %v7723_v14 = vld [vmem:[#allocation26 + $0x890] sm:$0xff] }
0x157d   :  { %v7727_v45 = vld [vmem:[#allocation26 + $0x8b0] sm:$0xff] }
0x157e   :  { %7574 = vmatpush1.bf16.msra.mxu1 %v12514_v44  ;;  %v7161_v44 = vld [vmem:[#allocation26 + $0x678] sm:$0xff] }
0x157f   :  { %7575 = vmatprep.subr.bf16.mxu1 %v12523_v38  ;;  %8094 = vmatpush1.bf16.msra.mxu0 %v12584_v15 }
0x1580   :  { %8095 = vmatprep.subr.bf16.mxu0 %v12593_v8  ;;  %v12519_v8 = vcombine.high %v7157_v58, %v7161_v44 }
0x1582   :  { %7576 = vmatpush1.bf16.msra.mxu1 %v12522_v41  ;;  %v12527_v41 = vcombine.high %v7165_v62, %v7169_v52 }
0x1583   :  { %7577 = vmatprep.subr.bf16.mxu1 %v12531_v12  ;;  %8096 = vmatpush1.bf16.msra.mxu0 %v12592_v7  ;;  %v7173_v12 = vld [vmem:[#allocation26 + $0x6d8] sm:$0xff] }
0x1584   :  { %8097 = vmatprep.subr.bf16.mxu0 %v12601_v37  ;;  %v7177_v7 = vld [vmem:[#allocation26 + $0x6f8] sm:$0xff] }
0x1585   :  { %v12535_v49 = vcombine.high %v7173_v12, %v7177_v7  ;;  %v7185_v37 = vld [vmem:[#allocation26 + $0x738] sm:$0xff]  ;;  %v12534_v60 = vcombine.low %v7173_v12, %v7177_v7  ;;  %v7718_v12 = vld [vmem:[#allocation26 + $0x868] sm:$0xff] }
0x1586   :  { %7578 = vmatpush1.bf16.msra.mxu1 %v12530_v59  ;;  %v12543_v3 = vcombine.high %v7181_v11, %v7185_v37  ;;  %v12542_v43 = vcombine.low %v7181_v11, %v7185_v37  ;;  %v7743_v11 = vld [vmem:[#allocation26 + $0x930] sm:$0xff] }
0x1587   :  { %7579 = vmatprep.subr.bf16.mxu1 %v12539_v9  ;;  %8098 = vmatpush1.bf16.msra.mxu0 %v12600_v29  ;;  %v7189_v9 = vld [vmem:[#allocation26 + $0x758] sm:$0xff] }
0x1588   :  { %8099 = vmatprep.subr.bf16.mxu0 %v12609_v25  ;;  %v7193_v29 = vld [vmem:[#allocation26 + $0x778] sm:$0xff] }
0x158a   :  { %7580 = vmatpush1.bf16.msra.mxu1 %v12538_v33  ;;  %v12551_v33 = vcombine.high %v7189_v9, %v7193_v29 }
0x158b   :  { %7581 = vmatprep.subr.bf16.mxu1 %v12547_v6  ;;  %8100 = vmatpush1.bf16.msra.mxu0 %v12608_v31 }
0x158c   :  { %8101 = vmatprep.subr.bf16.mxu0 %v12617_v54  ;;  %v7715_v54 = vld [vmem:[#allocation26 + $0x850] sm:$0xff] }
0x158e   :  { %7582 = vmatpush1.bf16.msra.mxu1 %v12546_v16  ;;  %v12550_v16 = vcombine.low %v7189_v9, %v7193_v29  ;;  %v7722_v9 = vld [vmem:[#allocation26 + $0x888] sm:$0xff] }
0x158f   :  { %7583 = vmatprep.subr.bf16.mxu1 %v12555_v35  ;;  %8102 = vmatpush1.bf16.msra.mxu0 %v12616_v40  ;;  %v12572_v35 = vcombine.low %v17690_v24, %v17692_v17  ;;  %v12559_v40 = vcombine.high %v7197_v5, %v7201_v18  ;;  %v12580_v24 = vcombine.low %v7715_v54, %v7719_v53  ;;  %v7726_v29 = vld [vmem:[#allocation26 + $0x8a8] sm:$0xff] }
0x1590   :  { %8103 = vmatprep.subr.bf16.mxu0 %v12625_v20  ;;  %v12581_v20 = vcombine.high %v7715_v54, %v7719_v53  ;;  %v12586_v54 = vcombine.low %v7722_v9, %v7726_v29 }
0x1592   :  { %7584 = vmatpush1.bf16.msra.mxu1 %v12554_v32  ;;  %v7205_v32 = vld [vmem:[#allocation26 + $0x7d8] sm:$0xff] }
0x1593   :  { %v6454_v56 = vpop.f32.mrb[164].mxu0  ;;  %7585 = vmatprep.subr.bf16.mxu1 %v12563_v1  ;;  %8104 = vmatpush1.bf16.msra.mxu0 %v12624_v48  ;;  %v7209_v1 = vld [vmem:[#allocation26 + $0x7f8] sm:$0xff] }
0x1594   :  { %v17697_v4 = vadd.f32 %v6454_v56, %v17672_v50  ;;  %v6456_v51 = vpop.f32.mrb[165].mxu0  ;;  %8171 = vmatprep.subr.bf16.mxu0 %v12573_v28  ;;  %v12518_v50 = vcombine.low %v7157_v58, %v7161_v44  ;;  %v12558_v28 = vcombine.low %v7197_v5, %v7201_v18  ;;  %v12567_v17 = vcombine.high %v7205_v32, %v7209_v1  ;;  %v7731_v58 = vld [vmem:[#allocation26 + $0x8d0] sm:$0xff] }
0x1595   :  { %v17700_v38 = vadd.f32 %v6456_v51, %v17676_v2  ;;  %v6458_v15 = vpop.f32.mrb[166].mxu0  ;;  %v12526_v2 = vcombine.low %v7165_v62, %v7169_v52  ;;  %v12589_v56 = vcombine.high %v7723_v14, %v7727_v45  ;;  %v7710_v51 = vld [vmem:[#allocation26 + $0x828] sm:$0xff]  ;;  %v7735_v44 = vld [vmem:[#allocation26 + $0x8f0] sm:$0xff] }
0x1596   :  { %v6459_v47 = vpop.f32.mrb[167].mxu0  ;;  %7586 = vmatpush1.bf16.msra.mxu1 %v12562_v22  ;;  %v12566_v15 = vcombine.low %v7205_v32, %v7209_v1  ;;  %v7755_v5 = vld [vmem:[#allocation26 + $0x990] sm:$0xff] }
0x1597   :  { %7653 = vmatprep.subr.bf16.mxu1 %v12511_v26  ;;  %v7706_v26 = vld [vmem:[#allocation26 + $0x808] sm:$0xff]  ;;  %v7759_v18 = vld [vmem:[#allocation26 + $0x9b0] sm:$0xff] }
0x1598   :  { %v12620_v1 = vcombine.low %v7755_v5, %v7759_v18 }
0x1599   :  { %7604 = vmatmul.mubr.bf16.vlgmr.msra.gmra.mrb[168].mxu1 %v17674_v19 }
0x159a   :  { %7654 = vmatpush1.bf16.msra.mxu1 %v12510_v30  ;;  %7685 = vmatprep.mubr.bf16.mxu1 %v15763_v10  ;;  %v12588_v30 = vcombine.low %v7723_v14, %v7727_v45 }
0x159b   :  { %7655 = vmatprep.subr.bf16.mxu1 %v12519_v8  ;;  %v12571_v8 = vcombine.high %v7706_v26, %v7710_v51 }
0x159e   :  { %7656 = vmatpush1.bf16.msra.mxu1 %v12518_v50  ;;  %v12597_v50 = vcombine.high %v7731_v58, %v7735_v44 }
0x159f   :  { %7657 = vmatprep.subr.bf16.mxu1 %v12527_v41  ;;  %v7714_v41 = vld [vmem:[#allocation26 + $0x848] sm:$0xff] }
0x15a2   :  { %7658 = vmatpush1.bf16.msra.mxu1 %v12526_v2 }
0x15a3   :  { %7659 = vmatprep.subr.bf16.mxu1 %v12535_v49  ;;  %v7739_v49 = vld [vmem:[#allocation26 + $0x910] sm:$0xff] }
0x15a4   :  { %v13433_v59 = vpop.f32.mrb[140].mxu1 }
0x15a5   :  { %v13434_v23 = vpop.f32.mrb[141].mxu1 }
0x15a6   :  { %v13435_v0 = vadd.f32 %v13434_v23, %v13433_v59  ;;  %7660 = vmatpush1.bf16.msra.mxu1 %v12534_v60  ;;  %v13436_v25 = vpop.f32.mrb[142].mxu1  ;;  %v12570_v60 = vcombine.low %v7706_v26, %v7710_v51  ;;  %v12579_v59 = vcombine.high %v7714_v41, %v7718_v12  ;;  %v7747_v23 = vld [vmem:[#allocation26 + $0x950] sm:$0xff] }
0x15a7   :  { %v13437_v39 = vpop.f32.mrb[143].mxu1  ;;  %7661 = vmatprep.subr.bf16.mxu1 %v12543_v3  ;;  %v12596_v3 = vcombine.low %v7731_v58, %v7735_v44  ;;  %v7754_v58 = vld [vmem:[#allocation26 + $0x988] sm:$0xff] }
0x15a8   :  { %v5465_v6 = vadd.f32 %v17667_v21, %v13435_v0  ;;  %v17705_v31 = vadd.f32 %v13437_v39, %v13436_v25  ;;  %v7751_v0 = vld [vmem:[#allocation26 + $0x970] sm:$0xff]  ;;  %v12604_v25 = vcombine.low %v7739_v49, %v7743_v11  ;;  %v7758_v44 = vld [vmem:[#allocation26 + $0x9a8] sm:$0xff] }
0x15a9   :  { %v12613_v39 = vcombine.high %v7747_v23, %v7751_v0 }
0x15aa   :  { %v5475_v27 = vadd.f32 %v5465_v6, %v17489_v34  ;;  %7662 = vmatpush1.bf16.msra.mxu1 %v12542_v43  ;;  %v12587_v43 = vcombine.high %v7722_v9, %v7726_v29  ;;  %v7734_v6 = vld [vmem:[#allocation26 + $0x8e8] sm:$0xff] }
0x15ab   :  { %7663 = vmatprep.subr.bf16.mxu1 %v12551_v33  ;;  %v7730_v33 = vld [vmem:[#allocation26 + $0x8c8] sm:$0xff] }
0x15ac   :  { %v17710_v46 = vpack.c.bf16 %v5475_v27, %v5475_v27  ;;  %v17712_v42 = vpop.f32.mrb[144].mxu1  ;;  %v12595_v53 = vcombine.high %v7730_v33, %v7734_v6  ;;  %v12621_v27 = vcombine.high %v7755_v5, %v7759_v18  ;;  %v12594_v32 = vcombine.low %v7730_v33, %v7734_v6  ;;  %v7716_v5 = vld [vmem:[#allocation26 + $0x858] sm:$0xff] }
0x15ad   :  { %v17714_v48 = vpop.f32.mrb[145].mxu1  ;;  %v7720_v18 = vld [vmem:[#allocation26 + $0x878] sm:$0xff] }
0x15ae   :  { %7664 = vmatpush1.bf16.msra.mxu1 %v12550_v16  ;;  %v6015_v34 = vpop.f32.mrb[146].mxu1  ;;  %8122 = vmatmul.mubr.bf16.vlgmr.msra.gmra.mrb[188].mxu0 %v17710_v46  ;;  %v7738_v16 = vld [vmem:[#allocation26 + $0x908] sm:$0xff] }
0x15af   :  { %8172 = vmatpush1.bf16.msra.mxu0 %v12572_v35  ;;  %v6016_v22 = vpop.f32.mrb[147].mxu1  ;;  %7665 = vmatprep.subr.bf16.mxu1 %v12559_v40  ;;  %v7742_v35 = vld [vmem:[#allocation26 + $0x928] sm:$0xff]  ;;  %v7763_v40 = vld [vmem:[#allocation26 + $0x9d0] sm:$0xff] }
0x15b0   :  { %8173 = vmatprep.subr.bf16.mxu0 %v12581_v20  ;;  %8203 = vmatprep.mubr.bf16.mxu0 %v15763_v10  ;;  %v7767_v20 = vld [vmem:[#allocation26 + $0x9f0] sm:$0xff]  ;;  %v12603_v14 = vcombine.high %v7738_v16, %v7742_v35  ;;  %v7746_v34 = vld [vmem:[#allocation26 + $0x948] sm:$0xff]  ;;  %v8264_v22 = vld [vmem:[#allocation26 + $0xa00] sm:$0xff] }
0x15b1   :  { %v12629_v45 = vcombine.high %v7763_v40, %v7767_v20 }
0x15b2   :  { %7666 = vmatpush1.bf16.msra.mxu1 %v12558_v28  ;;  %v7750_v28 = vld [vmem:[#allocation26 + $0x968] sm:$0xff] }
0x15b3   :  { %v6536_v47 = vpop.f32.mrb[168].mxu0  ;;  %8174 = vmatpush1.bf16.msra.mxu0 %v12580_v24  ;;  %7667 = vmatprep.subr.bf16.mxu1 %v12567_v17  ;;  %v8268_v24 = vld [vmem:[#allocation26 + $0xa20] sm:$0xff]  ;;  %v12602_v17 = vcombine.low %v7738_v16, %v7742_v35  ;;  %v12611_v26 = vcombine.high %v7746_v34, %v7750_v28  ;;  %v12583_v16 = vcombine.high %v7716_v5, %v7720_v18 }
0x15b4   :  { %v17719_v62 = vadd.f32 %v6536_v47, %v17682_v61  ;;  %v6538_v52 = vpop.f32.mrb[169].mxu0  ;;  %8175 = vmatprep.subr.bf16.mxu0 %v12589_v56  ;;  %v12605_v61 = vcombine.high %v7739_v49, %v7743_v11  ;;  %v12628_v56 = vcombine.low %v7763_v40, %v7767_v20  ;;  %v12633_v51 = vcombine.high %v8264_v22, %v8268_v24  ;;  %v8276_v47 = vld [vmem:[#allocation26 + $0xa60] sm:$0xff]  ;;  %v7724_v40 = vld [vmem:[#allocation26 + $0x898] sm:$0xff] }
0x15b5   :  { %v17722_v7 = vadd.f32 %v6538_v52, %v17684_v63  ;;  %v6540_v2 = vpop.f32.mrb[170].mxu0  ;;  %v12578_v63 = vcombine.low %v7714_v41, %v7718_v12  ;;  %v12619_v52 = vcombine.high %v7754_v58, %v7758_v44  ;;  %v7762_v12 = vld [vmem:[#allocation26 + $0x9c8] sm:$0xff]  ;;  %v8280_v11 = vld [vmem:[#allocation26 + $0xa80] sm:$0xff]  ;;  %v7728_v20 = vld [vmem:[#allocation26 + $0x8b8] sm:$0xff] }
0x15b6   :  { %v6541_v37 = vpop.f32.mrb[171].mxu0  ;;  %7668 = vmatpush1.bf16.msra.mxu1 %v12566_v15  ;;  %v8272_v15 = vld [vmem:[#allocation26 + $0xa40] sm:$0xff]  ;;  %v7766_v2 = vld [vmem:[#allocation26 + $0x9e8] sm:$0xff] }
0x15b7   :  { %8176 = vmatpush1.bf16.msra.mxu0 %v12588_v30  ;;  %8130 = vmatprep.subr.bf16.mxu1 %v12571_v8  ;;  %v12610_v30 = vcombine.low %v7746_v34, %v7750_v28  ;;  %v12632_v8 = vcombine.low %v8264_v22, %v8268_v24  ;;  %v12641_v41 = vcombine.high %v8272_v15, %v8276_v47  ;;  %v8284_v37 = vld [vmem:[#allocation26 + $0xaa0] sm:$0xff]  ;;  %v7732_v22 = vld [vmem:[#allocation26 + $0x8d8] sm:$0xff] }
0x15b8   :  { %8177 = vmatprep.subr.bf16.mxu0 %v12597_v50  ;;  %v12627_v9 = vcombine.high %v7762_v12, %v7766_v2  ;;  %v12649_v29 = vcombine.high %v8280_v11, %v8284_v37  ;;  %v12591_v34 = vcombine.high %v7724_v40, %v7728_v20  ;;  %v7736_v24 = vld [vmem:[#allocation26 + $0x8f8] sm:$0xff] }
0x15b9   :  { %7686 = vmatmul.mubr.bf16.vlgmr.msra.gmra.mrb[172].mxu1 %v17674_v19  ;;  %v12612_v19 = vcombine.low %v7747_v23, %v7751_v0  ;;  %v7708_v23 = vld [vmem:[#allocation26 + $0x818] sm:$0xff] }
0x15ba   :  { %8131 = vmatpush1.bf16.msra.mxu1 %v12570_v60  ;;  %8162 = vmatprep.mubr.bf16.mxu1 %v15763_v10  ;;  %v7712_v0 = vld [vmem:[#allocation26 + $0x838] sm:$0xff] }
0x15bb   :  { %8178 = vmatpush1.bf16.msra.mxu0 %v12596_v3  ;;  %8132 = vmatprep.subr.bf16.mxu1 %v12579_v59  ;;  %v12618_v3 = vcombine.low %v7754_v58, %v7758_v44  ;;  %v12575_v33 = vcombine.high %v7708_v23, %v7712_v0  ;;  %v12599_v58 = vcombine.high %v7732_v22, %v7736_v24 }
0x15bc   :  { %8179 = vmatprep.subr.bf16.mxu0 %v12605_v61  ;;  %v12640_v61 = vcombine.low %v8272_v15, %v8276_v47  ;;  %v7740_v15 = vld [vmem:[#allocation26 + $0x918] sm:$0xff] }
0x15bd   :  { %v7744_v47 = vld [vmem:[#allocation26 + $0x938] sm:$0xff] }
0x15be   :  { %8133 = vmatpush1.bf16.msra.mxu1 %v12578_v63  ;;  %v8288_v63 = vld [vmem:[#allocation26 + $0xac0] sm:$0xff] }
0x15bf   :  { %8180 = vmatpush1.bf16.msra.mxu0 %v12604_v25  ;;  %8134 = vmatprep.subr.bf16.mxu1 %v12587_v43  ;;  %v8292_v25 = vld [vmem:[#allocation26 + $0xae0] sm:$0xff]  ;;  %v12626_v43 = vcombine.low %v7762_v12, %v7766_v2  ;;  %v12607_v12 = vcombine.high %v7740_v15, %v7744_v47  ;;  %v5468_v2 = vadd.f32 %v17667_v21, %v17705_v31  ;;  %v8274_v21 = vld [vmem:[#allocation26 + $0xa50] sm:$0xff] }
0x15c0   :  { %8181 = vmatprep.subr.bf16.mxu0 %v12613_v39  ;;  %v12648_v39 = vcombine.low %v8280_v11, %v8284_v37  ;;  %v12657_v6 = vcombine.high %v8288_v63, %v8292_v25  ;;  %v7748_v37 = vld [vmem:[#allocation26 + $0x958] sm:$0xff]  ;;  %v8278_v31 = vld [vmem:[#allocation26 + $0xa70] sm:$0xff] }
0x15c2   :  { %8135 = vmatpush1.bf16.msra.mxu1 %v12586_v54  ;;  %v8296_v54 = vld [vmem:[#allocation26 + $0xb00] sm:$0xff] }
0x15c3   :  { %8182 = vmatpush1.bf16.msra.mxu0 %v12612_v19  ;;  %8136 = vmatprep.subr.bf16.mxu1 %v12595_v53  ;;  %v8300_v19 = vld [vmem:[#allocation26 + $0xb20] sm:$0xff]  ;;  %v12574_v53 = vcombine.low %v7708_v23, %v7712_v0  ;;  %v5476_v23 = vadd.f32 %v5468_v2, %v17491_v13 }
0x15c4   :  { %8183 = vmatprep.subr.bf16.mxu0 %v12621_v27  ;;  %v12656_v27 = vcombine.low %v8288_v63, %v8292_v25  ;;  %v12665_v35 = vcombine.high %v8296_v54, %v8300_v19  ;;  %v7756_v63 = vld [vmem:[#allocation26 + $0x998] sm:$0xff] }
0x15c5   :  { %v7760_v25 = vld [vmem:[#allocation26 + $0x9b8] sm:$0xff] }
0x15c6   :  { %8137 = vmatpush1.bf16.msra.mxu1 %v12594_v32  ;;  %v8304_v32 = vld [vmem:[#allocation26 + $0xb40] sm:$0xff] }
0x15c7   :  { %8184 = vmatpush1.bf16.msra.mxu0 %v12620_v1  ;;  %8138 = vmatprep.subr.bf16.mxu1 %v12603_v14  ;;  %v8308_v1 = vld [vmem:[#allocation26 + $0xb60] sm:$0xff]  ;;  %v12582_v14 = vcombine.low %v7716_v5, %v7720_v18 }
0x15c8   :  { %8185 = vmatprep.subr.bf16.mxu0 %v12629_v45  ;;  %v12664_v45 = vcombine.low %v8296_v54, %v8300_v19  ;;  %v12673_v28 = vcombine.high %v8304_v32, %v8308_v1  ;;  %v12623_v54 = vcombine.high %v7756_v63, %v7760_v25  ;;  %v17743_v19 = vpack.c.bf16 %v5476_v23, %v5476_v23  ;;  %v8289_v23 = vld [vmem:[#allocation26 + $0xac8] sm:$0xff] }
0x15ca   :  { %8139 = vmatpush1.bf16.msra.mxu1 %v12602_v17  ;;  %v8312_v17 = vld [vmem:[#allocation26 + $0xb80] sm:$0xff] }
0x15cb   :  { %8186 = vmatpush1.bf16.msra.mxu0 %v12628_v56  ;;  %8140 = vmatprep.subr.bf16.mxu1 %v12611_v26  ;;  %v8316_v56 = vld [vmem:[#allocation26 + $0xba0] sm:$0xff]  ;;  %v12590_v26 = vcombine.low %v7724_v40, %v7728_v20 }
0x15cc   :  { %v17726_v50 = vpop.f32.mrb[148].mxu1  ;;  %8648 = vmatprep.subr.bf16.mxu0 %v12633_v51  ;;  %v12672_v51 = vcombine.low %v8304_v32, %v8308_v1  ;;  %v12681_v44 = vcombine.high %v8312_v17, %v8316_v56  ;;  %v8282_v32 = vld [vmem:[#allocation26 + $0xa90] sm:$0xff] }
0x15cd   :  { %v17728_v49 = vpop.f32.mrb[149].mxu1 }
0x15ce   :  { %v6097_v60 = vpop.f32.mrb[150].mxu1  ;;  %8141 = vmatpush1.bf16.msra.mxu1 %v12610_v30  ;;  %8204 = vmatmul.mubr.bf16.vlgmr.msra.gmra.mrb[192].mxu0 %v17710_v46  ;;  %v8320_v30 = vld [vmem:[#allocation26 + $0xbc0] sm:$0xff] }
0x15cf   :  { %v6098_v59 = vpop.f32.mrb[151].mxu1  ;;  %8649 = vmatpush1.bf16.msra.mxu0 %v12632_v8  ;;  %8142 = vmatprep.subr.bf16.mxu1 %v12619_v52  ;;  %v8324_v8 = vld [vmem:[#allocation26 + $0xbe0] sm:$0xff]  ;;  %v12598_v52 = vcombine.low %v7732_v22, %v7736_v24  ;;  %v7752_v60 = vld [vmem:[#allocation26 + $0x978] sm:$0xff] }
0x15d0   :  { %8650 = vmatprep.subr.bf16.mxu0 %v12641_v41  ;;  %8680 = vmatprep.mubr.bf16.mxu0 %v15763_v10  ;;  %v12680_v41 = vcombine.low %v8312_v17, %v8316_v56  ;;  %v12689_v11 = vcombine.high %v8320_v30, %v8324_v8  ;;  %v8270_v59 = vld [vmem:[#allocation26 + $0xa30] sm:$0xff]  ;;  %v8269_v17 = vld [vmem:[#allocation26 + $0xa28] sm:$0xff] }
0x15d1   :  { %v8290_v56 = vld [vmem:[#allocation26 + $0xad0] sm:$0xff] }
0x15d2   :  { %8143 = vmatpush1.bf16.msra.mxu1 %v12618_v3  ;;  %v8266_v3 = vld [vmem:[#allocation26 + $0xa10] sm:$0xff] }
0x15d3   :  { %8651 = vmatpush1.bf16.msra.mxu0 %v12640_v61  ;;  %8144 = vmatprep.subr.bf16.mxu1 %v12627_v9  ;;  %v12606_v61 = vcombine.low %v7740_v15, %v7744_v47  ;;  %v12688_v9 = vcombine.low %v8320_v30, %v8324_v8  ;;  %v12637_v0 = vcombine.high %v8266_v3, %v8270_v59  ;;  %v8273_v15 = vld [vmem:[#allocation26 + $0xa48] sm:$0xff]  ;;  %v8298_v30 = vld [vmem:[#allocation26 + $0xb10] sm:$0xff] }
0x15d4   :  { %8652 = vmatprep.subr.bf16.mxu0 %v12649_v29  ;;  %v12615_v29 = vcombine.high %v7748_v37, %v7752_v60  ;;  %v12636_v13 = vcombine.low %v8266_v3, %v8270_v59  ;;  %v8277_v47 = vld [vmem:[#allocation26 + $0xa68] sm:$0xff]  ;;  %v8302_v8 = vld [vmem:[#allocation26 + $0xb30] sm:$0xff] }
0x15d5   :  { %v12669_v2 = vcombine.high %v8298_v30, %v8302_v8  ;;  %v8310_v3 = vld [vmem:[#allocation26 + $0xb70] sm:$0xff]  ;;  %v12642_v59 = vcombine.low %v8273_v15, %v8277_v47 }
0x15d6   :  { %8145 = vmatpush1.bf16.msra.mxu1 %v12626_v43 }
0x15d7   :  { %8653 = vmatpush1.bf16.msra.mxu0 %v12648_v39  ;;  %8212 = vmatprep.subr.bf16.mxu1 %v12575_v33 }
0x15d8   :  { %8654 = vmatprep.subr.bf16.mxu0 %v12657_v6  ;;  %v12614_v6 = vcombine.low %v7748_v37, %v7752_v60  ;;  %v8285_v37 = vld [vmem:[#allocation26 + $0xaa8] sm:$0xff]  ;;  %v8306_v60 = vld [vmem:[#allocation26 + $0xb50] sm:$0xff] }
0x15d9   :  { %8163 = vmatmul.mubr.bf16.vlgmr.msra.gmra.mrb[176].mxu1 %v17710_v46 }
0x15da   :  { %8213 = vmatpush1.bf16.msra.mxu1 %v12574_v53  ;;  %8244 = vmatprep.mubr.bf16.mxu1 %v15763_v10 }
0x15db   :  { %8655 = vmatpush1.bf16.msra.mxu0 %v12656_v27  ;;  %8214 = vmatprep.subr.bf16.mxu1 %v12583_v16  ;;  %v12645_v16 = vcombine.high %v8274_v21, %v8278_v31 }
0x15dc   :  { %8656 = vmatprep.subr.bf16.mxu0 %v12665_v35  ;;  %v7764_v35 = vld [vmem:[#allocation26 + $0x9d8] sm:$0xff] }
0x15de   :  { %8215 = vmatpush1.bf16.msra.mxu1 %v12582_v14 }
0x15df   :  { %8657 = vmatpush1.bf16.msra.mxu0 %v12664_v45  ;;  %8216 = vmatprep.subr.bf16.mxu1 %v12591_v34  ;;  %v12622_v45 = vcombine.low %v7756_v63, %v7760_v25  ;;  %v8314_v63 = vld [vmem:[#allocation26 + $0xb90] sm:$0xff] }
0x15e0   :  { %8658 = vmatprep.subr.bf16.mxu0 %v12673_v28  ;;  %v12644_v28 = vcombine.low %v8274_v21, %v8278_v31  ;;  %v8318_v25 = vld [vmem:[#allocation26 + $0xbb0] sm:$0xff] }
0x15e1   :  { %v12685_v31 = vcombine.high %v8314_v63, %v8318_v25 }
0x15e2   :  { %8217 = vmatpush1.bf16.msra.mxu1 %v12590_v26  ;;  %v8294_v26 = vld [vmem:[#allocation26 + $0xaf0] sm:$0xff] }
0x15e3   :  { %8659 = vmatpush1.bf16.msra.mxu0 %v12672_v51  ;;  %8218 = vmatprep.subr.bf16.mxu1 %v12599_v58 }
0x15e4   :  { %8660 = vmatprep.subr.bf16.mxu0 %v12681_v44  ;;  %v12661_v44 = vcombine.high %v8290_v56, %v8294_v26 }
0x15e6   :  { %8219 = vmatpush1.bf16.msra.mxu1 %v12598_v52 }
0x15e7   :  { %8661 = vmatpush1.bf16.msra.mxu0 %v12680_v41  ;;  %8220 = vmatprep.subr.bf16.mxu1 %v12607_v12  ;;  %v12660_v41 = vcombine.low %v8290_v56, %v8294_v26  ;;  %v12643_v12 = vcombine.high %v8273_v15, %v8277_v47 }
0x15e8   :  { %8662 = vmatprep.subr.bf16.mxu0 %v12689_v11  ;;  %v8281_v11 = vld [vmem:[#allocation26 + $0xa88] sm:$0xff] }
0x15e9   :  { %v7005_v43 = vpop.f32.mrb[172].mxu0 }
0x15ea   :  { %v17738_v39 = vadd.f32 %v7005_v43, %v17697_v4  ;;  %8221 = vmatpush1.bf16.msra.mxu1 %v12606_v61  ;;  %v7007_v33 = vpop.f32.mrb[173].mxu0  ;;  %v7768_v4 = vld [vmem:[#allocation26 + $0x9f8] sm:$0xff]  ;;  %v12668_v61 = vcombine.low %v8298_v30, %v8302_v8  ;;  %v12650_v43 = vcombine.low %v8281_v11, %v8285_v37 }
0x15eb   :  { %v17741_v5 = vadd.f32 %v7007_v33, %v17700_v38  ;;  %8663 = vmatpush1.bf16.msra.mxu0 %v12688_v9  ;;  %v7009_v18 = vpop.f32.mrb[174].mxu0  ;;  %8222 = vmatprep.subr.bf16.mxu1 %v12615_v29  ;;  %v8286_v38 = vld [vmem:[#allocation26 + $0xab0] sm:$0xff]  ;;  %v12631_v22 = vcombine.high %v7764_v35, %v7768_v4  ;;  %v12651_v9 = vcombine.high %v8281_v11, %v8285_v37  ;;  %v8297_v33 = vld [vmem:[#allocation26 + $0xb08] sm:$0xff]  ;;  %v8279_v11 = vld [vmem:[#allocation26 + $0xa78] sm:$0xff] }
0x15ec   :  { %v6495_v53 = vpop.f32.mrb[152].mxu1  ;;  %v7010_v27 = vpop.f32.mrb[175].mxu0  ;;  %8730 = vmatprep.subr.bf16.mxu0 %v12637_v0  ;;  %v12653_v24 = vcombine.high %v8282_v32, %v8286_v38  ;;  %v12652_v51 = vcombine.low %v8282_v32, %v8286_v38  ;;  %v12677_v29 = vcombine.high %v8306_v60, %v8310_v3  ;;  %v8293_v0 = vld [vmem:[#allocation26 + $0xae8] sm:$0xff]  ;;  %v8322_v18 = vld [vmem:[#allocation26 + $0xbd0] sm:$0xff] }
0x15ed   :  { %v17746_v40 = vadd.f32 %v6495_v53, %v17712_v42  ;;  %v6497_v20 = vpop.f32.mrb[153].mxu1  ;;  %v8265_v42 = vld [vmem:[#allocation26 + $0xa08] sm:$0xff]  ;;  %v12659_v21 = vcombine.high %v8289_v23, %v8293_v0  ;;  %v12684_v53 = vcombine.low %v8314_v63, %v8318_v25  ;;  %v8299_v63 = vld [vmem:[#allocation26 + $0xb18] sm:$0xff] }
0x15ee   :  { %v17749_v1 = vadd.f32 %v6497_v20, %v17714_v48  ;;  %v6499_v14 = vpop.f32.mrb[154].mxu1  ;;  %8223 = vmatpush1.bf16.msra.mxu1 %v12614_v6  ;;  %8681 = vmatmul.mubr.bf16.vlgmr.msra.gmra.mrb[196].mxu0 %v17743_v19  ;;  %v12630_v48 = vcombine.low %v7764_v35, %v7768_v4  ;;  %v12635_v58 = vcombine.high %v8265_v42, %v8269_v17  ;;  %v8301_v6 = vld [vmem:[#allocation26 + $0xb28] sm:$0xff]  ;;  %v8303_v25 = vld [vmem:[#allocation26 + $0xb38] sm:$0xff] }
0x15ef   :  { %v6500_v34 = vpop.f32.mrb[155].mxu1  ;;  %8731 = vmatpush1.bf16.msra.mxu0 %v12636_v13  ;;  %8224 = vmatprep.subr.bf16.mxu1 %v12623_v54  ;;  %v12634_v52 = vcombine.low %v8265_v42, %v8269_v17  ;;  %v8326_v13 = vld [vmem:[#allocation26 + $0xbf0] sm:$0xff]  ;;  %v12658_v54 = vcombine.low %v8289_v23, %v8293_v0  ;;  %v12667_v27 = vcombine.high %v8297_v33, %v8301_v6  ;;  %v8305_v35 = vld [vmem:[#allocation26 + $0xb48] sm:$0xff] }
0x15f0   :  { %8732 = vmatprep.subr.bf16.mxu0 %v12645_v16  ;;  %8762 = vmatprep.mubr.bf16.mxu0 %v15763_v10  ;;  %v12693_v16 = vcombine.high %v8322_v18, %v8326_v13  ;;  %v8309_v4 = vld [vmem:[#allocation26 + $0xb68] sm:$0xff]  ;;  %v12666_v20 = vcombine.low %v8297_v33, %v8301_v6  ;;  %v12692_v32 = vcombine.low %v8322_v18, %v8326_v13  ;;  %v8315_v6 = vld [vmem:[#allocation26 + $0xb98] sm:$0xff] }
0x15f1   :  { %v12675_v38 = vcombine.high %v8305_v35, %v8309_v4  ;;  %v8313_v14 = vld [vmem:[#allocation26 + $0xb88] sm:$0xff]  ;;  %v12670_v33 = vcombine.low %v8299_v63, %v8303_v25  ;;  %v8319_v18 = vld [vmem:[#allocation26 + $0xbb8] sm:$0xff] }
0x15f2   :  { %8225 = vmatpush1.bf16.msra.mxu1 %v12622_v45  ;;  %v8317_v45 = vld [vmem:[#allocation26 + $0xba8] sm:$0xff] }
0x15f3   :  { %8733 = vmatpush1.bf16.msra.mxu0 %v12644_v28  ;;  %8226 = vmatprep.subr.bf16.mxu1 %v12631_v22  ;;  %v12683_v56 = vcombine.high %v8313_v14, %v8317_v45 }
0x15f4   :  { %8734 = vmatprep.subr.bf16.mxu0 %v12653_v24  ;;  %v12674_v24 = vcombine.low %v8305_v35, %v8309_v4  ;;  %v12687_v4 = vcombine.high %v8315_v6, %v8319_v18 }
0x15f6   :  { %8227 = vmatpush1.bf16.msra.mxu1 %v12630_v48 }
0x15f7   :  { %8735 = vmatpush1.bf16.msra.mxu0 %v12652_v51  ;;  %8689 = vmatprep.subr.bf16.mxu1 %v12635_v58  ;;  %v8321_v51 = vld [vmem:[#allocation26 + $0xbc8] sm:$0xff] }
0x15f8   :  { %8736 = vmatprep.subr.bf16.mxu0 %v12661_v44  ;;  %v8325_v58 = vld [vmem:[#allocation26 + $0xbe8] sm:$0xff] }
0x15f9   :  { %8245 = vmatmul.mubr.bf16.vlgmr.msra.gmra.mrb[180].mxu1 %v17710_v46  ;;  %v12676_v46 = vcombine.low %v8306_v60, %v8310_v3  ;;  %v12691_v8 = vcombine.high %v8321_v51, %v8325_v58  ;;  %v8283_v60 = vld [vmem:[#allocation26 + $0xa98] sm:$0xff] }
0x15fa   :  { %8690 = vmatpush1.bf16.msra.mxu1 %v12634_v52  ;;  %8721 = vmatprep.mubr.bf16.mxu1 %v15763_v10  ;;  %v8267_v52 = vld [vmem:[#allocation26 + $0xa18] sm:$0xff] }
0x15fb   :  { %8737 = vmatpush1.bf16.msra.mxu0 %v12660_v41  ;;  %8691 = vmatprep.subr.bf16.mxu1 %v12643_v12  ;;  %v8271_v41 = vld [vmem:[#allocation26 + $0xa38] sm:$0xff]  ;;  %v12690_v12 = vcombine.low %v8321_v51, %v8325_v58  ;;  %v14479_v58 = vld [vmem:[#allocation29 + $0x60] ss:$24 sps:$4 sm:$0xff]  }
0x15fc   :  { %8738 = vmatprep.subr.bf16.mxu0 %v12669_v2  ;;  %v12639_v2 = vcombine.high %v8267_v52, %v8271_v41  ;;  %v12638_v37 = vcombine.low %v8267_v52, %v8271_v41  ;;  %v8287_v3 = vld [vmem:[#allocation26 + $0xab8] sm:$0xff] }
0x15fd   :  { %v12654_v23 = vcombine.low %v8283_v60, %v8287_v3  ;;  %v14478_v51 = vld [vmem:[#allocation29 + $0x34] ss:$24 sps:$4 sm:$0xff]  }
0x15fe   :  { %8692 = vmatpush1.bf16.msra.mxu1 %v12642_v59 }
0x15ff   :  { %8739 = vmatpush1.bf16.msra.mxu0 %v12668_v61  ;;  %8693 = vmatprep.subr.bf16.mxu1 %v12651_v9  ;;  %v12655_v61 = vcombine.high %v8283_v60, %v8287_v3  ;;  %v8291_v9 = vld [vmem:[#allocation26 + $0xad8] sm:$0xff]  ;;  %v14500_v3 = vld [vmem:[#allocation29 + $0x600] ss:$24 sps:$4 sm:$0xff]  }
0x1600   :  { %8740 = vmatprep.subr.bf16.mxu0 %v12677_v29  ;;  %v8295_v29 = vld [vmem:[#allocation26 + $0xaf8] sm:$0xff] }
0x1601   :  { %v12663_v0 = vcombine.high %v8291_v9, %v8295_v29 }
0x1602   :  { %8694 = vmatpush1.bf16.msra.mxu1 %v12650_v43  ;;  %v12662_v43 = vcombine.low %v8291_v9, %v8295_v29  ;;  %v14491_v29 = vld [vmem:[#allocation29 + $0x120] ss:$24 sps:$4 sm:$0xff]  }
0x1603   :  { %8741 = vmatpush1.bf16.msra.mxu0 %v12676_v46  ;;  %8695 = vmatprep.subr.bf16.mxu1 %v12659_v21  ;;  %v12671_v46 = vcombine.high %v8299_v63, %v8303_v25  ;;  %v8307_v21 = vld [vmem:[#allocation26 + $0xb58] sm:$0xff] }
0x1604   :  { %8742 = vmatprep.subr.bf16.mxu0 %v12685_v31  ;;  %v8311_v31 = vld [vmem:[#allocation26 + $0xb78] sm:$0xff] }
0x1605   :  { %v14506_v63 = vld [vmem:[#allocation29 + $0x630] ss:$24 sps:$4 sm:$0xff]  }
0x1606   :  { %8696 = vmatpush1.bf16.msra.mxu1 %v12658_v54  ;;  %v14494_v25 = vld [vmem:[#allocation29 + $0x150] ss:$24 sps:$4 sm:$0xff]  }
0x1607   :  { %8743 = vmatpush1.bf16.msra.mxu0 %v12684_v53  ;;  %8697 = vmatprep.subr.bf16.mxu1 %v12667_v27  ;;  %v12678_v27 = vcombine.low %v8307_v21, %v8311_v31 }
0x1608   :  { %8744 = vmatprep.subr.bf16.mxu0 %v12693_v16 }
0x1609   :  { %v7087_v34 = vpop.f32.mrb[176].mxu0 }
0x160a   :  { %v17756_v28 = vadd.f32 %v7087_v34, %v17719_v62  ;;  %v7089_v22 = vpop.f32.mrb[177].mxu0  ;;  %8698 = vmatpush1.bf16.msra.mxu1 %v12666_v20 }
0x160b   :  { %v17759_v42 = vadd.f32 %v7089_v22, %v17722_v7  ;;  %v7091_v17 = vpop.f32.mrb[178].mxu0  ;;  %8745 = vmatpush1.bf16.msra.mxu0 %v12692_v32  ;;  %8699 = vmatprep.subr.bf16.mxu1 %v12675_v38  ;;  %v12682_v7 = vcombine.low %v8313_v14, %v8317_v45  ;;  %v8323_v38 = vld [vmem:[#allocation26 + $0xbd8] sm:$0xff] }
0x160c   :  { %v6577_v26 = vpop.f32.mrb[156].mxu1  ;;  %v7092_v48 = vpop.f32.mrb[179].mxu0  ;;  %v8327_v14 = vld [vmem:[#allocation26 + $0xbf8] sm:$0xff] }
0x160d   :  { %v17762_v44 = vadd.f32 %v6577_v26, %v17726_v50  ;;  %v6579_v15 = vpop.f32.mrb[157].mxu1  ;;  %v8275_v50 = vld [vmem:[#allocation26 + $0xa58] sm:$0xff]  ;;  %v14475_v26 = vld [vmem:[#allocation29 + $0x4] ss:$24 sps:$4 sm:$0xff]   ;;  %v14473_v48 = vld [vmem:[#allocation29] ss:$24 sps:$4 sm:$0xff]  }
0x160e   :  { %v17765_v62 = vadd.f32 %v6579_v15, %v17728_v49  ;;  %v6581_v47 = vpop.f32.mrb[158].mxu1  ;;  %8700 = vmatpush1.bf16.msra.mxu1 %v12674_v24  ;;  %8763 = vmatmul.mubr.bf16.vlgmr.msra.gmra.mrb[200].mxu0 %v17743_v19  ;;  %v12647_v49 = vcombine.high %v8275_v50, %v8279_v11  ;;  %v12646_v59 = vcombine.low %v8275_v50, %v8279_v11  ;;  %v14484_v15 = vld [vmem:[#allocation29 + $0x94] ss:$24 sps:$4 sm:$0xff]   ;;  %v14493_v11 = vld [vmem:[#allocation29 + $0x124] ss:$24 sps:$4 sm:$0xff]  }
0x160f   :  { %v6582_v30 = vpop.f32.mrb[159].mxu1  ;;  %8701 = vmatprep.subr.bf16.mxu1 %v12683_v56  ;;  %v12686_v24 = vcombine.low %v8315_v6, %v8319_v18  ;;  %v12694_v56 = vcombine.low %v8323_v38, %v8327_v14  ;;  %v14482_v47 = vld [vmem:[#allocation29 + $0x90] ss:$24 sps:$4 sm:$0xff]   ;;  %v14511_v6 = vld [vmem:[#allocation29 + $0x1e4] ss:$24 sps:$4 sm:$0xff]  }
0x1610   :  { %v14485_v30 = vld [vmem:[#allocation29 + $0xc0] ss:$24 sps:$4 sm:$0xff]   ;;  %v14526_v18 = vld [vmem:[#allocation29 + $0x6c4] ss:$24 sps:$4 sm:$0xff]  }
0x1612   :  { %8702 = vmatpush1.bf16.msra.mxu1 %v12682_v7  ;;  %v14487_v7 = vld [vmem:[#allocation29 + $0xc4] ss:$24 sps:$4 sm:$0xff]  }
0x1613   :  { %8703 = vmatprep.subr.bf16.mxu1 %v12691_v8  ;;  %v14490_v8 = vld [vmem:[#allocation29 + $0xf4] ss:$24 sps:$4 sm:$0xff]  }
0x1616   :  { %8704 = vmatpush1.bf16.msra.mxu1 %v12690_v12  ;;  %v14488_v12 = vld [vmem:[#allocation29 + $0xf0] ss:$24 sps:$4 sm:$0xff]  }
0x1617   :  { %8771 = vmatprep.subr.bf16.mxu1 %v12639_v2 }
0x1619   :  { %8722 = vmatmul.mubr.bf16.vlgmr.msra.gmra.mrb[184].mxu1 %v17743_v19 }
0x161a   :  { %8772 = vmatpush1.bf16.msra.mxu1 %v12638_v37  ;;  %8803 = vmatprep.mubr.bf16.mxu1 %v15763_v10  ;;  %v12679_v10 = vcombine.high %v8307_v21, %v8311_v31  ;;  %v14502_v37 = vld [vmem:[#allocation29 + $0x604] ss:$24 sps:$4 sm:$0xff]   ;;  %v14505_v21 = vld [vmem:[#allocation29 + $0x1b4] ss:$24 sps:$4 sm:$0xff]  }
0x161b   :  { %8773 = vmatprep.subr.bf16.mxu1 %v12647_v49  ;;  %11392 = vmatprep.subr.bf16.mxu0 %v14502_v37  ;;  %v14520_v31 = vld [vmem:[#allocation29 + $0x694] ss:$24 sps:$4 sm:$0xff]   ;;  %v14574_v37 = vld [vmem:[#allocation29 + $0x844] ss:$24 sps:$4 sm:$0xff]  }
0x161c   :  { %11393 = vmatpush1.bf16.msra.mxu0 %v14500_v3 }
0x161e   :  { %8774 = vmatpush1.bf16.msra.mxu1 %v12646_v59 }
0x161f   :  { %8775 = vmatprep.subr.bf16.mxu1 %v12655_v61 }
0x1622   :  { %8776 = vmatpush1.bf16.msra.mxu1 %v12654_v23  ;;  %v14496_v23 = vld [vmem:[#allocation29 + $0x154] ss:$24 sps:$4 sm:$0xff]  }
0x1623   :  { %8777 = vmatprep.subr.bf16.mxu1 %v12663_v0  ;;  %v14508_v0 = vld [vmem:[#allocation29 + $0x634] ss:$24 sps:$4 sm:$0xff]  }
0x1624   :  { %11394 = vmatprep.subr.bf16.mxu0 %v14508_v0 }
0x1625   :  { %11395 = vmatpush1.bf16.msra.mxu0 %v14506_v63  ;;  %v14586_v63 = vld [vmem:[#allocation29 + $0x8a4] ss:$24 sps:$4 sm:$0xff]  }
0x1626   :  { %8778 = vmatpush1.bf16.msra.mxu1 %v12662_v43  ;;  %v14514_v43 = vld [vmem:[#allocation29 + $0x664] ss:$24 sps:$4 sm:$0xff]  }
0x1627   :  { %8779 = vmatprep.subr.bf16.mxu1 %v12671_v46  ;;  %v14512_v46 = vld [vmem:[#allocation29 + $0x660] ss:$24 sps:$4 sm:$0xff]   ;;  %11396 = vmatprep.subr.bf16.mxu0 %v14514_v43  ;;  %v14592_v43 = vld [vmem:[#allocation29 + $0x8d4] ss:$24 sps:$4 sm:$0xff]  }
0x1629   :  { %v7564_v13 = vpop.f32.mrb[180].mxu0  ;;  %11397 = vmatpush1.bf16.msra.mxu0 %v14512_v46 }
0x162a   :  { %v17771_v54 = vadd.f32 %v7564_v13, %v17738_v39  ;;  %v7566_v53 = vpop.f32.mrb[181].mxu0  ;;  %8780 = vmatpush1.bf16.msra.mxu1 %v12670_v33  ;;  %v14518_v33 = vld [vmem:[#allocation29 + $0x690] ss:$24 sps:$4 sm:$0xff]   ;;  %11398 = vmatprep.subr.bf16.mxu0 %v14520_v31  ;;  %v14524_v13 = vld [vmem:[#allocation29 + $0x6c0] ss:$24 sps:$4 sm:$0xff]  }
0x162b   :  { %v17774_v16 = vadd.f32 %v7566_v53, %v17741_v5  ;;  %v7568_v35 = vpop.f32.mrb[182].mxu0  ;;  %8781 = vmatprep.subr.bf16.mxu1 %v12679_v10  ;;  %v12695_v5 = vcombine.high %v8323_v38, %v8327_v14  ;;  %v14503_v10 = vld [vmem:[#allocation29 + $0x1b0] ss:$24 sps:$4 sm:$0xff]   ;;  %v14509_v53 = vld [vmem:[#allocation29 + $0x1e0] ss:$24 sps:$4 sm:$0xff]  }
0x162c   :  { %v7046_v20 = vpop.f32.mrb[160].mxu1  ;;  %v7569_v32 = vpop.f32.mrb[183].mxu0  ;;  %v14532_v35 = vld [vmem:[#allocation29 + $0x6f4] ss:$24 sps:$4 sm:$0xff]   ;;  %v14538_v38 = vld [vmem:[#allocation29 + $0x724] ss:$24 sps:$4 sm:$0xff]  }
0x162d   :  { %v17777_v45 = vadd.f32 %v7046_v20, %v17746_v40  ;;  %v7048_v34 = vpop.f32.mrb[161].mxu1  ;;  %v14476_v40 = vld [vmem:[#allocation29 + $0x30] ss:$24 sps:$4 sm:$0xff]   ;;  %11399 = vmatpush1.bf16.msra.mxu0 %v14518_v33  ;;  %v14523_v32 = vld [vmem:[#allocation29 + $0x244] ss:$24 sps:$4 sm:$0xff]  }
0x162e   :  { %v17780_v39 = vadd.f32 %v7048_v34, %v17749_v1  ;;  %v7050_v22 = vpop.f32.mrb[162].mxu1  ;;  %8782 = vmatpush1.bf16.msra.mxu1 %v12678_v27  ;;  %v14481_v1 = vld [vmem:[#allocation29 + $0x64] ss:$24 sps:$4 sm:$0xff]   ;;  %11400 = vmatprep.subr.bf16.mxu0 %v14526_v18  ;;  %v14517_v27 = vld [vmem:[#allocation29 + $0x214] ss:$24 sps:$4 sm:$0xff]  }
0x162f   :  { %v7051_v17 = vpop.f32.mrb[163].mxu1  ;;  %8783 = vmatprep.subr.bf16.mxu1 %v12687_v4  ;;  %v14530_v4 = vld [vmem:[#allocation29 + $0x6f0] ss:$24 sps:$4 sm:$0xff]   ;;  %v14536_v14 = vld [vmem:[#allocation29 + $0x720] ss:$24 sps:$4 sm:$0xff]  }
0x1630   :  { %v14515_v20 = vld [vmem:[#allocation29 + $0x210] ss:$24 sps:$4 sm:$0xff]   ;;  %v14521_v34 = vld [vmem:[#allocation29 + $0x240] ss:$24 sps:$4 sm:$0xff]   ;;  %v14529_v22 = vld [vmem:[#allocation29 + $0x274] ss:$24 sps:$4 sm:$0xff]  }
0x1631   :  { %11401 = vmatpush1.bf16.msra.mxu0 %v14524_v13  ;;  %v14542_v17 = vld [vmem:[#allocation29 + $0x750] ss:$24 sps:$4 sm:$0xff]  }
0x1632   :  { %8784 = vmatpush1.bf16.msra.mxu1 %v12686_v24  ;;  %11402 = vmatprep.subr.bf16.mxu0 %v14532_v35  ;;  %v14544_v24 = vld [vmem:[#allocation29 + $0x754] ss:$24 sps:$4 sm:$0xff]  }
0x1633   :  { %8785 = vmatprep.subr.bf16.mxu1 %v12695_v5  ;;  %v14527_v5 = vld [vmem:[#allocation29 + $0x270] ss:$24 sps:$4 sm:$0xff]  }
0x1635   :  { %11403 = vmatpush1.bf16.msra.mxu0 %v14530_v4 }
0x1636   :  { %8786 = vmatpush1.bf16.msra.mxu1 %v12694_v56  ;;  %11404 = vmatprep.subr.bf16.mxu0 %v14538_v38  ;;  %v14535_v56 = vld [vmem:[#allocation29 + $0x2a4] ss:$24 sps:$4 sm:$0xff]  }
0x1637   :  { %11310 = vmatprep.subr.bf16.mxu1 %v14475_v26  ;;  %v14550_v26 = vld [vmem:[#allocation29 + $0x784] ss:$24 sps:$4 sm:$0xff]  }
0x1638   :  { %v17813_v38 = vld [vmem:[#allocation28] sm:$0xff] }
0x1639   :  { %8804 = vmatmul.mubr.bf16.vlgmr.msra.gmra.mrb[188].mxu1 %v17743_v19  ;;  %11405 = vmatpush1.bf16.msra.mxu0 %v14536_v14 }
0x163a   :  { %11311 = vmatpush1.bf16.msra.mxu1 %v14473_v48  ;;  %11406 = vmatprep.subr.bf16.mxu0 %v14544_v24 }
0x163b   :  { %11312 = vmatprep.subr.bf16.mxu1 %v14478_v51  ;;  %v14548_v51 = vld [vmem:[#allocation29 + $0x780] ss:$24 sps:$4 sm:$0xff]  }
0x163d   :  { %11407 = vmatpush1.bf16.msra.mxu0 %v14542_v17 }
0x163e   :  { %11313 = vmatpush1.bf16.msra.mxu1 %v14476_v40  ;;  %11408 = vmatprep.subr.bf16.mxu0 %v14550_v26 }
0x163f   :  { %11314 = vmatprep.subr.bf16.mxu1 %v14481_v1 }
0x1641   :  { %11409 = vmatpush1.bf16.msra.mxu0 %v14548_v51 }
0x1642   :  { %11315 = vmatpush1.bf16.msra.mxu1 %v14479_v58 }
0x1643   :  { %11316 = vmatprep.subr.bf16.mxu1 %v14484_v15 }
0x1646   :  { %11317 = vmatpush1.bf16.msra.mxu1 %v14482_v47  ;;  %v14533_v47 = vld [vmem:[#allocation29 + $0x2a0] ss:$24 sps:$4 sm:$0xff]  }
0x1647   :  { %11318 = vmatprep.subr.bf16.mxu1 %v14487_v7 }
0x1649   :  { %v7646_v52 = vpop.f32.mrb[184].mxu0 }
0x164a   :  { %v17784_v41 = vadd.f32 %v7646_v52, %v17756_v28  ;;  %v7648_v19 = vpop.f32.mrb[185].mxu0  ;;  %11319 = vmatpush1.bf16.msra.mxu1 %v14485_v30  ;;  %v14541_v30 = vld [vmem:[#allocation29 + $0x2d4] ss:$24 sps:$4 sm:$0xff]   ;;  %v14554_v52 = vld [vmem:[#allocation29 + $0x7b0] ss:$24 sps:$4 sm:$0xff]  }
0x164b   :  { %v17787_v2 = vadd.f32 %v7648_v19, %v17759_v42  ;;  %v7650_v50 = vpop.f32.mrb[186].mxu0  ;;  %11320 = vmatprep.subr.bf16.mxu1 %v14490_v8  ;;  %v14556_v8 = vld [vmem:[#allocation29 + $0x7b4] ss:$24 sps:$4 sm:$0xff]   ;;  %v14539_v19 = vld [vmem:[#allocation29 + $0x2d0] ss:$24 sps:$4 sm:$0xff]  }
0x164c   :  { %v7128_v49 = vpop.f32.mrb[164].mxu1  ;;  %v7651_v60 = vpop.f32.mrb[187].mxu0  ;;  %11410 = vmatprep.subr.bf16.mxu0 %v14556_v8  ;;  %v14560_v50 = vld [vmem:[#allocation29 + $0x7e0] ss:$24 sps:$4 sm:$0xff]  }
0x164d   :  { %v17790_v59 = vadd.f32 %v7128_v49, %v17762_v44  ;;  %v7130_v61 = vpop.f32.mrb[165].mxu1  ;;  %v14499_v44 = vld [vmem:[#allocation29 + $0x184] ss:$24 sps:$4 sm:$0xff]   ;;  %11411 = vmatpush1.bf16.msra.mxu0 %v14554_v52  ;;  %v14572_v49 = vld [vmem:[#allocation29 + $0x840] ss:$24 sps:$4 sm:$0xff]  }
0x164e   :  { %v17793_v28 = vadd.f32 %v7130_v61, %v17765_v62  ;;  %v7132_v9 = vpop.f32.mrb[166].mxu1  ;;  %11321 = vmatpush1.bf16.msra.mxu1 %v14488_v12  ;;  %v14497_v62 = vld [vmem:[#allocation29 + $0x180] ss:$24 sps:$4 sm:$0xff]   ;;  %v14562_v12 = vld [vmem:[#allocation29 + $0x7e4] ss:$24 sps:$4 sm:$0xff]  }
0x164f   :  { %v7133_v42 = vpop.f32.mrb[167].mxu1  ;;  %11322 = vmatprep.subr.bf16.mxu1 %v14493_v11  ;;  %11412 = vmatprep.subr.bf16.mxu0 %v14562_v12  ;;  %v14566_v11 = vld [vmem:[#allocation29 + $0x810] ss:$24 sps:$4 sm:$0xff]   ;;  %v14580_v60 = vld [vmem:[#allocation29 + $0x874] ss:$24 sps:$4 sm:$0xff]  }
0x1650   :  { %v14578_v61 = vld [vmem:[#allocation29 + $0x870] ss:$24 sps:$4 sm:$0xff]  }
0x1651   :  { %11413 = vmatpush1.bf16.msra.mxu0 %v14560_v50 }
0x1652   :  { %11323 = vmatpush1.bf16.msra.mxu1 %v14491_v29 }
0x1653   :  { %11324 = vmatprep.subr.bf16.mxu1 %v14496_v23 }
0x1656   :  { %11325 = vmatpush1.bf16.msra.mxu1 %v14494_v25  ;;  %v14584_v25 = vld [vmem:[#allocation29 + $0x8a0] ss:$24 sps:$4 sm:$0xff]  }
0x1657   :  { %11326 = vmatprep.subr.bf16.mxu1 %v14499_v44  ;;  %v14590_v44 = vld [vmem:[#allocation29 + $0x8d0] ss:$24 sps:$4 sm:$0xff]  }
0x165a   :  { %11327 = vmatpush1.bf16.msra.mxu1 %v14497_v62  ;;  %v14598_v62 = vld [vmem:[#allocation29 + $0x904] ss:$24 sps:$4 sm:$0xff]  }
0x165b   :  { %11328 = vmatprep.subr.bf16.mxu1 %v14505_v21 }
0x165e   :  { %11329 = vmatpush1.bf16.msra.mxu1 %v14503_v10 }
0x165f   :  { %11330 = vmatprep.subr.bf16.mxu1 %v14511_v6 }
0x1662   :  { %11331 = vmatpush1.bf16.msra.mxu1 %v14509_v53 }
0x1663   :  { %11332 = vmatprep.subr.bf16.mxu1 %v14517_v27 }
0x1666   :  { %11333 = vmatpush1.bf16.msra.mxu1 %v14515_v20 }
0x1667   :  { %11334 = vmatprep.subr.bf16.mxu1 %v14523_v32 }
0x166a   :  { %11335 = vmatpush1.bf16.msra.mxu1 %v14521_v34 }
0x166b   :  { %11336 = vmatprep.subr.bf16.mxu1 %v14529_v22 }
0x166c   :  { %v7605_v48 = vpop.f32.mrb[168].mxu1 }
0x166d   :  { %v17796_v40 = vadd.f32 %v7605_v48, %v17777_v45  ;;  %v7607_v1 = vpop.f32.mrb[169].mxu1  ;;  %v14547_v45 = vld [vmem:[#allocation29 + $0x304] ss:$24 sps:$4 sm:$0xff]  }
0x166e   :  { %v17799_v58 = vadd.f32 %v7607_v1, %v17780_v39  ;;  %v7609_v15 = vpop.f32.mrb[170].mxu1  ;;  %11337 = vmatpush1.bf16.msra.mxu1 %v14527_v5  ;;  %v14568_v39 = vld [vmem:[#allocation29 + $0x814] ss:$24 sps:$4 sm:$0xff]  }
0x166f   :  { %v7610_v7 = vpop.f32.mrb[171].mxu1  ;;  %11338 = vmatprep.subr.bf16.mxu1 %v14535_v56  ;;  %11414 = vmatprep.subr.bf16.mxu0 %v14568_v39 }
0x1670   :  { %11415 = vmatpush1.bf16.msra.mxu0 %v14566_v11 }
0x1671   :  { %11416 = vmatprep.subr.bf16.mxu0 %v14574_v37 }
0x1672   :  { %11339 = vmatpush1.bf16.msra.mxu1 %v14533_v47 }
0x1673   :  { %11340 = vmatprep.subr.bf16.mxu1 %v14541_v30 }
0x1674   :  { %11417 = vmatpush1.bf16.msra.mxu0 %v14572_v49 }
0x1675   :  { %11418 = vmatprep.subr.bf16.mxu0 %v14580_v60 }
0x1676   :  { %11341 = vmatpush1.bf16.msra.mxu1 %v14539_v19 }
0x1677   :  { %11351 = vmatprep.subr.bf16.mxu1 %v14547_v45 }
0x1678   :  { %11419 = vmatpush1.bf16.msra.mxu0 %v14578_v61  ;;  %v8844_v61 = vsub.s32 5, %v17536_v57 }
0x1679   :  { %11420 = vmatprep.subr.bf16.mxu0 %v14586_v63 }
0x167c   :  { %11421 = vmatpush1.bf16.msra.mxu0 %v14584_v25 }
0x167d   :  { %11422 = vmatprep.subr.bf16.mxu0 %v14592_v43 }
0x1680   :  { %11423 = vmatpush1.bf16.msra.mxu0 %v14590_v44 }
0x1681   :  { %v8123_v3 = vpop.f32.mrb[188].mxu0  ;;  %11433 = vmatprep.subr.bf16.mxu0 %v14598_v62 }
0x1682   :  { %v8253_v9 = vadd.f32 %v8123_v3, %v17771_v54  ;;  %v8125_v29 = vpop.f32.mrb[189].mxu0  ;;  %v8840_v3 = vsub.s32 4, %v17536_v57 }
0x1683   :  { %v8254_v42 = vadd.f32 %v8125_v29, %v17774_v16  ;;  %v8127_v23 = vpop.f32.mrb[190].mxu0 }
0x1684   :  { %v8128_v0 = vpop.f32.mrb[191].mxu0 }
0x168c   :  { %v7687_v46 = vpop.f32.mrb[172].mxu1 }
0x168d   :  { %v7700_v21 = vadd.f32 %v7687_v46, %v17790_v59  ;;  %v7689_v54 = vpop.f32.mrb[173].mxu1 }
0x168e   :  { %v7701_v31 = vadd.f32 %v7689_v54, %v17793_v28  ;;  %v7691_v33 = vpop.f32.mrb[174].mxu1 }
0x168f   :  { %v7692_v16 = vpop.f32.mrb[175].mxu1  ;;  %v8832_v33 = vsub.s32 2, %v17536_v57 }
0x16a1   :  { %v8205_v10 = vpop.f32.mrb[192].mxu0 }
0x16a2   :  { %v8257_v6 = vadd.f32 %v8205_v10, %v17784_v41  ;;  %v8207_v18 = vpop.f32.mrb[193].mxu0  ;;  %v8825_v41 = vrot.slane %v17813_v38, %v17539_v36 }
0x16a3   :  { %v8258_v13 = vadd.f32 %v8207_v18, %v17787_v2  ;;  %v8209_v53 = vpop.f32.mrb[194].mxu0  ;;  %v8829_v2 = vrot.slane %v17813_v38, %v17542_v55  ;;  %v8836_v18 = vsub.s32 3, %v17536_v57 }
0x16a4   :  { %v8210_v27 = vpop.f32.mrb[195].mxu0 }
0x16ac   :  { %v8164_v35 = vpop.f32.mrb[176].mxu1 }
0x16ad   :  { %v17808_v4 = vadd.f32 %v8164_v35, %v17796_v40  ;;  %v8166_v20 = vpop.f32.mrb[177].mxu1  ;;  %v8833_v35 = vrot.slane %v17813_v38, %v8832_v33 }
0x16ae   :  { %v17811_v59 = vadd.f32 %v8166_v20, %v17799_v58  ;;  %v8168_v28 = vpop.f32.mrb[178].mxu1 }
0x16af   :  { %v8169_v32 = vpop.f32.mrb[179].mxu1  ;;  %v14545_v28 = vld [vmem:[#allocation29 + $0x300] ss:$24 sps:$4 sm:$0xff]  }
0x16c1   :  { %v8682_v14 = vpop.f32.mrb[196].mxu0 }
0x16c2   :  { %v8812_v34 = vadd.f32 %v8682_v14, %v8253_v9  ;;  %v8684_v22 = vpop.f32.mrb[197].mxu0  ;;  %v8841_v9 = vrot.slane %v17813_v38, %v8840_v3 }
0x16c3   :  { %v8813_v24 = vadd.f32 %v8684_v22, %v8254_v42  ;;  %v8686_v17 = vpop.f32.mrb[198].mxu0  ;;  %v8845_v42 = vrot.slane %v17813_v38, %v8844_v61 }
0x16c4   :  { %v8862_v5 = vadd.f32 %v8825_v41, %v8812_v34  ;;  %v8687_v56 = vpop.f32.mrb[199].mxu0  ;;  %v8837_v41 = vrot.slane %v17813_v38, %v8836_v18 }
0x16c5   :  { %v8863_v26 = vadd.f32 %v8829_v2, %v8813_v24  ;;  %v14553_v2 = vld [vmem:[#allocation29 + $0x334] ss:$24 sps:$4 sm:$0xff]  }
0x16c6   :  { %v8878_v48 = vmin.f32 %v8862_v5, 0.0  ;;  %vm8870_vm6 = vcmp.gt.f32.partialorder %v8862_v5, 0.0 }
0x16c7   :  { %v8879_v51 = vmin.f32 %v8863_v26, 0.0  ;;  %vm8871_vm7 = vcmp.gt.f32.partialorder %v8863_v26, 0.0 }
0x16c8   :  { %v8886_v40 = vmul.f32 1.442695, %v8878_v48 }
0x16c9   :  { %v8888_v1 = vmul.f32 1.442695, %v8879_v51  ;;  %v14559_v51 = vld [vmem:[#allocation29 + $0x364] ss:$24 sps:$4 sm:$0xff]  }
0x16ca   :  { %15241 = vpow2.f32 %v8886_v40 }
0x16cb   :  { %15243 = vpow2.f32 %v8888_v1 }
0x16cc   :  { %v8246_v58 = vpop.f32.mrb[180].mxu1 }
0x16cd   :  { %v17819_v15 = vadd.f32 %v8246_v58, %v7700_v21  ;;  %v8248_v47 = vpop.f32.mrb[181].mxu1 }
0x16ce   :  { %v17821_v7 = vadd.f32 %v8248_v47, %v7701_v31  ;;  %v8250_v30 = vpop.f32.mrb[182].mxu1 }
0x16cf   :  { %v8251_v8 = vpop.f32.mrb[183].mxu1 }
0x16d4   :  { %v15242_v52 = vpop.eup %15241 }
0x16d5   :  { %v15244_v19 = vpop.eup %15243  ;;  %v12696_v45 = vadd.f32 -1.0, %v15242_v52 }
0x16d6   :  { %v12697_v12 = vadd.f32 -1.0, %v15244_v19 }
0x16d7   :  { %v8910_v50 = vsel %vm8870_vm6, %v8862_v5, %v12696_v45 }
0x16d8   :  { %v8926_v39 = vmin.f32 %v8910_v50, 0.0  ;;  %v8911_v11 = vsel %vm8871_vm7, %v8863_v26, %v12697_v12  ;;  %vm8918_vm8 = vcmp.gt.f32.partialorder %v8910_v50, 0.0  ;;  %v14551_v26 = vld [vmem:[#allocation29 + $0x330] ss:$24 sps:$4 sm:$0xff]  }
0x16d9   :  { %v8927_v37 = vmin.f32 %v8911_v11, 0.0  ;;  %vm8919_vm9 = vcmp.gt.f32.partialorder %v8911_v11, 0.0  ;;  %v14563_v12 = vld [vmem:[#allocation29 + $0x390] ss:$24 sps:$4 sm:$0xff]  }
0x16da   :  { %v8934_v49 = vmul.f32 1.442695, %v8926_v39  ;;  %v14571_v39 = vld [vmem:[#allocation29 + $0x3c4] ss:$24 sps:$4 sm:$0xff]  }
0x16db   :  { %v8936_v60 = vmul.f32 1.442695, %v8927_v37 }
0x16dc   :  { %15245 = vpow2.f32 %v8934_v49 }
0x16dd   :  { %15247 = vpow2.f32 %v8936_v60  ;;  %v14569_v60 = vld [vmem:[#allocation29 + $0x3c0] ss:$24 sps:$4 sm:$0xff]  }
0x16e1   :  { %v8764_v29 = vpop.f32.mrb[200].mxu0 }
0x16e2   :  { %v8816_v23 = vadd.f32 %v8764_v29, %v8257_v6  ;;  %v8766_v0 = vpop.f32.mrb[201].mxu0  ;;  %v14577_v29 = vld [vmem:[#allocation29 + $0x3f4] ss:$24 sps:$4 sm:$0xff]  }
0x16e3   :  { %v8817_v63 = vadd.f32 %v8766_v0, %v8258_v13  ;;  %v8768_v25 = vpop.f32.mrb[202].mxu0  ;;  %v14583_v0 = vld [vmem:[#allocation29 + $0x424] ss:$24 sps:$4 sm:$0xff]  }
0x16e4   :  { %v8866_v44 = vadd.f32 %v8841_v9, %v8816_v23  ;;  %v8769_v43 = vpop.f32.mrb[203].mxu0  ;;  %v14581_v25 = vld [vmem:[#allocation29 + $0x420] ss:$24 sps:$4 sm:$0xff]  }
0x16e5   :  { %v8867_v46 = vadd.f32 %v8845_v42, %v8817_v63  ;;  %v14575_v42 = vld [vmem:[#allocation29 + $0x3f0] ss:$24 sps:$4 sm:$0xff]   ;;  %v14589_v43 = vld [vmem:[#allocation29 + $0x454] ss:$24 sps:$4 sm:$0xff]  }
0x16e6   :  { %v15246_v62 = vpop.eup %15245  ;;  %v8882_v21 = vmin.f32 %v8866_v44, 0.0  ;;  %vm8874_vm10 = vcmp.gt.f32.partialorder %v8866_v44, 0.0 }
0x16e7   :  { %v15248_v54 = vpop.eup %15247  ;;  %v8883_v31 = vmin.f32 %v8867_v46, 0.0  ;;  %v12704_v16 = vadd.f32 -1.0, %v15246_v62  ;;  %vm8875_vm11 = vcmp.gt.f32.partialorder %v8867_v46, 0.0 }
0x16e8   :  { %v8894_v10 = vmul.f32 1.442695, %v8882_v21  ;;  %v12705_v53 = vadd.f32 -1.0, %v15248_v54 }
0x16e9   :  { %v8896_v27 = vmul.f32 1.442695, %v8883_v31  ;;  %v8958_v6 = vsel %vm8918_vm8, %v8910_v50, %v12704_v16  ;;  %v14587_v16 = vld [vmem:[#allocation29 + $0x450] ss:$24 sps:$4 sm:$0xff]  }
0x16ea   :  { %15249 = vpow2.f32 %v8894_v10  ;;  %v8959_v13 = vsel %vm8919_vm9, %v8911_v11, %v12705_v53  ;;  %v17841_v14 = vpack.c.bf16 %v8958_v6, %v8958_v6  ;;  %v8848_v10 = vsub.s32 6, %v17536_v57  ;;  %v14595_v6 = vld [vmem:[#allocation29 + $0x484] ss:$24 sps:$4 sm:$0xff]  }
0x16eb   :  { %15251 = vpow2.f32 %v8896_v27  ;;  %v17836_v20 = vpack.c.bf16 %v8959_v13, %v8959_v13  ;;  %v8852_v27 = vsub.s32 7, %v17536_v57 }
0x16ec   :  { %v8723_v32 = vpop.f32.mrb[184].mxu1 }
0x16ed   :  { %v8814_v34 = vadd.f32 %v8723_v32, %v17808_v4  ;;  %v8725_v22 = vpop.f32.mrb[185].mxu1  ;;  %11342 = vmatprep.mubr.bf16.mxu1 %v17836_v20  ;;  %v14557_v4 = vld [vmem:[#allocation29 + $0x360] ss:$24 sps:$4 sm:$0xff]  }
0x16ee   :  { %v8815_v24 = vadd.f32 %v8725_v22, %v17811_v59  ;;  %v8727_v17 = vpop.f32.mrb[186].mxu1  ;;  %11343 = vmatmul.mubr.bf16.vlgmr.msra.gmra.mrb[192].mxu1 %v17841_v14  ;;  %v14565_v59 = vld [vmem:[#allocation29 + $0x394] ss:$24 sps:$4 sm:$0xff]  }
0x16ef   :  { %v17847_v5 = vadd.f32 %v8833_v35, %v8814_v34  ;;  %11352 = vmatpush1.bf16.msra.mxu1 %v14545_v28  ;;  %v8728_v56 = vpop.f32.mrb[187].mxu1  ;;  %v14596_v34 = vld [vmem:[#allocation29 + $0x900] ss:$24 sps:$4 sm:$0xff]   ;;  %v8853_v17 = vrot.slane %v17813_v38, %v8852_v27 }
0x16f0   :  { %v8865_v48 = vadd.f32 %v8837_v41, %v8815_v24  ;;  %11353 = vmatprep.subr.bf16.mxu1 %v14553_v2  ;;  %v14593_v41 = vld [vmem:[#allocation29 + $0x480] ss:$24 sps:$4 sm:$0xff]   ;;  %v8849_v24 = vrot.slane %v17813_v38, %v8848_v10  ;;  %v14634_v10 = vld [vmem:[#allocation29 + $0xa24] ss:$24 sps:$4 sm:$0xff]  }
0x16f1   :  { %v8880_v1 = vmin.f32 %v17847_v5, 0.0  ;;  %vm8872_vm15 = vcmp.gt.f32.partialorder %v17847_v5, 0.0 }
0x16f2   :  { %v8881_v40 = vmin.f32 %v8865_v48, 0.0  ;;  %vm8873_vm12 = vcmp.gt.f32.partialorder %v8865_v48, 0.0 }
0x16f3   :  { %11354 = vmatpush1.bf16.msra.mxu1 %v14551_v26  ;;  %v8890_v45 = vmul.f32 1.442695, %v8880_v1  ;;  %v14601_v26 = vld [vmem:[#allocation29 + $0x4b4] ss:$24 sps:$4 sm:$0xff]  }
0x16f4   :  { %v15250_v58 = vpop.eup %15249  ;;  %v8892_v47 = vmul.f32 1.442695, %v8881_v40  ;;  %11355 = vmatprep.subr.bf16.mxu1 %v14559_v51 }
0x16f5   :  { %v15252_v30 = vpop.eup %15251  ;;  %v12700_v8 = vadd.f32 -1.0, %v15250_v58 }
0x16f6   :  { %v12701_v52 = vadd.f32 -1.0, %v15252_v30  ;;  %15253 = vpow2.f32 %v8892_v47  ;;  %v14599_v47 = vld [vmem:[#allocation29 + $0x4b0] ss:$24 sps:$4 sm:$0xff]  }
0x16f7   :  { %v8914_v19 = vsel %vm8874_vm10, %v8866_v44, %v12700_v8  ;;  %11356 = vmatpush1.bf16.msra.mxu1 %v14557_v4  ;;  %15255 = vpow2.f32 %v8890_v45 }
0x16f8   :  { %v8930_v50 = vmin.f32 %v8914_v19, 0.0  ;;  %11357 = vmatprep.subr.bf16.mxu1 %v14565_v59  ;;  %v8915_v11 = vsel %vm8875_vm11, %v8867_v46, %v12701_v52  ;;  %vm8922_vm13 = vcmp.gt.f32.partialorder %v8914_v19, 0.0  ;;  %v14602_v59 = vld [vmem:[#allocation29 + $0x930] ss:$24 sps:$4 sm:$0xff]   ;;  %v14610_v52 = vld [vmem:[#allocation29 + $0x964] ss:$24 sps:$4 sm:$0xff]  }
0x16f9   :  { %v8931_v37 = vmin.f32 %v8915_v11, 0.0  ;;  %vm8923_vm14 = vcmp.gt.f32.partialorder %v8915_v11, 0.0 }
0x16fa   :  { %v8942_v49 = vmul.f32 1.442695, %v8930_v50 }
0x16fb   :  { %11358 = vmatpush1.bf16.msra.mxu1 %v14563_v12  ;;  %v8944_v9 = vmul.f32 1.442695, %v8931_v37  ;;  %v14608_v12 = vld [vmem:[#allocation29 + $0x960] ss:$24 sps:$4 sm:$0xff]  }
0x16fc   :  { %15257 = vpow2.f32 %v8942_v49  ;;  %11359 = vmatprep.subr.bf16.mxu1 %v14571_v39  ;;  %v14613_v39 = vld [vmem:[#allocation29 + $0x514] ss:$24 sps:$4 sm:$0xff]  }
0x16fd   :  { %15259 = vpow2.f32 %v8944_v9  ;;  %v14616_v9 = vld [vmem:[#allocation29 + $0x994] ss:$24 sps:$4 sm:$0xff]  }
0x16ff   :  { %11360 = vmatpush1.bf16.msra.mxu1 %v14569_v60 }
0x1700   :  { %v15254_v23 = vpop.eup %15253  ;;  %11361 = vmatprep.subr.bf16.mxu1 %v14577_v29 }
0x1701   :  { %v12699_v63 = vadd.f32 -1.0, %v15254_v23  ;;  %v15256_v62 = vpop.eup %15255  ;;  %v14614_v23 = vld [vmem:[#allocation29 + $0x990] ss:$24 sps:$4 sm:$0xff]  }
0x1702   :  { %v12698_v35 = vadd.f32 -1.0, %v15256_v62  ;;  %v14628_v62 = vld [vmem:[#allocation29 + $0x9f4] ss:$24 sps:$4 sm:$0xff]  }
0x1703   :  { %11362 = vmatpush1.bf16.msra.mxu1 %v14575_v42  ;;  %v17850_v44 = vsel %vm8873_vm12, %v8865_v48, %v12699_v63  ;;  %v14604_v48 = vld [vmem:[#allocation29 + $0x934] ss:$24 sps:$4 sm:$0xff]   ;;  %v14611_v42 = vld [vmem:[#allocation29 + $0x510] ss:$24 sps:$4 sm:$0xff]   ;;  %v14619_v63 = vld [vmem:[#allocation29 + $0x544] ss:$24 sps:$4 sm:$0xff]  }
0x1704   :  { %11363 = vmatprep.subr.bf16.mxu1 %v14583_v0  ;;  %v8929_v46 = vmin.f32 %v17850_v44, 0.0  ;;  %v17863_v51 = vsel %vm8872_vm15, %v17847_v5, %v12698_v35  ;;  %vm8921_vm0 = vcmp.gt.f32.partialorder %v17850_v44, 0.0 }
0x1705   :  { %v8928_v30 = vmin.f32 %v17863_v51, 0.0  ;;  %vm8920_vm2 = vcmp.gt.f32.partialorder %v17863_v51, 0.0 }
0x1706   :  { %v15258_v21 = vpop.eup %15257  ;;  %v8940_v54 = vmul.f32 1.442695, %v8929_v46  ;;  %v14625_v46 = vld [vmem:[#allocation29 + $0x574] ss:$24 sps:$4 sm:$0xff]  }
0x1707   :  { %v15260_v31 = vpop.eup %15259  ;;  %11364 = vmatpush1.bf16.msra.mxu1 %v14581_v25  ;;  %v12708_v53 = vadd.f32 -1.0, %v15258_v21  ;;  %v14622_v25 = vld [vmem:[#allocation29 + $0x9c4] ss:$24 sps:$4 sm:$0xff]   ;;  %v14623_v21 = vld [vmem:[#allocation29 + $0x570] ss:$24 sps:$4 sm:$0xff]  }
0x1708   :  { %11365 = vmatprep.subr.bf16.mxu1 %v14589_v43  ;;  %v12709_v13 = vadd.f32 -1.0, %v15260_v31  ;;  %15261 = vpow2.f32 %v8940_v54  ;;  %v14617_v43 = vld [vmem:[#allocation29 + $0x540] ss:$24 sps:$4 sm:$0xff]   ;;  %v14626_v54 = vld [vmem:[#allocation29 + $0x9f0] ss:$24 sps:$4 sm:$0xff]  }
0x1709   :  { %v8962_v28 = vsel %vm8922_vm13, %v8914_v19, %v12708_v53 }
0x170a   :  { %v8963_v32 = vsel %vm8923_vm14, %v8915_v11, %v12709_v13  ;;  %v17860_v56 = vpack.c.bf16 %v8962_v28, %v8962_v28  ;;  %v8938_v11 = vmul.f32 1.442695, %v8928_v30  ;;  %v14632_v13 = vld [vmem:[#allocation29 + $0xa20] ss:$24 sps:$4 sm:$0xff]   ;;  %v14637_v28 = vld [vmem:[#allocation29 + $0x5d4] ss:$24 sps:$4 sm:$0xff]  }
0x170b   :  { %11366 = vmatpush1.bf16.msra.mxu1 %v14587_v16  ;;  %v17855_v2 = vpack.c.bf16 %v8963_v32, %v8963_v32  ;;  %v14631_v16 = vld [vmem:[#allocation29 + $0x5a4] ss:$24 sps:$4 sm:$0xff]   ;;  %v14640_v32 = vld [vmem:[#allocation29 + $0xa54] ss:$24 sps:$4 sm:$0xff]  }
0x170c   :  { %v8805_v22 = vpop.f32.mrb[188].mxu1  ;;  %11367 = vmatprep.subr.bf16.mxu1 %v14595_v6  ;;  %v14629_v6 = vld [vmem:[#allocation29 + $0x5a0] ss:$24 sps:$4 sm:$0xff]  }
0x170d   :  { %v8818_v40 = vadd.f32 %v8805_v22, %v17819_v15  ;;  %v8807_v1 = vpop.f32.mrb[189].mxu1  ;;  %11424 = vmatprep.mubr.bf16.mxu0 %v17855_v2  ;;  %v14607_v15 = vld [vmem:[#allocation29 + $0x4e4] ss:$24 sps:$4 sm:$0xff]  }
0x170e   :  { %v8819_v4 = vadd.f32 %v8807_v1, %v17821_v7  ;;  %v8809_v58 = vpop.f32.mrb[190].mxu1  ;;  %11425 = vmatmul.mubr.bf16.vlgmr.msra.gmra.mrb[204].mxu0 %v17860_v56  ;;  %v14605_v7 = vld [vmem:[#allocation29 + $0x4e0] ss:$24 sps:$4 sm:$0xff]  }
0x170f   :  { %11368 = vmatpush1.bf16.msra.mxu1 %v14593_v41  ;;  %11434 = vmatpush1.bf16.msra.mxu0 %v14596_v34  ;;  %v8810_v38 = vpop.f32.mrb[191].mxu1  ;;  %v17870_v8 = vadd.f32 %v8849_v24, %v8818_v40  ;;  %v14646_v40 = vld [vmem:[#allocation29 + $0xc] ss:$24 sps:$4 sm:$0xff]   ;;  %v14641_v58 = vld [vmem:[#allocation29 + $0xa80] ss:$24 sps:$4 sm:$0xff]  }
0x1710   :  { %v8869_v5 = vadd.f32 %v8853_v17, %v8819_v4  ;;  %11369 = vmatprep.subr.bf16.mxu1 %v14601_v26  ;;  %11435 = vmatprep.subr.bf16.mxu0 %v14604_v48  ;;  %v14635_v17 = vld [vmem:[#allocation29 + $0x5d0] ss:$24 sps:$4 sm:$0xff]   ;;  %v14643_v48 = vld [vmem:[#allocation29 + $0xa84] ss:$24 sps:$4 sm:$0xff]  }
0x1711   :  { %v8884_v37 = vmin.f32 %v17870_v8, 0.0  ;;  %v14638_v26 = vld [vmem:[#allocation29 + $0xa50] ss:$24 sps:$4 sm:$0xff]   ;;  %vm8876_vm3 = vcmp.gt.f32.partialorder %v17870_v8, 0.0 }
0x1712   :  { %v15262_v19 = vpop.eup %15261  ;;  %v8885_v45 = vmin.f32 %v8869_v5, 0.0  ;;  %vm8877_vm1 = vcmp.gt.f32.partialorder %v8869_v5, 0.0  ;;  %v14644_v38 = vld [vmem:[#allocation29 + $0x8] ss:$24 sps:$4 sm:$0xff]  }
0x1713   :  { %11370 = vmatpush1.bf16.msra.mxu1 %v14599_v47  ;;  %11436 = vmatpush1.bf16.msra.mxu0 %v14602_v59  ;;  %v12707_v50 = vadd.f32 -1.0, %v15262_v19  ;;  %v8898_v0 = vmul.f32 1.442695, %v8884_v37  ;;  %v14649_v59 = vld [vmem:[#allocation29 + $0xab4] ss:$24 sps:$4 sm:$0xff]  }
0x1714   :  { %v8900_v49 = vmul.f32 1.442695, %v8885_v45  ;;  %11371 = vmatprep.subr.bf16.mxu1 %v14607_v15  ;;  %11437 = vmatprep.subr.bf16.mxu0 %v14610_v52  ;;  %v14650_v15 = vld [vmem:[#allocation29 + $0x38] ss:$24 sps:$4 sm:$0xff]   ;;  %v14655_v19 = vld [vmem:[#allocation29 + $0xae4] ss:$24 sps:$4 sm:$0xff]  }
0x1715   :  { %v8961_v60 = vsel %vm8921_vm0, %v17850_v44, %v12707_v50  ;;  %v14620_v44 = vld [vmem:[#allocation29 + $0x9c0] ss:$24 sps:$4 sm:$0xff]   ;;  %v14658_v45 = vld [vmem:[#allocation29 + $0x6c] ss:$24 sps:$4 sm:$0xff]  }
0x1716   :  { %15263 = vpow2.f32 %v8900_v49  ;;  %v17875_v29 = vpack.c.bf16 %v8961_v60, %v8961_v60  ;;  %v14664_v49 = vld [vmem:[#allocation29 + $0x9c] ss:$24 sps:$4 sm:$0xff]  }
0x1717   :  { %11372 = vmatpush1.bf16.msra.mxu1 %v14605_v7  ;;  %11438 = vmatpush1.bf16.msra.mxu0 %v14608_v12  ;;  %15265 = vpow2.f32 %v8938_v11  ;;  %v14656_v12 = vld [vmem:[#allocation29 + $0x68] ss:$24 sps:$4 sm:$0xff]   ;;  %v14661_v11 = vld [vmem:[#allocation29 + $0xb14] ss:$24 sps:$4 sm:$0xff]  }
0x1718   :  { %11383 = vmatprep.mubr.bf16.mxu1 %v17875_v29  ;;  %11373 = vmatprep.subr.bf16.mxu1 %v14613_v39  ;;  %15267 = vpow2.f32 %v8898_v0  ;;  %v14670_v0 = vld [vmem:[#allocation29 + $0xcc] ss:$24 sps:$4 sm:$0xff]  }
0x1719   :  { %11439 = vmatprep.subr.bf16.mxu0 %v14616_v9  ;;  %v14659_v9 = vld [vmem:[#allocation29 + $0xb10] ss:$24 sps:$4 sm:$0xff]  }
0x171b   :  { %11374 = vmatpush1.bf16.msra.mxu1 %v14611_v42  ;;  %11440 = vmatpush1.bf16.msra.mxu0 %v14614_v23  ;;  %v14662_v42 = vld [vmem:[#allocation29 + $0x98] ss:$24 sps:$4 sm:$0xff]   ;;  %v14667_v23 = vld [vmem:[#allocation29 + $0xb44] ss:$24 sps:$4 sm:$0xff]  }
0x171c   :  { %11375 = vmatprep.subr.bf16.mxu1 %v14619_v63  ;;  %11441 = vmatprep.subr.bf16.mxu0 %v14622_v25  ;;  %v14665_v63 = vld [vmem:[#allocation29 + $0xb40] ss:$24 sps:$4 sm:$0xff]  }
0x171d   :  { %v14668_v25 = vld [vmem:[#allocation29 + $0xc8] ss:$24 sps:$4 sm:$0xff]  }
0x171f   :  { %11376 = vmatpush1.bf16.msra.mxu1 %v14617_v43  ;;  %11442 = vmatpush1.bf16.msra.mxu0 %v14620_v44  ;;  %v14673_v43 = vld [vmem:[#allocation29 + $0xb74] ss:$24 sps:$4 sm:$0xff]  }
0x1720   :  { %v15264_v31 = vpop.eup %15263  ;;  %11377 = vmatprep.subr.bf16.mxu1 %v14625_v46  ;;  %11443 = vmatprep.subr.bf16.mxu0 %v14628_v62  ;;  %v14676_v44 = vld [vmem:[#allocation29 + $0xfc] ss:$24 sps:$4 sm:$0xff]   ;;  %v14671_v46 = vld [vmem:[#allocation29 + $0xb70] ss:$24 sps:$4 sm:$0xff]  }
0x1721   :  { %v12703_v53 = vadd.f32 -1.0, %v15264_v31  ;;  %v15266_v27 = vpop.eup %15265  ;;  %v14674_v62 = vld [vmem:[#allocation29 + $0xf8] ss:$24 sps:$4 sm:$0xff]  }
0x1722   :  { %v12706_v34 = vadd.f32 -1.0, %v15266_v27  ;;  %v15268_v22 = vpop.eup %15267  ;;  %v14688_v27 = vld [vmem:[#allocation29 + $0x15c] ss:$24 sps:$4 sm:$0xff]  }
0x1723   :  { %11378 = vmatpush1.bf16.msra.mxu1 %v14623_v21  ;;  %11444 = vmatpush1.bf16.msra.mxu0 %v14626_v54  ;;  %v8917_v35 = vsel %vm8877_vm1, %v8869_v5, %v12703_v53  ;;  %v12702_v1 = vadd.f32 -1.0, %v15268_v22  ;;  %v14652_v5 = vld [vmem:[#allocation29 + $0x3c] ss:$24 sps:$4 sm:$0xff]   ;;  %v14682_v54 = vld [vmem:[#allocation29 + $0x12c] ss:$24 sps:$4 sm:$0xff]  }
0x1724   :  { %11379 = vmatprep.subr.bf16.mxu1 %v14631_v16  ;;  %11445 = vmatprep.subr.bf16.mxu0 %v14634_v10  ;;  %v8933_v41 = vmin.f32 %v8917_v35, 0.0  ;;  %v8960_v4 = vsel %vm8920_vm2, %v17863_v51, %v12706_v34  ;;  %v14647_v51 = vld [vmem:[#allocation29 + $0xab0] ss:$24 sps:$4 sm:$0xff]   ;;  %vm8925_vm4 = vcmp.gt.f32.partialorder %v8917_v35, 0.0  ;;  %v14679_v21 = vld [vmem:[#allocation29 + $0xba4] ss:$24 sps:$4 sm:$0xff]  }
0x1725   :  { %v17881_v47 = vpack.c.bf16 %v8960_v4, %v8960_v4  ;;  %v17884_v30 = vsel %vm8876_vm3, %v17870_v8, %v12702_v1  ;;  %v14653_v8 = vld [vmem:[#allocation29 + $0xae0] ss:$24 sps:$4 sm:$0xff]   ;;  %v14685_v53 = vld [vmem:[#allocation29 + $0xbd4] ss:$24 sps:$4 sm:$0xff]   ;;  %v14692_v22 = vld [vmem:[#allocation29 + $0x10] ss:$24 sps:$4 sm:$0xff]  }
0x1726   :  { %v8948_v24 = vmul.f32 1.442695, %v8933_v41  ;;  %v8932_v52 = vmin.f32 %v17884_v30, 0.0  ;;  %v14677_v16 = vld [vmem:[#allocation29 + $0xba0] ss:$24 sps:$4 sm:$0xff]   ;;  %vm8924_vm5 = vcmp.gt.f32.partialorder %v17884_v30, 0.0 }
0x1727   :  { %11380 = vmatpush1.bf16.msra.mxu1 %v14629_v6  ;;  %11446 = vmatpush1.bf16.msra.mxu0 %v14632_v13  ;;  %v14680_v10 = vld [vmem:[#allocation29 + $0x128] ss:$24 sps:$4 sm:$0xff]   ;;  %v14703_v1 = vld [vmem:[#allocation29 + $0x1ec] ss:$24 sps:$4 sm:$0xff]  }
0x1728   :  { %11381 = vmatprep.subr.bf16.mxu1 %v14637_v28  ;;  %11447 = vmatprep.subr.bf16.mxu0 %v14640_v32  ;;  %15269 = vpow2.f32 %v8948_v24  ;;  %v8946_v39 = vmul.f32 1.442695, %v8932_v52  ;;  %v14683_v13 = vld [vmem:[#allocation29 + $0xbd0] ss:$24 sps:$4 sm:$0xff]   ;;  %v14691_v28 = vld [vmem:[#allocation29 + $0x18c] ss:$24 sps:$4 sm:$0xff]  }
0x1729   :  { %v14694_v32 = vld [vmem:[#allocation29 + $0x14] ss:$24 sps:$4 sm:$0xff]   ;;  %v14689_v34 = vld [vmem:[#allocation29 + $0x188] ss:$24 sps:$4 sm:$0xff]  }
0x172a   :  { %15271 = vpow2.f32 %v8946_v39  ;;  %v14706_v4 = vld [vmem:[#allocation29 + $0x74] ss:$24 sps:$4 sm:$0xff]   ;;  %v14713_v52 = vld [vmem:[#allocation29 + $0x248] ss:$24 sps:$4 sm:$0xff]  }
0x172b   :  { %11382 = vmatpush1.bf16.msra.mxu1 %v14635_v17  ;;  %11448 = vmatpush1.bf16.msra.mxu0 %v14638_v26  ;;  %v14697_v17 = vld [vmem:[#allocation29 + $0x1bc] ss:$24 sps:$4 sm:$0xff]  }
0x172c   :  { %11449 = vmatprep.subr.bf16.mxu0 %v14643_v48  ;;  %11474 = vmatprep.subr.bf16.mxu1 %v14646_v40  ;;  %v14700_v26 = vld [vmem:[#allocation29 + $0x44] ss:$24 sps:$4 sm:$0xff]   ;;  %v14695_v48 = vld [vmem:[#allocation29 + $0x1b8] ss:$24 sps:$4 sm:$0xff]   ;;  %v14730_v39 = vld [vmem:[#allocation29 + $0x134] ss:$24 sps:$4 sm:$0xff]  }
0x172d   :  { %v14698_v40 = vld [vmem:[#allocation29 + $0x40] ss:$24 sps:$4 sm:$0xff]  }
0x172e   :  { %11384 = vmatmul.mubr.bf16.vlgmr.msra.gmra.mrb[192].mxu1 %v17881_v47 }
0x172f   :  { %11450 = vmatpush1.bf16.msra.mxu0 %v14641_v58  ;;  %11475 = vmatpush1.bf16.msra.mxu1 %v14644_v38  ;;  %v14701_v58 = vld [vmem:[#allocation29 + $0x1e8] ss:$24 sps:$4 sm:$0xff]  }
0x1730   :  { %11506 = vmatprep.mubr.bf16.mxu1 %v17836_v20  ;;  %11451 = vmatprep.subr.bf16.mxu0 %v14649_v59  ;;  %v14704_v38 = vld [vmem:[#allocation29 + $0x70] ss:$24 sps:$4 sm:$0xff]   ;;  %v14709_v59 = vld [vmem:[#allocation29 + $0x21c] ss:$24 sps:$4 sm:$0xff]  }
0x1731   :  { %11476 = vmatprep.subr.bf16.mxu1 %v14652_v5  ;;  %v14707_v5 = vld [vmem:[#allocation29 + $0x218] ss:$24 sps:$4 sm:$0xff]  }
0x1732   :  { %v15270_v7 = vpop.eup %15269 }
0x1733   :  { %11452 = vmatpush1.bf16.msra.mxu0 %v14647_v51  ;;  %11477 = vmatpush1.bf16.msra.mxu1 %v14650_v15  ;;  %v12711_v50 = vadd.f32 -1.0, %v15270_v7  ;;  %v14710_v51 = vld [vmem:[#allocation29 + $0xa0] ss:$24 sps:$4 sm:$0xff]   ;;  %v14715_v15 = vld [vmem:[#allocation29 + $0x24c] ss:$24 sps:$4 sm:$0xff]  }
0x1734   :  { %11453 = vmatprep.subr.bf16.mxu0 %v14655_v19  ;;  %11478 = vmatprep.subr.bf16.mxu1 %v14658_v45  ;;  %v15272_v31 = vpop.eup %15271  ;;  %v14716_v19 = vld [vmem:[#allocation29 + $0xd0] ss:$24 sps:$4 sm:$0xff]   ;;  %v14721_v45 = vld [vmem:[#allocation29 + $0x27c] ss:$24 sps:$4 sm:$0xff]  }
0x1735   :  { %v8965_v37 = vsel %vm8925_vm4, %v8917_v35, %v12711_v50  ;;  %v12710_v6 = vadd.f32 -1.0, %v15272_v31  ;;  %v14686_v35 = vld [vmem:[#allocation29 + $0x158] ss:$24 sps:$4 sm:$0xff]   ;;  %v14724_v7 = vld [vmem:[#allocation29 + $0x104] ss:$24 sps:$4 sm:$0xff]  }
0x1736   :  { %v17889_v60 = vpack.c.bf16 %v8965_v37, %v8965_v37  ;;  %v14727_v50 = vld [vmem:[#allocation29 + $0x2ac] ss:$24 sps:$4 sm:$0xff]   ;;  %v14728_v37 = vld [vmem:[#allocation29 + $0x130] ss:$24 sps:$4 sm:$0xff]  }
0x1737   :  { %11454 = vmatpush1.bf16.msra.mxu0 %v14653_v8  ;;  %11479 = vmatpush1.bf16.msra.mxu1 %v14656_v12  ;;  %v8964_v41 = vsel %vm8924_vm5, %v17884_v30, %v12710_v6  ;;  %v14712_v30 = vld [vmem:[#allocation29 + $0xa4] ss:$24 sps:$4 sm:$0xff]   ;;  %v14719_v8 = vld [vmem:[#allocation29 + $0x278] ss:$24 sps:$4 sm:$0xff]   ;;  %v14754_v31 = vld [vmem:[#allocation29 + $0x1f4] ss:$24 sps:$4 sm:$0xff]  }
0x1738   :  { %11465 = vmatprep.mubr.bf16.mxu0 %v17889_v60  ;;  %11455 = vmatprep.subr.bf16.mxu0 %v14661_v11  ;;  %v17894_v24 = vpack.c.bf16 %v8964_v41, %v8964_v41  ;;  %v14722_v12 = vld [vmem:[#allocation29 + $0x100] ss:$24 sps:$4 sm:$0xff]   ;;  %v14764_v41 = vld [vmem:[#allocation29 + $0x250] ss:$24 sps:$4 sm:$0xff]  }
0x1739   :  { %11480 = vmatprep.subr.bf16.mxu1 %v14664_v49  ;;  %v14725_v11 = vld [vmem:[#allocation29 + $0x2a8] ss:$24 sps:$4 sm:$0xff]   ;;  %v14733_v49 = vld [vmem:[#allocation29 + $0x2dc] ss:$24 sps:$4 sm:$0xff]   ;;  %v14755_v6 = vld [vmem:[#allocation29 + $0x398] ss:$24 sps:$4 sm:$0xff]  }
0x173b   :  { %11456 = vmatpush1.bf16.msra.mxu0 %v14659_v9  ;;  %11481 = vmatpush1.bf16.msra.mxu1 %v14662_v42  ;;  %v14736_v9 = vld [vmem:[#allocation29 + $0x164] ss:$24 sps:$4 sm:$0xff]   ;;  %v14731_v42 = vld [vmem:[#allocation29 + $0x2d8] ss:$24 sps:$4 sm:$0xff]  }
0x173c   :  { %11457 = vmatprep.subr.bf16.mxu0 %v14667_v23  ;;  %11482 = vmatprep.subr.bf16.mxu1 %v14670_v0  ;;  %v14734_v23 = vld [vmem:[#allocation29 + $0x160] ss:$24 sps:$4 sm:$0xff]   ;;  %v14739_v0 = vld [vmem:[#allocation29 + $0x30c] ss:$24 sps:$4 sm:$0xff]  }
0x173f   :  { %11458 = vmatpush1.bf16.msra.mxu0 %v14665_v63  ;;  %11483 = vmatpush1.bf16.msra.mxu1 %v14668_v25  ;;  %v14742_v63 = vld [vmem:[#allocation29 + $0x194] ss:$24 sps:$4 sm:$0xff]   ;;  %v14737_v25 = vld [vmem:[#allocation29 + $0x308] ss:$24 sps:$4 sm:$0xff]  }
0x1740   :  { %11459 = vmatprep.subr.bf16.mxu0 %v14673_v43  ;;  %11484 = vmatprep.subr.bf16.mxu1 %v14676_v44  ;;  %v14740_v43 = vld [vmem:[#allocation29 + $0x190] ss:$24 sps:$4 sm:$0xff]   ;;  %v14745_v44 = vld [vmem:[#allocation29 + $0x33c] ss:$24 sps:$4 sm:$0xff]  }
0x1743   :  { %11460 = vmatpush1.bf16.msra.mxu0 %v14671_v46  ;;  %11485 = vmatpush1.bf16.msra.mxu1 %v14674_v62  ;;  %v14748_v46 = vld [vmem:[#allocation29 + $0x1c4] ss:$24 sps:$4 sm:$0xff]   ;;  %v14743_v62 = vld [vmem:[#allocation29 + $0x338] ss:$24 sps:$4 sm:$0xff]  }
0x1744   :  { %11461 = vmatprep.subr.bf16.mxu0 %v14679_v21  ;;  %11486 = vmatprep.subr.bf16.mxu1 %v14682_v54  ;;  %v14746_v21 = vld [vmem:[#allocation29 + $0x1c0] ss:$24 sps:$4 sm:$0xff]   ;;  %v14751_v54 = vld [vmem:[#allocation29 + $0x36c] ss:$24 sps:$4 sm:$0xff]  }
0x1747   :  { %11462 = vmatpush1.bf16.msra.mxu0 %v14677_v16  ;;  %11487 = vmatpush1.bf16.msra.mxu1 %v14680_v10  ;;  %v14749_v16 = vld [vmem:[#allocation29 + $0x368] ss:$24 sps:$4 sm:$0xff]  }
0x1748   :  { %11463 = vmatprep.subr.bf16.mxu0 %v14685_v53  ;;  %11488 = vmatprep.subr.bf16.mxu1 %v14688_v27  ;;  %v14752_v10 = vld [vmem:[#allocation29 + $0x1f0] ss:$24 sps:$4 sm:$0xff]   ;;  %v14757_v53 = vld [vmem:[#allocation29 + $0x39c] ss:$24 sps:$4 sm:$0xff]  }
0x1749   :  { %v14760_v27 = vld [vmem:[#allocation29 + $0x224] ss:$24 sps:$4 sm:$0xff]  }
0x174b   :  { %11464 = vmatpush1.bf16.msra.mxu0 %v14683_v13  ;;  %11489 = vmatpush1.bf16.msra.mxu1 %v14686_v35  ;;  %v14758_v13 = vld [vmem:[#allocation29 + $0x220] ss:$24 sps:$4 sm:$0xff]   ;;  %v14763_v35 = vld [vmem:[#allocation29 + $0x3cc] ss:$24 sps:$4 sm:$0xff]  }
0x174c   :  { %11490 = vmatprep.subr.bf16.mxu1 %v14691_v28  ;;  %11638 = vmatprep.subr.bf16.mxu0 %v14694_v32  ;;  %v14766_v28 = vld [vmem:[#allocation29 + $0x254] ss:$24 sps:$4 sm:$0xff]   ;;  %v14761_v32 = vld [vmem:[#allocation29 + $0x3c8] ss:$24 sps:$4 sm:$0xff]  }
0x174e   :  { %11466 = vmatmul.mubr.bf16.vlgmr.msra.gmra.mrb[204].mxu0 %v17894_v24 }
0x174f   :  { %11491 = vmatpush1.bf16.msra.mxu1 %v14689_v34  ;;  %11639 = vmatpush1.bf16.msra.mxu0 %v14692_v22  ;;  %v14769_v34 = vld [vmem:[#allocation29 + $0x3fc] ss:$24 sps:$4 sm:$0xff]  }
0x1750   :  { %11670 = vmatprep.mubr.bf16.mxu0 %v17836_v20  ;;  %11492 = vmatprep.subr.bf16.mxu1 %v14697_v17  ;;  %v14718_v20 = vld [vmem:[#allocation29 + $0xd4] ss:$24 sps:$4 sm:$0xff]   ;;  %v14772_v22 = vld [vmem:[#allocation29 + $0x284] ss:$24 sps:$4 sm:$0xff]   ;;  %v14767_v17 = vld [vmem:[#allocation29 + $0x3f8] ss:$24 sps:$4 sm:$0xff]  }
0x1751   :  { %11640 = vmatprep.subr.bf16.mxu0 %v14700_v26  ;;  %v14770_v26 = vld [vmem:[#allocation29 + $0x280] ss:$24 sps:$4 sm:$0xff]  }
0x1753   :  { %11493 = vmatpush1.bf16.msra.mxu1 %v14695_v48  ;;  %11641 = vmatpush1.bf16.msra.mxu0 %v14698_v40  ;;  %v14775_v48 = vld [vmem:[#allocation29 + $0x42c] ss:$24 sps:$4 sm:$0xff]  }
0x1754   :  { %11494 = vmatprep.subr.bf16.mxu1 %v14703_v1  ;;  %11642 = vmatprep.subr.bf16.mxu0 %v14706_v4  ;;  %v14778_v40 = vld [vmem:[#allocation29 + $0x2b4] ss:$24 sps:$4 sm:$0xff]   ;;  %v14773_v1 = vld [vmem:[#allocation29 + $0x428] ss:$24 sps:$4 sm:$0xff]  }
0x1755   :  { %v14776_v4 = vld [vmem:[#allocation29 + $0x2b0] ss:$24 sps:$4 sm:$0xff]  }
0x1757   :  { %11495 = vmatpush1.bf16.msra.mxu1 %v14701_v58  ;;  %11643 = vmatpush1.bf16.msra.mxu0 %v14704_v38  ;;  %v14781_v58 = vld [vmem:[#allocation29 + $0x45c] ss:$24 sps:$4 sm:$0xff]  }
0x1758   :  { %11496 = vmatprep.subr.bf16.mxu1 %v14709_v59  ;;  %11644 = vmatprep.subr.bf16.mxu0 %v14712_v30  ;;  %v14784_v38 = vld [vmem:[#allocation29 + $0x2e4] ss:$24 sps:$4 sm:$0xff]   ;;  %v14779_v59 = vld [vmem:[#allocation29 + $0x458] ss:$24 sps:$4 sm:$0xff]  }
0x1759   :  { %v14782_v30 = vld [vmem:[#allocation29 + $0x2e0] ss:$24 sps:$4 sm:$0xff]  }
0x175b   :  { %11497 = vmatpush1.bf16.msra.mxu1 %v14707_v5  ;;  %11645 = vmatpush1.bf16.msra.mxu0 %v14710_v51  ;;  %v14787_v5 = vld [vmem:[#allocation29 + $0x48c] ss:$24 sps:$4 sm:$0xff]  }
0x175c   :  { %11498 = vmatprep.subr.bf16.mxu1 %v14715_v15  ;;  %11646 = vmatprep.subr.bf16.mxu0 %v14718_v20  ;;  %v14790_v51 = vld [vmem:[#allocation29 + $0x314] ss:$24 sps:$4 sm:$0xff]   ;;  %v14785_v15 = vld [vmem:[#allocation29 + $0x488] ss:$24 sps:$4 sm:$0xff]  }
0x175d   :  { %v14788_v20 = vld [vmem:[#allocation29 + $0x310] ss:$24 sps:$4 sm:$0xff]  }
0x175f   :  { %11499 = vmatpush1.bf16.msra.mxu1 %v14713_v52  ;;  %11647 = vmatpush1.bf16.msra.mxu0 %v14716_v19  ;;  %v14793_v52 = vld [vmem:[#allocation29 + $0x4bc] ss:$24 sps:$4 sm:$0xff]  }
0x1760   :  { %11500 = vmatprep.subr.bf16.mxu1 %v14721_v45  ;;  %11648 = vmatprep.subr.bf16.mxu0 %v14724_v7  ;;  %v14796_v19 = vld [vmem:[#allocation29 + $0x344] ss:$24 sps:$4 sm:$0xff]   ;;  %v14791_v45 = vld [vmem:[#allocation29 + $0x4b8] ss:$24 sps:$4 sm:$0xff]  }
0x1761   :  { %v14794_v7 = vld [vmem:[#allocation29 + $0x340] ss:$24 sps:$4 sm:$0xff]  }
0x1763   :  { %11501 = vmatpush1.bf16.msra.mxu1 %v14719_v8  ;;  %11649 = vmatpush1.bf16.msra.mxu0 %v14722_v12  ;;  %v14799_v8 = vld [vmem:[#allocation29 + $0x4ec] ss:$24 sps:$4 sm:$0xff]  }
0x1764   :  { %11502 = vmatprep.subr.bf16.mxu1 %v14727_v50  ;;  %11650 = vmatprep.subr.bf16.mxu0 %v14730_v39  ;;  %v14802_v12 = vld [vmem:[#allocation29 + $0x374] ss:$24 sps:$4 sm:$0xff]   ;;  %v14797_v50 = vld [vmem:[#allocation29 + $0x4e8] ss:$24 sps:$4 sm:$0xff]  }
0x1765   :  { %v14800_v39 = vld [vmem:[#allocation29 + $0x370] ss:$24 sps:$4 sm:$0xff]  }
0x1767   :  { %11503 = vmatpush1.bf16.msra.mxu1 %v14725_v11  ;;  %11651 = vmatpush1.bf16.msra.mxu0 %v14728_v37  ;;  %v14805_v11 = vld [vmem:[#allocation29 + $0x51c] ss:$24 sps:$4 sm:$0xff]  }
0x1768   :  { %11504 = vmatprep.subr.bf16.mxu1 %v14733_v49  ;;  %11652 = vmatprep.subr.bf16.mxu0 %v14736_v9  ;;  %v14808_v37 = vld [vmem:[#allocation29 + $0x3a4] ss:$24 sps:$4 sm:$0xff]   ;;  %v14806_v49 = vld [vmem:[#allocation29 + $0x3a0] ss:$24 sps:$4 sm:$0xff]  }
0x1769   :  { %v14811_v9 = vld [vmem:[#allocation29 + $0x54c] ss:$24 sps:$4 sm:$0xff]  }
0x176b   :  { %11505 = vmatpush1.bf16.msra.mxu1 %v14731_v42  ;;  %11653 = vmatpush1.bf16.msra.mxu0 %v14734_v23  ;;  %v14809_v42 = vld [vmem:[#allocation29 + $0x548] ss:$24 sps:$4 sm:$0xff]  }
0x176c   :  { %11515 = vmatprep.subr.bf16.mxu1 %v14739_v0  ;;  %11654 = vmatprep.subr.bf16.mxu0 %v14742_v63  ;;  %v14812_v23 = vld [vmem:[#allocation29 + $0x3d0] ss:$24 sps:$4 sm:$0xff]   ;;  %v14817_v0 = vld [vmem:[#allocation29 + $0x57c] ss:$24 sps:$4 sm:$0xff]  }
0x176d   :  { %v14820_v63 = vld [vmem:[#allocation29 + $0x404] ss:$24 sps:$4 sm:$0xff]  }
0x176e   :  { %11507 = vmatmul.mubr.bf16.vlgmr.msra.gmra.mrb[196].mxu1 %v17841_v14 }
0x176f   :  { %11516 = vmatpush1.bf16.msra.mxu1 %v14737_v25  ;;  %11547 = vmatprep.mubr.bf16.mxu1 %v17875_v29  ;;  %v14815_v25 = vld [vmem:[#allocation29 + $0x578] ss:$24 sps:$4 sm:$0xff]  }
0x1770   :  { %11655 = vmatpush1.bf16.msra.mxu0 %v14740_v43  ;;  %11517 = vmatprep.subr.bf16.mxu1 %v14745_v44  ;;  %v14818_v43 = vld [vmem:[#allocation29 + $0x400] ss:$24 sps:$4 sm:$0xff]   ;;  %v14823_v44 = vld [vmem:[#allocation29 + $0x5ac] ss:$24 sps:$4 sm:$0xff]  }
0x1771   :  { %11656 = vmatprep.subr.bf16.mxu0 %v14748_v46  ;;  %v14826_v46 = vld [vmem:[#allocation29 + $0x434] ss:$24 sps:$4 sm:$0xff]  }
0x1773   :  { %11518 = vmatpush1.bf16.msra.mxu1 %v14743_v62  ;;  %v14821_v62 = vld [vmem:[#allocation29 + $0x5a8] ss:$24 sps:$4 sm:$0xff]  }
0x1774   :  { %11657 = vmatpush1.bf16.msra.mxu0 %v14746_v21  ;;  %11519 = vmatprep.subr.bf16.mxu1 %v14751_v54  ;;  %v14824_v21 = vld [vmem:[#allocation29 + $0x430] ss:$24 sps:$4 sm:$0xff]   ;;  %v14829_v54 = vld [vmem:[#allocation29 + $0x5dc] ss:$24 sps:$4 sm:$0xff]  }
0x1775   :  { %11658 = vmatprep.subr.bf16.mxu0 %v14754_v31  ;;  %v14832_v31 = vld [vmem:[#allocation29 + $0x464] ss:$24 sps:$4 sm:$0xff]  }
0x1777   :  { %11520 = vmatpush1.bf16.msra.mxu1 %v14749_v16  ;;  %v14827_v16 = vld [vmem:[#allocation29 + $0x5d8] ss:$24 sps:$4 sm:$0xff]  }
0x1778   :  { %11659 = vmatpush1.bf16.msra.mxu0 %v14752_v10  ;;  %11521 = vmatprep.subr.bf16.mxu1 %v14757_v53  ;;  %v14830_v10 = vld [vmem:[#allocation29 + $0x460] ss:$24 sps:$4 sm:$0xff]   ;;  %v14835_v53 = vld [vmem:[#allocation29 + $0x60c] ss:$24 sps:$4 sm:$0xff]  }
0x1779   :  { %11660 = vmatprep.subr.bf16.mxu0 %v14760_v27  ;;  %v14838_v27 = vld [vmem:[#allocation29 + $0x494] ss:$24 sps:$4 sm:$0xff]  }
0x177b   :  { %11522 = vmatpush1.bf16.msra.mxu1 %v14755_v6  ;;  %v14833_v6 = vld [vmem:[#allocation29 + $0x608] ss:$24 sps:$4 sm:$0xff]  }
0x177c   :  { %11661 = vmatpush1.bf16.msra.mxu0 %v14758_v13  ;;  %11523 = vmatprep.subr.bf16.mxu1 %v14763_v35  ;;  %v14836_v13 = vld [vmem:[#allocation29 + $0x490] ss:$24 sps:$4 sm:$0xff]   ;;  %v14841_v35 = vld [vmem:[#allocation29 + $0x63c] ss:$24 sps:$4 sm:$0xff]  }
0x177d   :  { %11662 = vmatprep.subr.bf16.mxu0 %v14766_v28  ;;  %v14844_v28 = vld [vmem:[#allocation29 + $0x4c4] ss:$24 sps:$4 sm:$0xff]  }
0x177f   :  { %11524 = vmatpush1.bf16.msra.mxu1 %v14761_v32  ;;  %v14839_v32 = vld [vmem:[#allocation29 + $0x638] ss:$24 sps:$4 sm:$0xff]  }
0x1780   :  { %11663 = vmatpush1.bf16.msra.mxu0 %v14764_v41  ;;  %11525 = vmatprep.subr.bf16.mxu1 %v14769_v34  ;;  %v14842_v41 = vld [vmem:[#allocation29 + $0x4c0] ss:$24 sps:$4 sm:$0xff]   ;;  %v14847_v34 = vld [vmem:[#allocation29 + $0x66c] ss:$24 sps:$4 sm:$0xff]  }
0x1781   :  { %11664 = vmatprep.subr.bf16.mxu0 %v14772_v22  ;;  %v14850_v22 = vld [vmem:[#allocation29 + $0x4f4] ss:$24 sps:$4 sm:$0xff]  }
0x1783   :  { %11526 = vmatpush1.bf16.msra.mxu1 %v14767_v17  ;;  %v14845_v17 = vld [vmem:[#allocation29 + $0x668] ss:$24 sps:$4 sm:$0xff]  }
0x1784   :  { %11665 = vmatpush1.bf16.msra.mxu0 %v14770_v26  ;;  %11527 = vmatprep.subr.bf16.mxu1 %v14775_v48  ;;  %v14848_v26 = vld [vmem:[#allocation29 + $0x4f0] ss:$24 sps:$4 sm:$0xff]   ;;  %v14853_v48 = vld [vmem:[#allocation29 + $0x69c] ss:$24 sps:$4 sm:$0xff]  }
0x1785   :  { %11666 = vmatprep.subr.bf16.mxu0 %v14778_v40  ;;  %v14856_v40 = vld [vmem:[#allocation29 + $0x524] ss:$24 sps:$4 sm:$0xff]  }
0x1787   :  { %11528 = vmatpush1.bf16.msra.mxu1 %v14773_v1  ;;  %v14851_v1 = vld [vmem:[#allocation29 + $0x698] ss:$24 sps:$4 sm:$0xff]  }
0x1788   :  { %11667 = vmatpush1.bf16.msra.mxu0 %v14776_v4  ;;  %11529 = vmatprep.subr.bf16.mxu1 %v14781_v58  ;;  %v14854_v4 = vld [vmem:[#allocation29 + $0x520] ss:$24 sps:$4 sm:$0xff]   ;;  %v14859_v58 = vld [vmem:[#allocation29 + $0x6cc] ss:$24 sps:$4 sm:$0xff]  }
0x1789   :  { %11668 = vmatprep.subr.bf16.mxu0 %v14784_v38  ;;  %v14862_v38 = vld [vmem:[#allocation29 + $0x554] ss:$24 sps:$4 sm:$0xff]  }
0x178b   :  { %11530 = vmatpush1.bf16.msra.mxu1 %v14779_v59  ;;  %v14857_v59 = vld [vmem:[#allocation29 + $0x6c8] ss:$24 sps:$4 sm:$0xff]  }
0x178c   :  { %11669 = vmatpush1.bf16.msra.mxu0 %v14782_v30  ;;  %11531 = vmatprep.subr.bf16.mxu1 %v14787_v5  ;;  %v14860_v30 = vld [vmem:[#allocation29 + $0x550] ss:$24 sps:$4 sm:$0xff]   ;;  %v14865_v5 = vld [vmem:[#allocation29 + $0x6fc] ss:$24 sps:$4 sm:$0xff]  }
0x178d   :  { %11679 = vmatprep.subr.bf16.mxu0 %v14790_v51  ;;  %v14868_v51 = vld [vmem:[#allocation29 + $0x584] ss:$24 sps:$4 sm:$0xff]  }
0x178f   :  { %11671 = vmatmul.mubr.bf16.vlgmr.msra.gmra.mrb[208].mxu0 %v17841_v14  ;;  %11532 = vmatpush1.bf16.msra.mxu1 %v14785_v15  ;;  %v14803_v14 = vld [vmem:[#allocation29 + $0x518] ss:$24 sps:$4 sm:$0xff]  }
0x1790   :  { %11680 = vmatpush1.bf16.msra.mxu0 %v14788_v20  ;;  %11711 = vmatprep.mubr.bf16.mxu0 %v17875_v29  ;;  %v14814_v29 = vld [vmem:[#allocation29 + $0x3d4] ss:$24 sps:$4 sm:$0xff]   ;;  %v14863_v15 = vld [vmem:[#allocation29 + $0x6f8] ss:$24 sps:$4 sm:$0xff]  }
0x1791   :  { %11533 = vmatprep.subr.bf16.mxu1 %v14793_v52  ;;  %11681 = vmatprep.subr.bf16.mxu0 %v14796_v19  ;;  %v14866_v20 = vld [vmem:[#allocation29 + $0x580] ss:$24 sps:$4 sm:$0xff]   ;;  %v14871_v52 = vld [vmem:[#allocation29 + $0x72c] ss:$24 sps:$4 sm:$0xff]  }
0x1792   :  { %v14874_v19 = vld [vmem:[#allocation29 + $0x5b4] ss:$24 sps:$4 sm:$0xff]  }
0x1793   :  { %11534 = vmatpush1.bf16.msra.mxu1 %v14791_v45  ;;  %v14869_v45 = vld [vmem:[#allocation29 + $0x728] ss:$24 sps:$4 sm:$0xff]  }
0x1794   :  { %11682 = vmatpush1.bf16.msra.mxu0 %v14794_v7  ;;  %11535 = vmatprep.subr.bf16.mxu1 %v14799_v8  ;;  %v14872_v7 = vld [vmem:[#allocation29 + $0x5b0] ss:$24 sps:$4 sm:$0xff]   ;;  %v14877_v8 = vld [vmem:[#allocation29 + $0x75c] ss:$24 sps:$4 sm:$0xff]  }
0x1795   :  { %11683 = vmatprep.subr.bf16.mxu0 %v14802_v12  ;;  %v14880_v12 = vld [vmem:[#allocation29 + $0x5e4] ss:$24 sps:$4 sm:$0xff]  }
0x1797   :  { %11536 = vmatpush1.bf16.msra.mxu1 %v14797_v50  ;;  %v14875_v50 = vld [vmem:[#allocation29 + $0x758] ss:$24 sps:$4 sm:$0xff]  }
0x1798   :  { %11684 = vmatpush1.bf16.msra.mxu0 %v14800_v39  ;;  %11537 = vmatprep.subr.bf16.mxu1 %v14805_v11  ;;  %v14878_v39 = vld [vmem:[#allocation29 + $0x5e0] ss:$24 sps:$4 sm:$0xff]   ;;  %v14883_v11 = vld [vmem:[#allocation29 + $0x78c] ss:$24 sps:$4 sm:$0xff]  }
0x1799   :  { %11685 = vmatprep.subr.bf16.mxu0 %v14808_v37  ;;  %v14886_v37 = vld [vmem:[#allocation29 + $0x614] ss:$24 sps:$4 sm:$0xff]  }
0x179b   :  { %11538 = vmatpush1.bf16.msra.mxu1 %v14803_v14  ;;  %v14881_v14 = vld [vmem:[#allocation29 + $0x788] ss:$24 sps:$4 sm:$0xff]  }
0x179c   :  { %11686 = vmatpush1.bf16.msra.mxu0 %v14806_v49  ;;  %11539 = vmatprep.subr.bf16.mxu1 %v14811_v9  ;;  %v14884_v49 = vld [vmem:[#allocation29 + $0x610] ss:$24 sps:$4 sm:$0xff]   ;;  %v14889_v9 = vld [vmem:[#allocation29 + $0x7bc] ss:$24 sps:$4 sm:$0xff]  }
0x179d   :  { %11687 = vmatprep.subr.bf16.mxu0 %v14814_v29  ;;  %v14892_v29 = vld [vmem:[#allocation29 + $0x644] ss:$24 sps:$4 sm:$0xff]  }
0x179f   :  { %11540 = vmatpush1.bf16.msra.mxu1 %v14809_v42  ;;  %v14887_v42 = vld [vmem:[#allocation29 + $0x7b8] ss:$24 sps:$4 sm:$0xff]  }
0x17a0   :  { %11688 = vmatpush1.bf16.msra.mxu0 %v14812_v23  ;;  %11541 = vmatprep.subr.bf16.mxu1 %v14817_v0  ;;  %v14890_v23 = vld [vmem:[#allocation29 + $0x640] ss:$24 sps:$4 sm:$0xff]   ;;  %v14895_v0 = vld [vmem:[#allocation29 + $0x7ec] ss:$24 sps:$4 sm:$0xff]  }
0x17a1   :  { %11689 = vmatprep.subr.bf16.mxu0 %v14820_v63  ;;  %v14898_v63 = vld [vmem:[#allocation29 + $0x674] ss:$24 sps:$4 sm:$0xff]  }
0x17a3   :  { %11542 = vmatpush1.bf16.msra.mxu1 %v14815_v25  ;;  %v14893_v25 = vld [vmem:[#allocation29 + $0x7e8] ss:$24 sps:$4 sm:$0xff]  }
0x17a4   :  { %11690 = vmatpush1.bf16.msra.mxu0 %v14818_v43  ;;  %11543 = vmatprep.subr.bf16.mxu1 %v14823_v44  ;;  %v14896_v43 = vld [vmem:[#allocation29 + $0x670] ss:$24 sps:$4 sm:$0xff]   ;;  %v14901_v44 = vld [vmem:[#allocation29 + $0x81c] ss:$24 sps:$4 sm:$0xff]  }
0x17a5   :  { %11691 = vmatprep.subr.bf16.mxu0 %v14826_v46  ;;  %v14904_v46 = vld [vmem:[#allocation29 + $0x6a4] ss:$24 sps:$4 sm:$0xff]  }
0x17a7   :  { %11544 = vmatpush1.bf16.msra.mxu1 %v14821_v62  ;;  %v14902_v62 = vld [vmem:[#allocation29 + $0x6a0] ss:$24 sps:$4 sm:$0xff]  }
0x17a8   :  { %11692 = vmatpush1.bf16.msra.mxu0 %v14824_v21  ;;  %11545 = vmatprep.subr.bf16.mxu1 %v14829_v54  ;;  %v14907_v21 = vld [vmem:[#allocation29 + $0x84c] ss:$24 sps:$4 sm:$0xff]   ;;  %v14905_v54 = vld [vmem:[#allocation29 + $0x848] ss:$24 sps:$4 sm:$0xff]  }
0x17a9   :  { %11693 = vmatprep.subr.bf16.mxu0 %v14832_v31  ;;  %v14908_v31 = vld [vmem:[#allocation29 + $0x6d0] ss:$24 sps:$4 sm:$0xff]  }
0x17ab   :  { %11546 = vmatpush1.bf16.msra.mxu1 %v14827_v16  ;;  %v14913_v16 = vld [vmem:[#allocation29 + $0x87c] ss:$24 sps:$4 sm:$0xff]  }
0x17ac   :  { %11694 = vmatpush1.bf16.msra.mxu0 %v14830_v10  ;;  %11556 = vmatprep.subr.bf16.mxu1 %v14835_v53  ;;  %v14916_v10 = vld [vmem:[#allocation29 + $0x704] ss:$24 sps:$4 sm:$0xff]   ;;  %v14911_v53 = vld [vmem:[#allocation29 + $0x878] ss:$24 sps:$4 sm:$0xff]  }
0x17ad   :  { %11695 = vmatprep.subr.bf16.mxu0 %v14838_v27  ;;  %v14914_v27 = vld [vmem:[#allocation29 + $0x700] ss:$24 sps:$4 sm:$0xff]  }
0x17ae   :  { %11548 = vmatmul.mubr.bf16.vlgmr.msra.gmra.mrb[196].mxu1 %v17881_v47 }
0x17af   :  { %11557 = vmatpush1.bf16.msra.mxu1 %v14833_v6  ;;  %11588 = vmatprep.mubr.bf16.mxu1 %v17855_v2  ;;  %v14919_v6 = vld [vmem:[#allocation29 + $0x8ac] ss:$24 sps:$4 sm:$0xff]  }
0x17b0   :  { %11696 = vmatpush1.bf16.msra.mxu0 %v14836_v13  ;;  %11558 = vmatprep.subr.bf16.mxu1 %v14841_v35  ;;  %v14922_v13 = vld [vmem:[#allocation29 + $0x734] ss:$24 sps:$4 sm:$0xff]   ;;  %v14917_v35 = vld [vmem:[#allocation29 + $0x8a8] ss:$24 sps:$4 sm:$0xff]  }
0x17b1   :  { %11697 = vmatprep.subr.bf16.mxu0 %v14844_v28  ;;  %v14920_v28 = vld [vmem:[#allocation29 + $0x730] ss:$24 sps:$4 sm:$0xff]  }
0x17b3   :  { %11559 = vmatpush1.bf16.msra.mxu1 %v14839_v32  ;;  %v14925_v32 = vld [vmem:[#allocation29 + $0x8dc] ss:$24 sps:$4 sm:$0xff]  }
0x17b4   :  { %11698 = vmatpush1.bf16.msra.mxu0 %v14842_v41  ;;  %11560 = vmatprep.subr.bf16.mxu1 %v14847_v34  ;;  %v14928_v41 = vld [vmem:[#allocation29 + $0x764] ss:$24 sps:$4 sm:$0xff]   ;;  %v14923_v34 = vld [vmem:[#allocation29 + $0x8d8] ss:$24 sps:$4 sm:$0xff]  }
0x17b5   :  { %11699 = vmatprep.subr.bf16.mxu0 %v14850_v22  ;;  %v14926_v22 = vld [vmem:[#allocation29 + $0x760] ss:$24 sps:$4 sm:$0xff]  }
0x17b7   :  { %11561 = vmatpush1.bf16.msra.mxu1 %v14845_v17  ;;  %v14931_v17 = vld [vmem:[#allocation29 + $0x90c] ss:$24 sps:$4 sm:$0xff]  }
0x17b8   :  { %11700 = vmatpush1.bf16.msra.mxu0 %v14848_v26  ;;  %11562 = vmatprep.subr.bf16.mxu1 %v14853_v48  ;;  %v14934_v26 = vld [vmem:[#allocation29 + $0x794] ss:$24 sps:$4 sm:$0xff]   ;;  %v14929_v48 = vld [vmem:[#allocation29 + $0x908] ss:$24 sps:$4 sm:$0xff]  }
0x17b9   :  { %11701 = vmatprep.subr.bf16.mxu0 %v14856_v40  ;;  %v14932_v40 = vld [vmem:[#allocation29 + $0x790] ss:$24 sps:$4 sm:$0xff]  }
0x17bb   :  { %11563 = vmatpush1.bf16.msra.mxu1 %v14851_v1  ;;  %v14937_v1 = vld [vmem:[#allocation29 + $0x93c] ss:$24 sps:$4 sm:$0xff]  }
0x17bc   :  { %11702 = vmatpush1.bf16.msra.mxu0 %v14854_v4  ;;  %11564 = vmatprep.subr.bf16.mxu1 %v14859_v58  ;;  %v14940_v4 = vld [vmem:[#allocation29 + $0x7c4] ss:$24 sps:$4 sm:$0xff]   ;;  %v14935_v58 = vld [vmem:[#allocation29 + $0x938] ss:$24 sps:$4 sm:$0xff]  }
0x17bd   :  { %11703 = vmatprep.subr.bf16.mxu0 %v14862_v38  ;;  %v14938_v38 = vld [vmem:[#allocation29 + $0x7c0] ss:$24 sps:$4 sm:$0xff]  }
0x17bf   :  { %11565 = vmatpush1.bf16.msra.mxu1 %v14857_v59  ;;  %v14943_v59 = vld [vmem:[#allocation29 + $0x96c] ss:$24 sps:$4 sm:$0xff]  }
0x17c0   :  { %11704 = vmatpush1.bf16.msra.mxu0 %v14860_v30  ;;  %11566 = vmatprep.subr.bf16.mxu1 %v14865_v5  ;;  %v14946_v30 = vld [vmem:[#allocation29 + $0x7f4] ss:$24 sps:$4 sm:$0xff]   ;;  %v14941_v5 = vld [vmem:[#allocation29 + $0x968] ss:$24 sps:$4 sm:$0xff]  }
0x17c1   :  { %11705 = vmatprep.subr.bf16.mxu0 %v14868_v51  ;;  %v14944_v51 = vld [vmem:[#allocation29 + $0x7f0] ss:$24 sps:$4 sm:$0xff]  }
0x17c3   :  { %11567 = vmatpush1.bf16.msra.mxu1 %v14863_v15  ;;  %v14949_v15 = vld [vmem:[#allocation29 + $0x99c] ss:$24 sps:$4 sm:$0xff]  }
0x17c4   :  { %11706 = vmatpush1.bf16.msra.mxu0 %v14866_v20  ;;  %11568 = vmatprep.subr.bf16.mxu1 %v14871_v52  ;;  %v14952_v20 = vld [vmem:[#allocation29 + $0x824] ss:$24 sps:$4 sm:$0xff]   ;;  %v14947_v52 = vld [vmem:[#allocation29 + $0x998] ss:$24 sps:$4 sm:$0xff]  }
0x17c5   :  { %11707 = vmatprep.subr.bf16.mxu0 %v14874_v19  ;;  %v14950_v19 = vld [vmem:[#allocation29 + $0x820] ss:$24 sps:$4 sm:$0xff]  }
0x17c7   :  { %11569 = vmatpush1.bf16.msra.mxu1 %v14869_v45  ;;  %v14955_v45 = vld [vmem:[#allocation29 + $0x9cc] ss:$24 sps:$4 sm:$0xff]  }
0x17c8   :  { %11708 = vmatpush1.bf16.msra.mxu0 %v14872_v7  ;;  %11570 = vmatprep.subr.bf16.mxu1 %v14877_v8  ;;  %v14958_v7 = vld [vmem:[#allocation29 + $0x854] ss:$24 sps:$4 sm:$0xff]   ;;  %v14953_v8 = vld [vmem:[#allocation29 + $0x9c8] ss:$24 sps:$4 sm:$0xff]  }
0x17c9   :  { %11709 = vmatprep.subr.bf16.mxu0 %v14880_v12  ;;  %v14956_v12 = vld [vmem:[#allocation29 + $0x850] ss:$24 sps:$4 sm:$0xff]  }
0x17cb   :  { %11571 = vmatpush1.bf16.msra.mxu1 %v14875_v50  ;;  %v14961_v50 = vld [vmem:[#allocation29 + $0x9fc] ss:$24 sps:$4 sm:$0xff]  }
0x17cc   :  { %11710 = vmatpush1.bf16.msra.mxu0 %v14878_v39  ;;  %11572 = vmatprep.subr.bf16.mxu1 %v14883_v11  ;;  %v14964_v39 = vld [vmem:[#allocation29 + $0x884] ss:$24 sps:$4 sm:$0xff]   ;;  %v14959_v11 = vld [vmem:[#allocation29 + $0x9f8] ss:$24 sps:$4 sm:$0xff]  }
0x17cd   :  { %11720 = vmatprep.subr.bf16.mxu0 %v14886_v37  ;;  %v14962_v37 = vld [vmem:[#allocation29 + $0x880] ss:$24 sps:$4 sm:$0xff]  }
0x17cf   :  { %11712 = vmatmul.mubr.bf16.vlgmr.msra.gmra.mrb[208].mxu0 %v17881_v47  ;;  %11573 = vmatpush1.bf16.msra.mxu1 %v14881_v14  ;;  %v14899_v47 = vld [vmem:[#allocation29 + $0x818] ss:$24 sps:$4 sm:$0xff]   ;;  %v14967_v14 = vld [vmem:[#allocation29 + $0xa2c] ss:$24 sps:$4 sm:$0xff]  }
0x17d0   :  { %11721 = vmatpush1.bf16.msra.mxu0 %v14884_v49  ;;  %11752 = vmatprep.mubr.bf16.mxu0 %v17855_v2  ;;  %v14910_v2 = vld [vmem:[#allocation29 + $0x6d4] ss:$24 sps:$4 sm:$0xff]  }
0x17d1   :  { %11574 = vmatprep.subr.bf16.mxu1 %v14889_v9  ;;  %11722 = vmatprep.subr.bf16.mxu0 %v14892_v29  ;;  %v14970_v9 = vld [vmem:[#allocation29 + $0x8b4] ss:$24 sps:$4 sm:$0xff]  }
0x17d3   :  { %11575 = vmatpush1.bf16.msra.mxu1 %v14887_v42 }
0x17d4   :  { %11723 = vmatpush1.bf16.msra.mxu0 %v14890_v23  ;;  %11576 = vmatprep.subr.bf16.mxu1 %v14895_v0  ;;  %v14965_v23 = vld [vmem:[#allocation29 + $0xa28] ss:$24 sps:$4 sm:$0xff]  }
0x17d5   :  { %11724 = vmatprep.subr.bf16.mxu0 %v14898_v63  ;;  %v14968_v63 = vld [vmem:[#allocation29 + $0x8b0] ss:$24 sps:$4 sm:$0xff]  }
0x17d7   :  { %11577 = vmatpush1.bf16.msra.mxu1 %v14893_v25  ;;  %v14973_v25 = vld [vmem:[#allocation29 + $0xa5c] ss:$24 sps:$4 sm:$0xff]  }
0x17d8   :  { %11725 = vmatpush1.bf16.msra.mxu0 %v14896_v43  ;;  %11578 = vmatprep.subr.bf16.mxu1 %v14901_v44  ;;  %v14976_v43 = vld [vmem:[#allocation29 + $0x8e4] ss:$24 sps:$4 sm:$0xff]   ;;  %v14971_v44 = vld [vmem:[#allocation29 + $0xa58] ss:$24 sps:$4 sm:$0xff]  }
0x17d9   :  { %11726 = vmatprep.subr.bf16.mxu0 %v14904_v46  ;;  %v14974_v46 = vld [vmem:[#allocation29 + $0x8e0] ss:$24 sps:$4 sm:$0xff]  }
0x17db   :  { %11579 = vmatpush1.bf16.msra.mxu1 %v14899_v47  ;;  %v14979_v47 = vld [vmem:[#allocation29 + $0xa8c] ss:$24 sps:$4 sm:$0xff]  }
0x17dc   :  { %11727 = vmatpush1.bf16.msra.mxu0 %v14902_v62  ;;  %11580 = vmatprep.subr.bf16.mxu1 %v14907_v21  ;;  %v14982_v62 = vld [vmem:[#allocation29 + $0x914] ss:$24 sps:$4 sm:$0xff]   ;;  %v14977_v21 = vld [vmem:[#allocation29 + $0xa88] ss:$24 sps:$4 sm:$0xff]  }
0x17dd   :  { %11728 = vmatprep.subr.bf16.mxu0 %v14910_v2  ;;  %v14980_v2 = vld [vmem:[#allocation29 + $0x910] ss:$24 sps:$4 sm:$0xff]  }
0x17df   :  { %11581 = vmatpush1.bf16.msra.mxu1 %v14905_v54  ;;  %v14985_v54 = vld [vmem:[#allocation29 + $0xabc] ss:$24 sps:$4 sm:$0xff]  }
0x17e0   :  { %11729 = vmatpush1.bf16.msra.mxu0 %v14908_v31  ;;  %11582 = vmatprep.subr.bf16.mxu1 %v14913_v16  ;;  %v14988_v31 = vld [vmem:[#allocation29 + $0x944] ss:$24 sps:$4 sm:$0xff]   ;;  %v14983_v16 = vld [vmem:[#allocation29 + $0xab8] ss:$24 sps:$4 sm:$0xff]  }
0x17e1   :  { %11730 = vmatprep.subr.bf16.mxu0 %v14916_v10  ;;  %v14986_v10 = vld [vmem:[#allocation29 + $0x940] ss:$24 sps:$4 sm:$0xff]  }
0x17e3   :  { %11583 = vmatpush1.bf16.msra.mxu1 %v14911_v53  ;;  %v14991_v53 = vld [vmem:[#allocation29 + $0xaec] ss:$24 sps:$4 sm:$0xff]  }
0x17e4   :  { %11731 = vmatpush1.bf16.msra.mxu0 %v14914_v27  ;;  %11584 = vmatprep.subr.bf16.mxu1 %v14919_v6  ;;  %v14994_v27 = vld [vmem:[#allocation29 + $0x974] ss:$24 sps:$4 sm:$0xff]   ;;  %v14989_v6 = vld [vmem:[#allocation29 + $0xae8] ss:$24 sps:$4 sm:$0xff]  }
0x17e5   :  { %11732 = vmatprep.subr.bf16.mxu0 %v14922_v13  ;;  %v14992_v13 = vld [vmem:[#allocation29 + $0x970] ss:$24 sps:$4 sm:$0xff]  }
0x17e7   :  { %11585 = vmatpush1.bf16.msra.mxu1 %v14917_v35  ;;  %v14997_v35 = vld [vmem:[#allocation29 + $0xb1c] ss:$24 sps:$4 sm:$0xff]  }
0x17e8   :  { %11733 = vmatpush1.bf16.msra.mxu0 %v14920_v28  ;;  %11586 = vmatprep.subr.bf16.mxu1 %v14925_v32  ;;  %v15000_v28 = vld [vmem:[#allocation29 + $0x9a4] ss:$24 sps:$4 sm:$0xff]   ;;  %v14998_v32 = vld [vmem:[#allocation29 + $0x9a0] ss:$24 sps:$4 sm:$0xff]  }
0x17e9   :  { %11734 = vmatprep.subr.bf16.mxu0 %v14928_v41  ;;  %v15003_v41 = vld [vmem:[#allocation29 + $0xb4c] ss:$24 sps:$4 sm:$0xff]  }
0x17eb   :  { %11587 = vmatpush1.bf16.msra.mxu1 %v14923_v34  ;;  %v15006_v34 = vld [vmem:[#allocation29 + $0x9d4] ss:$24 sps:$4 sm:$0xff]  }
0x17ec   :  { %11735 = vmatpush1.bf16.msra.mxu0 %v14926_v22  ;;  %11597 = vmatprep.subr.bf16.mxu1 %v14931_v17  ;;  %v15001_v22 = vld [vmem:[#allocation29 + $0xb48] ss:$24 sps:$4 sm:$0xff]  }
0x17ed   :  { %11736 = vmatprep.subr.bf16.mxu0 %v14934_v26  ;;  %v15004_v26 = vld [vmem:[#allocation29 + $0x9d0] ss:$24 sps:$4 sm:$0xff]  }
0x17ee   :  { %11589 = vmatmul.mubr.bf16.vlgmr.msra.gmra.mrb[196].mxu1 %v17860_v56 }
0x17ef   :  { %11598 = vmatpush1.bf16.msra.mxu1 %v14929_v48  ;;  %11629 = vmatprep.mubr.bf16.mxu1 %v17889_v60  ;;  %v15009_v48 = vld [vmem:[#allocation29 + $0xb7c] ss:$24 sps:$4 sm:$0xff]  }
0x17f0   :  { %11737 = vmatpush1.bf16.msra.mxu0 %v14932_v40  ;;  %11599 = vmatprep.subr.bf16.mxu1 %v14937_v1  ;;  %v15012_v1 = vld [vmem:[#allocation29 + $0xa04] ss:$24 sps:$4 sm:$0xff]  }
0x17f1   :  { %11738 = vmatprep.subr.bf16.mxu0 %v14940_v4  ;;  %v15007_v4 = vld [vmem:[#allocation29 + $0xb78] ss:$24 sps:$4 sm:$0xff]  }
0x17f3   :  { %11600 = vmatpush1.bf16.msra.mxu1 %v14935_v58 }
0x17f4   :  { %11739 = vmatpush1.bf16.msra.mxu0 %v14938_v38  ;;  %11601 = vmatprep.subr.bf16.mxu1 %v14943_v59  ;;  %v15010_v38 = vld [vmem:[#allocation29 + $0xa00] ss:$24 sps:$4 sm:$0xff]   ;;  %v15015_v59 = vld [vmem:[#allocation29 + $0xbac] ss:$24 sps:$4 sm:$0xff]  }
0x17f5   :  { %11740 = vmatprep.subr.bf16.mxu0 %v14946_v30 }
0x17f7   :  { %11602 = vmatpush1.bf16.msra.mxu1 %v14941_v5  ;;  %v15018_v5 = vld [vmem:[#allocation29 + $0xa34] ss:$24 sps:$4 sm:$0xff]  }
0x17f8   :  { %11741 = vmatpush1.bf16.msra.mxu0 %v14944_v51  ;;  %11603 = vmatprep.subr.bf16.mxu1 %v14949_v15 }
0x17f9   :  { %11742 = vmatprep.subr.bf16.mxu0 %v14952_v20 }
0x17fb   :  { %11604 = vmatpush1.bf16.msra.mxu1 %v14947_v52  ;;  %v15013_v52 = vld [vmem:[#allocation29 + $0xba8] ss:$24 sps:$4 sm:$0xff]  }
0x17fc   :  { %11743 = vmatpush1.bf16.msra.mxu0 %v14950_v19  ;;  %11605 = vmatprep.subr.bf16.mxu1 %v14955_v45  ;;  %v15016_v45 = vld [vmem:[#allocation29 + $0xa30] ss:$24 sps:$4 sm:$0xff]  }
0x17fd   :  { %11744 = vmatprep.subr.bf16.mxu0 %v14958_v7  ;;  %v15021_v7 = vld [vmem:[#allocation29 + $0xbdc] ss:$24 sps:$4 sm:$0xff]  }
0x17ff   :  { %11606 = vmatpush1.bf16.msra.mxu1 %v14953_v8  ;;  %v15024_v8 = vld [vmem:[#allocation29 + $0xa64] ss:$24 sps:$4 sm:$0xff]  }
0x1800   :  { %11745 = vmatpush1.bf16.msra.mxu0 %v14956_v12  ;;  %11607 = vmatprep.subr.bf16.mxu1 %v14961_v50  ;;  %v15019_v12 = vld [vmem:[#allocation29 + $0xbd8] ss:$24 sps:$4 sm:$0xff]  }
0x1801   :  { %v17908_v49 = vpop.f32.mrb[192].mxu1  ;;  %11746 = vmatprep.subr.bf16.mxu0 %v14964_v39  ;;  %v15022_v50 = vld [vmem:[#allocation29 + $0xa60] ss:$24 sps:$4 sm:$0xff]   ;;  %v15027_v39 = vld [vmem:[#allocation29 + $0xa94] ss:$24 sps:$4 sm:$0xff]  }
0x1802   :  { %v17910_v29 = vpop.f32.mrb[193].mxu1 }
0x1803   :  { %v11389_v42 = vpop.f32.mrb[194].mxu1  ;;  %11608 = vmatpush1.bf16.msra.mxu1 %v14959_v11  ;;  %v15025_v11 = vld [vmem:[#allocation29 + $0xa90] ss:$24 sps:$4 sm:$0xff]  }
0x1804   :  { %11747 = vmatpush1.bf16.msra.mxu0 %v14962_v37  ;;  %v11390_v0 = vpop.f32.mrb[195].mxu1  ;;  %11609 = vmatprep.subr.bf16.mxu1 %v14967_v14  ;;  %v15030_v37 = vld [vmem:[#allocation29 + $0xac4] ss:$24 sps:$4 sm:$0xff]   ;;  %v15028_v14 = vld [vmem:[#allocation29 + $0xac0] ss:$24 sps:$4 sm:$0xff]  }
0x1805   :  { %11748 = vmatprep.subr.bf16.mxu0 %v14970_v9  ;;  %v15031_v9 = vld [vmem:[#allocation29 + $0xaf0] ss:$24 sps:$4 sm:$0xff]   ;;  %v15034_v42 = vld [vmem:[#allocation29 + $0xb20] ss:$24 sps:$4 sm:$0xff]  }
0x1806   :  { %v15037_v0 = vld [vmem:[#allocation29 + $0xb50] ss:$24 sps:$4 sm:$0xff]  }
0x1807   :  { %11610 = vmatpush1.bf16.msra.mxu1 %v14965_v23  ;;  %v15039_v23 = vld [vmem:[#allocation29 + $0xb54] ss:$24 sps:$4 sm:$0xff]  }
0x1808   :  { %11749 = vmatpush1.bf16.msra.mxu0 %v14968_v63  ;;  %11611 = vmatprep.subr.bf16.mxu1 %v14973_v25  ;;  %v15042_v63 = vld [vmem:[#allocation29 + $0xb84] ss:$24 sps:$4 sm:$0xff]   ;;  %v15040_v25 = vld [vmem:[#allocation29 + $0xb80] ss:$24 sps:$4 sm:$0xff]  }
0x1809   :  { %11750 = vmatprep.subr.bf16.mxu0 %v14976_v43  ;;  %v15045_v43 = vld [vmem:[#allocation29 + $0xbb4] ss:$24 sps:$4 sm:$0xff]  }
0x180b   :  { %11612 = vmatpush1.bf16.msra.mxu1 %v14971_v44  ;;  %v15043_v44 = vld [vmem:[#allocation29 + $0xbb0] ss:$24 sps:$4 sm:$0xff]  }
0x180c   :  { %11751 = vmatpush1.bf16.msra.mxu0 %v14974_v46  ;;  %11613 = vmatprep.subr.bf16.mxu1 %v14979_v47  ;;  %v15048_v46 = vld [vmem:[#allocation29 + $0xbe4] ss:$24 sps:$4 sm:$0xff]   ;;  %v15046_v47 = vld [vmem:[#allocation29 + $0xbe0] ss:$24 sps:$4 sm:$0xff]  }
0x180d   :  { %11761 = vmatprep.subr.bf16.mxu0 %v14982_v62 }
0x180f   :  { %11753 = vmatmul.mubr.bf16.vlgmr.msra.gmra.mrb[208].mxu0 %v17860_v56  ;;  %11614 = vmatpush1.bf16.msra.mxu1 %v14977_v21  ;;  %v14995_v56 = vld [vmem:[#allocation29 + $0xb18] ss:$24 sps:$4 sm:$0xff]  }
0x1810   :  { %11762 = vmatpush1.bf16.msra.mxu0 %v14980_v2  ;;  %11793 = vmatprep.mubr.bf16.mxu0 %v17889_v60  ;;  %v17914_v60 = vld [vmem:[#allocation31] sm:$0x3f] }
0x1811   :  { %11615 = vmatprep.subr.bf16.mxu1 %v14985_v54  ;;  %11763 = vmatprep.subr.bf16.mxu0 %v14988_v31  ;;  %v9363_v17 = vrot.slane %v17914_v60, %v17539_v36  ;;  %v9367_v40 = vrot.slane %v17914_v60, %v17542_v55  ;;  %v9379_v31 = vrot.slane %v17914_v60, %v8840_v3 }
0x1813   :  { %11616 = vmatpush1.bf16.msra.mxu1 %v14983_v16  ;;  %v14231_v58 = vadd.f32 %v17908_v49, %v9363_v17  ;;  %v14233_v30 = vadd.f32 %v17910_v29, %v9367_v40  ;;  %v15033_v49 = vld [vmem:[#allocation29 + $0xaf4] ss:$24 sps:$4 sm:$0xff]   ;;  %v15036_v29 = vld [vmem:[#allocation29 + $0xb24] ss:$24 sps:$4 sm:$0xff]   ;;  %v9371_v16 = vrot.slane %v17914_v60, %v8832_v33 }
0x1814   :  { %11764 = vmatpush1.bf16.msra.mxu0 %v14986_v10  ;;  %11617 = vmatprep.subr.bf16.mxu1 %v14991_v53  ;;  %v9375_v10 = vrot.slane %v17914_v60, %v8836_v18 }
0x1815   :  { %11765 = vmatprep.subr.bf16.mxu0 %v14994_v27 }
0x1817   :  { %11618 = vmatpush1.bf16.msra.mxu1 %v14989_v6 }
0x1818   :  { %11766 = vmatpush1.bf16.msra.mxu0 %v14992_v13  ;;  %11619 = vmatprep.subr.bf16.mxu1 %v14997_v35 }
0x1819   :  { %11767 = vmatprep.subr.bf16.mxu0 %v15000_v28 }
0x181b   :  { %11620 = vmatpush1.bf16.msra.mxu1 %v14995_v56 }
0x181c   :  { %11768 = vmatpush1.bf16.msra.mxu0 %v14998_v32  ;;  %11621 = vmatprep.subr.bf16.mxu1 %v15003_v41 }
0x181d   :  { %11769 = vmatprep.subr.bf16.mxu0 %v15006_v34 }
0x181f   :  { %11622 = vmatpush1.bf16.msra.mxu1 %v15001_v22 }
0x1820   :  { %11770 = vmatpush1.bf16.msra.mxu0 %v15004_v26  ;;  %11623 = vmatprep.subr.bf16.mxu1 %v15009_v48 }
0x1821   :  { %v11467_v36 = vpop.f32.mrb[204].mxu0  ;;  %11771 = vmatprep.subr.bf16.mxu0 %v15012_v1 }
0x1822   :  { %v17922_v51 = vadd.f32 %v14231_v58, %v11467_v36  ;;  %v11469_v15 = vpop.f32.mrb[205].mxu0 }
0x1823   :  { %v17924_v20 = vadd.f32 %v14233_v30, %v11469_v15  ;;  %v11471_v55 = vpop.f32.mrb[206].mxu0  ;;  %11624 = vmatpush1.bf16.msra.mxu1 %v15007_v4 }
0x1824   :  { %11772 = vmatpush1.bf16.msra.mxu0 %v15010_v38  ;;  %v11472_v19 = vpop.f32.mrb[207].mxu0  ;;  %11625 = vmatprep.subr.bf16.mxu1 %v15015_v59 }
0x1825   :  { %11773 = vmatprep.subr.bf16.mxu0 %v15018_v5 }
0x1827   :  { %11626 = vmatpush1.bf16.msra.mxu1 %v15013_v52 }
0x1828   :  { %11774 = vmatpush1.bf16.msra.mxu0 %v15016_v45  ;;  %11627 = vmatprep.subr.bf16.mxu1 %v15021_v7 }
0x1829   :  { %11775 = vmatprep.subr.bf16.mxu0 %v15024_v8 }
0x182b   :  { %11628 = vmatpush1.bf16.msra.mxu1 %v15019_v12 }
0x182c   :  { %11776 = vmatpush1.bf16.msra.mxu0 %v15022_v50 }
0x182d   :  { %11777 = vmatprep.subr.bf16.mxu0 %v15027_v39 }
0x182e   :  { %11630 = vmatmul.mubr.bf16.vlgmr.msra.gmra.mrb[196].mxu1 %v17894_v24 }
0x1830   :  { %11778 = vmatpush1.bf16.msra.mxu0 %v15025_v11 }
0x1831   :  { %11779 = vmatprep.subr.bf16.mxu0 %v15030_v37 }
0x1834   :  { %11780 = vmatpush1.bf16.msra.mxu0 %v15028_v14 }
0x1835   :  { %11781 = vmatprep.subr.bf16.mxu0 %v15033_v49 }
0x1838   :  { %11782 = vmatpush1.bf16.msra.mxu0 %v15031_v9 }
0x1839   :  { %11783 = vmatprep.subr.bf16.mxu0 %v15036_v29 }
0x183c   :  { %11784 = vmatpush1.bf16.msra.mxu0 %v15034_v42 }
0x183d   :  { %11785 = vmatprep.subr.bf16.mxu0 %v15039_v23 }
0x1840   :  { %11786 = vmatpush1.bf16.msra.mxu0 %v15037_v0 }
0x1841   :  { %11787 = vmatprep.subr.bf16.mxu0 %v15042_v63 }
0x1844   :  { %11788 = vmatpush1.bf16.msra.mxu0 %v15040_v25 }
0x1845   :  { %11789 = vmatprep.subr.bf16.mxu0 %v15045_v43 }
0x1848   :  { %11790 = vmatpush1.bf16.msra.mxu0 %v15043_v44 }
0x1849   :  { %11791 = vmatprep.subr.bf16.mxu0 %v15048_v46 }
0x184c   :  { %11792 = vmatpush1.bf16.msra.mxu0 %v15046_v47 }
0x184f   :  { %11794 = vmatmul.mubr.bf16.vlgmr.msra.gmra.mrb[208].mxu0 %v17894_v24  ;;  %v9383_v24 = vrot.slane %v17914_v60, %v8844_v61 }
0x1901   :  { %v11631_v62 = vpop.f32.mrb[196].mxu1 }
0x1902   :  { %v11633_v21 = vpop.f32.mrb[197].mxu1  ;;  %v14235_v13 = vadd.f32 %v11631_v62, %v9371_v16 }
0x1903   :  { %v11635_v2 = vpop.f32.mrb[198].mxu1  ;;  %v14236_v35 = vadd.f32 %v11633_v21, %v9375_v10 }
0x1904   :  { %v11636_v54 = vpop.f32.mrb[199].mxu1 }
0x1905   :  { %v11805_v41 = vmax.f32 %v14235_v13, %v14236_v35 }
0x1922   :  { %v11795_v53 = vpop.f32.mrb[208].mxu0 }
0x1923   :  { %v14237_v27 = vadd.f32 %v11795_v53, %v9379_v31  ;;  %v11797_v6 = vpop.f32.mrb[209].mxu0 }
0x1924   :  { %v14238_v28 = vadd.f32 %v11797_v6, %v9383_v24  ;;  %v11799_v56 = vpop.f32.mrb[210].mxu0 }
0x1925   :  { %v11802_v3 = vmax.f32 %v17922_v51, %v14237_v27  ;;  %v11800_v32 = vpop.f32.mrb[211].mxu0 }
0x1926   :  { %v11803_v33 = vmax.f32 %v17924_v20, %v14238_v28 }
0x1928   :  { %v11804_v34 = vmax.f32 %v11802_v3, %v11803_v33 }
0x192a   :  { %v11806_v22 = vmax.f32 %v11804_v34, %v11805_v41 }
0x192c   :  { %11807 = vmax.xlane.f32.xlu0 %v11806_v22 }
0x19b9   :  { %v11808_v18 = vpop.xlane.xlu0 %11807 }
0x19ba   :  { %v11809_v57 = vsub.f32 %v17922_v51, %v11808_v18  ;;  %v11810_v61 = vsub.f32 %v17924_v20, %v11808_v18  ;;  %v11811_v60 = vsub.f32 %v14235_v13, %v11808_v18  ;;  %v11812_v17 = vsub.f32 %v14236_v35, %v11808_v18 }
0x19bb   :  { %v11813_v40 = vsub.f32 %v14237_v27, %v11808_v18  ;;  %v11814_v4 = vsub.f32 %v14238_v28, %v11808_v18 }
0x19bc   :  { %v11815_v26 = vmul.f32 1.442695, %v11809_v57  ;;  %v11817_v48 = vmul.f32 1.442695, %v11810_v61  ;;  %v11819_v1 = vmul.f32 1.442695, %v11811_v60 }
0x19bd   :  { %v11821_v58 = vmul.f32 1.442695, %v11812_v17  ;;  %v11823_v38 = vmul.f32 1.442695, %v11813_v40  ;;  %v11825_v59 = vmul.f32 1.442695, %v11814_v4 }
0x19be   :  { %15273 = vpow2.f32 %v11815_v26 }
0x19bf   :  { %15275 = vpow2.f32 %v11817_v48 }
0x19c0   :  { %15277 = vpow2.f32 %v11819_v1 }
0x19c1   :  { %15279 = vpow2.f32 %v11821_v58 }
0x19c2   :  { %15281 = vpow2.f32 %v11823_v38 }
0x19c3   :  { %15283 = vpow2.f32 %v11825_v59 }
0x19c8   :  { %v15274_v30 = vpop.eup %15273 }
0x19c9   :  { %v15276_v36 = vpop.eup %15275 }
0x19ca   :  { %v11827_v5 = vadd.f32 %v15276_v36, %v15274_v30  ;;  %v15278_v51 = vpop.eup %15277 }
0x19cb   :  { %v15280_v20 = vpop.eup %15279 }
0x19cc   :  { %v11828_v15 = vadd.f32 %v15278_v51, %v11827_v5  ;;  %v15282_v52 = vpop.eup %15281 }
0x19cd   :  { %v15284_v45 = vpop.eup %15283 }
0x19ce   :  { %v11829_v55 = vadd.f32 %v15280_v20, %v11828_v15 }
0x19d0   :  { %v11830_v19 = vadd.f32 %v15282_v52, %v11829_v55 }
0x19d2   :  { %v11831_v7 = vadd.f32 %v15284_v45, %v11830_v19 }
0x19d4   :  { %11832 = vadd.xlane.f32.xlu1 %v11831_v7 }
0x1a61   :  { %v11833_v8 = vpop.xlane.xlu1 %11832 }
0x1a62   :  { %15285 = vlog2.f32 %v11833_v8 }
0x1a6c   :  { %v15286_v12 = vpop.eup %15285 }
0x1a6d   :  { %v11835_v50 = vmul.f32 0.6931472, %v15286_v12 }
0x1a6f   :  { %v11836_v39 = vsub.f32 %v11809_v57, %v11835_v50  ;;  %v11837_v11 = vsub.f32 %v11810_v61, %v11835_v50  ;;  %v11838_v37 = vsub.f32 %v11811_v60, %v11835_v50  ;;  %v11839_v14 = vsub.f32 %v11812_v17, %v11835_v50 }
0x1a70   :  { %v11840_v49 = vsub.f32 %v11813_v40, %v11835_v50  ;;  %v11841_v9 = vsub.f32 %v11814_v4, %v11835_v50 }
0x1a71   :  { %11842 = vst [vmem:[%s18032_s15] sm:$0xff] %v11836_v39  ;;  %11843 = vst [vmem:[%s18032_s15 + $0x8] sm:$0xff] %v11837_v11 }
0x1a72   :  { %11844 = vst [vmem:[%s18032_s15 + $0x10] sm:$0xff] %v11838_v37  ;;  %11845 = vst [vmem:[%s18032_s15 + $0x18] sm:$0xff] %v11839_v14 }
0x1a73   :  { %11846 = vst [vmem:[%s18032_s15 + $0x20] sm:$0xff] %v11840_v49  ;;  %11847 = vst [vmem:[%s18032_s15 + $0x28] sm:$0xff] %v11841_v9 }
0x1a74   :  { %11852 = vsyncpa [#allocation4], 1 }
0x1a75   :  { %11853 = vsyncpa [#allocation6], 1 }
0x1a76   :  { %11854 = vsyncpa [#allocation9], 1 }
0x1a77   :  { %11855 = vsyncpa [#allocation12], 1 }
0x1a78   :  { %11856 = vsyncpa [#allocation15], 1 }
0x1a79   :  { %11857 = vsyncpa [#allocation18], 1 }
0x1a7a   :  { %11858 = vsyncpa [#allocation21], 1 }
0x1a7b   :  { %11859 = vsyncpa [#allocation24], 1 }
0x1a7c   :  { %11860 = vsyncpa [#allocation27], 1 }
0x1a7d   :  { %11861 = vsyncpa [#allocation30], 1 }

</bundles_post_ra>
